<compile_context>
chip_gen: v5e
topology: v5e:2x2
jax: 0.10.0
libtpu: 0.0.40
codegen_flags: <defaults>
</compile_context>

<pallas_src>
import functools

import jax
import jax.numpy as jnp
import numpy as np
from jax.experimental import pallas as pl
from jax.experimental.pallas import tpu as pltpu

LANE = 128                      # feature / lane padding
NODE_PAD = 512                  # node-dim padding (divides every tile below)
ROW_TILE = 512                  # aggregate / feature-transform row tile
K_TILE = 512                    # aggregate reduction tile (multiple of 256)
VMEM_LIMIT = 48 * 1024 * 1024   # explicit scoped-VMEM budget (v7x-safe)


def _pad_to(x, mult, axis):
    pad = (-x.shape[axis]) % mult
    if pad == 0:
        return x
    widths = [(0, 0)] * x.ndim
    widths[axis] = (0, pad)
    return jnp.pad(x, widths)


def _pick_row_tile(n_pad):
    # 512-row tiles (multiple of the 256 MXU dim); drop to 256 only when the
    # padded graph is a single 512-block so the "parallel" axis keeps >= 2
    # blocks for v7x's 2 TensorCores.
    return 256 if n_pad <= ROW_TILE else ROW_TILE


# ---------------------------------------------------------------------------
# Kernel 1: feature transform  XW = X @ W   (hoisted out of the A_hat loop)
# ---------------------------------------------------------------------------
def _xw_kernel(x_ref, w_ref, o_ref):
    o_ref[...] = jnp.dot(
        x_ref[...], w_ref[...], preferred_element_type=jnp.float32
    ).astype(o_ref.dtype)


def feature_transform(x, w, *, tm, out_dtype=jnp.bfloat16):
    n, f_in = x.shape
    f_out = w.shape[1]
    return pl.pallas_call(
        _xw_kernel,
        out_shape=jax.ShapeDtypeStruct((n, f_out), out_dtype),
        grid=(n // tm,),
        in_specs=[
            pl.BlockSpec((tm, f_in), lambda i: (i, 0)),
            pl.BlockSpec((f_in, f_out), lambda i: (0, 0)),
        ],
        out_specs=pl.BlockSpec((tm, f_out), lambda i: (i, 0)),
        compiler_params=pltpu.CompilerParams(dimension_semantics=("parallel",)),
    )(x, w)


# ---------------------------------------------------------------------------
# Kernel 2: neighborhood aggregation  O = A_hat @ XW + b  (+ optional relu)
#   grid = (rows, k), k (reduction) last; XW is VMEM-resident for the call.
# ---------------------------------------------------------------------------
def _aggregate_kernel(a_ref, xw_ref, b_ref, o_ref, acc_ref, *, apply_relu, tk):
    k = pl.program_id(1)

    @pl.when(k == 0)
    def _():
        acc_ref[...] = jnp.zeros_like(acc_ref)

    off = pl.multiple_of(k * tk, tk)
    xw_tile = xw_ref[pl.ds(off, tk), :]          # slice of the resident XW copy
    acc_ref[...] += jnp.dot(a_ref[...], xw_tile,
                            preferred_element_type=jnp.float32)

    @pl.when(k == pl.num_programs(1) - 1)
    def _():
        out = acc_ref[...] + b_ref[...]
        if apply_relu:
            out = jnp.maximum(out, 0.0)
        o_ref[...] = out.astype(o_ref.dtype)


def aggregate(a_hat, xw, b, *, apply_relu, tm, tk=K_TILE,
              out_dtype=jnp.bfloat16):
    n = a_hat.shape[0]
    f_out = xw.shape[1]
    kernel = functools.partial(_aggregate_kernel, apply_relu=apply_relu, tk=tk)
    return pl.pallas_call(
        kernel,
        out_shape=jax.ShapeDtypeStruct((n, f_out), out_dtype),
        grid=(n // tm, n // tk),
        in_specs=[
            # A_hat tile: the only per-step HBM stream.
            pl.BlockSpec((tm, tk), lambda i, k: (i, k)),
            # XW: full array, constant block index => DMA'd once, VMEM-resident.
            pl.BlockSpec((n, f_out), lambda i, k: (0, 0)),
            pl.BlockSpec((1, f_out), lambda i, k: (0, 0)),
        ],
        out_specs=pl.BlockSpec((tm, f_out), lambda i, k: (i, 0)),
        scratch_shapes=[pltpu.VMEM((tm, f_out), jnp.float32)],
        compiler_params=pltpu.CompilerParams(
            dimension_semantics=("parallel", "arbitrary"),
            vmem_limit_bytes=VMEM_LIMIT),
    )(a_hat, xw, b)


def gcn_layer(a_hat_bf16, x, w, b, *, apply_relu, tm, out_dtype=jnp.bfloat16):
    # X @ W once (tiny matmul), then stream A_hat tiles through the reduction.
    xw = feature_transform(x.astype(jnp.bfloat16), w.astype(jnp.bfloat16), tm=tm)
    return aggregate(a_hat_bf16, xw, b.astype(jnp.float32),
                     apply_relu=apply_relu, tm=tm, out_dtype=out_dtype)


# ---------------------------------------------------------------------------
# Kernel 3: lane-dense decode  score[e] = sum_d z_src[e, d] * z_dst[e, d]
# Inputs arrive transposed as (D, E): reduce over sublanes, output (1, E).
# ---------------------------------------------------------------------------
def _decode_kernel(zs_ref, zd_ref, o_ref):
    prod = zs_ref[...].astype(jnp.float32) * zd_ref[...].astype(jnp.float32)
    o_ref[...] = jnp.sum(prod, axis=0, keepdims=True)


def _pick_edge_tile(e_pad):
    for cand in (2048, 1024, 512, 256):
        if e_pad % cand == 0:
            return cand
    return LANE


def decode(z_src_t, z_dst_t):
    d, e = z_src_t.shape
    te = _pick_edge_tile(e)
    return pl.pallas_call(
        _decode_kernel,
        out_shape=jax.ShapeDtypeStruct((1, e), jnp.float32),
        grid=(e // te,),
        in_specs=[
            pl.BlockSpec((d, te), lambda j: (0, j)),
            pl.BlockSpec((d, te), lambda j: (0, j)),
        ],
        out_specs=pl.BlockSpec((1, te), lambda j: (0, j)),
        compiler_params=pltpu.CompilerParams(dimension_semantics=("parallel",)),
    )(z_src_t, z_dst_t)


# ---------------------------------------------------------------------------
# Glue: normalized adjacency + forward
# ---------------------------------------------------------------------------
def build_a_hat(edge_index, num_nodes):
    """Dense symmetric-normalized adjacency with (remaining) self-loops.

    Multi-edges are summed (scatter-add) and self-loops of weight 1 are added
    only for nodes that lack one, matching PyG gcn_norm semantics.
    """
    src, dst = edge_index
    a = jnp.zeros((num_nodes, num_nodes), jnp.float32).at[dst, src].add(1.0)
    idx = jnp.arange(num_nodes)
    diag = a[idx, idx]
    a = a.at[idx, idx].set(jnp.where(diag > 0, diag, 1.0))
    deg = a.sum(axis=1)
    dinv = jnp.where(deg > 0, jax.lax.rsqrt(deg), 0.0)
    return a * dinv[:, None] * dinv[None, :]


def gcn_forward(params, x, edge_index, edge_label_index):
    n_real = x.shape[0]
    out_real = params["w2"].shape[1]

    a_hat = build_a_hat(edge_index, n_real)
    # Pad node dim to the 512 tile and feature dims to 128 lanes; zero padding
    # is exact (padded rows/cols contribute nothing to the valid outputs).
    a_hat = _pad_to(_pad_to(a_hat, NODE_PAD, 0), NODE_PAD, 1).astype(jnp.bfloat16)
    x_p = _pad_to(_pad_to(x, NODE_PAD, 0), LANE, 1)

    w1 = _pad_to(_pad_to(params["w1"], LANE, 0), LANE, 1)
    b1 = _pad_to(params["b1"], LANE, 1)
    w2 = _pad_to(_pad_to(params["w2"], LANE, 0), LANE, 1)
    b2 = _pad_to(params["b2"], LANE, 1)

    n_pad = a_hat.shape[0]
    tm = _pick_row_tile(n_pad)

    # Both layers emit bf16 (decode upcasts to f32); accumulation is f32.
    h = gcn_layer(a_hat, x_p, w1, b1, apply_relu=True, tm=tm)
    z = gcn_layer(a_hat, h, w2, b2, apply_relu=False, tm=tm)
    z = z[:n_real, :out_real]

    # Endpoint gather + transpose to a lane-dense (D, E) layout (JAX glue).
    # TODO(synk): for large edge-label sets, scalar-prefetch the edge index and
    # gather rows inside the decode kernel instead of materializing z[src]/z[dst].
    src, dst = edge_label_index
    n_edges = src.shape[0]
    zs_t = _pad_to(_pad_to(z[src].T, 16, 0), LANE, 1)
    zd_t = _pad_to(_pad_to(z[dst].T, 16, 0), LANE, 1)
    scores = decode(zs_t, zd_t)
    return scores[0, :n_edges]  # matches .view(-1)


# Pure-JAX reference with identical dtype handling (for a correctness check).
def _reference_forward(params, x, edge_index, edge_label_index):
    a = build_a_hat(edge_index, x.shape[0]).astype(jnp.bfloat16)
    xw1 = jnp.dot(x.astype(jnp.bfloat16), params["w1"].astype(jnp.bfloat16),
                  preferred_element_type=jnp.float32)
    h = jnp.dot(a, xw1.astype(jnp.bfloat16), preferred_element_type=jnp.float32)
    h = jnp.maximum(h + params["b1"], 0.0).astype(jnp.bfloat16)
    xw2 = jnp.dot(h, params["w2"].astype(jnp.bfloat16),
                  preferred_element_type=jnp.float32)
    z = (jnp.dot(a, xw2.astype(jnp.bfloat16), preferred_element_type=jnp.float32)
         + params["b2"]).astype(jnp.bfloat16)
    src, dst = edge_label_index
    return (z[src].astype(jnp.float32) * z[dst].astype(jnp.float32)).sum(axis=-1)


if __name__ == "__main__":
    # Small shapes consistent with GCN(in_channels, 128, 64).
    N = 1000      # nodes -> pads to 1024: 2 row blocks x 2 k blocks (exercises grid)
    F_IN = 96     # input features (pads to 128 lanes)
    HID = 128     # hidden channels
    OUT = 64      # output channels
    E_LAB = 20    # number of label edges to decode

    key = jax.random.PRNGKey(0)
    k_x, k_w1, k_b1, k_w2, k_b2, k_e = jax.random.split(key, 6)

    # Node features (row-normalized like T.NormalizeFeatures()).
    x = jax.random.uniform(k_x, (N, F_IN), jnp.float32)
    x = x / jnp.maximum(x.sum(axis=-1, keepdims=True), 1e-12)

    # Undirected ring graph -> both edge directions.
    nodes = jnp.arange(N, dtype=jnp.int32)
    ring_src = jnp.concatenate([nodes, (nodes + 1) % N])
    ring_dst = jnp.concatenate([(nodes + 1) % N, nodes])
    edge_index = jnp.stack([ring_src, ring_dst])            # [2, 2N]

    # Edge-label index: deterministic pairs of nodes.
    edge_label_index = jax.random.randint(k_e, (2, E_LAB), 0, N, jnp.int32)

    # Deterministic parameter init (GCNConv: weight [in, out], bias [out]).
    params = {
        "w1": 0.2 * jax.random.normal(k_w1, (F_IN, HID), jnp.float32),
        "b1": 0.02 * jax.random.normal(k_b1, (1, HID), jnp.float32),
        "w2": 0.2 * jax.random.normal(k_w2, (HID, OUT), jnp.float32),
        "b2": 0.02 * jax.random.normal(k_b2, (1, OUT), jnp.float32),
    }

    out = jax.jit(gcn_forward)(params, x, edge_index, edge_label_index)
    jax.block_until_ready(out)
    assert out.shape == (E_LAB,)

    ref = np.asarray(_reference_forward(params, x, edge_index, edge_label_index))
    tol = 2e-2 * float(np.max(np.abs(ref))) + 1e-6
    np.testing.assert_allclose(np.asarray(out), ref, rtol=2e-2, atol=tol)
    print("KERNEL_OK")
</pallas_src>

<mosaic_0001>
module attributes {stable_mosaic.version = 11 : i64} {
  func.func @_xw_kernel(%arg0: i32, %arg1: memref<512x128xbf16, #tpu.memory_space<vmem>>, %arg2: memref<128x128xbf16, #tpu.memory_space<vmem>>, %arg3: memref<512x128xbf16, #tpu.memory_space<vmem>>) attributes {dimension_semantics = [#tpu.dimension_semantics<parallel>], iteration_bounds = array<i64: 2>, scalar_prefetch = 0 : i64, scratch_operands = 0 : i64, tpu.core_type = #tpu.core_type<tc>, window_params = [{transform_indices = @transform_0, window_bounds = array<i64: 512, 128>}, {pipeline_mode = #tpu.pipeline_mode<synchronous>, transform_indices = @transform_1, window_bounds = array<i64: 128, 128>}, {transform_indices = @transform_2, window_bounds = array<i64: 512, 128>}]} {
    %c0 = arith.constant 0 : index
    %c0_0 = arith.constant 0 : index
    %0 = vector.load %arg1[%c0, %c0_0] : memref<512x128xbf16, #tpu.memory_space<vmem>>, vector<512x128xbf16>
    %c0_1 = arith.constant 0 : index
    %c0_2 = arith.constant 0 : index
    %1 = vector.load %arg2[%c0_1, %c0_2] : memref<128x128xbf16, #tpu.memory_space<vmem>>, vector<128x128xbf16>
    %cst = arith.constant dense<0.000000e+00> : vector<512x128xf32>
    %2 = tpu.matmul %0, %1, %cst {dimension_numbers = #tpu.dot_dimension_numbers<[1], [0], [0], [1], [0, 0, 1, 1], [], []>} : vector<512x128xbf16>, vector<128x128xbf16>, vector<512x128xf32> -> vector<512x128xf32>
    %3 = arith.truncf %2 : vector<512x128xf32> to vector<512x128xbf16>
    %c0_3 = arith.constant 0 : index
    %c0_4 = arith.constant 0 : index
    %4 = vector.load %arg3[%c0_3, %c0_4] : memref<512x128xbf16, #tpu.memory_space<vmem>>, vector<512x128xbf16>
    tpu.vector_store %arg3[%c0_3, %c0_4], %3 {strides = array<i32>} : memref<512x128xbf16, #tpu.memory_space<vmem>>, vector<512x128xbf16>,
    return
  }
  func.func @transform_0(%arg0: i32) -> (i32, i32) {
    %c0_i32 = arith.constant 0 : i32
    %c0_i32_0 = arith.constant 0 : i32
    return %arg0, %c0_i32 : i32, i32
  }
  func.func @transform_1(%arg0: i32) -> (i32, i32) {
    %c0_i32 = arith.constant 0 : i32
    %c0_i32_0 = arith.constant 0 : i32
    %c0_i32_1 = arith.constant 0 : i32
    return %c0_i32, %c0_i32_0 : i32, i32
  }
  func.func @transform_2(%arg0: i32) -> (i32, i32) {
    %c0_i32 = arith.constant 0 : i32
    %c0_i32_0 = arith.constant 0 : i32
    return %arg0, %c0_i32 : i32, i32
  }
}

module attributes {stable_mosaic.version = 11 : i64} {
  func.func @_aggregate_kernel(%arg0: i32, %arg1: i32, %arg2: memref<512x512xbf16, #tpu.memory_space<vmem>>, %arg3: memref<1024x128xbf16, #tpu.memory_space<vmem>>, %arg4: memref<1x128xf32, #tpu.memory_space<vmem>>, %arg5: memref<512x128xbf16, #tpu.memory_space<vmem>>, %arg6: memref<512x128xf32, #tpu.memory_space<vmem>>) attributes {dimension_semantics = [#tpu.dimension_semantics<parallel>, #tpu.dimension_semantics<arbitrary>], iteration_bounds = array<i64: 2, 2>, scalar_prefetch = 0 : i64, scratch_operands = 1 : i64, tpu.core_type = #tpu.core_type<tc>, window_params = [{transform_indices = @transform_0, window_bounds = array<i64: 512, 512>}, {pipeline_mode = #tpu.pipeline_mode<synchronous>, transform_indices = @transform_1, window_bounds = array<i64: 1024, 128>}, {pipeline_mode = #tpu.pipeline_mode<synchronous>, transform_indices = @transform_2, window_bounds = array<i64: 1, 128>}, {transform_indices = @transform_3, window_bounds = array<i64: 512, 128>}]} {
    %c0_i32 = arith.constant 0 : i32
    %0 = arith.cmpi eq, %arg1, %c0_i32 : i32
    %1 = arith.extui %0 : i1 to i32
    %c0_i32_0 = arith.constant 0 : i32
    %2 = arith.cmpi ne, %1, %c0_i32_0 : i32
    scf.if %2 {
      %cst_8 = arith.constant 0.000000e+00 : f32
      %15 = vector.broadcast %cst_8 : f32 to vector<512x128xf32>
      %c0_9 = arith.constant 0 : index
      %c0_10 = arith.constant 0 : index
      %16 = vector.load %arg6[%c0_9, %c0_10] : memref<512x128xf32, #tpu.memory_space<vmem>>, vector<512x128xf32>
      tpu.vector_store %arg6[%c0_9, %c0_10], %15 {strides = array<i32>} : memref<512x128xf32, #tpu.memory_space<vmem>>, vector<512x128xf32>,
    } else {
    }
    %c512_i32 = arith.constant 512 : i32
    %3 = arith.muli %arg1, %c512_i32 : i32
    %4 = tpu.assume_multiple %3, 512 : i32
    %5 = arith.index_cast %4 : i32 to index
    %c0 = arith.constant 0 : index
    %6 = vector.load %arg3[%5, %c0] : memref<1024x128xbf16, #tpu.memory_space<vmem>>, vector<512x128xbf16>
    %c0_1 = arith.constant 0 : index
    %c0_2 = arith.constant 0 : index
    %7 = vector.load %arg6[%c0_1, %c0_2] : memref<512x128xf32, #tpu.memory_space<vmem>>, vector<512x128xf32>
    %c0_3 = arith.constant 0 : index
    %c0_4 = arith.constant 0 : index
    %8 = vector.load %arg2[%c0_3, %c0_4] : memref<512x512xbf16, #tpu.memory_space<vmem>>, vector<512x512xbf16>
    %cst = arith.constant dense<0.000000e+00> : vector<512x128xf32>
    %9 = tpu.matmul %8, %6, %cst {dimension_numbers = #tpu.dot_dimension_numbers<[1], [0], [0], [1], [0, 0, 1, 1], [], []>} : vector<512x512xbf16>, vector<512x128xbf16>, vector<512x128xf32> -> vector<512x128xf32>
    %10 = arith.addf %7, %9 : vector<512x128xf32>
    %c0_5 = arith.constant 0 : index
    %c0_6 = arith.constant 0 : index
    %11 = vector.load %arg6[%c0_5, %c0_6] : memref<512x128xf32, #tpu.memory_space<vmem>>, vector<512x128xf32>
    tpu.vector_store %arg6[%c0_5, %c0_6], %10 {strides = array<i32>} : memref<512x128xf32, #tpu.memory_space<vmem>>, vector<512x128xf32>,
    %c1_i32 = arith.constant 1 : i32
    %12 = arith.cmpi eq, %arg1, %c1_i32 : i32
    %13 = arith.extui %12 : i1 to i32
    %c0_i32_7 = arith.constant 0 : i32
    %14 = arith.cmpi ne, %13, %c0_i32_7 : i32
    scf.if %14 {
      %c0_8 = arith.constant 0 : index
      %c0_9 = arith.constant 0 : index
      %15 = vector.load %arg6[%c0_8, %c0_9] : memref<512x128xf32, #tpu.memory_space<vmem>>, vector<512x128xf32>
      %c0_10 = arith.constant 0 : index
      %c0_11 = arith.constant 0 : index
      %16 = vector.load %arg4[%c0_10, %c0_11] : memref<1x128xf32, #tpu.memory_space<vmem>>, vector<1x128xf32>
      %17 = vector.broadcast %16 : vector<1x128xf32> to vector<512x128xf32>
      %18 = arith.addf %15, %17 : vector<512x128xf32>
      %cst_12 = arith.constant 0.000000e+00 : f32
      %19 = vector.broadcast %cst_12 : f32 to vector<512x128xf32>
      %20 = arith.maximumf %18, %19 : vector<512x128xf32>
      %21 = arith.truncf %20 : vector<512x128xf32> to vector<512x128xbf16>
      %c0_13 = arith.constant 0 : index
      %c0_14 = arith.constant 0 : index
      %22 = vector.load %arg5[%c0_13, %c0_14] : memref<512x128xbf16, #tpu.memory_space<vmem>>, vector<512x128xbf16>
      tpu.vector_store %arg5[%c0_13, %c0_14], %21 {strides = array<i32>} : memref<512x128xbf16, #tpu.memory_space<vmem>>, vector<512x128xbf16>,
    } else {
    }
    return
  }
  func.func @transform_0(%arg0: i32, %arg1: i32) -> (i32, i32) {
    %c0_i32 = arith.constant 0 : i32
    return %arg0, %arg1 : i32, i32
  }
  func.func @transform_1(%arg0: i32, %arg1: i32) -> (i32, i32) {
    %c0_i32 = arith.constant 0 : i32
    %c0_i32_0 = arith.constant 0 : i32
    %c0_i32_1 = arith.constant 0 : i32
    return %c0_i32, %c0_i32_0 : i32, i32
  }
  func.func @transform_2(%arg0: i32, %arg1: i32) -> (i32, i32) {
    %c0_i32 = arith.constant 0 : i32
    %c0_i32_0 = arith.constant 0 : i32
    %c0_i32_1 = arith.constant 0 : i32
    return %c0_i32, %c0_i32_0 : i32, i32
  }
  func.func @transform_3(%arg0: i32, %arg1: i32) -> (i32, i32) {
    %c0_i32 = arith.constant 0 : i32
    %c0_i32_0 = arith.constant 0 : i32
    return %arg0, %c0_i32 : i32, i32
  }
}

module attributes {stable_mosaic.version = 11 : i64} {
  func.func @_aggregate_kernel(%arg0: i32, %arg1: i32, %arg2: memref<512x512xbf16, #tpu.memory_space<vmem>>, %arg3: memref<1024x128xbf16, #tpu.memory_space<vmem>>, %arg4: memref<1x128xf32, #tpu.memory_space<vmem>>, %arg5: memref<512x128xbf16, #tpu.memory_space<vmem>>, %arg6: memref<512x128xf32, #tpu.memory_space<vmem>>) attributes {dimension_semantics = [#tpu.dimension_semantics<parallel>, #tpu.dimension_semantics<arbitrary>], iteration_bounds = array<i64: 2, 2>, scalar_prefetch = 0 : i64, scratch_operands = 1 : i64, tpu.core_type = #tpu.core_type<tc>, window_params = [{transform_indices = @transform_0, window_bounds = array<i64: 512, 512>}, {pipeline_mode = #tpu.pipeline_mode<synchronous>, transform_indices = @transform_1, window_bounds = array<i64: 1024, 128>}, {pipeline_mode = #tpu.pipeline_mode<synchronous>, transform_indices = @transform_2, window_bounds = array<i64: 1, 128>}, {transform_indices = @transform_3, window_bounds = array<i64: 512, 128>}]} {
    %c0_i32 = arith.constant 0 : i32
    %0 = arith.cmpi eq, %arg1, %c0_i32 : i32
    %1 = arith.extui %0 : i1 to i32
    %c0_i32_0 = arith.constant 0 : i32
    %2 = arith.cmpi ne, %1, %c0_i32_0 : i32
    scf.if %2 {
      %cst_8 = arith.constant 0.000000e+00 : f32
      %15 = vector.broadcast %cst_8 : f32 to vector<512x128xf32>
      %c0_9 = arith.constant 0 : index
      %c0_10 = arith.constant 0 : index
      %16 = vector.load %arg6[%c0_9, %c0_10] : memref<512x128xf32, #tpu.memory_space<vmem>>, vector<512x128xf32>
      tpu.vector_store %arg6[%c0_9, %c0_10], %15 {strides = array<i32>} : memref<512x128xf32, #tpu.memory_space<vmem>>, vector<512x128xf32>,
    } else {
    }
    %c512_i32 = arith.constant 512 : i32
    %3 = arith.muli %arg1, %c512_i32 : i32
    %4 = tpu.assume_multiple %3, 512 : i32
    %5 = arith.index_cast %4 : i32 to index
    %c0 = arith.constant 0 : index
    %6 = vector.load %arg3[%5, %c0] : memref<1024x128xbf16, #tpu.memory_space<vmem>>, vector<512x128xbf16>
    %c0_1 = arith.constant 0 : index
    %c0_2 = arith.constant 0 : index
    %7 = vector.load %arg6[%c0_1, %c0_2] : memref<512x128xf32, #tpu.memory_space<vmem>>, vector<512x128xf32>
    %c0_3 = arith.constant 0 : index
    %c0_4 = arith.constant 0 : index
    %8 = vector.load %arg2[%c0_3, %c0_4] : memref<512x512xbf16, #tpu.memory_space<vmem>>, vector<512x512xbf16>
    %cst = arith.constant dense<0.000000e+00> : vector<512x128xf32>
    %9 = tpu.matmul %8, %6, %cst {dimension_numbers = #tpu.dot_dimension_numbers<[1], [0], [0], [1], [0, 0, 1, 1], [], []>} : vector<512x512xbf16>, vector<512x128xbf16>, vector<512x128xf32> -> vector<512x128xf32>
    %10 = arith.addf %7, %9 : vector<512x128xf32>
    %c0_5 = arith.constant 0 : index
    %c0_6 = arith.constant 0 : index
    %11 = vector.load %arg6[%c0_5, %c0_6] : memref<512x128xf32, #tpu.memory_space<vmem>>, vector<512x128xf32>
    tpu.vector_store %arg6[%c0_5, %c0_6], %10 {strides = array<i32>} : memref<512x128xf32, #tpu.memory_space<vmem>>, vector<512x128xf32>,
    %c1_i32 = arith.constant 1 : i32
    %12 = arith.cmpi eq, %arg1, %c1_i32 : i32
    %13 = arith.extui %12 : i1 to i32
    %c0_i32_7 = arith.constant 0 : i32
    %14 = arith.cmpi ne, %13, %c0_i32_7 : i32
    scf.if %14 {
      %c0_8 = arith.constant 0 : index
      %c0_9 = arith.constant 0 : index
      %15 = vector.load %arg6[%c0_8, %c0_9] : memref<512x128xf32, #tpu.memory_space<vmem>>, vector<512x128xf32>
      %c0_10 = arith.constant 0 : index
      %c0_11 = arith.constant 0 : index
      %16 = vector.load %arg4[%c0_10, %c0_11] : memref<1x128xf32, #tpu.memory_space<vmem>>, vector<1x128xf32>
      %17 = vector.broadcast %16 : vector<1x128xf32> to vector<512x128xf32>
      %18 = arith.addf %15, %17 : vector<512x128xf32>
      %19 = arith.truncf %18 : vector<512x128xf32> to vector<512x128xbf16>
      %c0_12 = arith.constant 0 : index
      %c0_13 = arith.constant 0 : index
      %20 = vector.load %arg5[%c0_12, %c0_13] : memref<512x128xbf16, #tpu.memory_space<vmem>>, vector<512x128xbf16>
      tpu.vector_store %arg5[%c0_12, %c0_13], %19 {strides = array<i32>} : memref<512x128xbf16, #tpu.memory_space<vmem>>, vector<512x128xbf16>,
    } else {
    }
    return
  }
  func.func @transform_0(%arg0: i32, %arg1: i32) -> (i32, i32) {
    %c0_i32 = arith.constant 0 : i32
    return %arg0, %arg1 : i32, i32
  }
  func.func @transform_1(%arg0: i32, %arg1: i32) -> (i32, i32) {
    %c0_i32 = arith.constant 0 : i32
    %c0_i32_0 = arith.constant 0 : i32
    %c0_i32_1 = arith.constant 0 : i32
    return %c0_i32, %c0_i32_0 : i32, i32
  }
  func.func @transform_2(%arg0: i32, %arg1: i32) -> (i32, i32) {
    %c0_i32 = arith.constant 0 : i32
    %c0_i32_0 = arith.constant 0 : i32
    %c0_i32_1 = arith.constant 0 : i32
    return %c0_i32, %c0_i32_0 : i32, i32
  }
  func.func @transform_3(%arg0: i32, %arg1: i32) -> (i32, i32) {
    %c0_i32 = arith.constant 0 : i32
    %c0_i32_0 = arith.constant 0 : i32
    return %arg0, %c0_i32 : i32, i32
  }
}

module attributes {stable_mosaic.version = 11 : i64} {
  func.func @_decode_kernel(%arg0: i32, %arg1: memref<64x128xbf16, #tpu.memory_space<vmem>>, %arg2: memref<64x128xbf16, #tpu.memory_space<vmem>>, %arg3: memref<1x128xf32, #tpu.memory_space<vmem>>) attributes {dimension_semantics = [#tpu.dimension_semantics<parallel>], iteration_bounds = array<i64: 1>, scalar_prefetch = 0 : i64, scratch_operands = 0 : i64, tpu.core_type = #tpu.core_type<tc>, window_params = [{transform_indices = @transform_0, window_bounds = array<i64: 64, 128>}, {transform_indices = @transform_1, window_bounds = array<i64: 64, 128>}, {transform_indices = @transform_2, window_bounds = array<i64: 1, 128>}]} {
    %c0 = arith.constant 0 : index
    %c0_0 = arith.constant 0 : index
    %0 = vector.load %arg1[%c0, %c0_0] : memref<64x128xbf16, #tpu.memory_space<vmem>>, vector<64x128xbf16>
    %1 = arith.extf %0 : vector<64x128xbf16> to vector<64x128xf32>
    %c0_1 = arith.constant 0 : index
    %c0_2 = arith.constant 0 : index
    %2 = vector.load %arg2[%c0_1, %c0_2] : memref<64x128xbf16, #tpu.memory_space<vmem>>, vector<64x128xbf16>
    %3 = arith.extf %2 : vector<64x128xbf16> to vector<64x128xf32>
    %4 = arith.mulf %1, %3 : vector<64x128xf32>
    %cst = arith.constant dense<0.000000e+00> : vector<128xf32>
    %5 = vector.multi_reduction <add>, %4, %cst [0] : vector<64x128xf32> to vector<128xf32>
    %6 = vector.shape_cast %5 : vector<128xf32> to vector<1x128xf32>
    %c0_3 = arith.constant 0 : index
    %c0_4 = arith.constant 0 : index
    %7 = vector.load %arg3[%c0_3, %c0_4] : memref<1x128xf32, #tpu.memory_space<vmem>>, vector<1x128xf32>
    tpu.vector_store %arg3[%c0_3, %c0_4], %6 {strides = array<i32>} : memref<1x128xf32, #tpu.memory_space<vmem>>, vector<1x128xf32>,
    return
  }
  func.func @transform_0(%arg0: i32) -> (i32, i32) {
    %c0_i32 = arith.constant 0 : i32
    %c0_i32_0 = arith.constant 0 : i32
    return %c0_i32, %arg0 : i32, i32
  }
  func.func @transform_1(%arg0: i32) -> (i32, i32) {
    %c0_i32 = arith.constant 0 : i32
    %c0_i32_0 = arith.constant 0 : i32
    return %c0_i32, %arg0 : i32, i32
  }
  func.func @transform_2(%arg0: i32) -> (i32, i32) {
    %c0_i32 = arith.constant 0 : i32
    %c0_i32_0 = arith.constant 0 : i32
    return %c0_i32, %arg0 : i32, i32
  }
}

</mosaic_0001>

<bundles_post_ra>
// kernel: gcn_forward.5
= control target key start
LH: loop header
LB: loop body
LE: loop exit
PB: predicated region body
PF: predicated region fallthrough
CT: control target
= control target key end

     0   :  { %s1277_s9 = smov 0   ;;  %s1393_s0 = inlined_call_operand.vmem [shape: bf16[1024,128], index: 0, kind: input, shape index: {}]   ;;  %s1394_s1 = inlined_call_operand.vmem [shape: bf16[128,128], index: 1, kind: input, shape index: {}]   ;;  %s1395_s2 = inlined_call_operand.vmem [shape: bf16[1024,128], index: 2, kind: output, shape index: {}]  }
   0x1 LB: > { %s820_s10 = sadd.s32 4294967295, %s1260_s9   ;;  %p824_p0 = scmp.ge.s32.totalorder %s1260_s9, 1  ;;  %s1260_s9 = sphi %s1277_s9, %s12_s9  }
   0x2   : > { %p113_p1 = scmp.lt.s32.totalorder %s1260_s9, 3 }
   0x4   : > { %p114_p2 = pnand %p824_p0, %p113_p1 }
   0x5   : > { %s825_s19 = sshll.u32 (!%p114_p2), %s820_s10, 6 }
   0x6   : > { %117 = sbr.rel (%p114_p2) target bundleno = 300 (0x12c), region = 28  ;;  %p136_p3 = scmp.lt.s32.totalorder (!%p114_p2), %s825_s19, 127 }
   0xb   : > { %v1030_v0 = vld [vmem:[%s1394_s1 + $0x38] sm:$0xff]  ;;  %v1029_v1 = vld [vmem:[%s1394_s1 + $0x30] sm:$0xff]  ;;  %v1028_v2 = vld [vmem:[%s1394_s1 + $0x28] sm:$0xff]  ;;  %s1397_s19 = smov (!%p136_p3, %s825_s19), 127 }
   0xc   : > { %467 = vmatpush.bf16.msra.mxu0 %v1030_v0  ;;  %1222 = vmatpush.bf16.msra.mxu1 %v1030_v0  ;;  %v1027_v3 = vld [vmem:[%s1394_s1 + $0x20] sm:$0xff]  ;;  %v1026_v4 = vld [vmem:[%s1394_s1 + $0x18] sm:$0xff]  ;;  %v1025_v5 = vld [vmem:[%s1394_s1 + $0x10] sm:$0xff]  ;;  %s826_s26 = sshll.u32 %s1397_s19, 2 }
   0xd   : > { %1223 = vmatpush.bf16.msra.mxu2 %v1030_v0  ;;  %1224 = vmatpush.bf16.msra.mxu3 %v1030_v0  ;;  %v1024_v6 = vld [vmem:[%s1394_s1 + $0x8] sm:$0xff]  ;;  %v1023_v7 = vld [vmem:[%s1394_s1] sm:$0xff]  ;;  %s1317_s3 = scalar_lea.vmem %s1393_s0, %s826_s26  ;;  %s1356_s6 = scalar_lea.vmem %s1395_s2, %s826_s26 }
   0xe   : > { %v991_v8 = vld [vmem:[%s1317_s3] sm:$0xff]  ;;  %v992_v12 = vld [vmem:[%s1317_s3 + $0x8] sm:$0xff]  ;;  %v993_v16 = vld [vmem:[%s1317_s3 + $0x10] sm:$0xff] }
   0xf   : > { %v999_v9 = vld [vmem:[%s1317_s3 + $0x40] sm:$0xff]  ;;  %v1000_v13 = vld [vmem:[%s1317_s3 + $0x48] sm:$0xff]  ;;  %v1001_v17 = vld [vmem:[%s1317_s3 + $0x50] sm:$0xff] }
  0x10   : > { %468 = vmatpush.bf16.msra.mxu0 %v1029_v1  ;;  %1225 = vmatpush.bf16.msra.mxu1 %v1029_v1  ;;  %v1007_v10 = vld [vmem:[%s1317_s3 + $0x80] sm:$0xff]  ;;  %v1008_v14 = vld [vmem:[%s1317_s3 + $0x88] sm:$0xff]  ;;  %v1009_v18 = vld [vmem:[%s1317_s3 + $0x90] sm:$0xff] }
  0x11   : > { %1226 = vmatpush.bf16.msra.mxu2 %v1029_v1  ;;  %1227 = vmatpush.bf16.msra.mxu3 %v1029_v1  ;;  %v1015_v11 = vld [vmem:[%s1317_s3 + $0xc0] sm:$0xff]  ;;  %v1016_v15 = vld [vmem:[%s1317_s3 + $0xc8] sm:$0xff]  ;;  %v1017_v19 = vld [vmem:[%s1317_s3 + $0xd0] sm:$0xff] }
  0x12   : > { %v994_v20 = vld [vmem:[%s1317_s3 + $0x18] sm:$0xff]  ;;  %v995_v24 = vld [vmem:[%s1317_s3 + $0x20] sm:$0xff]  ;;  %v996_v28 = vld [vmem:[%s1317_s3 + $0x28] sm:$0xff] }
  0x13   : > { %v1002_v21 = vld [vmem:[%s1317_s3 + $0x58] sm:$0xff]  ;;  %v1003_v25 = vld [vmem:[%s1317_s3 + $0x60] sm:$0xff]  ;;  %v1004_v29 = vld [vmem:[%s1317_s3 + $0x68] sm:$0xff] }
  0x14   : > { %469 = vmatpush.bf16.msra.mxu0 %v1028_v2  ;;  %1228 = vmatpush.bf16.msra.mxu1 %v1028_v2  ;;  %v1010_v22 = vld [vmem:[%s1317_s3 + $0x98] sm:$0xff]  ;;  %v1011_v26 = vld [vmem:[%s1317_s3 + $0xa0] sm:$0xff]  ;;  %v1012_v30 = vld [vmem:[%s1317_s3 + $0xa8] sm:$0xff] }
  0x15   : > { %1229 = vmatpush.bf16.msra.mxu2 %v1028_v2  ;;  %1230 = vmatpush.bf16.msra.mxu3 %v1028_v2  ;;  %v1018_v23 = vld [vmem:[%s1317_s3 + $0xd8] sm:$0xff]  ;;  %v1019_v27 = vld [vmem:[%s1317_s3 + $0xe0] sm:$0xff]  ;;  %v1020_v31 = vld [vmem:[%s1317_s3 + $0xe8] sm:$0xff] }
  0x16   : > { %v997_v32 = vld [vmem:[%s1317_s3 + $0x30] sm:$0xff]  ;;  %v998_v36 = vld [vmem:[%s1317_s3 + $0x38] sm:$0xff] }
  0x17   : > { %v1005_v33 = vld [vmem:[%s1317_s3 + $0x70] sm:$0xff]  ;;  %v1006_v37 = vld [vmem:[%s1317_s3 + $0x78] sm:$0xff] }
  0x18   : > { %470 = vmatpush.bf16.msra.mxu0 %v1027_v3  ;;  %1231 = vmatpush.bf16.msra.mxu1 %v1027_v3  ;;  %v1013_v34 = vld [vmem:[%s1317_s3 + $0xb0] sm:$0xff]  ;;  %v1014_v38 = vld [vmem:[%s1317_s3 + $0xb8] sm:$0xff] }
  0x19   : > { %1232 = vmatpush.bf16.msra.mxu2 %v1027_v3  ;;  %1233 = vmatpush.bf16.msra.mxu3 %v1027_v3  ;;  %v1021_v35 = vld [vmem:[%s1317_s3 + $0xf0] sm:$0xff]  ;;  %v1022_v39 = vld [vmem:[%s1317_s3 + $0xf8] sm:$0xff] }
  0x1c   : > { %471 = vmatpush.bf16.msra.mxu0 %v1026_v4  ;;  %1234 = vmatpush.bf16.msra.mxu1 %v1026_v4 }
  0x1d   : > { %1235 = vmatpush.bf16.msra.mxu2 %v1026_v4  ;;  %1236 = vmatpush.bf16.msra.mxu3 %v1026_v4 }
  0x20   : > { %472 = vmatpush.bf16.msra.mxu0 %v1025_v5  ;;  %1237 = vmatpush.bf16.msra.mxu1 %v1025_v5 }
  0x21   : > { %1238 = vmatpush.bf16.msra.mxu2 %v1025_v5  ;;  %1239 = vmatpush.bf16.msra.mxu3 %v1025_v5 }
  0x24   : > { %473 = vmatpush.bf16.msra.mxu0 %v1024_v6  ;;  %1240 = vmatpush.bf16.msra.mxu1 %v1024_v6 }
  0x25   : > { %1241 = vmatpush.bf16.msra.mxu2 %v1024_v6  ;;  %1242 = vmatpush.bf16.msra.mxu3 %v1024_v6 }
  0x28   : > { %474 = vmatpush.bf16.msra.mxu0 %v1023_v7  ;;  %1243 = vmatpush.bf16.msra.mxu1 %v1023_v7 }
  0x29   : > { %1244 = vmatpush.bf16.msra.mxu2 %v1023_v7  ;;  %1245 = vmatpush.bf16.msra.mxu3 %v1023_v7 }
  0x2b   : > { %475 = vmatmul.bf16.vlgmr.msra.gmra.mxu0 %v991_v8  ;;  %515 = vmatmul.bf16.vlgmr.msra.gmra.mxu1 %v999_v9 }
  0x2c   : > { %555 = vmatmul.bf16.vlgmr.msra.gmra.mxu2 %v1007_v10  ;;  %595 = vmatmul.bf16.vlgmr.msra.gmra.mxu3 %v1015_v11 }
  0x3b   : > { %480 = vmatmul.bf16.gmra.mxu0 %v992_v12  ;;  %520 = vmatmul.bf16.gmra.mxu1 %v1000_v13 }
  0x3c   : > { %560 = vmatmul.bf16.gmra.mxu2 %v1008_v14  ;;  %600 = vmatmul.bf16.gmra.mxu3 %v1016_v15 }
  0x4b   : > { %485 = vmatmul.bf16.gmra.mxu0 %v993_v16  ;;  %525 = vmatmul.bf16.gmra.mxu1 %v1001_v17 }
  0x4c   : > { %565 = vmatmul.bf16.gmra.mxu2 %v1009_v18  ;;  %605 = vmatmul.bf16.gmra.mxu3 %v1017_v19 }
  0x5b   : > { %490 = vmatmul.bf16.gmra.mxu0 %v994_v20  ;;  %530 = vmatmul.bf16.gmra.mxu1 %v1002_v21 }
  0x5c   : > { %570 = vmatmul.bf16.gmra.mxu2 %v1010_v22  ;;  %610 = vmatmul.bf16.gmra.mxu3 %v1018_v23 }
  0x6b   : > { %495 = vmatmul.bf16.gmra.mxu0 %v995_v24  ;;  %535 = vmatmul.bf16.gmra.mxu1 %v1003_v25 }
  0x6c   : > { %575 = vmatmul.bf16.gmra.mxu2 %v1011_v26  ;;  %615 = vmatmul.bf16.gmra.mxu3 %v1019_v27 }
  0x7b   : > { %500 = vmatmul.bf16.gmra.mxu0 %v996_v28  ;;  %540 = vmatmul.bf16.gmra.mxu1 %v1004_v29 }
  0x7c   : > { %580 = vmatmul.bf16.gmra.mxu2 %v1012_v30  ;;  %620 = vmatmul.bf16.gmra.mxu3 %v1020_v31 }
  0x8b   : > { %505 = vmatmul.bf16.gmra.mxu0 %v997_v32  ;;  %545 = vmatmul.bf16.gmra.mxu1 %v1005_v33 }
  0x8c   : > { %585 = vmatmul.bf16.gmra.mxu2 %v1013_v34  ;;  %625 = vmatmul.bf16.gmra.mxu3 %v1021_v35 }
  0x9b   : > { %510 = vmatmul.bf16.gmra.mxu0 %v998_v36  ;;  %550 = vmatmul.bf16.gmra.mxu1 %v1006_v37 }
  0x9c   : > { %590 = vmatmul.bf16.gmra.mxu2 %v1014_v38  ;;  %630 = vmatmul.bf16.gmra.mxu3 %v1022_v39 }
  0xa8   : > { %v476_v40 = vpop.f32.mrf.mxu0  ;;  %v516_v41 = vpop.f32.mrf.mxu1 }
  0xaf   : > { %v556_v42 = vpop.f32.mrf.mxu2  ;;  %v596_v43 = vpop.f32.mrf.mxu3 }
  0xb0   : > { %v478_v44 = vpop.f32.mrf.mxu0  ;;  %v518_v45 = vpop.f32.mrf.mxu1 }
  0xb1   : > { %v1034_v46 = vpack.c.bf16 %v478_v44, %v476_v40  ;;  %v1074_v47 = vpack.c.bf16 %v518_v45, %v516_v41 }
  0xb3   : > { %1035 = vst [vmem:[%s1356_s6] sm:$0xff] %v1034_v46  }
  0xb4   : > { %1198 = vst [vmem:[%s1356_s6 + $0x40] sm:$0xff] %v1074_v47  }
  0xb7   : > { %v558_v48 = vpop.f32.mrf.mxu2  ;;  %v598_v49 = vpop.f32.mrf.mxu3 }
  0xb8   : > { %v1114_v50 = vpack.c.bf16 %v558_v48, %v556_v42  ;;  %v1154_v51 = vpack.c.bf16 %v598_v49, %v596_v43  ;;  %v481_v52 = vpop.f32.mrf.mxu0  ;;  %v521_v53 = vpop.f32.mrf.mxu1 }
  0xba   : > { %1206 = vst [vmem:[%s1356_s6 + $0x80] sm:$0xff] %v1114_v50  }
  0xbb   : > { %1214 = vst [vmem:[%s1356_s6 + $0xc0] sm:$0xff] %v1154_v51  }
  0xbf   : > { %v561_v54 = vpop.f32.mrf.mxu2  ;;  %v601_v55 = vpop.f32.mrf.mxu3 }
  0xc0   : > { %v483_v56 = vpop.f32.mrf.mxu0  ;;  %v523_v57 = vpop.f32.mrf.mxu1 }
  0xc1   : > { %v1039_v58 = vpack.c.bf16 %v483_v56, %v481_v52  ;;  %v1079_v59 = vpack.c.bf16 %v523_v57, %v521_v53 }
  0xc3   : > { %1191 = vst [vmem:[%s1356_s6 + $0x8] sm:$0xff] %v1039_v58  }
  0xc4   : > { %1199 = vst [vmem:[%s1356_s6 + $0x48] sm:$0xff] %v1079_v59  }
  0xc7   : > { %v563_v60 = vpop.f32.mrf.mxu2  ;;  %v603_v61 = vpop.f32.mrf.mxu3 }
  0xc8   : > { %v1119_v62 = vpack.c.bf16 %v563_v60, %v561_v54  ;;  %v1159_v63 = vpack.c.bf16 %v603_v61, %v601_v55  ;;  %v486_v0 = vpop.f32.mrf.mxu0  ;;  %v526_v1 = vpop.f32.mrf.mxu1 }
  0xca   : > { %1207 = vst [vmem:[%s1356_s6 + $0x88] sm:$0xff] %v1119_v62  }
  0xcb   : > { %1215 = vst [vmem:[%s1356_s6 + $0xc8] sm:$0xff] %v1159_v63  }
  0xcf   : > { %v566_v2 = vpop.f32.mrf.mxu2  ;;  %v606_v3 = vpop.f32.mrf.mxu3 }
  0xd0   : > { %v488_v4 = vpop.f32.mrf.mxu0  ;;  %v528_v5 = vpop.f32.mrf.mxu1 }
  0xd1   : > { %v1044_v6 = vpack.c.bf16 %v488_v4, %v486_v0  ;;  %v1084_v7 = vpack.c.bf16 %v528_v5, %v526_v1 }
  0xd3   : > { %1192 = vst [vmem:[%s1356_s6 + $0x10] sm:$0xff] %v1044_v6  }
  0xd4   : > { %1200 = vst [vmem:[%s1356_s6 + $0x50] sm:$0xff] %v1084_v7  }
  0xd7   : > { %v568_v8 = vpop.f32.mrf.mxu2  ;;  %v608_v9 = vpop.f32.mrf.mxu3 }
  0xd8   : > { %v1124_v10 = vpack.c.bf16 %v568_v8, %v566_v2  ;;  %v1164_v11 = vpack.c.bf16 %v608_v9, %v606_v3  ;;  %v491_v12 = vpop.f32.mrf.mxu0  ;;  %v531_v13 = vpop.f32.mrf.mxu1 }
  0xda   : > { %1208 = vst [vmem:[%s1356_s6 + $0x90] sm:$0xff] %v1124_v10  }
  0xdb   : > { %1216 = vst [vmem:[%s1356_s6 + $0xd0] sm:$0xff] %v1164_v11  }
  0xdf   : > { %v571_v14 = vpop.f32.mrf.mxu2  ;;  %v611_v15 = vpop.f32.mrf.mxu3 }
  0xe0   : > { %v493_v16 = vpop.f32.mrf.mxu0  ;;  %v533_v17 = vpop.f32.mrf.mxu1 }
  0xe1   : > { %v1049_v18 = vpack.c.bf16 %v493_v16, %v491_v12  ;;  %v1089_v19 = vpack.c.bf16 %v533_v17, %v531_v13 }
  0xe3   : > { %1193 = vst [vmem:[%s1356_s6 + $0x18] sm:$0xff] %v1049_v18  }
  0xe4   : > { %1201 = vst [vmem:[%s1356_s6 + $0x58] sm:$0xff] %v1089_v19  }
  0xe7   : > { %v573_v20 = vpop.f32.mrf.mxu2  ;;  %v613_v21 = vpop.f32.mrf.mxu3 }
  0xe8   : > { %v1129_v22 = vpack.c.bf16 %v573_v20, %v571_v14  ;;  %v1169_v23 = vpack.c.bf16 %v613_v21, %v611_v15  ;;  %v496_v24 = vpop.f32.mrf.mxu0  ;;  %v536_v25 = vpop.f32.mrf.mxu1 }
  0xea   : > { %1209 = vst [vmem:[%s1356_s6 + $0x98] sm:$0xff] %v1129_v22  }
  0xeb   : > { %1217 = vst [vmem:[%s1356_s6 + $0xd8] sm:$0xff] %v1169_v23  }
  0xef   : > { %v576_v26 = vpop.f32.mrf.mxu2  ;;  %v616_v27 = vpop.f32.mrf.mxu3 }
  0xf0   : > { %v498_v28 = vpop.f32.mrf.mxu0  ;;  %v538_v29 = vpop.f32.mrf.mxu1 }
  0xf1   : > { %v1054_v30 = vpack.c.bf16 %v498_v28, %v496_v24  ;;  %v1094_v31 = vpack.c.bf16 %v538_v29, %v536_v25 }
  0xf3   : > { %1194 = vst [vmem:[%s1356_s6 + $0x20] sm:$0xff] %v1054_v30  }
  0xf4   : > { %1202 = vst [vmem:[%s1356_s6 + $0x60] sm:$0xff] %v1094_v31  }
  0xf7   : > { %v578_v32 = vpop.f32.mrf.mxu2  ;;  %v618_v33 = vpop.f32.mrf.mxu3 }
  0xf8   : > { %v1134_v34 = vpack.c.bf16 %v578_v32, %v576_v26  ;;  %v1174_v35 = vpack.c.bf16 %v618_v33, %v616_v27  ;;  %v501_v36 = vpop.f32.mrf.mxu0  ;;  %v541_v37 = vpop.f32.mrf.mxu1 }
  0xfa   : > { %1210 = vst [vmem:[%s1356_s6 + $0xa0] sm:$0xff] %v1134_v34  }
  0xfb   : > { %1218 = vst [vmem:[%s1356_s6 + $0xe0] sm:$0xff] %v1174_v35  }
  0xff   : > { %v581_v38 = vpop.f32.mrf.mxu2  ;;  %v621_v39 = vpop.f32.mrf.mxu3 }
 0x100   : > { %v503_v40 = vpop.f32.mrf.mxu0  ;;  %v543_v41 = vpop.f32.mrf.mxu1 }
 0x101   : > { %v1059_v42 = vpack.c.bf16 %v503_v40, %v501_v36  ;;  %v1099_v43 = vpack.c.bf16 %v543_v41, %v541_v37 }
 0x103   : > { %1195 = vst [vmem:[%s1356_s6 + $0x28] sm:$0xff] %v1059_v42  }
 0x104   : > { %1203 = vst [vmem:[%s1356_s6 + $0x68] sm:$0xff] %v1099_v43  }
 0x107   : > { %v583_v44 = vpop.f32.mrf.mxu2  ;;  %v623_v45 = vpop.f32.mrf.mxu3 }
 0x108   : > { %v1139_v46 = vpack.c.bf16 %v583_v44, %v581_v38  ;;  %v1179_v47 = vpack.c.bf16 %v623_v45, %v621_v39  ;;  %v506_v48 = vpop.f32.mrf.mxu0  ;;  %v546_v49 = vpop.f32.mrf.mxu1 }
 0x10a   : > { %1211 = vst [vmem:[%s1356_s6 + $0xa8] sm:$0xff] %v1139_v46  }
 0x10b   : > { %1219 = vst [vmem:[%s1356_s6 + $0xe8] sm:$0xff] %v1179_v47  }
 0x10f   : > { %v586_v50 = vpop.f32.mrf.mxu2  ;;  %v626_v51 = vpop.f32.mrf.mxu3 }
 0x110   : > { %v508_v52 = vpop.f32.mrf.mxu0  ;;  %v548_v53 = vpop.f32.mrf.mxu1 }
 0x111   : > { %v1064_v54 = vpack.c.bf16 %v508_v52, %v506_v48  ;;  %v1104_v55 = vpack.c.bf16 %v548_v53, %v546_v49 }
 0x113   : > { %1196 = vst [vmem:[%s1356_s6 + $0x30] sm:$0xff] %v1064_v54  }
 0x114   : > { %1204 = vst [vmem:[%s1356_s6 + $0x70] sm:$0xff] %v1104_v55  }
 0x117   : > { %v588_v56 = vpop.f32.mrf.mxu2  ;;  %v628_v57 = vpop.f32.mrf.mxu3 }
 0x118   : > { %v1144_v58 = vpack.c.bf16 %v588_v56, %v586_v50  ;;  %v1184_v59 = vpack.c.bf16 %v628_v57, %v626_v51  ;;  %v511_v60 = vpop.f32.mrf.mxu0  ;;  %v551_v61 = vpop.f32.mrf.mxu1 }
 0x11a   : > { %1212 = vst [vmem:[%s1356_s6 + $0xb0] sm:$0xff] %v1144_v58  }
 0x11b   : > { %1220 = vst [vmem:[%s1356_s6 + $0xf0] sm:$0xff] %v1184_v59  }
 0x11f   : > { %v591_v62 = vpop.f32.mrf.mxu2  ;;  %v631_v63 = vpop.f32.mrf.mxu3 }
 0x120   : > { %v513_v0 = vpop.f32.mrf.mxu0  ;;  %v553_v1 = vpop.f32.mrf.mxu1 }
 0x121   : > { %v1069_v2 = vpack.c.bf16 %v513_v0, %v511_v60  ;;  %v1109_v3 = vpack.c.bf16 %v553_v1, %v551_v61 }
 0x123   : > { %1197 = vst [vmem:[%s1356_s6 + $0x38] sm:$0xff] %v1069_v2  }
 0x124   : > { %1205 = vst [vmem:[%s1356_s6 + $0x78] sm:$0xff] %v1109_v3  }
 0x127   : > { %v593_v4 = vpop.f32.mrf.mxu2  ;;  %v633_v5 = vpop.f32.mrf.mxu3 }
 0x128   : > { %v1149_v6 = vpack.c.bf16 %v593_v4, %v591_v62  ;;  %v1189_v7 = vpack.c.bf16 %v633_v5, %v631_v63 }
 0x12a   : > { %1213 = vst [vmem:[%s1356_s6 + $0xb8] sm:$0xff] %v1149_v6  }
 0x12b   : > { %1221 = vst [vmem:[%s1356_s6 + $0xf8] sm:$0xff] %v1189_v7  }
 0x12c PF: > { %s12_s9 = sadd.s32 1, %s1260_s9  }
 0x12d   : > { %p9_p4 = scmp.ge.s32.totalorder %s12_s9, 4  }
 0x12f   :  { %11 = sbr.rel (!%p9_p4) target bundleno = 1 (0x1), region = 58 }

// kernel: gcn_forward.6
= control target key start
LH: loop header
LB: loop body
LE: loop exit
PB: predicated region body
PF: predicated region fallthrough
CT: control target
= control target key end

     0   :  { %s3983_s12 = smov 0   ;;  %s3985_s13 = smov 0   ;;  %s4796_s0 = inlined_call_operand.vmem [shape: bf16[1024,1024], index: 0, kind: input, shape index: {}]   ;;  %s4797_s1 = inlined_call_operand.vmem [shape: bf16[1024,128], index: 1, kind: input, shape index: {}]   ;;  %s4798_s2 = inlined_call_operand.vmem [shape: f32[1,128], index: 2, kind: input, shape index: {}]   ;;  %s4799_s3 = inlined_call_operand.vmem [shape: bf16[1024,128], index: 3, kind: output, shape index: {}]  }
   0x1   :  { %s3987_s14 = smov 0   ;;  %s3989_s15 = smov 0  }
   0x2   :  { %s3991_s16 = smov 0   ;;  %s3993_s17 = smov 0  }
   0x3   :  { %s3995_s18 = smov 0  }
   0x4 LB: > { %s22_s19 = sadd.s32 1, %s3952_s16  ;;  %s25_s20 = sadd.s32 1, %s3956_s17  ;;  %s3960_s18 = sphi %s3995_s18, %s13_s18   ;;  %s3956_s17 = sphi %s3993_s17, %s4805_s17   ;;  %s3952_s16 = sphi %s3991_s16, %s4804_s16   ;;  %s3948_s15 = sphi %s3989_s15, %s4803_s15   ;;  %s3944_s14 = sphi %s3987_s14, %s4802_s14   ;;  %s3940_s13 = sphi %s3985_s13, %s4801_s13   ;;  %s3936_s12 = sphi %s3983_s12, %s4800_s12  }
   0x5   : > { %p23_p0 = scmp.ge.s32.totalorder %s22_s19, 2  ;;  %p41_p1 = scmp.ne.s32.totalorder %s3940_s13, %s3936_s12 }
   0x6   : > { %p42_p2 = scmp.eq.s32.totalorder %s3960_s18, 0  ;;  %s34_s24 = sadd.s32 1, %s3940_s13 }
   0x7   : > { %s4807_s19 = smov (%p23_p0, %s22_s19), 0  ;;  %s4809_s20 = smov (!%p23_p0, %s25_s20), %s3956_s17 }
   0x8   : > { %p43_p3 = por %p42_p2, %p41_p1  ;;  %p27_p4 = scmp.ge.s32.totalorder %s4809_s20, 2 }
   0x9   : > { %s30_s21 = ssub.s32 %s3952_s16, %s4807_s19  ;;  %p2840_p6 = scmp.ge.s32.totalorder %s3960_s18, 4 }
   0xa   : > { %s4811_s20 = smov (%p27_p4, %s4809_s20), 0 }
   0xb   : > { %s29_s22 = ssub.s32 %s3956_s17, %s4811_s20  ;;  %141 = sbr.rel (%p2840_p6) target bundleno = 151 (0x97), region = 24 }
   0xc   : > { %s31_s23 = sor.u32 %s30_s21, %s29_s22 }
   0xd   : > { %p32_p5 = scmp.eq.s32.totalorder %s31_s23, 0 }
   0xf   : > { %s4034_s25 = scalar_select %p32_p5, %s3940_s13, %s34_s24  }
  0x10   : > { %144 = sbr.rel (!%p43_p3) target bundleno = 151 (0x97), region = 28  ;;  %s146_s26 = sand.u32 (%p43_p3), 1, %s3940_s13  }
  0x11   : > { %s2843_s27 = sshll.u32 (%p43_p3), %s3952_s16, 2  ;;  %s2841_s28 = sshll.u32 (%p43_p3), %s146_s26, 10 }
  0x12   : > { %s3496_s29 = sshll.u32 (%p43_p3), %s3956_s17, 9  ;;  %s4048_s8 = scalar_lea.vmem (%p43_p3), [#allocation3], %s2841_s28 }
  0x13   : > { %s152_s30 = sadd.s32 (%p43_p3), %s3496_s29, %s2843_s27 }
  0x14   : > { %s2845_s4 = sshll.u32 (%p43_p3), %s152_s30, 2 }
  0x15   : > { %s4043_s7 = scalar_lea.vmem %s4796_s0, %s2845_s4 }
  0x16   : > { %v167_v0 = vld [vmem:[%s4043_s7] sm:$0xff]  ;;  %v169_v1 = vld [vmem:[%s4043_s7 + $0x8] sm:$0xff] }
  0x17   : > { %v171_v2 = vld [vmem:[%s4043_s7 + $0x20] sm:$0xff]  ;;  %168 = vst [vmem:[%s4048_s8] sm:$0xff] %v167_v0  ;;  %v173_v3 = vld [vmem:[%s4043_s7 + $0x28] sm:$0xff] }
  0x18   : > { %170 = vst [vmem:[%s4048_s8 + $0x8] sm:$0xff] %v169_v1  ;;  %v175_v4 = vld [vmem:[%s4043_s7 + $0x40] sm:$0xff]  ;;  %v177_v5 = vld [vmem:[%s4043_s7 + $0x48] sm:$0xff] }
  0x19   : > { %172 = vst [vmem:[%s4048_s8 + $0x10] sm:$0xff] %v171_v2  ;;  %v179_v6 = vld [vmem:[%s4043_s7 + $0x60] sm:$0xff]  ;;  %v181_v7 = vld [vmem:[%s4043_s7 + $0x68] sm:$0xff] }
  0x1a   : > { %174 = vst [vmem:[%s4048_s8 + $0x18] sm:$0xff] %v173_v3  ;;  %v183_v8 = vld [vmem:[%s4043_s7 + $0x80] sm:$0xff]  ;;  %v185_v9 = vld [vmem:[%s4043_s7 + $0x88] sm:$0xff] }
  0x1b   : > { %176 = vst [vmem:[%s4048_s8 + $0x20] sm:$0xff] %v175_v4  ;;  %v187_v10 = vld [vmem:[%s4043_s7 + $0xa0] sm:$0xff]  ;;  %v189_v11 = vld [vmem:[%s4043_s7 + $0xa8] sm:$0xff] }
  0x1c   : > { %178 = vst [vmem:[%s4048_s8 + $0x28] sm:$0xff] %v177_v5  ;;  %v191_v12 = vld [vmem:[%s4043_s7 + $0xc0] sm:$0xff]  ;;  %v193_v13 = vld [vmem:[%s4043_s7 + $0xc8] sm:$0xff] }
  0x1d   : > { %180 = vst [vmem:[%s4048_s8 + $0x30] sm:$0xff] %v179_v6  ;;  %v195_v14 = vld [vmem:[%s4043_s7 + $0xe0] sm:$0xff]  ;;  %v197_v15 = vld [vmem:[%s4043_s7 + $0xe8] sm:$0xff] }
  0x1e   : > { %182 = vst [vmem:[%s4048_s8 + $0x38] sm:$0xff] %v181_v7  ;;  %v199_v16 = vld [vmem:[%s4043_s7 + $0x100] sm:$0xff]  ;;  %v201_v17 = vld [vmem:[%s4043_s7 + $0x108] sm:$0xff] }
  0x1f   : > { %184 = vst [vmem:[%s4048_s8 + $0x40] sm:$0xff] %v183_v8  ;;  %v203_v18 = vld [vmem:[%s4043_s7 + $0x120] sm:$0xff]  ;;  %v205_v19 = vld [vmem:[%s4043_s7 + $0x128] sm:$0xff] }
  0x20   : > { %186 = vst [vmem:[%s4048_s8 + $0x48] sm:$0xff] %v185_v9  ;;  %v207_v20 = vld [vmem:[%s4043_s7 + $0x140] sm:$0xff]  ;;  %v209_v21 = vld [vmem:[%s4043_s7 + $0x148] sm:$0xff] }
  0x21   : > { %188 = vst [vmem:[%s4048_s8 + $0x50] sm:$0xff] %v187_v10  ;;  %v211_v22 = vld [vmem:[%s4043_s7 + $0x160] sm:$0xff]  ;;  %v213_v23 = vld [vmem:[%s4043_s7 + $0x168] sm:$0xff] }
  0x22   : > { %190 = vst [vmem:[%s4048_s8 + $0x58] sm:$0xff] %v189_v11  ;;  %v215_v24 = vld [vmem:[%s4043_s7 + $0x180] sm:$0xff]  ;;  %v217_v25 = vld [vmem:[%s4043_s7 + $0x188] sm:$0xff] }
  0x23   : > { %192 = vst [vmem:[%s4048_s8 + $0x60] sm:$0xff] %v191_v12  ;;  %v219_v26 = vld [vmem:[%s4043_s7 + $0x1a0] sm:$0xff]  ;;  %v221_v27 = vld [vmem:[%s4043_s7 + $0x1a8] sm:$0xff] }
  0x24   : > { %194 = vst [vmem:[%s4048_s8 + $0x68] sm:$0xff] %v193_v13  ;;  %v223_v28 = vld [vmem:[%s4043_s7 + $0x1c0] sm:$0xff]  ;;  %v225_v29 = vld [vmem:[%s4043_s7 + $0x1c8] sm:$0xff] }
  0x25   : > { %196 = vst [vmem:[%s4048_s8 + $0x70] sm:$0xff] %v195_v14  ;;  %v227_v30 = vld [vmem:[%s4043_s7 + $0x1e0] sm:$0xff]  ;;  %v229_v31 = vld [vmem:[%s4043_s7 + $0x1e8] sm:$0xff] }
  0x26   : > { %198 = vst [vmem:[%s4048_s8 + $0x78] sm:$0xff] %v197_v15  ;;  %v231_v32 = vld [vmem:[%s4043_s7 + $0x200] sm:$0xff]  ;;  %v233_v33 = vld [vmem:[%s4043_s7 + $0x208] sm:$0xff] }
  0x27   : > { %200 = vst [vmem:[%s4048_s8 + $0x80] sm:$0xff] %v199_v16  ;;  %v235_v34 = vld [vmem:[%s4043_s7 + $0x220] sm:$0xff]  ;;  %v237_v35 = vld [vmem:[%s4043_s7 + $0x228] sm:$0xff] }
  0x28   : > { %202 = vst [vmem:[%s4048_s8 + $0x88] sm:$0xff] %v201_v17  ;;  %v239_v36 = vld [vmem:[%s4043_s7 + $0x240] sm:$0xff]  ;;  %v241_v37 = vld [vmem:[%s4043_s7 + $0x248] sm:$0xff] }
  0x29   : > { %204 = vst [vmem:[%s4048_s8 + $0x90] sm:$0xff] %v203_v18  ;;  %v243_v38 = vld [vmem:[%s4043_s7 + $0x260] sm:$0xff]  ;;  %v245_v39 = vld [vmem:[%s4043_s7 + $0x268] sm:$0xff] }
  0x2a   : > { %206 = vst [vmem:[%s4048_s8 + $0x98] sm:$0xff] %v205_v19  ;;  %v247_v40 = vld [vmem:[%s4043_s7 + $0x280] sm:$0xff]  ;;  %v249_v41 = vld [vmem:[%s4043_s7 + $0x288] sm:$0xff] }
  0x2b   : > { %208 = vst [vmem:[%s4048_s8 + $0xa0] sm:$0xff] %v207_v20  ;;  %v251_v42 = vld [vmem:[%s4043_s7 + $0x2a0] sm:$0xff]  ;;  %v253_v43 = vld [vmem:[%s4043_s7 + $0x2a8] sm:$0xff] }
  0x2c   : > { %210 = vst [vmem:[%s4048_s8 + $0xa8] sm:$0xff] %v209_v21  ;;  %v255_v44 = vld [vmem:[%s4043_s7 + $0x2c0] sm:$0xff]  ;;  %v257_v45 = vld [vmem:[%s4043_s7 + $0x2c8] sm:$0xff] }
  0x2d   : > { %212 = vst [vmem:[%s4048_s8 + $0xb0] sm:$0xff] %v211_v22  ;;  %v259_v46 = vld [vmem:[%s4043_s7 + $0x2e0] sm:$0xff]  ;;  %v261_v47 = vld [vmem:[%s4043_s7 + $0x2e8] sm:$0xff] }
  0x2e   : > { %214 = vst [vmem:[%s4048_s8 + $0xb8] sm:$0xff] %v213_v23  ;;  %v263_v48 = vld [vmem:[%s4043_s7 + $0x300] sm:$0xff]  ;;  %v265_v49 = vld [vmem:[%s4043_s7 + $0x308] sm:$0xff] }
  0x2f   : > { %216 = vst [vmem:[%s4048_s8 + $0xc0] sm:$0xff] %v215_v24  ;;  %v267_v50 = vld [vmem:[%s4043_s7 + $0x320] sm:$0xff]  ;;  %v269_v51 = vld [vmem:[%s4043_s7 + $0x328] sm:$0xff] }
  0x30   : > { %218 = vst [vmem:[%s4048_s8 + $0xc8] sm:$0xff] %v217_v25  ;;  %v271_v52 = vld [vmem:[%s4043_s7 + $0x340] sm:$0xff]  ;;  %v273_v53 = vld [vmem:[%s4043_s7 + $0x348] sm:$0xff] }
  0x31   : > { %220 = vst [vmem:[%s4048_s8 + $0xd0] sm:$0xff] %v219_v26  ;;  %v275_v54 = vld [vmem:[%s4043_s7 + $0x360] sm:$0xff]  ;;  %v277_v55 = vld [vmem:[%s4043_s7 + $0x368] sm:$0xff] }
  0x32   : > { %222 = vst [vmem:[%s4048_s8 + $0xd8] sm:$0xff] %v221_v27  ;;  %v279_v56 = vld [vmem:[%s4043_s7 + $0x380] sm:$0xff]  ;;  %v281_v57 = vld [vmem:[%s4043_s7 + $0x388] sm:$0xff] }
  0x33   : > { %224 = vst [vmem:[%s4048_s8 + $0xe0] sm:$0xff] %v223_v28  ;;  %v283_v58 = vld [vmem:[%s4043_s7 + $0x3a0] sm:$0xff]  ;;  %v285_v59 = vld [vmem:[%s4043_s7 + $0x3a8] sm:$0xff] }
  0x34   : > { %226 = vst [vmem:[%s4048_s8 + $0xe8] sm:$0xff] %v225_v29  ;;  %v287_v60 = vld [vmem:[%s4043_s7 + $0x3c0] sm:$0xff]  ;;  %v289_v61 = vld [vmem:[%s4043_s7 + $0x3c8] sm:$0xff] }
  0x35   : > { %228 = vst [vmem:[%s4048_s8 + $0xf0] sm:$0xff] %v227_v30  ;;  %v291_v62 = vld [vmem:[%s4043_s7 + $0x3e0] sm:$0xff]  ;;  %v293_v63 = vld [vmem:[%s4043_s7 + $0x3e8] sm:$0xff] }
  0x36   : > { %230 = vst [vmem:[%s4048_s8 + $0xf8] sm:$0xff] %v229_v31  ;;  %v295_v0 = vld [vmem:[%s4043_s7 + $0x400] sm:$0xff]  ;;  %v297_v1 = vld [vmem:[%s4043_s7 + $0x408] sm:$0xff] }
  0x37   : > { %232 = vst [vmem:[%s4048_s8 + $0x100] sm:$0xff] %v231_v32  ;;  %v299_v2 = vld [vmem:[%s4043_s7 + $0x420] sm:$0xff]  ;;  %v301_v3 = vld [vmem:[%s4043_s7 + $0x428] sm:$0xff] }
  0x38   : > { %234 = vst [vmem:[%s4048_s8 + $0x108] sm:$0xff] %v233_v33  ;;  %v303_v4 = vld [vmem:[%s4043_s7 + $0x440] sm:$0xff]  ;;  %v305_v5 = vld [vmem:[%s4043_s7 + $0x448] sm:$0xff] }
  0x39   : > { %236 = vst [vmem:[%s4048_s8 + $0x110] sm:$0xff] %v235_v34  ;;  %v307_v6 = vld [vmem:[%s4043_s7 + $0x460] sm:$0xff]  ;;  %v309_v7 = vld [vmem:[%s4043_s7 + $0x468] sm:$0xff] }
  0x3a   : > { %238 = vst [vmem:[%s4048_s8 + $0x118] sm:$0xff] %v237_v35  ;;  %v311_v8 = vld [vmem:[%s4043_s7 + $0x480] sm:$0xff]  ;;  %v313_v9 = vld [vmem:[%s4043_s7 + $0x488] sm:$0xff] }
  0x3b   : > { %240 = vst [vmem:[%s4048_s8 + $0x120] sm:$0xff] %v239_v36  ;;  %v315_v10 = vld [vmem:[%s4043_s7 + $0x4a0] sm:$0xff]  ;;  %v317_v11 = vld [vmem:[%s4043_s7 + $0x4a8] sm:$0xff] }
  0x3c   : > { %242 = vst [vmem:[%s4048_s8 + $0x128] sm:$0xff] %v241_v37  ;;  %v319_v12 = vld [vmem:[%s4043_s7 + $0x4c0] sm:$0xff]  ;;  %v321_v13 = vld [vmem:[%s4043_s7 + $0x4c8] sm:$0xff] }
  0x3d   : > { %244 = vst [vmem:[%s4048_s8 + $0x130] sm:$0xff] %v243_v38  ;;  %v323_v14 = vld [vmem:[%s4043_s7 + $0x4e0] sm:$0xff]  ;;  %v325_v15 = vld [vmem:[%s4043_s7 + $0x4e8] sm:$0xff] }
  0x3e   : > { %246 = vst [vmem:[%s4048_s8 + $0x138] sm:$0xff] %v245_v39  ;;  %v327_v16 = vld [vmem:[%s4043_s7 + $0x500] sm:$0xff]  ;;  %v329_v17 = vld [vmem:[%s4043_s7 + $0x508] sm:$0xff] }
  0x3f   : > { %248 = vst [vmem:[%s4048_s8 + $0x140] sm:$0xff] %v247_v40  ;;  %v331_v18 = vld [vmem:[%s4043_s7 + $0x520] sm:$0xff]  ;;  %v333_v19 = vld [vmem:[%s4043_s7 + $0x528] sm:$0xff] }
  0x40   : > { %250 = vst [vmem:[%s4048_s8 + $0x148] sm:$0xff] %v249_v41  ;;  %v335_v20 = vld [vmem:[%s4043_s7 + $0x540] sm:$0xff]  ;;  %v337_v21 = vld [vmem:[%s4043_s7 + $0x548] sm:$0xff] }
  0x41   : > { %252 = vst [vmem:[%s4048_s8 + $0x150] sm:$0xff] %v251_v42  ;;  %v339_v22 = vld [vmem:[%s4043_s7 + $0x560] sm:$0xff]  ;;  %v341_v23 = vld [vmem:[%s4043_s7 + $0x568] sm:$0xff] }
  0x42   : > { %254 = vst [vmem:[%s4048_s8 + $0x158] sm:$0xff] %v253_v43  ;;  %v343_v24 = vld [vmem:[%s4043_s7 + $0x580] sm:$0xff]  ;;  %v345_v25 = vld [vmem:[%s4043_s7 + $0x588] sm:$0xff] }
  0x43   : > { %256 = vst [vmem:[%s4048_s8 + $0x160] sm:$0xff] %v255_v44  ;;  %v347_v26 = vld [vmem:[%s4043_s7 + $0x5a0] sm:$0xff]  ;;  %v349_v27 = vld [vmem:[%s4043_s7 + $0x5a8] sm:$0xff] }
  0x44   : > { %258 = vst [vmem:[%s4048_s8 + $0x168] sm:$0xff] %v257_v45  ;;  %v351_v28 = vld [vmem:[%s4043_s7 + $0x5c0] sm:$0xff]  ;;  %v353_v29 = vld [vmem:[%s4043_s7 + $0x5c8] sm:$0xff] }
  0x45   : > { %260 = vst [vmem:[%s4048_s8 + $0x170] sm:$0xff] %v259_v46  ;;  %v355_v30 = vld [vmem:[%s4043_s7 + $0x5e0] sm:$0xff]  ;;  %v357_v31 = vld [vmem:[%s4043_s7 + $0x5e8] sm:$0xff] }
  0x46   : > { %262 = vst [vmem:[%s4048_s8 + $0x178] sm:$0xff] %v261_v47  ;;  %v359_v32 = vld [vmem:[%s4043_s7 + $0x600] sm:$0xff]  ;;  %v361_v33 = vld [vmem:[%s4043_s7 + $0x608] sm:$0xff] }
  0x47   : > { %264 = vst [vmem:[%s4048_s8 + $0x180] sm:$0xff] %v263_v48  ;;  %v363_v34 = vld [vmem:[%s4043_s7 + $0x620] sm:$0xff]  ;;  %v365_v35 = vld [vmem:[%s4043_s7 + $0x628] sm:$0xff] }
  0x48   : > { %266 = vst [vmem:[%s4048_s8 + $0x188] sm:$0xff] %v265_v49  ;;  %v367_v36 = vld [vmem:[%s4043_s7 + $0x640] sm:$0xff]  ;;  %v369_v37 = vld [vmem:[%s4043_s7 + $0x648] sm:$0xff] }
  0x49   : > { %268 = vst [vmem:[%s4048_s8 + $0x190] sm:$0xff] %v267_v50  ;;  %v371_v38 = vld [vmem:[%s4043_s7 + $0x660] sm:$0xff]  ;;  %v373_v39 = vld [vmem:[%s4043_s7 + $0x668] sm:$0xff] }
  0x4a   : > { %270 = vst [vmem:[%s4048_s8 + $0x198] sm:$0xff] %v269_v51  ;;  %v375_v40 = vld [vmem:[%s4043_s7 + $0x680] sm:$0xff]  ;;  %v377_v41 = vld [vmem:[%s4043_s7 + $0x688] sm:$0xff] }
  0x4b   : > { %272 = vst [vmem:[%s4048_s8 + $0x1a0] sm:$0xff] %v271_v52  ;;  %v379_v42 = vld [vmem:[%s4043_s7 + $0x6a0] sm:$0xff]  ;;  %v381_v43 = vld [vmem:[%s4043_s7 + $0x6a8] sm:$0xff] }
  0x4c   : > { %274 = vst [vmem:[%s4048_s8 + $0x1a8] sm:$0xff] %v273_v53  ;;  %v383_v44 = vld [vmem:[%s4043_s7 + $0x6c0] sm:$0xff]  ;;  %v385_v45 = vld [vmem:[%s4043_s7 + $0x6c8] sm:$0xff] }
  0x4d   : > { %276 = vst [vmem:[%s4048_s8 + $0x1b0] sm:$0xff] %v275_v54  ;;  %v387_v46 = vld [vmem:[%s4043_s7 + $0x6e0] sm:$0xff]  ;;  %v389_v47 = vld [vmem:[%s4043_s7 + $0x6e8] sm:$0xff] }
  0x4e   : > { %278 = vst [vmem:[%s4048_s8 + $0x1b8] sm:$0xff] %v277_v55  ;;  %v391_v48 = vld [vmem:[%s4043_s7 + $0x700] sm:$0xff]  ;;  %v393_v49 = vld [vmem:[%s4043_s7 + $0x708] sm:$0xff] }
  0x4f   : > { %280 = vst [vmem:[%s4048_s8 + $0x1c0] sm:$0xff] %v279_v56  ;;  %v395_v50 = vld [vmem:[%s4043_s7 + $0x720] sm:$0xff]  ;;  %v397_v51 = vld [vmem:[%s4043_s7 + $0x728] sm:$0xff] }
  0x50   : > { %282 = vst [vmem:[%s4048_s8 + $0x1c8] sm:$0xff] %v281_v57  ;;  %v399_v52 = vld [vmem:[%s4043_s7 + $0x740] sm:$0xff]  ;;  %v401_v53 = vld [vmem:[%s4043_s7 + $0x748] sm:$0xff] }
  0x51   : > { %284 = vst [vmem:[%s4048_s8 + $0x1d0] sm:$0xff] %v283_v58  ;;  %v403_v54 = vld [vmem:[%s4043_s7 + $0x760] sm:$0xff]  ;;  %v405_v55 = vld [vmem:[%s4043_s7 + $0x768] sm:$0xff] }
  0x52   : > { %286 = vst [vmem:[%s4048_s8 + $0x1d8] sm:$0xff] %v285_v59  ;;  %v407_v56 = vld [vmem:[%s4043_s7 + $0x780] sm:$0xff]  ;;  %v409_v57 = vld [vmem:[%s4043_s7 + $0x788] sm:$0xff] }
  0x53   : > { %288 = vst [vmem:[%s4048_s8 + $0x1e0] sm:$0xff] %v287_v60  ;;  %v411_v58 = vld [vmem:[%s4043_s7 + $0x7a0] sm:$0xff]  ;;  %v413_v59 = vld [vmem:[%s4043_s7 + $0x7a8] sm:$0xff] }
  0x54   : > { %290 = vst [vmem:[%s4048_s8 + $0x1e8] sm:$0xff] %v289_v61  ;;  %v415_v60 = vld [vmem:[%s4043_s7 + $0x7c0] sm:$0xff]  ;;  %v417_v61 = vld [vmem:[%s4043_s7 + $0x7c8] sm:$0xff] }
  0x55   : > { %292 = vst [vmem:[%s4048_s8 + $0x1f0] sm:$0xff] %v291_v62  ;;  %v419_v62 = vld [vmem:[%s4043_s7 + $0x7e0] sm:$0xff] }
  0x56   : > { %294 = vst [vmem:[%s4048_s8 + $0x1f8] sm:$0xff] %v293_v63  ;;  %v421_v63 = vld [vmem:[%s4043_s7 + $0x7e8] sm:$0xff] }
  0x57   : > { %296 = vst [vmem:[%s4048_s8 + $0x200] sm:$0xff] %v295_v0 }
  0x58   : > { %298 = vst [vmem:[%s4048_s8 + $0x208] sm:$0xff] %v297_v1 }
  0x59   : > { %300 = vst [vmem:[%s4048_s8 + $0x210] sm:$0xff] %v299_v2 }
  0x5a   : > { %302 = vst [vmem:[%s4048_s8 + $0x218] sm:$0xff] %v301_v3 }
  0x5b   : > { %304 = vst [vmem:[%s4048_s8 + $0x220] sm:$0xff] %v303_v4 }
  0x5c   : > { %306 = vst [vmem:[%s4048_s8 + $0x228] sm:$0xff] %v305_v5 }
  0x5d   : > { %308 = vst [vmem:[%s4048_s8 + $0x230] sm:$0xff] %v307_v6 }
  0x5e   : > { %310 = vst [vmem:[%s4048_s8 + $0x238] sm:$0xff] %v309_v7 }
  0x5f   : > { %312 = vst [vmem:[%s4048_s8 + $0x240] sm:$0xff] %v311_v8 }
  0x60   : > { %314 = vst [vmem:[%s4048_s8 + $0x248] sm:$0xff] %v313_v9 }
  0x61   : > { %316 = vst [vmem:[%s4048_s8 + $0x250] sm:$0xff] %v315_v10 }
  0x62   : > { %318 = vst [vmem:[%s4048_s8 + $0x258] sm:$0xff] %v317_v11 }
  0x63   : > { %320 = vst [vmem:[%s4048_s8 + $0x260] sm:$0xff] %v319_v12 }
  0x64   : > { %322 = vst [vmem:[%s4048_s8 + $0x268] sm:$0xff] %v321_v13 }
  0x65   : > { %324 = vst [vmem:[%s4048_s8 + $0x270] sm:$0xff] %v323_v14 }
  0x66   : > { %326 = vst [vmem:[%s4048_s8 + $0x278] sm:$0xff] %v325_v15 }
  0x67   : > { %328 = vst [vmem:[%s4048_s8 + $0x280] sm:$0xff] %v327_v16 }
  0x68   : > { %330 = vst [vmem:[%s4048_s8 + $0x288] sm:$0xff] %v329_v17 }
  0x69   : > { %332 = vst [vmem:[%s4048_s8 + $0x290] sm:$0xff] %v331_v18 }
  0x6a   : > { %334 = vst [vmem:[%s4048_s8 + $0x298] sm:$0xff] %v333_v19 }
  0x6b   : > { %336 = vst [vmem:[%s4048_s8 + $0x2a0] sm:$0xff] %v335_v20 }
  0x6c   : > { %338 = vst [vmem:[%s4048_s8 + $0x2a8] sm:$0xff] %v337_v21 }
  0x6d   : > { %340 = vst [vmem:[%s4048_s8 + $0x2b0] sm:$0xff] %v339_v22 }
  0x6e   : > { %342 = vst [vmem:[%s4048_s8 + $0x2b8] sm:$0xff] %v341_v23 }
  0x6f   : > { %344 = vst [vmem:[%s4048_s8 + $0x2c0] sm:$0xff] %v343_v24 }
  0x70   : > { %346 = vst [vmem:[%s4048_s8 + $0x2c8] sm:$0xff] %v345_v25 }
  0x71   : > { %348 = vst [vmem:[%s4048_s8 + $0x2d0] sm:$0xff] %v347_v26 }
  0x72   : > { %350 = vst [vmem:[%s4048_s8 + $0x2d8] sm:$0xff] %v349_v27 }
  0x73   : > { %352 = vst [vmem:[%s4048_s8 + $0x2e0] sm:$0xff] %v351_v28 }
  0x74   : > { %354 = vst [vmem:[%s4048_s8 + $0x2e8] sm:$0xff] %v353_v29 }
  0x75   : > { %356 = vst [vmem:[%s4048_s8 + $0x2f0] sm:$0xff] %v355_v30 }
  0x76   : > { %358 = vst [vmem:[%s4048_s8 + $0x2f8] sm:$0xff] %v357_v31 }
  0x77   : > { %360 = vst [vmem:[%s4048_s8 + $0x300] sm:$0xff] %v359_v32 }
  0x78   : > { %362 = vst [vmem:[%s4048_s8 + $0x308] sm:$0xff] %v361_v33 }
  0x79   : > { %364 = vst [vmem:[%s4048_s8 + $0x310] sm:$0xff] %v363_v34 }
  0x7a   : > { %366 = vst [vmem:[%s4048_s8 + $0x318] sm:$0xff] %v365_v35 }
  0x7b   : > { %368 = vst [vmem:[%s4048_s8 + $0x320] sm:$0xff] %v367_v36 }
  0x7c   : > { %370 = vst [vmem:[%s4048_s8 + $0x328] sm:$0xff] %v369_v37 }
  0x7d   : > { %372 = vst [vmem:[%s4048_s8 + $0x330] sm:$0xff] %v371_v38 }
  0x7e   : > { %374 = vst [vmem:[%s4048_s8 + $0x338] sm:$0xff] %v373_v39 }
  0x7f   : > { %376 = vst [vmem:[%s4048_s8 + $0x340] sm:$0xff] %v375_v40 }
  0x80   : > { %378 = vst [vmem:[%s4048_s8 + $0x348] sm:$0xff] %v377_v41 }
  0x81   : > { %380 = vst [vmem:[%s4048_s8 + $0x350] sm:$0xff] %v379_v42 }
  0x82   : > { %382 = vst [vmem:[%s4048_s8 + $0x358] sm:$0xff] %v381_v43 }
  0x83   : > { %384 = vst [vmem:[%s4048_s8 + $0x360] sm:$0xff] %v383_v44 }
  0x84   : > { %386 = vst [vmem:[%s4048_s8 + $0x368] sm:$0xff] %v385_v45 }
  0x85   : > { %388 = vst [vmem:[%s4048_s8 + $0x370] sm:$0xff] %v387_v46 }
  0x86   : > { %390 = vst [vmem:[%s4048_s8 + $0x378] sm:$0xff] %v389_v47 }
  0x87   : > { %392 = vst [vmem:[%s4048_s8 + $0x380] sm:$0xff] %v391_v48 }
  0x88   : > { %394 = vst [vmem:[%s4048_s8 + $0x388] sm:$0xff] %v393_v49 }
  0x89   : > { %396 = vst [vmem:[%s4048_s8 + $0x390] sm:$0xff] %v395_v50 }
  0x8a   : > { %398 = vst [vmem:[%s4048_s8 + $0x398] sm:$0xff] %v397_v51 }
  0x8b   : > { %400 = vst [vmem:[%s4048_s8 + $0x3a0] sm:$0xff] %v399_v52 }
  0x8c   : > { %402 = vst [vmem:[%s4048_s8 + $0x3a8] sm:$0xff] %v401_v53 }
  0x8d   : > { %404 = vst [vmem:[%s4048_s8 + $0x3b0] sm:$0xff] %v403_v54 }
  0x8e   : > { %406 = vst [vmem:[%s4048_s8 + $0x3b8] sm:$0xff] %v405_v55 }
  0x8f   : > { %408 = vst [vmem:[%s4048_s8 + $0x3c0] sm:$0xff] %v407_v56 }
  0x90   : > { %410 = vst [vmem:[%s4048_s8 + $0x3c8] sm:$0xff] %v409_v57 }
  0x91   : > { %412 = vst [vmem:[%s4048_s8 + $0x3d0] sm:$0xff] %v411_v58 }
  0x92   : > { %414 = vst [vmem:[%s4048_s8 + $0x3d8] sm:$0xff] %v413_v59 }
  0x93   : > { %416 = vst [vmem:[%s4048_s8 + $0x3e0] sm:$0xff] %v415_v60 }
  0x94   : > { %418 = vst [vmem:[%s4048_s8 + $0x3e8] sm:$0xff] %v417_v61 }
  0x95   : > { %420 = vst [vmem:[%s4048_s8 + $0x3f0] sm:$0xff] %v419_v62 }
  0x96   : > { %422 = vst [vmem:[%s4048_s8 + $0x3f8] sm:$0xff] %v421_v63 }
  0x97 PF: > { %p2846_p7 = scmp.ge.s32.totalorder %s3960_s18, 1  ;;  %p427_p8 = scmp.lt.s32.totalorder %s3960_s18, 5 }
  0x99   : > { %p428_p9 = pnand %p2846_p7, %p427_p8 }
  0x9a   : > { %s434_s9 = sand.u32 (!%p428_p9), 1, %s3936_s12   ;;  %s2848_s10 = sshll.u32 (!%p428_p9), %s3948_s15, 6 }
  0x9b   : > { %431 = sbr.rel (%p428_p9) target bundleno = 957 (0x3bd), region = 51  ;;  %s2847_s11 = sshll.u32 (!%p428_p9), %s434_s9, 10 }
  0x9c   : > { %p460_p10 = scmp.lt.s32.totalorder (!%p428_p9), %s2848_s10, 127  ;;  %s4312_s26 = scalar_lea.vmem (!%p428_p9), [#allocation3], %s2847_s11 }
  0x9d   : > { %p2850_p11 = scmp.ne.s32.totalorder (!%p428_p9), %s3944_s14, 0 }
  0xa0   : > { %s4813_s10 = smov (!%p460_p10, %s2848_s10), 127  ;;  %468 = sbr.rel (%p2850_p11) target bundleno = 230 (0xe6), region = 59 }
  0xa1   : > { %s2849_s21 = sshll.u32 %s4813_s10, 2 }
  0xa2   : > { %s4310_s24 = scalar_lea.vmem %s4799_s3, %s2849_s21 }
  0xa5   : > { %v3962_v0 = vmov 0.0  }
  0xa6   : > { %469 = vst [vmem:[#allocation2 + $0xb0] sm:$0xff] %v3962_v0 }
  0xa7   : > { %470 = vst [vmem:[#allocation2 + $0x1b0] sm:$0xff] %v3962_v0 }
  0xa8   : > { %471 = vst [vmem:[#allocation2 + $0xd8] sm:$0xff] %v3962_v0 }
  0xa9   : > { %472 = vst [vmem:[#allocation2 + $0x18] sm:$0xff] %v3962_v0 }
  0xaa   : > { %473 = vst [vmem:[#allocation2 + $0x50] sm:$0xff] %v3962_v0 }
  0xab   : > { %474 = vst [vmem:[#allocation2 + $0x168] sm:$0xff] %v3962_v0 }
  0xac   : > { %475 = vst [vmem:[#allocation2 + $0x130] sm:$0xff] %v3962_v0 }
  0xad   : > { %476 = vst [vmem:[#allocation2 + $0x48] sm:$0xff] %v3962_v0 }
  0xae   : > { %477 = vst [vmem:[#allocation2 + $0x180] sm:$0xff] %v3962_v0 }
  0xaf   : > { %478 = vst [vmem:[#allocation2 + $0x110] sm:$0xff] %v3962_v0 }
  0xb0   : > { %479 = vst [vmem:[#allocation2 + $0x118] sm:$0xff] %v3962_v0 }
  0xb1   : > { %480 = vst [vmem:[#allocation2 + $0x98] sm:$0xff] %v3962_v0 }
  0xb2   : > { %481 = vst [vmem:[#allocation2 + $0x120] sm:$0xff] %v3962_v0 }
  0xb3   : > { %482 = vst [vmem:[#allocation2 + $0x150] sm:$0xff] %v3962_v0 }
  0xb4   : > { %483 = vst [vmem:[#allocation2 + $0x108] sm:$0xff] %v3962_v0 }
  0xb5   : > { %484 = vst [vmem:[#allocation2 + $0x60] sm:$0xff] %v3962_v0 }
  0xb6   : > { %485 = vst [vmem:[#allocation2 + $0xe0] sm:$0xff] %v3962_v0 }
  0xb7   : > { %486 = vst [vmem:[#allocation2 + $0x188] sm:$0xff] %v3962_v0 }
  0xb8   : > { %487 = vst [vmem:[#allocation2 + $0x138] sm:$0xff] %v3962_v0 }
  0xb9   : > { %488 = vst [vmem:[#allocation2 + $0x140] sm:$0xff] %v3962_v0 }
  0xba   : > { %489 = vst [vmem:[#allocation2 + $0x80] sm:$0xff] %v3962_v0 }
  0xbb   : > { %490 = vst [vmem:[#allocation2 + $0x1a8] sm:$0xff] %v3962_v0 }
  0xbc   : > { %491 = vst [vmem:[#allocation2 + $0x1b8] sm:$0xff] %v3962_v0 }
  0xbd   : > { %492 = vst [vmem:[#allocation2 + $0x28] sm:$0xff] %v3962_v0 }
  0xbe   : > { %493 = vst [vmem:[#allocation2 + $0x1e8] sm:$0xff] %v3962_v0 }
  0xbf   : > { %494 = vst [vmem:[#allocation2 + $0xf8] sm:$0xff] %v3962_v0 }
  0xc0   : > { %495 = vst [vmem:[#allocation2 + $0x160] sm:$0xff] %v3962_v0 }
  0xc1   : > { %496 = vst [vmem:[#allocation2 + $0x30] sm:$0xff] %v3962_v0 }
  0xc2   : > { %497 = vst [vmem:[#allocation2 + $0x1e0] sm:$0xff] %v3962_v0 }
  0xc3   : > { %498 = vst [vmem:[#allocation2] sm:$0xff] %v3962_v0 }
  0xc4   : > { %499 = vst [vmem:[#allocation2 + $0xf0] sm:$0xff] %v3962_v0 }
  0xc5   : > { %500 = vst [vmem:[#allocation2 + $0x8] sm:$0xff] %v3962_v0 }
  0xc6   : > { %501 = vst [vmem:[#allocation2 + $0x148] sm:$0xff] %v3962_v0 }
  0xc7   : > { %502 = vst [vmem:[#allocation2 + $0x1d0] sm:$0xff] %v3962_v0 }
  0xc8   : > { %503 = vst [vmem:[#allocation2 + $0x100] sm:$0xff] %v3962_v0 }
  0xc9   : > { %504 = vst [vmem:[#allocation2 + $0xc8] sm:$0xff] %v3962_v0 }
  0xca   : > { %505 = vst [vmem:[#allocation2 + $0x40] sm:$0xff] %v3962_v0 }
  0xcb   : > { %506 = vst [vmem:[#allocation2 + $0x1f8] sm:$0xff] %v3962_v0 }
  0xcc   : > { %507 = vst [vmem:[#allocation2 + $0x20] sm:$0xff] %v3962_v0 }
  0xcd   : > { %508 = vst [vmem:[#allocation2 + $0x128] sm:$0xff] %v3962_v0 }
  0xce   : > { %509 = vst [vmem:[#allocation2 + $0x1a0] sm:$0xff] %v3962_v0 }
  0xcf   : > { %510 = vst [vmem:[#allocation2 + $0x1f0] sm:$0xff] %v3962_v0 }
  0xd0   : > { %511 = vst [vmem:[#allocation2 + $0xe8] sm:$0xff] %v3962_v0 }
  0xd1   : > { %512 = vst [vmem:[#allocation2 + $0x78] sm:$0xff] %v3962_v0 }
  0xd2   : > { %513 = vst [vmem:[#allocation2 + $0x70] sm:$0xff] %v3962_v0 }
  0xd3   : > { %514 = vst [vmem:[#allocation2 + $0x90] sm:$0xff] %v3962_v0 }
  0xd4   : > { %515 = vst [vmem:[#allocation2 + $0x1d8] sm:$0xff] %v3962_v0 }
  0xd5   : > { %516 = vst [vmem:[#allocation2 + $0xd0] sm:$0xff] %v3962_v0 }
  0xd6   : > { %517 = vst [vmem:[#allocation2 + $0xb8] sm:$0xff] %v3962_v0 }
  0xd7   : > { %518 = vst [vmem:[#allocation2 + $0x88] sm:$0xff] %v3962_v0 }
  0xd8   : > { %519 = vst [vmem:[#allocation2 + $0xa8] sm:$0xff] %v3962_v0 }
  0xd9   : > { %520 = vst [vmem:[#allocation2 + $0x1c8] sm:$0xff] %v3962_v0 }
  0xda   : > { %521 = vst [vmem:[#allocation2 + $0x170] sm:$0xff] %v3962_v0 }
  0xdb   : > { %522 = vst [vmem:[#allocation2 + $0x178] sm:$0xff] %v3962_v0 }
  0xdc   : > { %523 = vst [vmem:[#allocation2 + $0x68] sm:$0xff] %v3962_v0 }
  0xdd   : > { %524 = vst [vmem:[#allocation2 + $0x190] sm:$0xff] %v3962_v0 }
  0xde   : > { %525 = vst [vmem:[#allocation2 + $0x198] sm:$0xff] %v3962_v0 }
  0xdf   : > { %526 = vst [vmem:[#allocation2 + $0x38] sm:$0xff] %v3962_v0 }
  0xe0   : > { %527 = vst [vmem:[#allocation2 + $0xc0] sm:$0xff] %v3962_v0 }
  0xe1   : > { %528 = vst [vmem:[#allocation2 + $0x1c0] sm:$0xff] %v3962_v0 }
  0xe2   : > { %529 = vst [vmem:[#allocation2 + $0x158] sm:$0xff] %v3962_v0 }
  0xe3   : > { %530 = vst [vmem:[#allocation2 + $0x10] sm:$0xff] %v3962_v0 }
  0xe4   : > { %531 = vst [vmem:[#allocation2 + $0x58] sm:$0xff] %v3962_v0 }
  0xe5   : > { %532 = vst [vmem:[#allocation2 + $0xa0] sm:$0xff] %v3962_v0 }
  0xe6 PF: > { %s2851_s12 = sshll.u32 %s3944_s14, 9  ;;  %v2855_v29 = vld [vmem:[%s4312_s26] sm:$0xf]  ;;  %v3531_v30 = vld [vmem:[%s4312_s26 + $0xc] sm:$0xf0]  ;;  %p3493_p12 = scmp.ne.s32.totalorder %s3944_s14, 1 }
  0xe7   : > { %s534_s15 = sshra.s32 %s2851_s12, 3  ;;  %v3529_v31 = vld [vmem:[%s4312_s26 + $0x4] sm:$0xf]  ;;  %v2857_v36 = vld [vmem:[%s4312_s26 + $0x10] sm:$0xf0]  ;;  %v2856_v41 = vor.u32 %v3531_v30, %v2855_v29 }
  0xe8   : > { %s2852_s27 = sshll.u32 %s534_s15, 2  ;;  %v2863_v37 = vld [vmem:[%s4312_s26 + $0x8] sm:$0xf]  ;;  %v3532_v38 = vld [vmem:[%s4312_s26 + $0x14] sm:$0xf0]  ;;  %v2860_v42 = vor.u32 %v3529_v31, %v2857_v36 }
  0xe9   : > { %s4383_s30 = scalar_lea.vmem %s4797_s1, %s2852_s27  ;;  %v3530_v39 = vld [vmem:[%s4312_s26 + $0xc] sm:$0xf]  ;;  %v2865_v40 = vld [vmem:[%s4312_s26 + $0x18] sm:$0xf0]  ;;  %v2864_v43 = vor.u32 %v3532_v38, %v2863_v37  ;;  %v2871_v45 = vld [vmem:[%s4312_s26 + $0x20] sm:$0xf] }
  0xea   : > { %v3504_v1 = vld [vmem:[%s4383_s30 + $0x38] sm:$0xff]  ;;  %v3503_v5 = vld [vmem:[%s4383_s30 + $0x30] sm:$0xff]  ;;  %v3502_v9 = vld [vmem:[%s4383_s30 + $0x28] sm:$0xff]  ;;  %v2868_v44 = vor.u32 %v3530_v39, %v2865_v40 }
  0xeb   : > { %v3512_v2 = vld [vmem:[%s4383_s30 + $0x78] sm:$0xff]  ;;  %1626 = vmatpush.bf16.msra.mxu0 %v3504_v1  ;;  %v3511_v6 = vld [vmem:[%s4383_s30 + $0x70] sm:$0xff]  ;;  %v3510_v10 = vld [vmem:[%s4383_s30 + $0x68] sm:$0xff] }
  0xec   : > { %v3520_v3 = vld [vmem:[%s4383_s30 + $0xb8] sm:$0xff]  ;;  %1795 = vmatpush.bf16.msra.mxu1 %v3512_v2  ;;  %v3519_v7 = vld [vmem:[%s4383_s30 + $0xb0] sm:$0xff]  ;;  %v3518_v11 = vld [vmem:[%s4383_s30 + $0xa8] sm:$0xff] }
  0xed   : > { %v3528_v4 = vld [vmem:[%s4383_s30 + $0xf8] sm:$0xff]  ;;  %1964 = vmatpush.bf16.msra.mxu2 %v3520_v3  ;;  %v3527_v8 = vld [vmem:[%s4383_s30 + $0xf0] sm:$0xff]  ;;  %v3526_v12 = vld [vmem:[%s4383_s30 + $0xe8] sm:$0xff] }
  0xee   : > { %2133 = vmatpush.bf16.msra.mxu3 %v3528_v4  ;;  %v3501_v13 = vld [vmem:[%s4383_s30 + $0x20] sm:$0xff]  ;;  %v3500_v17 = vld [vmem:[%s4383_s30 + $0x18] sm:$0xff]  ;;  %v3499_v21 = vld [vmem:[%s4383_s30 + $0x10] sm:$0xff] }
  0xef   : > { %1627 = vmatpush.bf16.msra.mxu0 %v3503_v5  ;;  %v3509_v14 = vld [vmem:[%s4383_s30 + $0x60] sm:$0xff]  ;;  %v3508_v18 = vld [vmem:[%s4383_s30 + $0x58] sm:$0xff]  ;;  %v3507_v22 = vld [vmem:[%s4383_s30 + $0x50] sm:$0xff] }
  0xf0   : > { %1796 = vmatpush.bf16.msra.mxu1 %v3511_v6  ;;  %v3517_v15 = vld [vmem:[%s4383_s30 + $0xa0] sm:$0xff]  ;;  %v3516_v19 = vld [vmem:[%s4383_s30 + $0x98] sm:$0xff]  ;;  %v3515_v23 = vld [vmem:[%s4383_s30 + $0x90] sm:$0xff] }
  0xf1   : > { %1965 = vmatpush.bf16.msra.mxu2 %v3519_v7  ;;  %v3525_v16 = vld [vmem:[%s4383_s30 + $0xe0] sm:$0xff]  ;;  %v3524_v20 = vld [vmem:[%s4383_s30 + $0xd8] sm:$0xff]  ;;  %v3523_v24 = vld [vmem:[%s4383_s30 + $0xd0] sm:$0xff] }
  0xf2   : > { %2134 = vmatpush.bf16.msra.mxu3 %v3527_v8  ;;  %v3498_v25 = vld [vmem:[%s4383_s30 + $0x8] sm:$0xff]  ;;  %v3497_v32 = vld [vmem:[%s4383_s30] sm:$0xff]  ;;  %v3535_v46 = vld [vmem:[%s4312_s26 + $0x2c] sm:$0xf0] }
  0xf3   : > { %1628 = vmatpush.bf16.msra.mxu0 %v3502_v9  ;;  %v3506_v26 = vld [vmem:[%s4383_s30 + $0x48] sm:$0xff]  ;;  %v3505_v33 = vld [vmem:[%s4383_s30 + $0x40] sm:$0xff]  ;;  %v2873_v48 = vld [vmem:[%s4312_s26 + $0x30] sm:$0xf0]  ;;  %v2872_v53 = vor.u32 %v3535_v46, %v2871_v45 }
  0xf4   : > { %1797 = vmatpush.bf16.msra.mxu1 %v3510_v10  ;;  %v3514_v27 = vld [vmem:[%s4383_s30 + $0x88] sm:$0xff]  ;;  %v3513_v34 = vld [vmem:[%s4383_s30 + $0x80] sm:$0xff]  ;;  %v3536_v50 = vld [vmem:[%s4312_s26 + $0x34] sm:$0xf0] }
  0xf5   : > { %1966 = vmatpush.bf16.msra.mxu2 %v3518_v11  ;;  %v3522_v28 = vld [vmem:[%s4383_s30 + $0xc8] sm:$0xff]  ;;  %v3521_v35 = vld [vmem:[%s4383_s30 + $0xc0] sm:$0xff]  ;;  %v2881_v52 = vld [vmem:[%s4312_s26 + $0x38] sm:$0xf0] }
  0xf6   : > { %2135 = vmatpush.bf16.msra.mxu3 %v3526_v12  ;;  %v3533_v47 = vld [vmem:[%s4312_s26 + $0x24] sm:$0xf]  ;;  %v2879_v49 = vld [vmem:[%s4312_s26 + $0x28] sm:$0xf]  ;;  %v3534_v51 = vld [vmem:[%s4312_s26 + $0x2c] sm:$0xf] }
  0xf7   : > { %1629 = vmatpush.bf16.msra.mxu0 %v3501_v13  ;;  %v2876_v54 = vor.u32 %v3533_v47, %v2873_v48  ;;  %v2880_v55 = vor.u32 %v3536_v50, %v2879_v49  ;;  %v2884_v56 = vor.u32 %v3534_v51, %v2881_v52  ;;  %v2887_v57 = vld [vmem:[%s4312_s26 + $0x40] sm:$0xf]  ;;  %v3539_v58 = vld [vmem:[%s4312_s26 + $0x4c] sm:$0xf0]  ;;  %v3537_v59 = vld [vmem:[%s4312_s26 + $0x44] sm:$0xf] }
  0xf8   : > { %1798 = vmatpush.bf16.msra.mxu1 %v3509_v14  ;;  %v2889_v60 = vld [vmem:[%s4312_s26 + $0x50] sm:$0xf0]  ;;  %v2895_v61 = vld [vmem:[%s4312_s26 + $0x48] sm:$0xf]  ;;  %v3540_v62 = vld [vmem:[%s4312_s26 + $0x54] sm:$0xf0]  ;;  %v2888_v1 = vor.u32 %v3539_v58, %v2887_v57 }
  0xf9   : > { %1967 = vmatpush.bf16.msra.mxu2 %v3517_v15  ;;  %v3538_v63 = vld [vmem:[%s4312_s26 + $0x4c] sm:$0xf]  ;;  %v2897_v0 = vld [vmem:[%s4312_s26 + $0x58] sm:$0xf0]  ;;  %v2892_v2 = vor.u32 %v3537_v59, %v2889_v60  ;;  %v2896_v3 = vor.u32 %v3540_v62, %v2895_v61  ;;  %v2903_v5 = vld [vmem:[%s4312_s26 + $0x60] sm:$0xf] }
  0xfa   : > { %2136 = vmatpush.bf16.msra.mxu3 %v3525_v16  ;;  %v2900_v4 = vor.u32 %v3538_v63, %v2897_v0  ;;  %v3543_v6 = vld [vmem:[%s4312_s26 + $0x6c] sm:$0xf0]  ;;  %v3541_v7 = vld [vmem:[%s4312_s26 + $0x64] sm:$0xf]  ;;  %v2905_v8 = vld [vmem:[%s4312_s26 + $0x70] sm:$0xf0] }
  0xfb   : > { %1630 = vmatpush.bf16.msra.mxu0 %v3500_v17  ;;  %v2911_v9 = vld [vmem:[%s4312_s26 + $0x68] sm:$0xf]  ;;  %v3544_v10 = vld [vmem:[%s4312_s26 + $0x74] sm:$0xf0]  ;;  %v3542_v11 = vld [vmem:[%s4312_s26 + $0x6c] sm:$0xf]  ;;  %v2904_v13 = vor.u32 %v3543_v6, %v2903_v5  ;;  %v2908_v14 = vor.u32 %v3541_v7, %v2905_v8 }
  0xfc   : > { %1799 = vmatpush.bf16.msra.mxu1 %v3508_v18  ;;  %v2913_v12 = vld [vmem:[%s4312_s26 + $0x78] sm:$0xf0]  ;;  %v2912_v15 = vor.u32 %v3544_v10, %v2911_v9  ;;  %v2919_v17 = vld [vmem:[%s4312_s26 + $0x80] sm:$0xf]  ;;  %v3547_v18 = vld [vmem:[%s4312_s26 + $0x8c] sm:$0xf0] }
  0xfd   : > { %1968 = vmatpush.bf16.msra.mxu2 %v3516_v19  ;;  %v2916_v16 = vor.u32 %v3542_v11, %v2913_v12  ;;  %v3545_v19 = vld [vmem:[%s4312_s26 + $0x84] sm:$0xf]  ;;  %v2935_v29 = vld [vmem:[%s4312_s26 + $0xa0] sm:$0xf]  ;;  %v3551_v30 = vld [vmem:[%s4312_s26 + $0xac] sm:$0xf0] }
  0xfe   : > { %2137 = vmatpush.bf16.msra.mxu3 %v3524_v20  ;;  %v2921_v20 = vld [vmem:[%s4312_s26 + $0x90] sm:$0xf0]  ;;  %v3549_v31 = vld [vmem:[%s4312_s26 + $0xa4] sm:$0xf]  ;;  %v2945_v36 = vld [vmem:[%s4312_s26 + $0xb8] sm:$0xf0]  ;;  %v2936_v37 = vor.u32 %v3551_v30, %v2935_v29 }
  0xff   : > { %1631 = vmatpush.bf16.msra.mxu0 %v3499_v21  ;;  %v2927_v21 = vld [vmem:[%s4312_s26 + $0x88] sm:$0xf]  ;;  %v3556_v46 = vld [vmem:[%s4312_s26 + $0xd4] sm:$0xf0]  ;;  %v3554_v47 = vld [vmem:[%s4312_s26 + $0xcc] sm:$0xf] }
 0x100   : > { %1800 = vmatpush.bf16.msra.mxu1 %v3507_v22  ;;  %v3548_v22 = vld [vmem:[%s4312_s26 + $0x94] sm:$0xf0]  ;;  %v2959_v45 = vld [vmem:[%s4312_s26 + $0xc8] sm:$0xf]  ;;  %v2961_v48 = vld [vmem:[%s4312_s26 + $0xd8] sm:$0xf0] }
 0x101   : > { %1969 = vmatpush.bf16.msra.mxu2 %v3515_v23  ;;  %v3546_v23 = vld [vmem:[%s4312_s26 + $0x8c] sm:$0xf]  ;;  %v2960_v51 = vor.u32 %v3556_v46, %v2959_v45  ;;  %v2964_v52 = vor.u32 %v3554_v47, %v2961_v48  ;;  %v2975_v57 = vld [vmem:[%s4312_s26 + $0xe8] sm:$0xf]  ;;  %v3560_v58 = vld [vmem:[%s4312_s26 + $0xf4] sm:$0xf0] }
 0x102   : > { %2138 = vmatpush.bf16.msra.mxu3 %v3523_v24  ;;  %v2929_v24 = vld [vmem:[%s4312_s26 + $0x98] sm:$0xf0]  ;;  %v3558_v59 = vld [vmem:[%s4312_s26 + $0xec] sm:$0xf]  ;;  %v2976_v63 = vor.u32 %v3560_v58, %v2975_v57  ;;  %v2991_v5 = vld [vmem:[%s4312_s26 + $0x108] sm:$0xf] }
 0x103   : > { %1632 = vmatpush.bf16.msra.mxu0 %v3498_v25  ;;  %v2920_v25 = vor.u32 %v3547_v18, %v2919_v17  ;;  %v2977_v60 = vld [vmem:[%s4312_s26 + $0xf8] sm:$0xf0]  ;;  %v3564_v6 = vld [vmem:[%s4312_s26 + $0x114] sm:$0xf0]  ;;  %v3562_v7 = vld [vmem:[%s4312_s26 + $0x10c] sm:$0xf] }
 0x104   : > { %1801 = vmatpush.bf16.msra.mxu1 %v3506_v26  ;;  %v2924_v26 = vor.u32 %v3545_v19, %v2921_v20  ;;  %v2980_v0 = vor.u32 %v3558_v59, %v2977_v60  ;;  %v2993_v8 = vld [vmem:[%s4312_s26 + $0x118] sm:$0xf0]  ;;  %v3568_v29 = vld [vmem:[%s4312_s26 + $0x134] sm:$0xf0]  ;;  %v3566_v30 = vld [vmem:[%s4312_s26 + $0x12c] sm:$0xf] }
 0x105   : > { %1970 = vmatpush.bf16.msra.mxu2 %v3514_v27  ;;  %v2928_v27 = vor.u32 %v3548_v22, %v2927_v21  ;;  %v602_v21 = vld [vmem:[#allocation2 + $0xb0] sm:$0xff]  ;;  %v3023_v58 = vld [vmem:[%s4312_s26 + $0x148] sm:$0xf]  ;;  %v3572_v59 = vld [vmem:[%s4312_s26 + $0x154] sm:$0xf0] }
 0x106   : > { %2139 = vmatpush.bf16.msra.mxu3 %v3522_v28  ;;  %v2932_v28 = vor.u32 %v3546_v23, %v2929_v24  ;;  %v2999_v23 = vld [vmem:[%s4312_s26 + $0x120] sm:$0xf]  ;;  %v3567_v24 = vld [vmem:[%s4312_s26 + $0x12c] sm:$0xf0]  ;;  %v3017_v57 = vld [vmem:[%s4312_s26 + $0x150] sm:$0xf0] }
 0x107   : > { %1633 = vmatpush.bf16.msra.mxu0 %v3497_v32  ;;  %v2937_v32 = vld [vmem:[%s4312_s26 + $0xb0] sm:$0xf0]  ;;  %v3570_v60 = vld [vmem:[%s4312_s26 + $0x14c] sm:$0xf] }
 0x108   : > { %1802 = vmatpush.bf16.msra.mxu1 %v3505_v33  ;;  %v2943_v33 = vld [vmem:[%s4312_s26 + $0xa8] sm:$0xf]  ;;  %v2940_v38 = vor.u32 %v3549_v31, %v2937_v32  ;;  %v3009_v31 = vld [vmem:[%s4312_s26 + $0x138] sm:$0xf0] }
 0x109   : > { %1971 = vmatpush.bf16.msra.mxu2 %v3513_v34  ;;  %v3552_v34 = vld [vmem:[%s4312_s26 + $0xb4] sm:$0xf0] }
 0x10a   : > { %2140 = vmatpush.bf16.msra.mxu3 %v3521_v35  ;;  %1634 = vmatmul.bf16.vlgmr.msra.gmra.mxu0 %v2856_v41  ;;  %v3550_v35 = vld [vmem:[%s4312_s26 + $0xac] sm:$0xf]  ;;  %v2944_v39 = vor.u32 %v3552_v34, %v2943_v33  ;;  %v2951_v41 = vld [vmem:[%s4312_s26 + $0xc0] sm:$0xf] }
 0x10b   : > { %1803 = vmatmul.bf16.vlgmr.msra.gmra.mxu1 %v2860_v42  ;;  %v2948_v40 = vor.u32 %v3550_v35, %v2945_v36  ;;  %v3555_v42 = vld [vmem:[%s4312_s26 + $0xcc] sm:$0xf0]  ;;  %v3000_v35 = vor.u32 %v3567_v24, %v2999_v23  ;;  %v3033_v23 = vld [vmem:[%s4312_s26 + $0x170] sm:$0xf0]  ;;  %v3039_v24 = vld [vmem:[%s4312_s26 + $0x168] sm:$0xf] }
 0x10c   : > { %1972 = vmatmul.bf16.vlgmr.msra.gmra.mxu2 %v2864_v43  ;;  %v3553_v43 = vld [vmem:[%s4312_s26 + $0xc4] sm:$0xf]  ;;  %v2952_v49 = vor.u32 %v3555_v42, %v2951_v41  ;;  %v3012_v41 = vor.u32 %v3566_v30, %v3009_v31  ;;  %v603_v42 = vld [vmem:[#allocation2 + $0x1b0] sm:$0xff] }
 0x10d   : > { %2141 = vmatmul.bf16.vlgmr.msra.gmra.mxu3 %v2868_v44  ;;  %v2953_v44 = vld [vmem:[%s4312_s26 + $0xd0] sm:$0xf0] }
 0x10e   : > { %v2956_v50 = vor.u32 %v3553_v43, %v2953_v44 }
 0x11a   : > { %1639 = vmatmul.bf16.gmra.mxu0 %v2872_v53  ;;  %v2967_v53 = vld [vmem:[%s4312_s26 + $0xe0] sm:$0xf] }
 0x11b   : > { %1808 = vmatmul.bf16.gmra.mxu1 %v2876_v54  ;;  %v3559_v54 = vld [vmem:[%s4312_s26 + $0xec] sm:$0xf0] }
 0x11c   : > { %1977 = vmatmul.bf16.gmra.mxu2 %v2880_v55  ;;  %v3557_v55 = vld [vmem:[%s4312_s26 + $0xe4] sm:$0xf]  ;;  %v2968_v61 = vor.u32 %v3559_v54, %v2967_v53  ;;  %v3015_v53 = vld [vmem:[%s4312_s26 + $0x140] sm:$0xf]  ;;  %v3571_v54 = vld [vmem:[%s4312_s26 + $0x14c] sm:$0xf0] }
 0x11d   : > { %2146 = vmatmul.bf16.gmra.mxu3 %v2884_v56  ;;  %v2969_v56 = vld [vmem:[%s4312_s26 + $0xf0] sm:$0xf0] }
 0x11e   : > { %v2972_v62 = vor.u32 %v3557_v55, %v2969_v56  ;;  %v3569_v56 = vld [vmem:[%s4312_s26 + $0x144] sm:$0xf] }
 0x12a   : > { %1644 = vmatmul.bf16.gmra.mxu0 %v2888_v1  ;;  %v2983_v1 = vld [vmem:[%s4312_s26 + $0x100] sm:$0xf] }
 0x12b   : > { %1813 = vmatmul.bf16.gmra.mxu1 %v2892_v2  ;;  %v3563_v2 = vld [vmem:[%s4312_s26 + $0x10c] sm:$0xf0] }
 0x12c   : > { %1982 = vmatmul.bf16.gmra.mxu2 %v2896_v3  ;;  %v3561_v3 = vld [vmem:[%s4312_s26 + $0x104] sm:$0xf]  ;;  %v2984_v9 = vor.u32 %v3563_v2, %v2983_v1  ;;  %v3016_v1 = vor.u32 %v3571_v54, %v3015_v53  ;;  %v3020_v2 = vor.u32 %v3569_v56, %v3017_v57  ;;  %v3049_v53 = vld [vmem:[%s4312_s26 + $0x190] sm:$0xf0]  ;;  %v3055_v54 = vld [vmem:[%s4312_s26 + $0x188] sm:$0xf] }
 0x12d   : > { %2151 = vmatmul.bf16.gmra.mxu3 %v2900_v4  ;;  %v2985_v4 = vld [vmem:[%s4312_s26 + $0x110] sm:$0xf0]  ;;  %v3578_v56 = vld [vmem:[%s4312_s26 + $0x18c] sm:$0xf]  ;;  %v3057_v57 = vld [vmem:[%s4312_s26 + $0x198] sm:$0xf0] }
 0x12e   : > { %v2988_v10 = vor.u32 %v3561_v3, %v2985_v4 }
 0x13a   : > { %1649 = vmatmul.bf16.gmra.mxu0 %v2904_v13  ;;  %v2992_v13 = vor.u32 %v3564_v6, %v2991_v5  ;;  %v3024_v6 = vor.u32 %v3572_v59, %v3023_v58 }
 0x13b   : > { %1818 = vmatmul.bf16.gmra.mxu1 %v2908_v14  ;;  %v2996_v14 = vor.u32 %v3562_v7, %v2993_v8  ;;  %v605_v8 = vld [vmem:[#allocation2 + $0x18] sm:$0xff] }
 0x13c   : > { %1987 = vmatmul.bf16.gmra.mxu2 %v2912_v15 }
 0x13d   : > { %2156 = vmatmul.bf16.gmra.mxu3 %v2916_v16 }
 0x14a   : > { %1654 = vmatmul.bf16.gmra.mxu0 %v2920_v25 }
 0x14b   : > { %1823 = vmatmul.bf16.gmra.mxu1 %v2924_v26  ;;  %v3565_v26 = vld [vmem:[%s4312_s26 + $0x124] sm:$0xf] }
 0x14c   : > { %1992 = vmatmul.bf16.gmra.mxu2 %v2928_v27  ;;  %v3001_v27 = vld [vmem:[%s4312_s26 + $0x130] sm:$0xf0] }
 0x14d   : > { %2161 = vmatmul.bf16.gmra.mxu3 %v2932_v28  ;;  %v3007_v28 = vld [vmem:[%s4312_s26 + $0x128] sm:$0xf]  ;;  %v3004_v36 = vor.u32 %v3565_v26, %v3001_v27  ;;  %v3574_v26 = vld [vmem:[%s4312_s26 + $0x16c] sm:$0xf]  ;;  %v3041_v27 = vld [vmem:[%s4312_s26 + $0x178] sm:$0xf0] }
 0x15a   : > { %1659 = vmatmul.bf16.gmra.mxu0 %v2936_v37 }
 0x15b   : > { %1828 = vmatmul.bf16.gmra.mxu1 %v2940_v38 }
 0x15c   : > { %1997 = vmatmul.bf16.gmra.mxu2 %v2944_v39 }
 0x15d   : > { %2166 = vmatmul.bf16.gmra.mxu3 %v2948_v40  ;;  %v3008_v40 = vor.u32 %v3568_v29, %v3007_v28 }
 0x16a   : > { %1664 = vmatmul.bf16.gmra.mxu0 %v2952_v49 }
 0x16b   : > { %1833 = vmatmul.bf16.gmra.mxu1 %v2956_v50 }
 0x16c   : > { %2002 = vmatmul.bf16.gmra.mxu2 %v2960_v51  ;;  %v604_v51 = vld [vmem:[#allocation2 + $0xd8] sm:$0xff] }
 0x16d   : > { %2171 = vmatmul.bf16.gmra.mxu3 %v2964_v52 }
 0x17a   : > { %1669 = vmatmul.bf16.gmra.mxu0 %v2968_v61  ;;  %v3025_v61 = vld [vmem:[%s4312_s26 + $0x158] sm:$0xf0] }
 0x17b   : > { %1838 = vmatmul.bf16.gmra.mxu1 %v2972_v62  ;;  %v3028_v7 = vor.u32 %v3570_v60, %v3025_v61 }
 0x17c   : > { %2007 = vmatmul.bf16.gmra.mxu2 %v2976_v63 }
 0x17d   : > { %2176 = vmatmul.bf16.gmra.mxu3 %v2980_v0 }
 0x187   : > { %v1635_v11 = vpop.f32.mrf.mxu0 }
 0x188   : > { %v1804_v12 = vpop.f32.mrf.mxu1 }
 0x189   : > { %v1805_v15 = vadd.f32 %v1804_v12, %v1635_v11 }
 0x18a   : > { %1674 = vmatmul.bf16.gmra.mxu0 %v2984_v9 }
 0x18b   : > { %1843 = vmatmul.bf16.gmra.mxu1 %v2988_v10 }
 0x18c   : > { %2012 = vmatmul.bf16.gmra.mxu2 %v2992_v13 }
 0x18d   : > { %2181 = vmatmul.bf16.gmra.mxu3 %v2996_v14 }
 0x18f   : > { %v1973_v16 = vpop.f32.mrf.mxu2  ;;  %v1637_v19 = vpop.f32.mrf.mxu0 }
 0x190   : > { %v2142_v17 = vpop.f32.mrf.mxu3  ;;  %v1974_v18 = vadd.f32 %v1973_v16, %v1805_v15  ;;  %v1806_v20 = vpop.f32.mrf.mxu1 }
 0x191   : > { %v1807_v32 = vadd.f32 %v1806_v20, %v1637_v19  ;;  %v3031_v19 = vld [vmem:[%s4312_s26 + $0x160] sm:$0xf]  ;;  %v3575_v20 = vld [vmem:[%s4312_s26 + $0x16c] sm:$0xf0] }
 0x192   : > { %v2143_v22 = vadd.f32 %v2142_v17, %v1974_v18  ;;  %v606_v17 = vld [vmem:[#allocation2 + $0x50] sm:$0xff]  ;;  %v3032_v31 = vor.u32 %v3575_v20, %v3031_v19  ;;  %v3071_v20 = vld [vmem:[%s4312_s26 + $0x1a8] sm:$0xf] }
 0x193   : > { %v3065_v19 = vld [vmem:[%s4312_s26 + $0x1b0] sm:$0xf0] }
 0x194   : > { %v2302_v25 = vadd.f32 %v2143_v22, %v602_v21  ;;  %v3573_v22 = vld [vmem:[%s4312_s26 + $0x164] sm:$0xf] }
 0x196   : > { %2366 = vst [vmem:[#allocation2 + $0xb0] sm:$0xff] %v2302_v25  ;;  %v3576_v25 = vld [vmem:[%s4312_s26 + $0x174] sm:$0xf0] }
 0x197   : > { %v1975_v33 = vpop.f32.mrf.mxu2  ;;  %v1640_v38 = vpop.f32.mrf.mxu0 }
 0x198   : > { %v2144_v34 = vpop.f32.mrf.mxu3  ;;  %v1976_v37 = vadd.f32 %v1975_v33, %v1807_v32  ;;  %v1809_v39 = vpop.f32.mrf.mxu1  ;;  %v3036_v32 = vor.u32 %v3573_v22, %v3033_v23  ;;  %v3582_v22 = vld [vmem:[%s4312_s26 + $0x1ac] sm:$0xf]  ;;  %v3073_v23 = vld [vmem:[%s4312_s26 + $0x1b8] sm:$0xf0] }
 0x199   : > { %v1810_v45 = vadd.f32 %v1809_v39, %v1640_v38  ;;  %v607_v38 = vld [vmem:[#allocation2 + $0x168] sm:$0xff] }
 0x19a   : > { %v2145_v43 = vadd.f32 %v2144_v34, %v1976_v37  ;;  %1679 = vmatmul.bf16.gmra.mxu0 %v3000_v35  ;;  %v3044_v37 = vor.u32 %v3574_v26, %v3041_v27 }
 0x19b   : > { %1848 = vmatmul.bf16.gmra.mxu1 %v3004_v36  ;;  %v3040_v36 = vor.u32 %v3576_v25, %v3039_v24 }
 0x19c   : > { %v2303_v44 = vadd.f32 %v2145_v43, %v603_v42  ;;  %2017 = vmatmul.bf16.gmra.mxu2 %v3008_v40 }
 0x19d   : > { %2186 = vmatmul.bf16.gmra.mxu3 %v3012_v41 }
 0x19e   : > { %2367 = vst [vmem:[#allocation2 + $0x1b0] sm:$0xff] %v2303_v44 }
 0x19f   : > { %v1978_v46 = vpop.f32.mrf.mxu2  ;;  %v1642_v49 = vpop.f32.mrf.mxu0 }
 0x1a0   : > { %v2147_v47 = vpop.f32.mrf.mxu3  ;;  %v1979_v48 = vadd.f32 %v1978_v46, %v1810_v45  ;;  %v1811_v50 = vpop.f32.mrf.mxu1 }
 0x1a1   : > { %v1812_v62 = vadd.f32 %v1811_v50, %v1642_v49  ;;  %v3047_v49 = vld [vmem:[%s4312_s26 + $0x180] sm:$0xf]  ;;  %v3579_v50 = vld [vmem:[%s4312_s26 + $0x18c] sm:$0xf0] }
 0x1a2   : > { %v2148_v52 = vadd.f32 %v2147_v47, %v1979_v48  ;;  %v608_v47 = vld [vmem:[#allocation2 + $0x130] sm:$0xff]  ;;  %v3048_v61 = vor.u32 %v3579_v50, %v3047_v49  ;;  %v3087_v50 = vld [vmem:[%s4312_s26 + $0x1c8] sm:$0xf] }
 0x1a3   : > { %v3081_v49 = vld [vmem:[%s4312_s26 + $0x1d0] sm:$0xf0] }
 0x1a4   : > { %v2304_v55 = vadd.f32 %v2148_v52, %v604_v51  ;;  %v3577_v52 = vld [vmem:[%s4312_s26 + $0x184] sm:$0xf] }
 0x1a6   : > { %2368 = vst [vmem:[#allocation2 + $0xd8] sm:$0xff] %v2304_v55  ;;  %v3580_v55 = vld [vmem:[%s4312_s26 + $0x194] sm:$0xf0] }
 0x1a7   : > { %v1980_v63 = vpop.f32.mrf.mxu2  ;;  %v1645_v4 = vpop.f32.mrf.mxu0 }
 0x1a8   : > { %v2149_v0 = vpop.f32.mrf.mxu3  ;;  %v1981_v3 = vadd.f32 %v1980_v63, %v1812_v62  ;;  %v1814_v5 = vpop.f32.mrf.mxu1  ;;  %v3052_v62 = vor.u32 %v3577_v52, %v3049_v53  ;;  %v3586_v52 = vld [vmem:[%s4312_s26 + $0x1cc] sm:$0xf]  ;;  %v3089_v53 = vld [vmem:[%s4312_s26 + $0x1d8] sm:$0xf0] }
 0x1a9   : > { %v1815_v11 = vadd.f32 %v1814_v5, %v1645_v4  ;;  %v609_v4 = vld [vmem:[#allocation2 + $0x48] sm:$0xff] }
 0x1aa   : > { %v2150_v9 = vadd.f32 %v2149_v0, %v1981_v3  ;;  %1684 = vmatmul.bf16.gmra.mxu0 %v3016_v1  ;;  %v3060_v3 = vor.u32 %v3578_v56, %v3057_v57 }
 0x1ab   : > { %1853 = vmatmul.bf16.gmra.mxu1 %v3020_v2  ;;  %v3056_v2 = vor.u32 %v3580_v55, %v3055_v54 }
 0x1ac   : > { %v2305_v10 = vadd.f32 %v2150_v9, %v605_v8  ;;  %2022 = vmatmul.bf16.gmra.mxu2 %v3024_v6 }
 0x1ad   : > { %2191 = vmatmul.bf16.gmra.mxu3 %v3028_v7 }
 0x1ae   : > { %2369 = vst [vmem:[#allocation2 + $0x18] sm:$0xff] %v2305_v10 }
 0x1af   : > { %v1983_v12 = vpop.f32.mrf.mxu2  ;;  %v1647_v15 = vpop.f32.mrf.mxu0 }
 0x1b0   : > { %v2152_v13 = vpop.f32.mrf.mxu3  ;;  %v1984_v14 = vadd.f32 %v1983_v12, %v1815_v11  ;;  %v1816_v16 = vpop.f32.mrf.mxu1 }
 0x1b1   : > { %v1817_v28 = vadd.f32 %v1816_v16, %v1647_v15  ;;  %v3063_v15 = vld [vmem:[%s4312_s26 + $0x1a0] sm:$0xf]  ;;  %v3583_v16 = vld [vmem:[%s4312_s26 + $0x1ac] sm:$0xf0] }
 0x1b2   : > { %v2153_v18 = vadd.f32 %v2152_v13, %v1984_v14  ;;  %v610_v13 = vld [vmem:[#allocation2 + $0x180] sm:$0xff]  ;;  %v3064_v27 = vor.u32 %v3583_v16, %v3063_v15  ;;  %v3097_v15 = vld [vmem:[%s4312_s26 + $0x1f0] sm:$0xf0]  ;;  %v3103_v16 = vld [vmem:[%s4312_s26 + $0x1e8] sm:$0xf] }
 0x1b4   : > { %v2306_v21 = vadd.f32 %v2153_v18, %v606_v17  ;;  %v3581_v18 = vld [vmem:[%s4312_s26 + $0x1a4] sm:$0xf] }
 0x1b6   : > { %2370 = vst [vmem:[#allocation2 + $0x50] sm:$0xff] %v2306_v21  ;;  %v3584_v21 = vld [vmem:[%s4312_s26 + $0x1b4] sm:$0xf0] }
 0x1b7   : > { %v1985_v29 = vpop.f32.mrf.mxu2  ;;  %v1650_v34 = vpop.f32.mrf.mxu0 }
 0x1b8   : > { %v2154_v30 = vpop.f32.mrf.mxu3  ;;  %v1986_v33 = vadd.f32 %v1985_v29, %v1817_v28  ;;  %v1819_v35 = vpop.f32.mrf.mxu1  ;;  %v3068_v28 = vor.u32 %v3581_v18, %v3065_v19  ;;  %v3590_v18 = vld [vmem:[%s4312_s26 + $0x1ec] sm:$0xf]  ;;  %v3105_v19 = vld [vmem:[%s4312_s26 + $0x1f8] sm:$0xf0] }
 0x1b9   : > { %v1820_v41 = vadd.f32 %v1819_v35, %v1650_v34  ;;  %v611_v34 = vld [vmem:[#allocation2 + $0x110] sm:$0xff] }
 0x1ba   : > { %v2155_v39 = vadd.f32 %v2154_v30, %v1986_v33  ;;  %1689 = vmatmul.bf16.gmra.mxu0 %v3032_v31  ;;  %v3076_v33 = vor.u32 %v3582_v22, %v3073_v23 }
 0x1bb   : > { %1858 = vmatmul.bf16.gmra.mxu1 %v3036_v32  ;;  %v3072_v32 = vor.u32 %v3584_v21, %v3071_v20 }
 0x1bc   : > { %v2307_v40 = vadd.f32 %v2155_v39, %v607_v38  ;;  %2027 = vmatmul.bf16.gmra.mxu2 %v3040_v36 }
 0x1bd   : > { %2196 = vmatmul.bf16.gmra.mxu3 %v3044_v37 }
 0x1be   : > { %2371 = vst [vmem:[#allocation2 + $0x168] sm:$0xff] %v2307_v40 }
 0x1bf   : > { %v1988_v42 = vpop.f32.mrf.mxu2  ;;  %v1652_v45 = vpop.f32.mrf.mxu0 }
 0x1c0   : > { %v2157_v43 = vpop.f32.mrf.mxu3  ;;  %v1989_v44 = vadd.f32 %v1988_v42, %v1820_v41  ;;  %v1821_v46 = vpop.f32.mrf.mxu1 }
 0x1c1   : > { %v1822_v58 = vadd.f32 %v1821_v46, %v1652_v45  ;;  %v3079_v45 = vld [vmem:[%s4312_s26 + $0x1c0] sm:$0xf]  ;;  %v3587_v46 = vld [vmem:[%s4312_s26 + $0x1cc] sm:$0xf0] }
 0x1c2   : > { %v2158_v48 = vadd.f32 %v2157_v43, %v1989_v44  ;;  %v612_v43 = vld [vmem:[#allocation2 + $0x118] sm:$0xff]  ;;  %v3080_v57 = vor.u32 %v3587_v46, %v3079_v45  ;;  %v3113_v45 = vld [vmem:[%s4312_s26 + $0x210] sm:$0xf0]  ;;  %v3119_v46 = vld [vmem:[%s4312_s26 + $0x208] sm:$0xf] }
 0x1c4   : > { %v2308_v51 = vadd.f32 %v2158_v48, %v608_v47  ;;  %v3585_v48 = vld [vmem:[%s4312_s26 + $0x1c4] sm:$0xf] }
 0x1c6   : > { %2372 = vst [vmem:[#allocation2 + $0x130] sm:$0xff] %v2308_v51  ;;  %v3588_v51 = vld [vmem:[%s4312_s26 + $0x1d4] sm:$0xf0] }
 0x1c7   : > { %v1990_v59 = vpop.f32.mrf.mxu2  ;;  %v1655_v0 = vpop.f32.mrf.mxu0 }
 0x1c8   : > { %v2159_v60 = vpop.f32.mrf.mxu3  ;;  %v1991_v63 = vadd.f32 %v1990_v59, %v1822_v58  ;;  %v1824_v1 = vpop.f32.mrf.mxu1  ;;  %v3084_v58 = vor.u32 %v3585_v48, %v3081_v49  ;;  %v3594_v48 = vld [vmem:[%s4312_s26 + $0x20c] sm:$0xf]  ;;  %v3121_v49 = vld [vmem:[%s4312_s26 + $0x218] sm:$0xf0] }
 0x1c9   : > { %v1825_v7 = vadd.f32 %v1824_v1, %v1655_v0  ;;  %v613_v0 = vld [vmem:[#allocation2 + $0x98] sm:$0xff] }
 0x1ca   : > { %v2160_v5 = vadd.f32 %v2159_v60, %v1991_v63  ;;  %1694 = vmatmul.bf16.gmra.mxu0 %v3048_v61  ;;  %v3092_v63 = vor.u32 %v3586_v52, %v3089_v53 }
 0x1cb   : > { %1863 = vmatmul.bf16.gmra.mxu1 %v3052_v62  ;;  %v3088_v62 = vor.u32 %v3588_v51, %v3087_v50 }
 0x1cc   : > { %v2309_v6 = vadd.f32 %v2160_v5, %v609_v4  ;;  %2032 = vmatmul.bf16.gmra.mxu2 %v3056_v2 }
 0x1cd   : > { %2201 = vmatmul.bf16.gmra.mxu3 %v3060_v3 }
 0x1ce   : > { %2373 = vst [vmem:[#allocation2 + $0x48] sm:$0xff] %v2309_v6 }
 0x1cf   : > { %v1993_v8 = vpop.f32.mrf.mxu2  ;;  %v1657_v11 = vpop.f32.mrf.mxu0 }
 0x1d0   : > { %v2162_v9 = vpop.f32.mrf.mxu3  ;;  %v1994_v10 = vadd.f32 %v1993_v8, %v1825_v7  ;;  %v1826_v12 = vpop.f32.mrf.mxu1 }
 0x1d1   : > { %v1827_v24 = vadd.f32 %v1826_v12, %v1657_v11  ;;  %v3095_v11 = vld [vmem:[%s4312_s26 + $0x1e0] sm:$0xf]  ;;  %v3591_v12 = vld [vmem:[%s4312_s26 + $0x1ec] sm:$0xf0] }
 0x1d2   : > { %v2163_v14 = vadd.f32 %v2162_v9, %v1994_v10  ;;  %v614_v9 = vld [vmem:[#allocation2 + $0x120] sm:$0xff]  ;;  %v3096_v23 = vor.u32 %v3591_v12, %v3095_v11  ;;  %v3129_v11 = vld [vmem:[%s4312_s26 + $0x230] sm:$0xf0]  ;;  %v3135_v12 = vld [vmem:[%s4312_s26 + $0x228] sm:$0xf] }
 0x1d4   : > { %v2310_v17 = vadd.f32 %v2163_v14, %v610_v13  ;;  %v3589_v14 = vld [vmem:[%s4312_s26 + $0x1e4] sm:$0xf] }
 0x1d6   : > { %2374 = vst [vmem:[#allocation2 + $0x180] sm:$0xff] %v2310_v17  ;;  %v3592_v17 = vld [vmem:[%s4312_s26 + $0x1f4] sm:$0xf0] }
 0x1d7   : > { %v1995_v25 = vpop.f32.mrf.mxu2  ;;  %v1660_v30 = vpop.f32.mrf.mxu0 }
 0x1d8   : > { %v2164_v26 = vpop.f32.mrf.mxu3  ;;  %v1996_v29 = vadd.f32 %v1995_v25, %v1827_v24  ;;  %v1829_v31 = vpop.f32.mrf.mxu1  ;;  %v3100_v24 = vor.u32 %v3589_v14, %v3097_v15  ;;  %v3598_v14 = vld [vmem:[%s4312_s26 + $0x22c] sm:$0xf]  ;;  %v3137_v15 = vld [vmem:[%s4312_s26 + $0x238] sm:$0xf0] }
 0x1d9   : > { %v1830_v37 = vadd.f32 %v1829_v31, %v1660_v30  ;;  %v615_v30 = vld [vmem:[#allocation2 + $0x150] sm:$0xff] }
 0x1da   : > { %v2165_v35 = vadd.f32 %v2164_v26, %v1996_v29  ;;  %1699 = vmatmul.bf16.gmra.mxu0 %v3064_v27  ;;  %v3108_v29 = vor.u32 %v3590_v18, %v3105_v19 }
 0x1db   : > { %1868 = vmatmul.bf16.gmra.mxu1 %v3068_v28  ;;  %v3104_v28 = vor.u32 %v3592_v17, %v3103_v16 }
 0x1dc   : > { %v2311_v36 = vadd.f32 %v2165_v35, %v611_v34  ;;  %2037 = vmatmul.bf16.gmra.mxu2 %v3072_v32 }
 0x1dd   : > { %2206 = vmatmul.bf16.gmra.mxu3 %v3076_v33 }
 0x1de   : > { %2375 = vst [vmem:[#allocation2 + $0x110] sm:$0xff] %v2311_v36 }
 0x1df   : > { %v1998_v38 = vpop.f32.mrf.mxu2  ;;  %v1662_v41 = vpop.f32.mrf.mxu0 }
 0x1e0   : > { %v2167_v39 = vpop.f32.mrf.mxu3  ;;  %v1999_v40 = vadd.f32 %v1998_v38, %v1830_v37  ;;  %v1831_v42 = vpop.f32.mrf.mxu1 }
 0x1e1   : > { %v1832_v54 = vadd.f32 %v1831_v42, %v1662_v41  ;;  %v3111_v41 = vld [vmem:[%s4312_s26 + $0x200] sm:$0xf]  ;;  %v3595_v42 = vld [vmem:[%s4312_s26 + $0x20c] sm:$0xf0] }
 0x1e2   : > { %v2168_v44 = vadd.f32 %v2167_v39, %v1999_v40  ;;  %v616_v39 = vld [vmem:[#allocation2 + $0x108] sm:$0xff]  ;;  %v3112_v53 = vor.u32 %v3595_v42, %v3111_v41  ;;  %v3145_v41 = vld [vmem:[%s4312_s26 + $0x250] sm:$0xf0] }
 0x1e3   : > { %v3151_v42 = vld [vmem:[%s4312_s26 + $0x248] sm:$0xf] }
 0x1e4   : > { %v2312_v47 = vadd.f32 %v2168_v44, %v612_v43  ;;  %v3593_v44 = vld [vmem:[%s4312_s26 + $0x204] sm:$0xf] }
 0x1e6   : > { %2376 = vst [vmem:[#allocation2 + $0x118] sm:$0xff] %v2312_v47  ;;  %v3596_v47 = vld [vmem:[%s4312_s26 + $0x214] sm:$0xf0] }
 0x1e7   : > { %v2000_v55 = vpop.f32.mrf.mxu2  ;;  %v1665_v60 = vpop.f32.mrf.mxu0 }
 0x1e8   : > { %v2169_v56 = vpop.f32.mrf.mxu3  ;;  %v2001_v59 = vadd.f32 %v2000_v55, %v1832_v54  ;;  %v1834_v61 = vpop.f32.mrf.mxu1  ;;  %v3116_v54 = vor.u32 %v3593_v44, %v3113_v45  ;;  %v3602_v44 = vld [vmem:[%s4312_s26 + $0x24c] sm:$0xf]  ;;  %v3153_v45 = vld [vmem:[%s4312_s26 + $0x258] sm:$0xf0] }
 0x1e9   : > { %v1835_v3 = vadd.f32 %v1834_v61, %v1665_v60  ;;  %v617_v60 = vld [vmem:[#allocation2 + $0x60] sm:$0xff] }
 0x1ea   : > { %v2170_v1 = vadd.f32 %v2169_v56, %v2001_v59  ;;  %1704 = vmatmul.bf16.gmra.mxu0 %v3080_v57  ;;  %v3124_v59 = vor.u32 %v3594_v48, %v3121_v49 }
 0x1eb   : > { %1873 = vmatmul.bf16.gmra.mxu1 %v3084_v58  ;;  %v3120_v58 = vor.u32 %v3596_v47, %v3119_v46 }
 0x1ec   : > { %v2313_v2 = vadd.f32 %v2170_v1, %v613_v0  ;;  %2042 = vmatmul.bf16.gmra.mxu2 %v3088_v62 }
 0x1ed   : > { %2211 = vmatmul.bf16.gmra.mxu3 %v3092_v63 }
 0x1ee   : > { %2377 = vst [vmem:[#allocation2 + $0x98] sm:$0xff] %v2313_v2 }
 0x1ef   : > { %v2003_v4 = vpop.f32.mrf.mxu2  ;;  %v1667_v7 = vpop.f32.mrf.mxu0 }
 0x1f0   : > { %v2172_v5 = vpop.f32.mrf.mxu3  ;;  %v2004_v6 = vadd.f32 %v2003_v4, %v1835_v3  ;;  %v1836_v8 = vpop.f32.mrf.mxu1 }
 0x1f1   : > { %v1837_v20 = vadd.f32 %v1836_v8, %v1667_v7  ;;  %v3127_v7 = vld [vmem:[%s4312_s26 + $0x220] sm:$0xf]  ;;  %v3599_v8 = vld [vmem:[%s4312_s26 + $0x22c] sm:$0xf0] }
 0x1f2   : > { %v2173_v10 = vadd.f32 %v2172_v5, %v2004_v6  ;;  %v618_v5 = vld [vmem:[#allocation2 + $0xe0] sm:$0xff]  ;;  %v3128_v19 = vor.u32 %v3599_v8, %v3127_v7  ;;  %v3161_v7 = vld [vmem:[%s4312_s26 + $0x270] sm:$0xf0]  ;;  %v3167_v8 = vld [vmem:[%s4312_s26 + $0x268] sm:$0xf] }
 0x1f4   : > { %v2314_v13 = vadd.f32 %v2173_v10, %v614_v9  ;;  %v3597_v10 = vld [vmem:[%s4312_s26 + $0x224] sm:$0xf] }
 0x1f6   : > { %2378 = vst [vmem:[#allocation2 + $0x120] sm:$0xff] %v2314_v13  ;;  %v3600_v13 = vld [vmem:[%s4312_s26 + $0x234] sm:$0xf0] }
 0x1f7   : > { %v2005_v21 = vpop.f32.mrf.mxu2  ;;  %v1670_v26 = vpop.f32.mrf.mxu0 }
 0x1f8   : > { %v2174_v22 = vpop.f32.mrf.mxu3  ;;  %v2006_v25 = vadd.f32 %v2005_v21, %v1837_v20  ;;  %v1839_v27 = vpop.f32.mrf.mxu1  ;;  %v3132_v20 = vor.u32 %v3597_v10, %v3129_v11  ;;  %v3606_v10 = vld [vmem:[%s4312_s26 + $0x26c] sm:$0xf]  ;;  %v3169_v11 = vld [vmem:[%s4312_s26 + $0x278] sm:$0xf0] }
 0x1f9   : > { %v1840_v33 = vadd.f32 %v1839_v27, %v1670_v26  ;;  %v619_v26 = vld [vmem:[#allocation2 + $0x188] sm:$0xff] }
 0x1fa   : > { %v2175_v31 = vadd.f32 %v2174_v22, %v2006_v25  ;;  %1709 = vmatmul.bf16.gmra.mxu0 %v3096_v23  ;;  %v3140_v25 = vor.u32 %v3598_v14, %v3137_v15 }
 0x1fb   : > { %1878 = vmatmul.bf16.gmra.mxu1 %v3100_v24  ;;  %v3136_v24 = vor.u32 %v3600_v13, %v3135_v12 }
 0x1fc   : > { %v2315_v32 = vadd.f32 %v2175_v31, %v615_v30  ;;  %2047 = vmatmul.bf16.gmra.mxu2 %v3104_v28 }
 0x1fd   : > { %2216 = vmatmul.bf16.gmra.mxu3 %v3108_v29 }
 0x1fe   : > { %2379 = vst [vmem:[#allocation2 + $0x150] sm:$0xff] %v2315_v32 }
 0x1ff   : > { %v2008_v34 = vpop.f32.mrf.mxu2  ;;  %v1672_v37 = vpop.f32.mrf.mxu0 }
 0x200   : > { %v2177_v35 = vpop.f32.mrf.mxu3  ;;  %v2009_v36 = vadd.f32 %v2008_v34, %v1840_v33  ;;  %v1841_v38 = vpop.f32.mrf.mxu1 }
 0x201   : > { %v1842_v50 = vadd.f32 %v1841_v38, %v1672_v37  ;;  %v3143_v37 = vld [vmem:[%s4312_s26 + $0x240] sm:$0xf]  ;;  %v3603_v38 = vld [vmem:[%s4312_s26 + $0x24c] sm:$0xf0] }
 0x202   : > { %v2178_v40 = vadd.f32 %v2177_v35, %v2009_v36  ;;  %v620_v35 = vld [vmem:[#allocation2 + $0x138] sm:$0xff]  ;;  %v3144_v49 = vor.u32 %v3603_v38, %v3143_v37  ;;  %v3177_v37 = vld [vmem:[%s4312_s26 + $0x290] sm:$0xf0]  ;;  %v3183_v38 = vld [vmem:[%s4312_s26 + $0x288] sm:$0xf] }
 0x204   : > { %v2316_v43 = vadd.f32 %v2178_v40, %v616_v39  ;;  %v3601_v40 = vld [vmem:[%s4312_s26 + $0x244] sm:$0xf] }
 0x206   : > { %2380 = vst [vmem:[#allocation2 + $0x108] sm:$0xff] %v2316_v43  ;;  %v3604_v43 = vld [vmem:[%s4312_s26 + $0x254] sm:$0xf0] }
 0x207   : > { %v2010_v51 = vpop.f32.mrf.mxu2  ;;  %v1675_v56 = vpop.f32.mrf.mxu0 }
 0x208   : > { %v2179_v52 = vpop.f32.mrf.mxu3  ;;  %v2011_v55 = vadd.f32 %v2010_v51, %v1842_v50  ;;  %v1844_v57 = vpop.f32.mrf.mxu1  ;;  %v3148_v50 = vor.u32 %v3601_v40, %v3145_v41  ;;  %v3610_v40 = vld [vmem:[%s4312_s26 + $0x28c] sm:$0xf]  ;;  %v3185_v41 = vld [vmem:[%s4312_s26 + $0x298] sm:$0xf0] }
 0x209   : > { %v1845_v63 = vadd.f32 %v1844_v57, %v1675_v56  ;;  %v621_v56 = vld [vmem:[#allocation2 + $0x140] sm:$0xff] }
 0x20a   : > { %v2180_v61 = vadd.f32 %v2179_v52, %v2011_v55  ;;  %1714 = vmatmul.bf16.gmra.mxu0 %v3112_v53  ;;  %v3156_v55 = vor.u32 %v3602_v44, %v3153_v45 }
 0x20b   : > { %1883 = vmatmul.bf16.gmra.mxu1 %v3116_v54  ;;  %v3152_v54 = vor.u32 %v3604_v43, %v3151_v42 }
 0x20c   : > { %v2317_v62 = vadd.f32 %v2180_v61, %v617_v60  ;;  %2052 = vmatmul.bf16.gmra.mxu2 %v3120_v58 }
 0x20d   : > { %2221 = vmatmul.bf16.gmra.mxu3 %v3124_v59 }
 0x20e   : > { %2381 = vst [vmem:[#allocation2 + $0x60] sm:$0xff] %v2317_v62 }
 0x20f   : > { %v2013_v0 = vpop.f32.mrf.mxu2  ;;  %v1677_v3 = vpop.f32.mrf.mxu0 }
 0x210   : > { %v2182_v1 = vpop.f32.mrf.mxu3  ;;  %v2014_v2 = vadd.f32 %v2013_v0, %v1845_v63  ;;  %v1846_v4 = vpop.f32.mrf.mxu1 }
 0x211   : > { %v1847_v16 = vadd.f32 %v1846_v4, %v1677_v3  ;;  %v3159_v3 = vld [vmem:[%s4312_s26 + $0x260] sm:$0xf]  ;;  %v3607_v4 = vld [vmem:[%s4312_s26 + $0x26c] sm:$0xf0] }
 0x212   : > { %v2183_v6 = vadd.f32 %v2182_v1, %v2014_v2  ;;  %v622_v1 = vld [vmem:[#allocation2 + $0x80] sm:$0xff]  ;;  %v3160_v15 = vor.u32 %v3607_v4, %v3159_v3  ;;  %v3193_v3 = vld [vmem:[%s4312_s26 + $0x2b0] sm:$0xf0]  ;;  %v3199_v4 = vld [vmem:[%s4312_s26 + $0x2a8] sm:$0xf] }
 0x214   : > { %v2318_v9 = vadd.f32 %v2183_v6, %v618_v5  ;;  %v3605_v6 = vld [vmem:[%s4312_s26 + $0x264] sm:$0xf] }
 0x216   : > { %2382 = vst [vmem:[#allocation2 + $0xe0] sm:$0xff] %v2318_v9  ;;  %v3608_v9 = vld [vmem:[%s4312_s26 + $0x274] sm:$0xf0] }
 0x217   : > { %v2015_v17 = vpop.f32.mrf.mxu2  ;;  %v1680_v22 = vpop.f32.mrf.mxu0 }
 0x218   : > { %v2184_v18 = vpop.f32.mrf.mxu3  ;;  %v2016_v21 = vadd.f32 %v2015_v17, %v1847_v16  ;;  %v1849_v23 = vpop.f32.mrf.mxu1  ;;  %v3164_v16 = vor.u32 %v3605_v6, %v3161_v7  ;;  %v3614_v6 = vld [vmem:[%s4312_s26 + $0x2ac] sm:$0xf]  ;;  %v3201_v7 = vld [vmem:[%s4312_s26 + $0x2b8] sm:$0xf0] }
 0x219   : > { %v1850_v29 = vadd.f32 %v1849_v23, %v1680_v22  ;;  %v623_v22 = vld [vmem:[#allocation2 + $0x1a8] sm:$0xff] }
 0x21a   : > { %v2185_v27 = vadd.f32 %v2184_v18, %v2016_v21  ;;  %1719 = vmatmul.bf16.gmra.mxu0 %v3128_v19  ;;  %v3172_v21 = vor.u32 %v3606_v10, %v3169_v11 }
 0x21b   : > { %1888 = vmatmul.bf16.gmra.mxu1 %v3132_v20  ;;  %v3168_v20 = vor.u32 %v3608_v9, %v3167_v8 }
 0x21c   : > { %v2319_v28 = vadd.f32 %v2185_v27, %v619_v26  ;;  %2057 = vmatmul.bf16.gmra.mxu2 %v3136_v24 }
 0x21d   : > { %2226 = vmatmul.bf16.gmra.mxu3 %v3140_v25 }
 0x21e   : > { %2383 = vst [vmem:[#allocation2 + $0x188] sm:$0xff] %v2319_v28 }
 0x21f   : > { %v2018_v30 = vpop.f32.mrf.mxu2  ;;  %v1682_v33 = vpop.f32.mrf.mxu0 }
 0x220   : > { %v2187_v31 = vpop.f32.mrf.mxu3  ;;  %v2019_v32 = vadd.f32 %v2018_v30, %v1850_v29  ;;  %v1851_v34 = vpop.f32.mrf.mxu1 }
 0x221   : > { %v1852_v46 = vadd.f32 %v1851_v34, %v1682_v33  ;;  %v3175_v33 = vld [vmem:[%s4312_s26 + $0x280] sm:$0xf]  ;;  %v3611_v34 = vld [vmem:[%s4312_s26 + $0x28c] sm:$0xf0] }
 0x222   : > { %v2188_v36 = vadd.f32 %v2187_v31, %v2019_v32  ;;  %v624_v31 = vld [vmem:[#allocation2 + $0x1b8] sm:$0xff]  ;;  %v3176_v45 = vor.u32 %v3611_v34, %v3175_v33  ;;  %v3209_v33 = vld [vmem:[%s4312_s26 + $0x2d0] sm:$0xf0]  ;;  %v3215_v34 = vld [vmem:[%s4312_s26 + $0x2c8] sm:$0xf] }
 0x224   : > { %v2320_v39 = vadd.f32 %v2188_v36, %v620_v35  ;;  %v3609_v36 = vld [vmem:[%s4312_s26 + $0x284] sm:$0xf] }
 0x226   : > { %2384 = vst [vmem:[#allocation2 + $0x138] sm:$0xff] %v2320_v39  ;;  %v3612_v39 = vld [vmem:[%s4312_s26 + $0x294] sm:$0xf0] }
 0x227   : > { %v2020_v47 = vpop.f32.mrf.mxu2  ;;  %v1685_v52 = vpop.f32.mrf.mxu0 }
 0x228   : > { %v2189_v48 = vpop.f32.mrf.mxu3  ;;  %v2021_v51 = vadd.f32 %v2020_v47, %v1852_v46  ;;  %v1854_v53 = vpop.f32.mrf.mxu1  ;;  %v3180_v46 = vor.u32 %v3609_v36, %v3177_v37  ;;  %v3618_v36 = vld [vmem:[%s4312_s26 + $0x2cc] sm:$0xf]  ;;  %v3217_v37 = vld [vmem:[%s4312_s26 + $0x2d8] sm:$0xf0] }
 0x229   : > { %v1855_v59 = vadd.f32 %v1854_v53, %v1685_v52  ;;  %v625_v52 = vld [vmem:[#allocation2 + $0x28] sm:$0xff] }
 0x22a   : > { %v2190_v57 = vadd.f32 %v2189_v48, %v2021_v51  ;;  %1724 = vmatmul.bf16.gmra.mxu0 %v3144_v49  ;;  %v3188_v51 = vor.u32 %v3610_v40, %v3185_v41 }
 0x22b   : > { %1893 = vmatmul.bf16.gmra.mxu1 %v3148_v50  ;;  %v3184_v50 = vor.u32 %v3612_v39, %v3183_v38 }
 0x22c   : > { %v2321_v58 = vadd.f32 %v2190_v57, %v621_v56  ;;  %2062 = vmatmul.bf16.gmra.mxu2 %v3152_v54 }
 0x22d   : > { %2231 = vmatmul.bf16.gmra.mxu3 %v3156_v55 }
 0x22e   : > { %2385 = vst [vmem:[#allocation2 + $0x140] sm:$0xff] %v2321_v58 }
 0x22f   : > { %v2023_v60 = vpop.f32.mrf.mxu2  ;;  %v1687_v63 = vpop.f32.mrf.mxu0 }
 0x230   : > { %v2192_v61 = vpop.f32.mrf.mxu3  ;;  %v2024_v62 = vadd.f32 %v2023_v60, %v1855_v59  ;;  %v1856_v0 = vpop.f32.mrf.mxu1 }
 0x231   : > { %v1857_v12 = vadd.f32 %v1856_v0, %v1687_v63  ;;  %v3191_v63 = vld [vmem:[%s4312_s26 + $0x2a0] sm:$0xf]  ;;  %v3615_v0 = vld [vmem:[%s4312_s26 + $0x2ac] sm:$0xf0] }
 0x232   : > { %v2193_v2 = vadd.f32 %v2192_v61, %v2024_v62  ;;  %v626_v61 = vld [vmem:[#allocation2 + $0x1e8] sm:$0xff]  ;;  %v3192_v11 = vor.u32 %v3615_v0, %v3191_v63  ;;  %v3225_v63 = vld [vmem:[%s4312_s26 + $0x2f0] sm:$0xf0] }
 0x233   : > { %v3231_v0 = vld [vmem:[%s4312_s26 + $0x2e8] sm:$0xf] }
 0x234   : > { %v2322_v5 = vadd.f32 %v2193_v2, %v622_v1  ;;  %v3613_v2 = vld [vmem:[%s4312_s26 + $0x2a4] sm:$0xf] }
 0x236   : > { %2386 = vst [vmem:[#allocation2 + $0x80] sm:$0xff] %v2322_v5  ;;  %v3616_v5 = vld [vmem:[%s4312_s26 + $0x2b4] sm:$0xf0] }
 0x237   : > { %v2025_v13 = vpop.f32.mrf.mxu2  ;;  %v1690_v18 = vpop.f32.mrf.mxu0 }
 0x238   : > { %v2194_v14 = vpop.f32.mrf.mxu3  ;;  %v2026_v17 = vadd.f32 %v2025_v13, %v1857_v12  ;;  %v1859_v19 = vpop.f32.mrf.mxu1  ;;  %v3196_v12 = vor.u32 %v3613_v2, %v3193_v3  ;;  %v3622_v2 = vld [vmem:[%s4312_s26 + $0x2ec] sm:$0xf]  ;;  %v3233_v3 = vld [vmem:[%s4312_s26 + $0x2f8] sm:$0xf0] }
 0x239   : > { %v1860_v25 = vadd.f32 %v1859_v19, %v1690_v18  ;;  %v627_v18 = vld [vmem:[#allocation2 + $0xf8] sm:$0xff] }
 0x23a   : > { %v2195_v23 = vadd.f32 %v2194_v14, %v2026_v17  ;;  %1729 = vmatmul.bf16.gmra.mxu0 %v3160_v15  ;;  %v3204_v17 = vor.u32 %v3614_v6, %v3201_v7 }
 0x23b   : > { %1898 = vmatmul.bf16.gmra.mxu1 %v3164_v16  ;;  %v3200_v16 = vor.u32 %v3616_v5, %v3199_v4 }
 0x23c   : > { %v2323_v24 = vadd.f32 %v2195_v23, %v623_v22  ;;  %2067 = vmatmul.bf16.gmra.mxu2 %v3168_v20 }
 0x23d   : > { %2236 = vmatmul.bf16.gmra.mxu3 %v3172_v21 }
 0x23e   : > { %2387 = vst [vmem:[#allocation2 + $0x1a8] sm:$0xff] %v2323_v24 }
 0x23f   : > { %v2028_v26 = vpop.f32.mrf.mxu2  ;;  %v1692_v29 = vpop.f32.mrf.mxu0 }
 0x240   : > { %v2197_v27 = vpop.f32.mrf.mxu3  ;;  %v2029_v28 = vadd.f32 %v2028_v26, %v1860_v25  ;;  %v1861_v30 = vpop.f32.mrf.mxu1 }
 0x241   : > { %v1862_v42 = vadd.f32 %v1861_v30, %v1692_v29  ;;  %v3207_v29 = vld [vmem:[%s4312_s26 + $0x2c0] sm:$0xf]  ;;  %v3619_v30 = vld [vmem:[%s4312_s26 + $0x2cc] sm:$0xf0] }
 0x242   : > { %v2198_v32 = vadd.f32 %v2197_v27, %v2029_v28  ;;  %v628_v27 = vld [vmem:[#allocation2 + $0x160] sm:$0xff]  ;;  %v3208_v41 = vor.u32 %v3619_v30, %v3207_v29  ;;  %v3241_v29 = vld [vmem:[%s4312_s26 + $0x310] sm:$0xf0]  ;;  %v3247_v30 = vld [vmem:[%s4312_s26 + $0x308] sm:$0xf] }
 0x244   : > { %v2324_v35 = vadd.f32 %v2198_v32, %v624_v31  ;;  %v3617_v32 = vld [vmem:[%s4312_s26 + $0x2c4] sm:$0xf] }
 0x246   : > { %2388 = vst [vmem:[#allocation2 + $0x1b8] sm:$0xff] %v2324_v35  ;;  %v3620_v35 = vld [vmem:[%s4312_s26 + $0x2d4] sm:$0xf0] }
 0x247   : > { %v2030_v43 = vpop.f32.mrf.mxu2  ;;  %v1695_v48 = vpop.f32.mrf.mxu0 }
 0x248   : > { %v2199_v44 = vpop.f32.mrf.mxu3  ;;  %v2031_v47 = vadd.f32 %v2030_v43, %v1862_v42  ;;  %v1864_v49 = vpop.f32.mrf.mxu1  ;;  %v3212_v42 = vor.u32 %v3617_v32, %v3209_v33  ;;  %v3626_v32 = vld [vmem:[%s4312_s26 + $0x30c] sm:$0xf]  ;;  %v3249_v33 = vld [vmem:[%s4312_s26 + $0x318] sm:$0xf0] }
 0x249   : > { %v1865_v55 = vadd.f32 %v1864_v49, %v1695_v48  ;;  %v629_v48 = vld [vmem:[#allocation2 + $0x30] sm:$0xff] }
 0x24a   : > { %v2200_v53 = vadd.f32 %v2199_v44, %v2031_v47  ;;  %1734 = vmatmul.bf16.gmra.mxu0 %v3176_v45  ;;  %v3220_v47 = vor.u32 %v3618_v36, %v3217_v37 }
 0x24b   : > { %1903 = vmatmul.bf16.gmra.mxu1 %v3180_v46  ;;  %v3216_v46 = vor.u32 %v3620_v35, %v3215_v34 }
 0x24c   : > { %v2325_v54 = vadd.f32 %v2200_v53, %v625_v52  ;;  %2072 = vmatmul.bf16.gmra.mxu2 %v3184_v50 }
 0x24d   : > { %2241 = vmatmul.bf16.gmra.mxu3 %v3188_v51 }
 0x24e   : > { %2389 = vst [vmem:[#allocation2 + $0x28] sm:$0xff] %v2325_v54 }
 0x24f   : > { %v2033_v56 = vpop.f32.mrf.mxu2  ;;  %v1697_v59 = vpop.f32.mrf.mxu0 }
 0x250   : > { %v2202_v57 = vpop.f32.mrf.mxu3  ;;  %v2034_v58 = vadd.f32 %v2033_v56, %v1865_v55  ;;  %v1866_v60 = vpop.f32.mrf.mxu1 }
 0x251   : > { %v1867_v8 = vadd.f32 %v1866_v60, %v1697_v59  ;;  %v3223_v59 = vld [vmem:[%s4312_s26 + $0x2e0] sm:$0xf]  ;;  %v3623_v60 = vld [vmem:[%s4312_s26 + $0x2ec] sm:$0xf0] }
 0x252   : > { %v2203_v62 = vadd.f32 %v2202_v57, %v2034_v58  ;;  %v630_v57 = vld [vmem:[#allocation2 + $0x1e0] sm:$0xff]  ;;  %v3224_v7 = vor.u32 %v3623_v60, %v3223_v59  ;;  %v3257_v59 = vld [vmem:[%s4312_s26 + $0x330] sm:$0xf0]  ;;  %v3263_v60 = vld [vmem:[%s4312_s26 + $0x328] sm:$0xf] }
 0x254   : > { %v2326_v1 = vadd.f32 %v2203_v62, %v626_v61  ;;  %v3621_v62 = vld [vmem:[%s4312_s26 + $0x2e4] sm:$0xf] }
 0x256   : > { %2390 = vst [vmem:[#allocation2 + $0x1e8] sm:$0xff] %v2326_v1  ;;  %v3624_v1 = vld [vmem:[%s4312_s26 + $0x2f4] sm:$0xf0] }
 0x257   : > { %v2035_v9 = vpop.f32.mrf.mxu2  ;;  %v1700_v14 = vpop.f32.mrf.mxu0 }
 0x258   : > { %v2204_v10 = vpop.f32.mrf.mxu3  ;;  %v2036_v13 = vadd.f32 %v2035_v9, %v1867_v8  ;;  %v1869_v15 = vpop.f32.mrf.mxu1  ;;  %v3228_v8 = vor.u32 %v3621_v62, %v3225_v63  ;;  %v3630_v62 = vld [vmem:[%s4312_s26 + $0x32c] sm:$0xf]  ;;  %v3265_v63 = vld [vmem:[%s4312_s26 + $0x338] sm:$0xf0] }
 0x259   : > { %v1870_v21 = vadd.f32 %v1869_v15, %v1700_v14  ;;  %v631_v14 = vld [vmem:[#allocation2] sm:$0xff] }
 0x25a   : > { %v2205_v19 = vadd.f32 %v2204_v10, %v2036_v13  ;;  %1739 = vmatmul.bf16.gmra.mxu0 %v3192_v11  ;;  %v3236_v13 = vor.u32 %v3622_v2, %v3233_v3 }
 0x25b   : > { %1908 = vmatmul.bf16.gmra.mxu1 %v3196_v12  ;;  %v3232_v12 = vor.u32 %v3624_v1, %v3231_v0 }
 0x25c   : > { %v2327_v20 = vadd.f32 %v2205_v19, %v627_v18  ;;  %2077 = vmatmul.bf16.gmra.mxu2 %v3200_v16 }
 0x25d   : > { %2246 = vmatmul.bf16.gmra.mxu3 %v3204_v17 }
 0x25e   : > { %2391 = vst [vmem:[#allocation2 + $0xf8] sm:$0xff] %v2327_v20 }
 0x25f   : > { %v2038_v22 = vpop.f32.mrf.mxu2  ;;  %v1702_v25 = vpop.f32.mrf.mxu0 }
 0x260   : > { %v2207_v23 = vpop.f32.mrf.mxu3  ;;  %v2039_v24 = vadd.f32 %v2038_v22, %v1870_v21  ;;  %v1871_v26 = vpop.f32.mrf.mxu1 }
 0x261   : > { %v1872_v38 = vadd.f32 %v1871_v26, %v1702_v25  ;;  %v3239_v25 = vld [vmem:[%s4312_s26 + $0x300] sm:$0xf]  ;;  %v3627_v26 = vld [vmem:[%s4312_s26 + $0x30c] sm:$0xf0] }
 0x262   : > { %v2208_v28 = vadd.f32 %v2207_v23, %v2039_v24  ;;  %v632_v23 = vld [vmem:[#allocation2 + $0xf0] sm:$0xff]  ;;  %v3240_v37 = vor.u32 %v3627_v26, %v3239_v25  ;;  %v3279_v26 = vld [vmem:[%s4312_s26 + $0x348] sm:$0xf] }
 0x263   : > { %v3273_v25 = vld [vmem:[%s4312_s26 + $0x350] sm:$0xf0] }
 0x264   : > { %v2328_v31 = vadd.f32 %v2208_v28, %v628_v27  ;;  %v3625_v28 = vld [vmem:[%s4312_s26 + $0x304] sm:$0xf] }
 0x266   : > { %2392 = vst [vmem:[#allocation2 + $0x160] sm:$0xff] %v2328_v31  ;;  %v3628_v31 = vld [vmem:[%s4312_s26 + $0x314] sm:$0xf0] }
 0x267   : > { %v2040_v39 = vpop.f32.mrf.mxu2  ;;  %v1705_v44 = vpop.f32.mrf.mxu0 }
 0x268   : > { %v2209_v40 = vpop.f32.mrf.mxu3  ;;  %v2041_v43 = vadd.f32 %v2040_v39, %v1872_v38  ;;  %v1874_v45 = vpop.f32.mrf.mxu1  ;;  %v3244_v38 = vor.u32 %v3625_v28, %v3241_v29  ;;  %v3634_v28 = vld [vmem:[%s4312_s26 + $0x34c] sm:$0xf]  ;;  %v3281_v29 = vld [vmem:[%s4312_s26 + $0x358] sm:$0xf0] }
 0x269   : > { %v1875_v51 = vadd.f32 %v1874_v45, %v1705_v44  ;;  %v633_v44 = vld [vmem:[#allocation2 + $0x8] sm:$0xff] }
 0x26a   : > { %v2210_v49 = vadd.f32 %v2209_v40, %v2041_v43  ;;  %1744 = vmatmul.bf16.gmra.mxu0 %v3208_v41  ;;  %v3252_v43 = vor.u32 %v3626_v32, %v3249_v33 }
 0x26b   : > { %1913 = vmatmul.bf16.gmra.mxu1 %v3212_v42  ;;  %v3248_v42 = vor.u32 %v3628_v31, %v3247_v30 }
 0x26c   : > { %v2329_v50 = vadd.f32 %v2210_v49, %v629_v48  ;;  %2082 = vmatmul.bf16.gmra.mxu2 %v3216_v46 }
 0x26d   : > { %2251 = vmatmul.bf16.gmra.mxu3 %v3220_v47 }
 0x26e   : > { %2393 = vst [vmem:[#allocation2 + $0x30] sm:$0xff] %v2329_v50 }
 0x26f   : > { %v2043_v52 = vpop.f32.mrf.mxu2  ;;  %v1707_v55 = vpop.f32.mrf.mxu0 }
 0x270   : > { %v2212_v53 = vpop.f32.mrf.mxu3  ;;  %v2044_v54 = vadd.f32 %v2043_v52, %v1875_v51  ;;  %v1876_v56 = vpop.f32.mrf.mxu1 }
 0x271   : > { %v1877_v4 = vadd.f32 %v1876_v56, %v1707_v55  ;;  %v3255_v55 = vld [vmem:[%s4312_s26 + $0x320] sm:$0xf]  ;;  %v3631_v56 = vld [vmem:[%s4312_s26 + $0x32c] sm:$0xf0] }
 0x272   : > { %v2213_v58 = vadd.f32 %v2212_v53, %v2044_v54  ;;  %v634_v53 = vld [vmem:[#allocation2 + $0x148] sm:$0xff]  ;;  %v3256_v3 = vor.u32 %v3631_v56, %v3255_v55  ;;  %v3289_v55 = vld [vmem:[%s4312_s26 + $0x370] sm:$0xf0] }
 0x273   : > { %v3295_v56 = vld [vmem:[%s4312_s26 + $0x368] sm:$0xf] }
 0x274   : > { %v2330_v61 = vadd.f32 %v2213_v58, %v630_v57  ;;  %v3629_v58 = vld [vmem:[%s4312_s26 + $0x324] sm:$0xf] }
 0x276   : > { %2394 = vst [vmem:[#allocation2 + $0x1e0] sm:$0xff] %v2330_v61  ;;  %v3632_v61 = vld [vmem:[%s4312_s26 + $0x334] sm:$0xf0] }
 0x277   : > { %v2045_v5 = vpop.f32.mrf.mxu2  ;;  %v1710_v10 = vpop.f32.mrf.mxu0 }
 0x278   : > { %v2214_v6 = vpop.f32.mrf.mxu3  ;;  %v2046_v9 = vadd.f32 %v2045_v5, %v1877_v4  ;;  %v1879_v11 = vpop.f32.mrf.mxu1  ;;  %v3260_v4 = vor.u32 %v3629_v58, %v3257_v59  ;;  %v3638_v58 = vld [vmem:[%s4312_s26 + $0x36c] sm:$0xf]  ;;  %v3297_v59 = vld [vmem:[%s4312_s26 + $0x378] sm:$0xf0] }
 0x279   : > { %v1880_v17 = vadd.f32 %v1879_v11, %v1710_v10  ;;  %v635_v10 = vld [vmem:[#allocation2 + $0x1d0] sm:$0xff] }
 0x27a   : > { %v2215_v15 = vadd.f32 %v2214_v6, %v2046_v9  ;;  %1749 = vmatmul.bf16.gmra.mxu0 %v3224_v7  ;;  %v3268_v9 = vor.u32 %v3630_v62, %v3265_v63 }
 0x27b   : > { %1918 = vmatmul.bf16.gmra.mxu1 %v3228_v8  ;;  %v3264_v8 = vor.u32 %v3632_v61, %v3263_v60 }
 0x27c   : > { %v2331_v16 = vadd.f32 %v2215_v15, %v631_v14  ;;  %2087 = vmatmul.bf16.gmra.mxu2 %v3232_v12 }
 0x27d   : > { %2256 = vmatmul.bf16.gmra.mxu3 %v3236_v13 }
 0x27e   : > { %2395 = vst [vmem:[#allocation2] sm:$0xff] %v2331_v16 }
 0x27f   : > { %v2048_v18 = vpop.f32.mrf.mxu2  ;;  %v1712_v21 = vpop.f32.mrf.mxu0 }
 0x280   : > { %v2217_v19 = vpop.f32.mrf.mxu3  ;;  %v2049_v20 = vadd.f32 %v2048_v18, %v1880_v17  ;;  %v1881_v22 = vpop.f32.mrf.mxu1 }
 0x281   : > { %v1882_v34 = vadd.f32 %v1881_v22, %v1712_v21  ;;  %v3271_v21 = vld [vmem:[%s4312_s26 + $0x340] sm:$0xf]  ;;  %v3635_v22 = vld [vmem:[%s4312_s26 + $0x34c] sm:$0xf0] }
 0x282   : > { %v2218_v24 = vadd.f32 %v2217_v19, %v2049_v20  ;;  %v636_v19 = vld [vmem:[#allocation2 + $0x100] sm:$0xff]  ;;  %v3272_v33 = vor.u32 %v3635_v22, %v3271_v21  ;;  %v3305_v21 = vld [vmem:[%s4312_s26 + $0x390] sm:$0xf0]  ;;  %v3311_v22 = vld [vmem:[%s4312_s26 + $0x388] sm:$0xf] }
 0x284   : > { %v2332_v27 = vadd.f32 %v2218_v24, %v632_v23  ;;  %v3633_v24 = vld [vmem:[%s4312_s26 + $0x344] sm:$0xf] }
 0x286   : > { %2396 = vst [vmem:[#allocation2 + $0xf0] sm:$0xff] %v2332_v27  ;;  %v3636_v27 = vld [vmem:[%s4312_s26 + $0x354] sm:$0xf0] }
 0x287   : > { %v2050_v35 = vpop.f32.mrf.mxu2  ;;  %v1715_v40 = vpop.f32.mrf.mxu0 }
 0x288   : > { %v2219_v36 = vpop.f32.mrf.mxu3  ;;  %v2051_v39 = vadd.f32 %v2050_v35, %v1882_v34  ;;  %v1884_v41 = vpop.f32.mrf.mxu1  ;;  %v3276_v34 = vor.u32 %v3633_v24, %v3273_v25  ;;  %v3642_v24 = vld [vmem:[%s4312_s26 + $0x38c] sm:$0xf]  ;;  %v3313_v25 = vld [vmem:[%s4312_s26 + $0x398] sm:$0xf0] }
 0x289   : > { %v1885_v47 = vadd.f32 %v1884_v41, %v1715_v40  ;;  %v637_v40 = vld [vmem:[#allocation2 + $0xc8] sm:$0xff] }
 0x28a   : > { %v2220_v45 = vadd.f32 %v2219_v36, %v2051_v39  ;;  %1754 = vmatmul.bf16.gmra.mxu0 %v3240_v37  ;;  %v3284_v39 = vor.u32 %v3634_v28, %v3281_v29 }
 0x28b   : > { %1923 = vmatmul.bf16.gmra.mxu1 %v3244_v38  ;;  %v3280_v38 = vor.u32 %v3636_v27, %v3279_v26 }
 0x28c   : > { %v2333_v46 = vadd.f32 %v2220_v45, %v633_v44  ;;  %2092 = vmatmul.bf16.gmra.mxu2 %v3248_v42 }
 0x28d   : > { %2261 = vmatmul.bf16.gmra.mxu3 %v3252_v43 }
 0x28e   : > { %2397 = vst [vmem:[#allocation2 + $0x8] sm:$0xff] %v2333_v46 }
 0x28f   : > { %v2053_v48 = vpop.f32.mrf.mxu2  ;;  %v1717_v51 = vpop.f32.mrf.mxu0 }
 0x290   : > { %v2222_v49 = vpop.f32.mrf.mxu3  ;;  %v2054_v50 = vadd.f32 %v2053_v48, %v1885_v47  ;;  %v1886_v52 = vpop.f32.mrf.mxu1 }
 0x291   : > { %v1887_v0 = vadd.f32 %v1886_v52, %v1717_v51  ;;  %v3287_v51 = vld [vmem:[%s4312_s26 + $0x360] sm:$0xf]  ;;  %v3639_v52 = vld [vmem:[%s4312_s26 + $0x36c] sm:$0xf0] }
 0x292   : > { %v2223_v54 = vadd.f32 %v2222_v49, %v2054_v50  ;;  %v638_v49 = vld [vmem:[#allocation2 + $0x40] sm:$0xff]  ;;  %v3288_v63 = vor.u32 %v3639_v52, %v3287_v51  ;;  %v3321_v51 = vld [vmem:[%s4312_s26 + $0x3b0] sm:$0xf0]  ;;  %v3327_v52 = vld [vmem:[%s4312_s26 + $0x3a8] sm:$0xf] }
 0x294   : > { %v2334_v57 = vadd.f32 %v2223_v54, %v634_v53  ;;  %v3637_v54 = vld [vmem:[%s4312_s26 + $0x364] sm:$0xf] }
 0x296   : > { %2398 = vst [vmem:[#allocation2 + $0x148] sm:$0xff] %v2334_v57  ;;  %v3640_v57 = vld [vmem:[%s4312_s26 + $0x374] sm:$0xf0] }
 0x297   : > { %v2055_v1 = vpop.f32.mrf.mxu2  ;;  %v1720_v6 = vpop.f32.mrf.mxu0 }
 0x298   : > { %v2224_v2 = vpop.f32.mrf.mxu3  ;;  %v2056_v5 = vadd.f32 %v2055_v1, %v1887_v0  ;;  %v1889_v7 = vpop.f32.mrf.mxu1  ;;  %v3292_v0 = vor.u32 %v3637_v54, %v3289_v55  ;;  %v3646_v54 = vld [vmem:[%s4312_s26 + $0x3ac] sm:$0xf]  ;;  %v3329_v55 = vld [vmem:[%s4312_s26 + $0x3b8] sm:$0xf0] }
 0x299   : > { %v1890_v13 = vadd.f32 %v1889_v7, %v1720_v6  ;;  %v639_v6 = vld [vmem:[#allocation2 + $0x1f8] sm:$0xff] }
 0x29a   : > { %v2225_v11 = vadd.f32 %v2224_v2, %v2056_v5  ;;  %1759 = vmatmul.bf16.gmra.mxu0 %v3256_v3  ;;  %v3300_v5 = vor.u32 %v3638_v58, %v3297_v59 }
 0x29b   : > { %1928 = vmatmul.bf16.gmra.mxu1 %v3260_v4  ;;  %v3296_v4 = vor.u32 %v3640_v57, %v3295_v56 }
 0x29c   : > { %v2335_v12 = vadd.f32 %v2225_v11, %v635_v10  ;;  %2097 = vmatmul.bf16.gmra.mxu2 %v3264_v8 }
 0x29d   : > { %2266 = vmatmul.bf16.gmra.mxu3 %v3268_v9 }
 0x29e   : > { %2399 = vst [vmem:[#allocation2 + $0x1d0] sm:$0xff] %v2335_v12 }
 0x29f   : > { %v2058_v14 = vpop.f32.mrf.mxu2  ;;  %v1722_v17 = vpop.f32.mrf.mxu0 }
 0x2a0   : > { %v2227_v15 = vpop.f32.mrf.mxu3  ;;  %v2059_v16 = vadd.f32 %v2058_v14, %v1890_v13  ;;  %v1891_v18 = vpop.f32.mrf.mxu1 }
 0x2a1   : > { %v1892_v30 = vadd.f32 %v1891_v18, %v1722_v17  ;;  %v3303_v17 = vld [vmem:[%s4312_s26 + $0x380] sm:$0xf]  ;;  %v3643_v18 = vld [vmem:[%s4312_s26 + $0x38c] sm:$0xf0] }
 0x2a2   : > { %v2228_v20 = vadd.f32 %v2227_v15, %v2059_v16  ;;  %v640_v15 = vld [vmem:[#allocation2 + $0x20] sm:$0xff]  ;;  %v3304_v29 = vor.u32 %v3643_v18, %v3303_v17  ;;  %v3337_v17 = vld [vmem:[%s4312_s26 + $0x3d0] sm:$0xf0]  ;;  %v3343_v18 = vld [vmem:[%s4312_s26 + $0x3c8] sm:$0xf] }
 0x2a4   : > { %v2336_v23 = vadd.f32 %v2228_v20, %v636_v19  ;;  %v3641_v20 = vld [vmem:[%s4312_s26 + $0x384] sm:$0xf] }
 0x2a6   : > { %2400 = vst [vmem:[#allocation2 + $0x100] sm:$0xff] %v2336_v23  ;;  %v3644_v23 = vld [vmem:[%s4312_s26 + $0x394] sm:$0xf0] }
 0x2a7   : > { %v2060_v31 = vpop.f32.mrf.mxu2  ;;  %v1725_v36 = vpop.f32.mrf.mxu0 }
 0x2a8   : > { %v2229_v32 = vpop.f32.mrf.mxu3  ;;  %v2061_v35 = vadd.f32 %v2060_v31, %v1892_v30  ;;  %v1894_v37 = vpop.f32.mrf.mxu1  ;;  %v3308_v30 = vor.u32 %v3641_v20, %v3305_v21  ;;  %v3650_v20 = vld [vmem:[%s4312_s26 + $0x3cc] sm:$0xf]  ;;  %v3345_v21 = vld [vmem:[%s4312_s26 + $0x3d8] sm:$0xf0] }
 0x2a9   : > { %v1895_v43 = vadd.f32 %v1894_v37, %v1725_v36  ;;  %v641_v36 = vld [vmem:[#allocation2 + $0x128] sm:$0xff] }
 0x2aa   : > { %v2230_v41 = vadd.f32 %v2229_v32, %v2061_v35  ;;  %1764 = vmatmul.bf16.gmra.mxu0 %v3272_v33  ;;  %v3316_v35 = vor.u32 %v3642_v24, %v3313_v25 }
 0x2ab   : > { %1933 = vmatmul.bf16.gmra.mxu1 %v3276_v34  ;;  %v3312_v34 = vor.u32 %v3644_v23, %v3311_v22 }
 0x2ac   : > { %v2337_v42 = vadd.f32 %v2230_v41, %v637_v40  ;;  %2102 = vmatmul.bf16.gmra.mxu2 %v3280_v38 }
 0x2ad   : > { %2271 = vmatmul.bf16.gmra.mxu3 %v3284_v39 }
 0x2ae   : > { %2401 = vst [vmem:[#allocation2 + $0xc8] sm:$0xff] %v2337_v42 }
 0x2af   : > { %v2063_v44 = vpop.f32.mrf.mxu2  ;;  %v1727_v47 = vpop.f32.mrf.mxu0 }
 0x2b0   : > { %v2232_v45 = vpop.f32.mrf.mxu3  ;;  %v2064_v46 = vadd.f32 %v2063_v44, %v1895_v43  ;;  %v1896_v48 = vpop.f32.mrf.mxu1 }
 0x2b1   : > { %v1897_v60 = vadd.f32 %v1896_v48, %v1727_v47  ;;  %v3319_v47 = vld [vmem:[%s4312_s26 + $0x3a0] sm:$0xf]  ;;  %v3647_v48 = vld [vmem:[%s4312_s26 + $0x3ac] sm:$0xf0] }
 0x2b2   : > { %v2233_v50 = vadd.f32 %v2232_v45, %v2064_v46  ;;  %v642_v45 = vld [vmem:[#allocation2 + $0x1a0] sm:$0xff]  ;;  %v3320_v59 = vor.u32 %v3647_v48, %v3319_v47  ;;  %v3353_v47 = vld [vmem:[%s4312_s26 + $0x3f0] sm:$0xf0]  ;;  %v3359_v48 = vld [vmem:[%s4312_s26 + $0x3e8] sm:$0xf] }
 0x2b4   : > { %v2338_v53 = vadd.f32 %v2233_v50, %v638_v49  ;;  %v3645_v50 = vld [vmem:[%s4312_s26 + $0x3a4] sm:$0xf] }
 0x2b6   : > { %2402 = vst [vmem:[#allocation2 + $0x40] sm:$0xff] %v2338_v53  ;;  %v3648_v53 = vld [vmem:[%s4312_s26 + $0x3b4] sm:$0xf0] }
 0x2b7   : > { %v2065_v61 = vpop.f32.mrf.mxu2  ;;  %v1730_v2 = vpop.f32.mrf.mxu0 }
 0x2b8   : > { %v2234_v62 = vpop.f32.mrf.mxu3  ;;  %v2066_v1 = vadd.f32 %v2065_v61, %v1897_v60  ;;  %v1899_v3 = vpop.f32.mrf.mxu1  ;;  %v3324_v60 = vor.u32 %v3645_v50, %v3321_v51  ;;  %v3654_v50 = vld [vmem:[%s4312_s26 + $0x3ec] sm:$0xf]  ;;  %v3361_v51 = vld [vmem:[%s4312_s26 + $0x3f8] sm:$0xf0] }
 0x2b9   : > { %v1900_v9 = vadd.f32 %v1899_v3, %v1730_v2  ;;  %v643_v2 = vld [vmem:[#allocation2 + $0x1f0] sm:$0xff] }
 0x2ba   : > { %v2235_v7 = vadd.f32 %v2234_v62, %v2066_v1  ;;  %1769 = vmatmul.bf16.gmra.mxu0 %v3288_v63  ;;  %v3332_v1 = vor.u32 %v3646_v54, %v3329_v55 }
 0x2bb   : > { %1938 = vmatmul.bf16.gmra.mxu1 %v3292_v0  ;;  %v3328_v0 = vor.u32 %v3648_v53, %v3327_v52 }
 0x2bc   : > { %v2339_v8 = vadd.f32 %v2235_v7, %v639_v6  ;;  %2107 = vmatmul.bf16.gmra.mxu2 %v3296_v4 }
 0x2bd   : > { %2276 = vmatmul.bf16.gmra.mxu3 %v3300_v5 }
 0x2be   : > { %2403 = vst [vmem:[#allocation2 + $0x1f8] sm:$0xff] %v2339_v8 }
 0x2bf   : > { %v2068_v10 = vpop.f32.mrf.mxu2  ;;  %v1732_v13 = vpop.f32.mrf.mxu0 }
 0x2c0   : > { %v2237_v11 = vpop.f32.mrf.mxu3  ;;  %v2069_v12 = vadd.f32 %v2068_v10, %v1900_v9  ;;  %v1901_v14 = vpop.f32.mrf.mxu1 }
 0x2c1   : > { %v1902_v26 = vadd.f32 %v1901_v14, %v1732_v13  ;;  %v3335_v13 = vld [vmem:[%s4312_s26 + $0x3c0] sm:$0xf]  ;;  %v3651_v14 = vld [vmem:[%s4312_s26 + $0x3cc] sm:$0xf0] }
 0x2c2   : > { %v2238_v16 = vadd.f32 %v2237_v11, %v2069_v12  ;;  %v644_v11 = vld [vmem:[#allocation2 + $0xe8] sm:$0xff]  ;;  %v3336_v25 = vor.u32 %v3651_v14, %v3335_v13 }
 0x2c4   : > { %v2340_v19 = vadd.f32 %v2238_v16, %v640_v15  ;;  %v3649_v16 = vld [vmem:[%s4312_s26 + $0x3c4] sm:$0xf] }
 0x2c6   : > { %2404 = vst [vmem:[#allocation2 + $0x20] sm:$0xff] %v2340_v19  ;;  %v3652_v19 = vld [vmem:[%s4312_s26 + $0x3d4] sm:$0xf0] }
 0x2c7   : > { %v2070_v27 = vpop.f32.mrf.mxu2  ;;  %v1735_v32 = vpop.f32.mrf.mxu0 }
 0x2c8   : > { %v2239_v28 = vpop.f32.mrf.mxu3  ;;  %v2071_v31 = vadd.f32 %v2070_v27, %v1902_v26  ;;  %v1904_v33 = vpop.f32.mrf.mxu1  ;;  %v3340_v26 = vor.u32 %v3649_v16, %v3337_v17  ;;  %v649_v16 = vld [vmem:[#allocation2 + $0xd0] sm:$0xff] }
 0x2c9   : > { %v1905_v39 = vadd.f32 %v1904_v33, %v1735_v32  ;;  %v645_v32 = vld [vmem:[#allocation2 + $0x78] sm:$0xff] }
 0x2ca   : > { %v2240_v37 = vadd.f32 %v2239_v28, %v2071_v31  ;;  %1774 = vmatmul.bf16.gmra.mxu0 %v3304_v29  ;;  %v3348_v31 = vor.u32 %v3650_v20, %v3345_v21 }
 0x2cb   : > { %1943 = vmatmul.bf16.gmra.mxu1 %v3308_v30  ;;  %v3344_v30 = vor.u32 %v3652_v19, %v3343_v18 }
 0x2cc   : > { %v2341_v38 = vadd.f32 %v2240_v37, %v641_v36  ;;  %2112 = vmatmul.bf16.gmra.mxu2 %v3312_v34 }
 0x2cd   : > { %2281 = vmatmul.bf16.gmra.mxu3 %v3316_v35 }
 0x2ce   : > { %2405 = vst [vmem:[#allocation2 + $0x128] sm:$0xff] %v2341_v38 }
 0x2cf   : > { %v2073_v40 = vpop.f32.mrf.mxu2  ;;  %v1737_v43 = vpop.f32.mrf.mxu0 }
 0x2d0   : > { %v2242_v41 = vpop.f32.mrf.mxu3  ;;  %v2074_v42 = vadd.f32 %v2073_v40, %v1905_v39  ;;  %v1906_v44 = vpop.f32.mrf.mxu1 }
 0x2d1   : > { %v1907_v56 = vadd.f32 %v1906_v44, %v1737_v43  ;;  %v3351_v43 = vld [vmem:[%s4312_s26 + $0x3e0] sm:$0xf]  ;;  %v3655_v44 = vld [vmem:[%s4312_s26 + $0x3ec] sm:$0xf0] }
 0x2d2   : > { %v2243_v46 = vadd.f32 %v2242_v41, %v2074_v42  ;;  %v646_v41 = vld [vmem:[#allocation2 + $0x70] sm:$0xff]  ;;  %v3352_v55 = vor.u32 %v3655_v44, %v3351_v43  ;;  %v652_v43 = vld [vmem:[#allocation2 + $0xa8] sm:$0xff] }
 0x2d4   : > { %v2342_v49 = vadd.f32 %v2243_v46, %v642_v45  ;;  %v3653_v46 = vld [vmem:[%s4312_s26 + $0x3e4] sm:$0xf] }
 0x2d6   : > { %2406 = vst [vmem:[#allocation2 + $0x1a0] sm:$0xff] %v2342_v49  ;;  %v3656_v49 = vld [vmem:[%s4312_s26 + $0x3f4] sm:$0xf0] }
 0x2d7   : > { %v2075_v57 = vpop.f32.mrf.mxu2  ;;  %v1740_v62 = vpop.f32.mrf.mxu0 }
 0x2d8   : > { %v2244_v58 = vpop.f32.mrf.mxu3  ;;  %v2076_v61 = vadd.f32 %v2075_v57, %v1907_v56  ;;  %v1909_v63 = vpop.f32.mrf.mxu1  ;;  %v3356_v56 = vor.u32 %v3653_v46, %v3353_v47 }
 0x2d9   : > { %v1910_v5 = vadd.f32 %v1909_v63, %v1740_v62  ;;  %v647_v62 = vld [vmem:[#allocation2 + $0x90] sm:$0xff] }
 0x2da   : > { %v2245_v3 = vadd.f32 %v2244_v58, %v2076_v61  ;;  %1779 = vmatmul.bf16.gmra.mxu0 %v3320_v59  ;;  %v3364_v61 = vor.u32 %v3654_v50, %v3361_v51 }
 0x2db   : > { %1948 = vmatmul.bf16.gmra.mxu1 %v3324_v60  ;;  %v3360_v60 = vor.u32 %v3656_v49, %v3359_v48 }
 0x2dc   : > { %v2343_v4 = vadd.f32 %v2245_v3, %v643_v2  ;;  %2117 = vmatmul.bf16.gmra.mxu2 %v3328_v0 }
 0x2dd   : > { %2286 = vmatmul.bf16.gmra.mxu3 %v3332_v1 }
 0x2de   : > { %2407 = vst [vmem:[#allocation2 + $0x1f0] sm:$0xff] %v2343_v4 }
 0x2df   : > { %v2078_v6 = vpop.f32.mrf.mxu2  ;;  %v1742_v9 = vpop.f32.mrf.mxu0 }
 0x2e0   : > { %v2247_v7 = vpop.f32.mrf.mxu3  ;;  %v2079_v8 = vadd.f32 %v2078_v6, %v1910_v5  ;;  %v1911_v10 = vpop.f32.mrf.mxu1 }
 0x2e1   : > { %v1912_v22 = vadd.f32 %v1911_v10, %v1742_v9 }
 0x2e2   : > { %v2248_v12 = vadd.f32 %v2247_v7, %v2079_v8  ;;  %v648_v7 = vld [vmem:[#allocation2 + $0x1d8] sm:$0xff] }
 0x2e4   : > { %v2344_v15 = vadd.f32 %v2248_v12, %v644_v11 }
 0x2e6   : > { %2408 = vst [vmem:[#allocation2 + $0xe8] sm:$0xff] %v2344_v15 }
 0x2e7   : > { %v2080_v23 = vpop.f32.mrf.mxu2  ;;  %v1745_v28 = vpop.f32.mrf.mxu0 }
 0x2e8   : > { %v2249_v24 = vpop.f32.mrf.mxu3  ;;  %v2081_v27 = vadd.f32 %v2080_v23, %v1912_v22  ;;  %v1914_v29 = vpop.f32.mrf.mxu1 }
 0x2e9   : > { %v1915_v35 = vadd.f32 %v1914_v29, %v1745_v28 }
 0x2ea   : > { %v2250_v33 = vadd.f32 %v2249_v24, %v2081_v27  ;;  %1784 = vmatmul.bf16.gmra.mxu0 %v3336_v25  ;;  %v650_v25 = vld [vmem:[#allocation2 + $0xb8] sm:$0xff] }
 0x2eb   : > { %1953 = vmatmul.bf16.gmra.mxu1 %v3340_v26 }
 0x2ec   : > { %v2345_v34 = vadd.f32 %v2250_v33, %v645_v32  ;;  %2122 = vmatmul.bf16.gmra.mxu2 %v3344_v30 }
 0x2ed   : > { %2291 = vmatmul.bf16.gmra.mxu3 %v3348_v31 }
 0x2ee   : > { %2409 = vst [vmem:[#allocation2 + $0x78] sm:$0xff] %v2345_v34  ;;  %v651_v34 = vld [vmem:[#allocation2 + $0x88] sm:$0xff] }
 0x2ef   : > { %v2083_v36 = vpop.f32.mrf.mxu2  ;;  %v1747_v39 = vpop.f32.mrf.mxu0 }
 0x2f0   : > { %v2252_v37 = vpop.f32.mrf.mxu3  ;;  %v2084_v38 = vadd.f32 %v2083_v36, %v1915_v35  ;;  %v1916_v40 = vpop.f32.mrf.mxu1 }
 0x2f1   : > { %v1917_v52 = vadd.f32 %v1916_v40, %v1747_v39 }
 0x2f2   : > { %v2253_v42 = vadd.f32 %v2252_v37, %v2084_v38 }
 0x2f4   : > { %v2346_v45 = vadd.f32 %v2253_v42, %v646_v41 }
 0x2f6   : > { %2410 = vst [vmem:[#allocation2 + $0x70] sm:$0xff] %v2346_v45 }
 0x2f7   : > { %v2085_v53 = vpop.f32.mrf.mxu2  ;;  %v1750_v58 = vpop.f32.mrf.mxu0 }
 0x2f8   : > { %v2254_v54 = vpop.f32.mrf.mxu3  ;;  %v2086_v57 = vadd.f32 %v2085_v53, %v1917_v52  ;;  %v1919_v59 = vpop.f32.mrf.mxu1  ;;  %v653_v52 = vld [vmem:[#allocation2 + $0x1c8] sm:$0xff] }
 0x2f9   : > { %v1920_v1 = vadd.f32 %v1919_v59, %v1750_v58 }
 0x2fa   : > { %v2255_v63 = vadd.f32 %v2254_v54, %v2086_v57  ;;  %1789 = vmatmul.bf16.gmra.mxu0 %v3352_v55 }
 0x2fb   : > { %1958 = vmatmul.bf16.gmra.mxu1 %v3356_v56 }
 0x2fc   : > { %v2347_v0 = vadd.f32 %v2255_v63, %v647_v62  ;;  %2127 = vmatmul.bf16.gmra.mxu2 %v3360_v60 }
 0x2fd   : > { %2296 = vmatmul.bf16.gmra.mxu3 %v3364_v61  ;;  %v654_v61 = vld [vmem:[#allocation2 + $0x170] sm:$0xff] }
 0x2fe   : > { %2411 = vst [vmem:[#allocation2 + $0x90] sm:$0xff] %v2347_v0 }
 0x2ff   : > { %v2088_v2 = vpop.f32.mrf.mxu2  ;;  %v1752_v5 = vpop.f32.mrf.mxu0 }
 0x300   : > { %v2257_v3 = vpop.f32.mrf.mxu3  ;;  %v2089_v4 = vadd.f32 %v2088_v2, %v1920_v1  ;;  %v1921_v6 = vpop.f32.mrf.mxu1 }
 0x301   : > { %v1922_v10 = vadd.f32 %v1921_v6, %v1752_v5  ;;  %v655_v6 = vld [vmem:[#allocation2 + $0x178] sm:$0xff] }
 0x302   : > { %v2258_v8 = vadd.f32 %v2257_v3, %v2089_v4 }
 0x304   : > { %v2348_v9 = vadd.f32 %v2258_v8, %v648_v7 }
 0x306   : > { %2412 = vst [vmem:[#allocation2 + $0x1d8] sm:$0xff] %v2348_v9 }
 0x307   : > { %v2090_v11 = vpop.f32.mrf.mxu2  ;;  %v1755_v14 = vpop.f32.mrf.mxu0 }
 0x308   : > { %v2259_v12 = vpop.f32.mrf.mxu3  ;;  %v2091_v13 = vadd.f32 %v2090_v11, %v1922_v10  ;;  %v1924_v15 = vpop.f32.mrf.mxu1 }
 0x309   : > { %v1925_v19 = vadd.f32 %v1924_v15, %v1755_v14  ;;  %v656_v15 = vld [vmem:[#allocation2 + $0x68] sm:$0xff] }
 0x30a   : > { %v2260_v17 = vadd.f32 %v2259_v12, %v2091_v13 }
 0x30c   : > { %v2349_v18 = vadd.f32 %v2260_v17, %v649_v16 }
 0x30e   : > { %2413 = vst [vmem:[#allocation2 + $0xd0] sm:$0xff] %v2349_v18 }
 0x30f   : > { %v2093_v20 = vpop.f32.mrf.mxu2  ;;  %v1757_v23 = vpop.f32.mrf.mxu0 }
 0x310   : > { %v2262_v21 = vpop.f32.mrf.mxu3  ;;  %v2094_v22 = vadd.f32 %v2093_v20, %v1925_v19  ;;  %v1926_v24 = vpop.f32.mrf.mxu1 }
 0x311   : > { %v1927_v28 = vadd.f32 %v1926_v24, %v1757_v23  ;;  %v657_v24 = vld [vmem:[#allocation2 + $0x190] sm:$0xff] }
 0x312   : > { %v2263_v26 = vadd.f32 %v2262_v21, %v2094_v22 }
 0x314   : > { %v2350_v27 = vadd.f32 %v2263_v26, %v650_v25 }
 0x316   : > { %2414 = vst [vmem:[#allocation2 + $0xb8] sm:$0xff] %v2350_v27 }
 0x317   : > { %v2095_v29 = vpop.f32.mrf.mxu2  ;;  %v1760_v32 = vpop.f32.mrf.mxu0 }
 0x318   : > { %v2264_v30 = vpop.f32.mrf.mxu3  ;;  %v2096_v31 = vadd.f32 %v2095_v29, %v1927_v28  ;;  %v1929_v33 = vpop.f32.mrf.mxu1 }
 0x319   : > { %v1930_v37 = vadd.f32 %v1929_v33, %v1760_v32  ;;  %v658_v33 = vld [vmem:[#allocation2 + $0x198] sm:$0xff] }
 0x31a   : > { %v2265_v35 = vadd.f32 %v2264_v30, %v2096_v31 }
 0x31c   : > { %v2351_v36 = vadd.f32 %v2265_v35, %v651_v34 }
 0x31e   : > { %2415 = vst [vmem:[#allocation2 + $0x88] sm:$0xff] %v2351_v36 }
 0x31f   : > { %v2098_v38 = vpop.f32.mrf.mxu2  ;;  %v1762_v41 = vpop.f32.mrf.mxu0 }
 0x320   : > { %v2267_v39 = vpop.f32.mrf.mxu3  ;;  %v2099_v40 = vadd.f32 %v2098_v38, %v1930_v37  ;;  %v1931_v42 = vpop.f32.mrf.mxu1 }
 0x321   : > { %v1932_v46 = vadd.f32 %v1931_v42, %v1762_v41  ;;  %v659_v42 = vld [vmem:[#allocation2 + $0x38] sm:$0xff] }
 0x322   : > { %v2268_v44 = vadd.f32 %v2267_v39, %v2099_v40 }
 0x324   : > { %v2352_v45 = vadd.f32 %v2268_v44, %v652_v43 }
 0x326   : > { %2416 = vst [vmem:[#allocation2 + $0xa8] sm:$0xff] %v2352_v45 }
 0x327   : > { %v2100_v47 = vpop.f32.mrf.mxu2  ;;  %v1765_v50 = vpop.f32.mrf.mxu0 }
 0x328   : > { %v2269_v48 = vpop.f32.mrf.mxu3  ;;  %v2101_v49 = vadd.f32 %v2100_v47, %v1932_v46  ;;  %v1934_v51 = vpop.f32.mrf.mxu1 }
 0x329   : > { %v1935_v55 = vadd.f32 %v1934_v51, %v1765_v50  ;;  %v660_v51 = vld [vmem:[#allocation2 + $0xc0] sm:$0xff] }
 0x32a   : > { %v2270_v53 = vadd.f32 %v2269_v48, %v2101_v49 }
 0x32c   : > { %v2353_v54 = vadd.f32 %v2270_v53, %v653_v52 }
 0x32e   : > { %2417 = vst [vmem:[#allocation2 + $0x1c8] sm:$0xff] %v2353_v54 }
 0x32f   : > { %v2103_v56 = vpop.f32.mrf.mxu2  ;;  %v1767_v59 = vpop.f32.mrf.mxu0 }
 0x330   : > { %v2272_v57 = vpop.f32.mrf.mxu3  ;;  %v2104_v58 = vadd.f32 %v2103_v56, %v1935_v55  ;;  %v1936_v60 = vpop.f32.mrf.mxu1 }
 0x331   : > { %v1937_v0 = vadd.f32 %v1936_v60, %v1767_v59  ;;  %v661_v60 = vld [vmem:[#allocation2 + $0x1c0] sm:$0xff] }
 0x332   : > { %v2273_v62 = vadd.f32 %v2272_v57, %v2104_v58 }
 0x334   : > { %v2354_v63 = vadd.f32 %v2273_v62, %v654_v61 }
 0x336   : > { %2418 = vst [vmem:[#allocation2 + $0x170] sm:$0xff] %v2354_v63 }
 0x337   : > { %v2105_v1 = vpop.f32.mrf.mxu2  ;;  %v1770_v4 = vpop.f32.mrf.mxu0 }
 0x338   : > { %v2274_v2 = vpop.f32.mrf.mxu3  ;;  %v2106_v3 = vadd.f32 %v2105_v1, %v1937_v0  ;;  %v1939_v5 = vpop.f32.mrf.mxu1 }
 0x339   : > { %v1940_v9 = vadd.f32 %v1939_v5, %v1770_v4  ;;  %v662_v5 = vld [vmem:[#allocation2 + $0x158] sm:$0xff] }
 0x33a   : > { %v2275_v7 = vadd.f32 %v2274_v2, %v2106_v3 }
 0x33c   : > { %v2355_v8 = vadd.f32 %v2275_v7, %v655_v6 }
 0x33e   : > { %2419 = vst [vmem:[#allocation2 + $0x178] sm:$0xff] %v2355_v8 }
 0x33f   : > { %v2108_v10 = vpop.f32.mrf.mxu2  ;;  %v1772_v13 = vpop.f32.mrf.mxu0 }
 0x340   : > { %v2277_v11 = vpop.f32.mrf.mxu3  ;;  %v2109_v12 = vadd.f32 %v2108_v10, %v1940_v9  ;;  %v1941_v14 = vpop.f32.mrf.mxu1 }
 0x341   : > { %v1942_v18 = vadd.f32 %v1941_v14, %v1772_v13 }
 0x342   : > { %v2278_v16 = vadd.f32 %v2277_v11, %v2109_v12  ;;  %v663_v12 = vld [vmem:[#allocation2 + $0x10] sm:$0xff] }
 0x344   : > { %v2356_v17 = vadd.f32 %v2278_v16, %v656_v15 }
 0x346   : > { %2420 = vst [vmem:[#allocation2 + $0x68] sm:$0xff] %v2356_v17 }
 0x347   : > { %v2110_v19 = vpop.f32.mrf.mxu2  ;;  %v1775_v22 = vpop.f32.mrf.mxu0 }
 0x348   : > { %v2279_v20 = vpop.f32.mrf.mxu3  ;;  %v2111_v21 = vadd.f32 %v2110_v19, %v1942_v18  ;;  %v1944_v23 = vpop.f32.mrf.mxu1 }
 0x349   : > { %v1945_v27 = vadd.f32 %v1944_v23, %v1775_v22 }
 0x34a   : > { %v2280_v25 = vadd.f32 %v2279_v20, %v2111_v21  ;;  %v664_v21 = vld [vmem:[#allocation2 + $0x58] sm:$0xff] }
 0x34c   : > { %v2357_v26 = vadd.f32 %v2280_v25, %v657_v24 }
 0x34e   : > { %2421 = vst [vmem:[#allocation2 + $0x190] sm:$0xff] %v2357_v26 }
 0x34f   : > { %v2113_v28 = vpop.f32.mrf.mxu2  ;;  %v1777_v31 = vpop.f32.mrf.mxu0 }
 0x350   : > { %v2282_v29 = vpop.f32.mrf.mxu3  ;;  %v2114_v30 = vadd.f32 %v2113_v28, %v1945_v27  ;;  %v1946_v32 = vpop.f32.mrf.mxu1 }
 0x351   : > { %v1947_v36 = vadd.f32 %v1946_v32, %v1777_v31 }
 0x352   : > { %v2283_v34 = vadd.f32 %v2282_v29, %v2114_v30  ;;  %v665_v29 = vld [vmem:[#allocation2 + $0xa0] sm:$0xff] }
 0x354   : > { %v2358_v35 = vadd.f32 %v2283_v34, %v658_v33 }
 0x356   : > { %2422 = vst [vmem:[#allocation2 + $0x198] sm:$0xff] %v2358_v35 }
 0x357   : > { %v2115_v37 = vpop.f32.mrf.mxu2  ;;  %v1780_v40 = vpop.f32.mrf.mxu0 }
 0x358   : > { %v2284_v38 = vpop.f32.mrf.mxu3  ;;  %v2116_v39 = vadd.f32 %v2115_v37, %v1947_v36  ;;  %v1949_v41 = vpop.f32.mrf.mxu1 }
 0x359   : > { %v1950_v45 = vadd.f32 %v1949_v41, %v1780_v40 }
 0x35a   : > { %v2285_v43 = vadd.f32 %v2284_v38, %v2116_v39 }
 0x35c   : > { %v2359_v44 = vadd.f32 %v2285_v43, %v659_v42 }
 0x35e   : > { %2423 = vst [vmem:[#allocation2 + $0x38] sm:$0xff] %v2359_v44 }
 0x35f   : > { %v2118_v46 = vpop.f32.mrf.mxu2  ;;  %v1782_v49 = vpop.f32.mrf.mxu0 }
 0x360   : > { %v2287_v47 = vpop.f32.mrf.mxu3  ;;  %v2119_v48 = vadd.f32 %v2118_v46, %v1950_v45  ;;  %v1951_v50 = vpop.f32.mrf.mxu1 }
 0x361   : > { %v1952_v54 = vadd.f32 %v1951_v50, %v1782_v49 }
 0x362   : > { %v2288_v52 = vadd.f32 %v2287_v47, %v2119_v48 }
 0x364   : > { %v2360_v53 = vadd.f32 %v2288_v52, %v660_v51 }
 0x366   : > { %2424 = vst [vmem:[#allocation2 + $0xc0] sm:$0xff] %v2360_v53 }
 0x367   : > { %v2120_v55 = vpop.f32.mrf.mxu2  ;;  %v1785_v58 = vpop.f32.mrf.mxu0 }
 0x368   : > { %v2289_v56 = vpop.f32.mrf.mxu3  ;;  %v2121_v57 = vadd.f32 %v2120_v55, %v1952_v54  ;;  %v1954_v59 = vpop.f32.mrf.mxu1 }
 0x369   : > { %v1955_v63 = vadd.f32 %v1954_v59, %v1785_v58 }
 0x36a   : > { %v2290_v61 = vadd.f32 %v2289_v56, %v2121_v57 }
 0x36c   : > { %v2361_v62 = vadd.f32 %v2290_v61, %v661_v60 }
 0x36e   : > { %2425 = vst [vmem:[#allocation2 + $0x1c0] sm:$0xff] %v2361_v62 }
 0x36f   : > { %v2123_v0 = vpop.f32.mrf.mxu2  ;;  %v1787_v3 = vpop.f32.mrf.mxu0 }
 0x370   : > { %v2292_v1 = vpop.f32.mrf.mxu3  ;;  %v2124_v2 = vadd.f32 %v2123_v0, %v1955_v63  ;;  %v1956_v4 = vpop.f32.mrf.mxu1 }
 0x371   : > { %v1957_v8 = vadd.f32 %v1956_v4, %v1787_v3 }
 0x372   : > { %v2293_v6 = vadd.f32 %v2292_v1, %v2124_v2 }
 0x374   : > { %v2362_v7 = vadd.f32 %v2293_v6, %v662_v5 }
 0x376   : > { %2426 = vst [vmem:[#allocation2 + $0x158] sm:$0xff] %v2362_v7 }
 0x377   : > { %v2125_v9 = vpop.f32.mrf.mxu2  ;;  %v1790_v13 = vpop.f32.mrf.mxu0 }
 0x378   : > { %v2294_v10 = vpop.f32.mrf.mxu3  ;;  %v2126_v11 = vadd.f32 %v2125_v9, %v1957_v8  ;;  %v1959_v14 = vpop.f32.mrf.mxu1 }
 0x379   : > { %v1960_v17 = vadd.f32 %v1959_v14, %v1790_v13 }
 0x37a   : > { %v2295_v15 = vadd.f32 %v2294_v10, %v2126_v11 }
 0x37c   : > { %v2363_v16 = vadd.f32 %v2295_v15, %v663_v12 }
 0x37e   : > { %2427 = vst [vmem:[#allocation2 + $0x10] sm:$0xff] %v2363_v16 }
 0x37f   : > { %v2128_v18 = vpop.f32.mrf.mxu2  ;;  %v1792_v23 = vpop.f32.mrf.mxu0 }
 0x380   : > { %v2297_v19 = vpop.f32.mrf.mxu3  ;;  %v2129_v20 = vadd.f32 %v2128_v18, %v1960_v17  ;;  %v1961_v24 = vpop.f32.mrf.mxu1 }
 0x381   : > { %v1962_v26 = vadd.f32 %v1961_v24, %v1792_v23 }
 0x382   : > { %v2298_v22 = vadd.f32 %v2297_v19, %v2129_v20 }
 0x384   : > { %v2364_v25 = vadd.f32 %v2298_v22, %v664_v21 }
 0x386   : > { %2428 = vst [vmem:[#allocation2 + $0x58] sm:$0xff] %v2364_v25 }
 0x387   : > { %v2130_v27 = vpop.f32.mrf.mxu2 }
 0x388   : > { %v2131_v28 = vadd.f32 %v2130_v27, %v1962_v26  ;;  %v2299_v30 = vpop.f32.mrf.mxu3 }
 0x38a   : > { %v2300_v31 = vadd.f32 %v2299_v30, %v2131_v28  ;;  %2433 = sbr.rel (%p3493_p12) target bundleno = 957 (0x3bd), region = 63 }
 0x38c   : > { %v2365_v32 = vadd.f32 %v2300_v31, %v665_v29 }
 0x38e   : > { %2429 = vst [vmem:[#allocation2 + $0xa0] sm:$0xff] %v2365_v32 }
 0x38f   : > { %v2434_v33 = vld [vmem:[#allocation2 + $0xb0] sm:$0xff]  ;;  %v4677_v35 = vld [vmem:[%s4798_s2] ss:$0 sm:$0xff]  ;;  %v2436_v36 = vld [vmem:[#allocation2 + $0xd8] sm:$0xff] }
 0x390   : > { %v2435_v34 = vld [vmem:[#allocation2 + $0x1b0] sm:$0xff]  ;;  %v2437_v37 = vld [vmem:[#allocation2 + $0x18] sm:$0xff]  ;;  %v2439_v39 = vld [vmem:[#allocation2 + $0x168] sm:$0xff]  ;;  %v2502_v41 = vadd.f32 %v4677_v35, %v2434_v33  ;;  %v2504_v43 = vadd.f32 %v4677_v35, %v2436_v36 }
 0x391   : > { %v2438_v38 = vld [vmem:[#allocation2 + $0x50] sm:$0xff]  ;;  %v2503_v42 = vadd.f32 %v4677_v35, %v2435_v34  ;;  %v2505_v44 = vadd.f32 %v4677_v35, %v2437_v37  ;;  %v2441_v45 = vld [vmem:[#allocation2 + $0x48] sm:$0xff]  ;;  %v2507_v47 = vadd.f32 %v4677_v35, %v2439_v39  ;;  %v2442_v50 = vld [vmem:[#allocation2 + $0x180] sm:$0xff] }
 0x392   : > { %v2440_v40 = vld [vmem:[#allocation2 + $0x130] sm:$0xff]  ;;  %v2506_v46 = vadd.f32 %v4677_v35, %v2438_v38  ;;  %v2509_v49 = vadd.f32 %v4677_v35, %v2441_v45  ;;  %v2566_v52 = vmax.f32 %v2502_v41, 0.0  ;;  %v2568_v54 = vmax.f32 %v2504_v43, 0.0  ;;  %v2444_v56 = vld [vmem:[#allocation2 + $0x118] sm:$0xff]  ;;  %v2446_v62 = vld [vmem:[#allocation2 + $0x120] sm:$0xff] }
 0x393   : > { %v2508_v48 = vadd.f32 %v4677_v35, %v2440_v40  ;;  %v2443_v51 = vld [vmem:[#allocation2 + $0x110] sm:$0xff]  ;;  %v2567_v53 = vmax.f32 %v2503_v42, 0.0  ;;  %v2569_v55 = vmax.f32 %v2505_v44, 0.0  ;;  %v2445_v57 = vld [vmem:[#allocation2 + $0x98] sm:$0xff]  ;;  %v2571_v59 = vmax.f32 %v2507_v47, 0.0  ;;  %v2448_v4 = vld [vmem:[#allocation2 + $0x108] sm:$0xff] }
 0x394   : > { %v2570_v58 = vmax.f32 %v2506_v46, 0.0  ;;  %v2573_v61 = vmax.f32 %v2509_v49, 0.0  ;;  %v2447_v63 = vld [vmem:[#allocation2 + $0x150] sm:$0xff]  ;;  %v2510_v2 = vadd.f32 %v4677_v35, %v2442_v50  ;;  %v2511_v3 = vadd.f32 %v4677_v35, %v2443_v51  ;;  %v2449_v5 = vld [vmem:[#allocation2 + $0x60] sm:$0xff]  ;;  %v2451_v15 = vld [vmem:[#allocation2 + $0x188] sm:$0xff] }
 0x395   : > { %v2572_v60 = vmax.f32 %v2508_v48, 0.0  ;;  %v3660_v0 = vpack.c.bf16 %v2567_v53, %v2566_v52  ;;  %v3665_v1 = vpack.c.bf16 %v2569_v55, %v2568_v54  ;;  %v2512_v8 = vadd.f32 %v4677_v35, %v2444_v56  ;;  %v2450_v10 = vld [vmem:[#allocation2 + $0xe0] sm:$0xff]  ;;  %v2452_v20 = vld [vmem:[#allocation2 + $0x138] sm:$0xff]  ;;  %v2455_v27 = vld [vmem:[#allocation2 + $0x1a8] sm:$0xff] }
 0x396   : > { %v3670_v6 = vpack.c.bf16 %v2571_v59, %v2570_v58  ;;  %v2513_v9 = vadd.f32 %v4677_v35, %v2445_v57  ;;  %v2574_v11 = vmax.f32 %v2510_v2, 0.0  ;;  %v2575_v12 = vmax.f32 %v2511_v3, 0.0  ;;  %v2453_v21 = vld [vmem:[#allocation2 + $0x140] sm:$0xff]  ;;  %v2456_v32 = vld [vmem:[#allocation2 + $0x1b8] sm:$0xff]  ;;  %v2457_v33 = vld [vmem:[#allocation2 + $0x28] sm:$0xff] }
 0x397   : > { %v3675_v7 = vpack.c.bf16 %v2573_v61, %v2572_v60  ;;  %3661 = vst [vmem:[%s4310_s24] sm:$0xff] %v3660_v0   ;;  %v2514_v13 = vadd.f32 %v4677_v35, %v2446_v62  ;;  %v2515_v14 = vadd.f32 %v4677_v35, %v2447_v63  ;;  %v2576_v16 = vmax.f32 %v2512_v8, 0.0  ;;  %v2454_v26 = vld [vmem:[#allocation2 + $0x80] sm:$0xff]  ;;  %v2458_v39 = vld [vmem:[#allocation2 + $0x1e8] sm:$0xff]  ;;  %v2459_v44 = vld [vmem:[#allocation2 + $0xf8] sm:$0xff] }
 0x398   : > { %3817 = vst [vmem:[%s4310_s24 + $0x8] sm:$0xff] %v3665_v1   ;;  %v2577_v17 = vmax.f32 %v2513_v9, 0.0  ;;  %v2516_v18 = vadd.f32 %v4677_v35, %v2448_v4  ;;  %v2517_v19 = vadd.f32 %v4677_v35, %v2449_v5  ;;  %v3680_v22 = vpack.c.bf16 %v2575_v12, %v2574_v11  ;;  %v2460_v49 = vld [vmem:[#allocation2 + $0x160] sm:$0xff]  ;;  %v2461_v50 = vld [vmem:[#allocation2 + $0x30] sm:$0xff]  ;;  %v2465_v62 = vld [vmem:[#allocation2 + $0x8] sm:$0xff] }
 0x399   : > { %3818 = vst [vmem:[%s4310_s24 + $0x10] sm:$0xff] %v3670_v6   ;;  %v2578_v23 = vmax.f32 %v2514_v13, 0.0  ;;  %v2579_v24 = vmax.f32 %v2515_v14, 0.0  ;;  %v2518_v25 = vadd.f32 %v4677_v35, %v2450_v10  ;;  %v2519_v31 = vadd.f32 %v4677_v35, %v2451_v15  ;;  %v2462_v55 = vld [vmem:[#allocation2 + $0x1e0] sm:$0xff]  ;;  %v2464_v61 = vld [vmem:[#allocation2 + $0xf0] sm:$0xff]  ;;  %v2466_v3 = vld [vmem:[#allocation2 + $0x148] sm:$0xff] }
 0x39a   : > { %3819 = vst [vmem:[%s4310_s24 + $0x18] sm:$0xff] %v3675_v7   ;;  %v3685_v28 = vpack.c.bf16 %v2577_v17, %v2576_v16  ;;  %v2580_v29 = vmax.f32 %v2516_v18, 0.0  ;;  %v2581_v30 = vmax.f32 %v2517_v19, 0.0  ;;  %v2520_v37 = vadd.f32 %v4677_v35, %v2452_v20  ;;  %v2463_v56 = vld [vmem:[#allocation2] sm:$0xff]  ;;  %v2467_v8 = vld [vmem:[#allocation2 + $0x1d0] sm:$0xff]  ;;  %v2469_v14 = vld [vmem:[#allocation2 + $0xc8] sm:$0xff] }
 0x39b   : > { %3820 = vst [vmem:[%s4310_s24 + $0x20] sm:$0xff] %v3680_v22   ;;  %v3690_v34 = vpack.c.bf16 %v2579_v24, %v2578_v23  ;;  %v2582_v36 = vmax.f32 %v2518_v25, 0.0  ;;  %v2521_v38 = vadd.f32 %v4677_v35, %v2453_v21  ;;  %v2583_v41 = vmax.f32 %v2519_v31, 0.0  ;;  %v2468_v13 = vld [vmem:[#allocation2 + $0x100] sm:$0xff]  ;;  %v2471_v20 = vld [vmem:[#allocation2 + $0x1f8] sm:$0xff] }
 0x39c   : > { %3821 = vst [vmem:[%s4310_s24 + $0x28] sm:$0xff] %v3685_v28   ;;  %v3695_v40 = vpack.c.bf16 %v2581_v30, %v2580_v29  ;;  %v2522_v42 = vadd.f32 %v4677_v35, %v2454_v26  ;;  %v2523_v43 = vadd.f32 %v4677_v35, %v2455_v27  ;;  %v2584_v45 = vmax.f32 %v2520_v37, 0.0  ;;  %v2470_v19 = vld [vmem:[#allocation2 + $0x40] sm:$0xff]  ;;  %v2473_v26 = vld [vmem:[#allocation2 + $0x128] sm:$0xff]  ;;  %v2475_v37 = vld [vmem:[#allocation2 + $0x1f0] sm:$0xff] }
 0x39d   : > { %3822 = vst [vmem:[%s4310_s24 + $0x30] sm:$0xff] %v3690_v34   ;;  %v2585_v46 = vmax.f32 %v2521_v38, 0.0  ;;  %v2524_v47 = vadd.f32 %v4677_v35, %v2456_v32  ;;  %v2525_v48 = vadd.f32 %v4677_v35, %v2457_v33  ;;  %v3700_v51 = vpack.c.bf16 %v2583_v41, %v2582_v36  ;;  %v2472_v25 = vld [vmem:[#allocation2 + $0x20] sm:$0xff] }
 0x39e   : > { %3823 = vst [vmem:[%s4310_s24 + $0x38] sm:$0xff] %v3695_v40   ;;  %v2586_v52 = vmax.f32 %v2522_v42, 0.0  ;;  %v2587_v53 = vmax.f32 %v2523_v43, 0.0  ;;  %v2526_v54 = vadd.f32 %v4677_v35, %v2458_v39  ;;  %v2527_v60 = vadd.f32 %v4677_v35, %v2459_v44  ;;  %v2474_v31 = vld [vmem:[#allocation2 + $0x1a0] sm:$0xff]  ;;  %v2476_v42 = vld [vmem:[#allocation2 + $0xe8] sm:$0xff]  ;;  %v2477_v43 = vld [vmem:[#allocation2 + $0x78] sm:$0xff] }
 0x39f   : > { %v3705_v57 = vpack.c.bf16 %v2585_v46, %v2584_v45  ;;  %v2588_v58 = vmax.f32 %v2524_v47, 0.0  ;;  %v2589_v59 = vmax.f32 %v2525_v48, 0.0  ;;  %3824 = vst [vmem:[%s4310_s24 + $0x40] sm:$0xff] %v3700_v51   ;;  %v2528_v1 = vadd.f32 %v4677_v35, %v2460_v49  ;;  %v2478_v48 = vld [vmem:[#allocation2 + $0x70] sm:$0xff] }
 0x3a0   : > { %v3710_v63 = vpack.c.bf16 %v2587_v53, %v2586_v52  ;;  %v2590_v0 = vmax.f32 %v2526_v54, 0.0  ;;  %v2529_v2 = vadd.f32 %v4677_v35, %v2461_v50  ;;  %v2591_v5 = vmax.f32 %v2527_v60, 0.0  ;;  %v2479_v49 = vld [vmem:[#allocation2 + $0x90] sm:$0xff]  ;;  %v2480_v54 = vld [vmem:[#allocation2 + $0x1d8] sm:$0xff] }
 0x3a1   : > { %3825 = vst [vmem:[%s4310_s24 + $0x48] sm:$0xff] %v3705_v57   ;;  %v3715_v4 = vpack.c.bf16 %v2589_v59, %v2588_v58  ;;  %v2530_v6 = vadd.f32 %v4677_v35, %v2462_v55  ;;  %v2531_v7 = vadd.f32 %v4677_v35, %v2463_v56  ;;  %v2592_v9 = vmax.f32 %v2528_v1, 0.0  ;;  %v2481_v55 = vld [vmem:[#allocation2 + $0xd0] sm:$0xff]  ;;  %v2482_v60 = vld [vmem:[#allocation2 + $0xb8] sm:$0xff]  ;;  %v2483_v1 = vld [vmem:[#allocation2 + $0x88] sm:$0xff] }
 0x3a2   : > { %3826 = vst [vmem:[%s4310_s24 + $0x50] sm:$0xff] %v3710_v63   ;;  %v2593_v10 = vmax.f32 %v2529_v2, 0.0  ;;  %v2532_v11 = vadd.f32 %v4677_v35, %v2464_v61  ;;  %v2533_v12 = vadd.f32 %v4677_v35, %v2465_v62  ;;  %v3720_v15 = vpack.c.bf16 %v2591_v5, %v2590_v0 }
 0x3a3   : > { %3827 = vst [vmem:[%s4310_s24 + $0x58] sm:$0xff] %v3715_v4   ;;  %v2594_v16 = vmax.f32 %v2530_v6, 0.0  ;;  %v2595_v17 = vmax.f32 %v2531_v7, 0.0  ;;  %v2534_v18 = vadd.f32 %v4677_v35, %v2466_v3  ;;  %v2535_v24 = vadd.f32 %v4677_v35, %v2467_v8  ;;  %v2484_v6 = vld [vmem:[#allocation2 + $0xa8] sm:$0xff] }
 0x3a4   : > { %v3725_v21 = vpack.c.bf16 %v2593_v10, %v2592_v9  ;;  %v2596_v22 = vmax.f32 %v2532_v11, 0.0  ;;  %v2597_v23 = vmax.f32 %v2533_v12, 0.0  ;;  %3828 = vst [vmem:[%s4310_s24 + $0x60] sm:$0xff] %v3720_v15   ;;  %v2536_v29 = vadd.f32 %v4677_v35, %v2468_v13  ;;  %v2485_v7 = vld [vmem:[#allocation2 + $0x1c8] sm:$0xff]  ;;  %v2486_v12 = vld [vmem:[#allocation2 + $0x170] sm:$0xff]  ;;  %v2487_v13 = vld [vmem:[#allocation2 + $0x178] sm:$0xff] }
 0x3a5   : > { %v3730_v27 = vpack.c.bf16 %v2595_v17, %v2594_v16  ;;  %v2598_v28 = vmax.f32 %v2534_v18, 0.0  ;;  %v2537_v30 = vadd.f32 %v4677_v35, %v2469_v14  ;;  %v2599_v33 = vmax.f32 %v2535_v24, 0.0  ;;  %v2488_v18 = vld [vmem:[#allocation2 + $0x68] sm:$0xff]  ;;  %v2490_v24 = vld [vmem:[#allocation2 + $0x198] sm:$0xff] }
 0x3a6   : > { %3829 = vst [vmem:[%s4310_s24 + $0x68] sm:$0xff] %v3725_v21   ;;  %v3735_v32 = vpack.c.bf16 %v2597_v23, %v2596_v22  ;;  %v2538_v34 = vadd.f32 %v4677_v35, %v2470_v19  ;;  %v2539_v36 = vadd.f32 %v4677_v35, %v2471_v20  ;;  %v2600_v38 = vmax.f32 %v2536_v29, 0.0  ;;  %v2489_v19 = vld [vmem:[#allocation2 + $0x190] sm:$0xff]  ;;  %v2491_v29 = vld [vmem:[#allocation2 + $0x38] sm:$0xff] }
 0x3a7   : > { %3830 = vst [vmem:[%s4310_s24 + $0x70] sm:$0xff] %v3730_v27   ;;  %v2601_v39 = vmax.f32 %v2537_v30, 0.0  ;;  %v2540_v40 = vadd.f32 %v4677_v35, %v2472_v25  ;;  %v2541_v41 = vadd.f32 %v4677_v35, %v2473_v26  ;;  %v3740_v44 = vpack.c.bf16 %v2599_v33, %v2598_v28 }
 0x3a8   : > { %3831 = vst [vmem:[%s4310_s24 + $0x78] sm:$0xff] %v3735_v32   ;;  %v2602_v45 = vmax.f32 %v2538_v34, 0.0  ;;  %v2603_v46 = vmax.f32 %v2539_v36, 0.0  ;;  %v2542_v47 = vadd.f32 %v4677_v35, %v2474_v31  ;;  %v2543_v53 = vadd.f32 %v4677_v35, %v2475_v37  ;;  %v2492_v34 = vld [vmem:[#allocation2 + $0xc0] sm:$0xff] }
 0x3a9   : > { %v3745_v50 = vpack.c.bf16 %v2601_v39, %v2600_v38  ;;  %v2604_v51 = vmax.f32 %v2540_v40, 0.0  ;;  %v2605_v52 = vmax.f32 %v2541_v41, 0.0  ;;  %3832 = vst [vmem:[%s4310_s24 + $0x80] sm:$0xff] %v3740_v44   ;;  %v2544_v58 = vadd.f32 %v4677_v35, %v2476_v42  ;;  %v2493_v36 = vld [vmem:[#allocation2 + $0x1c0] sm:$0xff]  ;;  %v2494_v41 = vld [vmem:[#allocation2 + $0x158] sm:$0xff]  ;;  %v2495_v42 = vld [vmem:[#allocation2 + $0x10] sm:$0xff] }
 0x3aa   : > { %v3750_v56 = vpack.c.bf16 %v2603_v46, %v2602_v45  ;;  %v2606_v57 = vmax.f32 %v2542_v47, 0.0  ;;  %v2545_v59 = vadd.f32 %v4677_v35, %v2477_v43  ;;  %v2607_v62 = vmax.f32 %v2543_v53, 0.0  ;;  %v2496_v47 = vld [vmem:[#allocation2 + $0x58] sm:$0xff] }
 0x3ab   : > { %3833 = vst [vmem:[%s4310_s24 + $0x88] sm:$0xff] %v3745_v50   ;;  %v3755_v61 = vpack.c.bf16 %v2605_v52, %v2604_v51  ;;  %v2546_v63 = vadd.f32 %v4677_v35, %v2478_v48  ;;  %v2547_v0 = vadd.f32 %v4677_v35, %v2479_v49  ;;  %v2608_v2 = vmax.f32 %v2544_v58, 0.0  ;;  %v2497_v48 = vld [vmem:[#allocation2 + $0xa0] sm:$0xff] }
 0x3ac   : > { %3834 = vst [vmem:[%s4310_s24 + $0x90] sm:$0xff] %v3750_v56   ;;  %v2609_v3 = vmax.f32 %v2545_v59, 0.0  ;;  %v2548_v4 = vadd.f32 %v4677_v35, %v2480_v54  ;;  %v2549_v5 = vadd.f32 %v4677_v35, %v2481_v55  ;;  %v3760_v8 = vpack.c.bf16 %v2607_v62, %v2606_v57 }
 0x3ad   : > { %3835 = vst [vmem:[%s4310_s24 + $0x98] sm:$0xff] %v3755_v61   ;;  %v2610_v9 = vmax.f32 %v2546_v63, 0.0  ;;  %v2611_v10 = vmax.f32 %v2547_v0, 0.0  ;;  %v2550_v11 = vadd.f32 %v4677_v35, %v2482_v60  ;;  %v2551_v17 = vadd.f32 %v4677_v35, %v2483_v1 }
 0x3ae   : > { %v3765_v14 = vpack.c.bf16 %v2609_v3, %v2608_v2  ;;  %v2612_v15 = vmax.f32 %v2548_v4, 0.0  ;;  %v2613_v16 = vmax.f32 %v2549_v5, 0.0  ;;  %3836 = vst [vmem:[%s4310_s24 + $0xa0] sm:$0xff] %v3760_v8   ;;  %v2552_v22 = vadd.f32 %v4677_v35, %v2484_v6 }
 0x3af   : > { %v3770_v20 = vpack.c.bf16 %v2611_v10, %v2610_v9  ;;  %v2614_v21 = vmax.f32 %v2550_v11, 0.0  ;;  %v2553_v23 = vadd.f32 %v4677_v35, %v2485_v7  ;;  %v2615_v26 = vmax.f32 %v2551_v17, 0.0 }
 0x3b0   : > { %3837 = vst [vmem:[%s4310_s24 + $0xa8] sm:$0xff] %v3765_v14   ;;  %v3775_v25 = vpack.c.bf16 %v2613_v16, %v2612_v15  ;;  %v2554_v27 = vadd.f32 %v4677_v35, %v2486_v12  ;;  %v2555_v28 = vadd.f32 %v4677_v35, %v2487_v13  ;;  %v2616_v30 = vmax.f32 %v2552_v22, 0.0 }
 0x3b1   : > { %3838 = vst [vmem:[%s4310_s24 + $0xb0] sm:$0xff] %v3770_v20   ;;  %v2617_v31 = vmax.f32 %v2553_v23, 0.0  ;;  %v2556_v32 = vadd.f32 %v4677_v35, %v2488_v18  ;;  %v2557_v33 = vadd.f32 %v4677_v35, %v2489_v19  ;;  %v3780_v37 = vpack.c.bf16 %v2615_v26, %v2614_v21 }
 0x3b2   : > { %3839 = vst [vmem:[%s4310_s24 + $0xb8] sm:$0xff] %v3775_v25   ;;  %v2618_v38 = vmax.f32 %v2554_v27, 0.0  ;;  %v2619_v39 = vmax.f32 %v2555_v28, 0.0  ;;  %v2558_v40 = vadd.f32 %v4677_v35, %v2490_v24  ;;  %v2559_v46 = vadd.f32 %v4677_v35, %v2491_v29 }
 0x3b3   : > { %v3785_v43 = vpack.c.bf16 %v2617_v31, %v2616_v30  ;;  %v2620_v44 = vmax.f32 %v2556_v32, 0.0  ;;  %v2621_v45 = vmax.f32 %v2557_v33, 0.0  ;;  %3840 = vst [vmem:[%s4310_s24 + $0xc0] sm:$0xff] %v3780_v37   ;;  %v2560_v51 = vadd.f32 %v4677_v35, %v2492_v34 }
 0x3b4   : > { %v3790_v49 = vpack.c.bf16 %v2619_v39, %v2618_v38  ;;  %v2622_v50 = vmax.f32 %v2558_v40, 0.0  ;;  %v2561_v52 = vadd.f32 %v4677_v35, %v2493_v36  ;;  %v2623_v54 = vmax.f32 %v2559_v46, 0.0 }
 0x3b5   : > { %3841 = vst [vmem:[%s4310_s24 + $0xc8] sm:$0xff] %v3785_v43   ;;  %v3795_v53 = vpack.c.bf16 %v2621_v45, %v2620_v44  ;;  %v2562_v55 = vadd.f32 %v4677_v35, %v2494_v41  ;;  %v2563_v56 = vadd.f32 %v4677_v35, %v2495_v42  ;;  %v2624_v57 = vmax.f32 %v2560_v51, 0.0 }
 0x3b6   : > { %3842 = vst [vmem:[%s4310_s24 + $0xd0] sm:$0xff] %v3790_v49   ;;  %v2625_v58 = vmax.f32 %v2561_v52, 0.0  ;;  %v2564_v59 = vadd.f32 %v4677_v35, %v2496_v47  ;;  %v2565_v60 = vadd.f32 %v4677_v35, %v2497_v48  ;;  %v3800_v61 = vpack.c.bf16 %v2623_v54, %v2622_v50 }
 0x3b7   : > { %3843 = vst [vmem:[%s4310_s24 + $0xd8] sm:$0xff] %v3795_v53   ;;  %v2626_v62 = vmax.f32 %v2562_v55, 0.0  ;;  %v2627_v63 = vmax.f32 %v2563_v56, 0.0 }
 0x3b8   : > { %v3805_v0 = vpack.c.bf16 %v2625_v58, %v2624_v57  ;;  %v2628_v1 = vmax.f32 %v2564_v59, 0.0  ;;  %v2629_v2 = vmax.f32 %v2565_v60, 0.0  ;;  %3844 = vst [vmem:[%s4310_s24 + $0xe0] sm:$0xff] %v3800_v61  }
 0x3b9   : > { %v3810_v3 = vpack.c.bf16 %v2627_v63, %v2626_v62 }
 0x3ba   : > { %3845 = vst [vmem:[%s4310_s24 + $0xe8] sm:$0xff] %v3805_v0   ;;  %v3815_v4 = vpack.c.bf16 %v2629_v2, %v2628_v1 }
 0x3bb   : > { %3846 = vst [vmem:[%s4310_s24 + $0xf0] sm:$0xff] %v3810_v3  }
 0x3bc   : > { %3847 = vst [vmem:[%s4310_s24 + $0xf8] sm:$0xff] %v3815_v4  }
 0x3bd PF: > { %s13_s18 = sadd.s32 1, %s3960_s18   ;;  %s4800_s12 = smov %s3940_s13 }
 0x3be   : > { %p10_p13 = scmp.ge.s32.totalorder %s13_s18, 6   ;;  %s4801_s13 = smov %s4034_s25 }
 0x3bf   : > { %s4802_s14 = smov %s3952_s16  ;;  %s4803_s15 = smov %s3956_s17 }
 0x3c0   : > { %s4804_s16 = smov %s4807_s19  ;;  %s4805_s17 = smov %s4811_s20 }
 0x3c1   :  { %12 = sbr.rel (!%p10_p13) target bundleno = 4 (0x4), region = 99 }

// kernel: gcn_forward.9
= control target key start
LH: loop header
LB: loop body
LE: loop exit
PB: predicated region body
PF: predicated region fallthrough
CT: control target
= control target key end

     0   :  { %s149_s0 = inlined_call_operand.vmem [shape: bf16[64,128], index: 0, kind: input, shape index: {}]   ;;  %s150_s1 = inlined_call_operand.vmem [shape: bf16[64,128], index: 1, kind: input, shape index: {}]   ;;  %s151_s2 = inlined_call_operand.vmem [shape: f32[1,128], index: 2, kind: output, shape index: {}]  }
   0x1   :  { %v70_v0 = vld [vmem:[%s149_s0] sm:$0xff]   ;;  %v101_v1 = vld [vmem:[%s149_s0 + $0x8] sm:$0xff]   ;;  %v102_v5 = vld [vmem:[%s149_s0 + $0x10] sm:$0xff]  }
   0x2   :  { %v71_v2 = vunpack.c.l.bf16 %v70_v0  ;;  %v72_v3 = vunpack.c.h.bf16 %v70_v0  ;;  %v75_v4 = vunpack.c.l.bf16 %v101_v1  ;;  %v86_v6 = vld [vmem:[%s150_s1] sm:$0xff]   ;;  %v104_v7 = vld [vmem:[%s150_s1 + $0x8] sm:$0xff]   ;;  %v76_v8 = vunpack.c.h.bf16 %v101_v1  ;;  %v105_v9 = vld [vmem:[%s150_s1 + $0x10] sm:$0xff]  }
   0x3   :  { %v87_v10 = vunpack.c.l.bf16 %v86_v6  ;;  %v88_v11 = vunpack.c.h.bf16 %v86_v6  ;;  %v91_v12 = vunpack.c.l.bf16 %v104_v7  ;;  %v92_v13 = vunpack.c.h.bf16 %v104_v7  ;;  %v103_v19 = vld [vmem:[%s149_s0 + $0x18] sm:$0xff]  }
   0x4   :  { %v79_v14 = vunpack.c.l.bf16 %v102_v5  ;;  %v95_v15 = vunpack.c.l.bf16 %v105_v9  ;;  %v106_v20 = vld [vmem:[%s150_s1 + $0x18] sm:$0xff]   ;;  %v80_v21 = vunpack.c.h.bf16 %v102_v5  ;;  %v96_v22 = vunpack.c.h.bf16 %v105_v9 }
   0x5   :  { %v43_v16 = vmul.f32 %v87_v10, %v71_v2  ;;  %v44_v17 = vmul.f32 %v88_v11, %v72_v3  ;;  %v45_v18 = vmul.f32 %v91_v12, %v75_v4  ;;  %v46_v23 = vmul.f32 %v92_v13, %v76_v8 }
   0x6   :  { %v83_v25 = vunpack.c.l.bf16 %v103_v19  ;;  %v99_v26 = vunpack.c.l.bf16 %v106_v20  ;;  %v47_v27 = vmul.f32 %v95_v15, %v79_v14  ;;  %v84_v29 = vunpack.c.h.bf16 %v103_v19 }
   0x7   :  { %v51_v24 = vadd.f32 %v44_v17, %v43_v16  ;;  %v100_v30 = vunpack.c.h.bf16 %v106_v20  ;;  %v48_v31 = vmul.f32 %v96_v22, %v80_v21 }
   0x8   :  { %v49_v33 = vmul.f32 %v99_v26, %v83_v25 }
   0x9   :  { %v52_v28 = vadd.f32 %v51_v24, %v45_v18  ;;  %v50_v35 = vmul.f32 %v100_v30, %v84_v29 }
   0xb   :  { %v53_v32 = vadd.f32 %v52_v28, %v46_v23 }
   0xd   :  { %v54_v34 = vadd.f32 %v53_v32, %v47_v27 }
   0xf   :  { %v55_v36 = vadd.f32 %v54_v34, %v48_v31 }
  0x11   :  { %v56_v37 = vadd.f32 %v55_v36, %v49_v33 }
  0x13   :  { %v57_v38 = vadd.f32 %v56_v37, %v50_v35 }
  0x15   :  { %v58_v39 = vrot.slane %v57_v38, 4 }
  0x17   :  { %v59_v40 = vadd.f32 %v58_v39, %v57_v38 }
  0x19   :  { %v60_v41 = vrot.slane %v59_v40, 2 }
  0x1b   :  { %v61_v42 = vadd.f32 %v60_v41, %v59_v40 }
  0x1d   :  { %v62_v43 = vrot.slane %v61_v42, 1 }
  0x1f   :  { %v63_v44 = vadd.f32 %v62_v43, %v61_v42 }
  0x21   :  { %64 = vst [vmem:[%s151_s2] sm:$0x1] %v63_v44 }

// kernel: gcn_forward.8
= control target key start
LH: loop header
LB: loop body
LE: loop exit
PB: predicated region body
PF: predicated region fallthrough
CT: control target
= control target key end

     0   :  { %s3919_s12 = smov 0   ;;  %s3921_s13 = smov 0   ;;  %s4732_s0 = inlined_call_operand.vmem [shape: bf16[1024,1024], index: 0, kind: input, shape index: {}]   ;;  %s4733_s1 = inlined_call_operand.vmem [shape: bf16[1024,128], index: 1, kind: input, shape index: {}]   ;;  %s4734_s2 = inlined_call_operand.vmem [shape: f32[1,128], index: 2, kind: input, shape index: {}]   ;;  %s4735_s3 = inlined_call_operand.vmem [shape: bf16[1024,128], index: 3, kind: output, shape index: {}]  }
   0x1   :  { %s3923_s14 = smov 0   ;;  %s3925_s15 = smov 0  }
   0x2   :  { %s3927_s16 = smov 0   ;;  %s3929_s17 = smov 0  }
   0x3   :  { %s3931_s18 = smov 0  }
   0x4 LB: > { %s22_s19 = sadd.s32 1, %s3888_s16  ;;  %s25_s20 = sadd.s32 1, %s3892_s17  ;;  %s3896_s18 = sphi %s3931_s18, %s13_s18   ;;  %s3892_s17 = sphi %s3929_s17, %s4741_s17   ;;  %s3888_s16 = sphi %s3927_s16, %s4740_s16   ;;  %s3884_s15 = sphi %s3925_s15, %s4739_s15   ;;  %s3880_s14 = sphi %s3923_s14, %s4738_s14   ;;  %s3876_s13 = sphi %s3921_s13, %s4737_s13   ;;  %s3872_s12 = sphi %s3919_s12, %s4736_s12  }
   0x5   : > { %p23_p0 = scmp.ge.s32.totalorder %s22_s19, 2  ;;  %p41_p1 = scmp.ne.s32.totalorder %s3876_s13, %s3872_s12 }
   0x6   : > { %p42_p2 = scmp.eq.s32.totalorder %s3896_s18, 0  ;;  %s34_s24 = sadd.s32 1, %s3876_s13 }
   0x7   : > { %s4743_s19 = smov (%p23_p0, %s22_s19), 0  ;;  %s4745_s20 = smov (!%p23_p0, %s25_s20), %s3892_s17 }
   0x8   : > { %p43_p3 = por %p42_p2, %p41_p1  ;;  %p27_p4 = scmp.ge.s32.totalorder %s4745_s20, 2 }
   0x9   : > { %s30_s21 = ssub.s32 %s3888_s16, %s4743_s19  ;;  %p2776_p6 = scmp.ge.s32.totalorder %s3896_s18, 4 }
   0xa   : > { %s4747_s20 = smov (%p27_p4, %s4745_s20), 0 }
   0xb   : > { %s29_s22 = ssub.s32 %s3892_s17, %s4747_s20  ;;  %141 = sbr.rel (%p2776_p6) target bundleno = 151 (0x97), region = 24 }
   0xc   : > { %s31_s23 = sor.u32 %s30_s21, %s29_s22 }
   0xd   : > { %p32_p5 = scmp.eq.s32.totalorder %s31_s23, 0 }
   0xf   : > { %s3970_s25 = scalar_select %p32_p5, %s3876_s13, %s34_s24  }
  0x10   : > { %144 = sbr.rel (!%p43_p3) target bundleno = 151 (0x97), region = 28  ;;  %s146_s26 = sand.u32 (%p43_p3), 1, %s3876_s13  }
  0x11   : > { %s2779_s27 = sshll.u32 (%p43_p3), %s3888_s16, 2  ;;  %s2777_s28 = sshll.u32 (%p43_p3), %s146_s26, 10 }
  0x12   : > { %s3432_s29 = sshll.u32 (%p43_p3), %s3892_s17, 9  ;;  %s3984_s8 = scalar_lea.vmem (%p43_p3), [#allocation3], %s2777_s28 }
  0x13   : > { %s152_s30 = sadd.s32 (%p43_p3), %s3432_s29, %s2779_s27 }
  0x14   : > { %s2781_s4 = sshll.u32 (%p43_p3), %s152_s30, 2 }
  0x15   : > { %s3979_s7 = scalar_lea.vmem %s4732_s0, %s2781_s4 }
  0x16   : > { %v167_v0 = vld [vmem:[%s3979_s7] sm:$0xff]  ;;  %v169_v1 = vld [vmem:[%s3979_s7 + $0x8] sm:$0xff] }
  0x17   : > { %v171_v2 = vld [vmem:[%s3979_s7 + $0x20] sm:$0xff]  ;;  %168 = vst [vmem:[%s3984_s8] sm:$0xff] %v167_v0  ;;  %v173_v3 = vld [vmem:[%s3979_s7 + $0x28] sm:$0xff] }
  0x18   : > { %170 = vst [vmem:[%s3984_s8 + $0x8] sm:$0xff] %v169_v1  ;;  %v175_v4 = vld [vmem:[%s3979_s7 + $0x40] sm:$0xff]  ;;  %v177_v5 = vld [vmem:[%s3979_s7 + $0x48] sm:$0xff] }
  0x19   : > { %172 = vst [vmem:[%s3984_s8 + $0x10] sm:$0xff] %v171_v2  ;;  %v179_v6 = vld [vmem:[%s3979_s7 + $0x60] sm:$0xff]  ;;  %v181_v7 = vld [vmem:[%s3979_s7 + $0x68] sm:$0xff] }
  0x1a   : > { %174 = vst [vmem:[%s3984_s8 + $0x18] sm:$0xff] %v173_v3  ;;  %v183_v8 = vld [vmem:[%s3979_s7 + $0x80] sm:$0xff]  ;;  %v185_v9 = vld [vmem:[%s3979_s7 + $0x88] sm:$0xff] }
  0x1b   : > { %176 = vst [vmem:[%s3984_s8 + $0x20] sm:$0xff] %v175_v4  ;;  %v187_v10 = vld [vmem:[%s3979_s7 + $0xa0] sm:$0xff]  ;;  %v189_v11 = vld [vmem:[%s3979_s7 + $0xa8] sm:$0xff] }
  0x1c   : > { %178 = vst [vmem:[%s3984_s8 + $0x28] sm:$0xff] %v177_v5  ;;  %v191_v12 = vld [vmem:[%s3979_s7 + $0xc0] sm:$0xff]  ;;  %v193_v13 = vld [vmem:[%s3979_s7 + $0xc8] sm:$0xff] }
  0x1d   : > { %180 = vst [vmem:[%s3984_s8 + $0x30] sm:$0xff] %v179_v6  ;;  %v195_v14 = vld [vmem:[%s3979_s7 + $0xe0] sm:$0xff]  ;;  %v197_v15 = vld [vmem:[%s3979_s7 + $0xe8] sm:$0xff] }
  0x1e   : > { %182 = vst [vmem:[%s3984_s8 + $0x38] sm:$0xff] %v181_v7  ;;  %v199_v16 = vld [vmem:[%s3979_s7 + $0x100] sm:$0xff]  ;;  %v201_v17 = vld [vmem:[%s3979_s7 + $0x108] sm:$0xff] }
  0x1f   : > { %184 = vst [vmem:[%s3984_s8 + $0x40] sm:$0xff] %v183_v8  ;;  %v203_v18 = vld [vmem:[%s3979_s7 + $0x120] sm:$0xff]  ;;  %v205_v19 = vld [vmem:[%s3979_s7 + $0x128] sm:$0xff] }
  0x20   : > { %186 = vst [vmem:[%s3984_s8 + $0x48] sm:$0xff] %v185_v9  ;;  %v207_v20 = vld [vmem:[%s3979_s7 + $0x140] sm:$0xff]  ;;  %v209_v21 = vld [vmem:[%s3979_s7 + $0x148] sm:$0xff] }
  0x21   : > { %188 = vst [vmem:[%s3984_s8 + $0x50] sm:$0xff] %v187_v10  ;;  %v211_v22 = vld [vmem:[%s3979_s7 + $0x160] sm:$0xff]  ;;  %v213_v23 = vld [vmem:[%s3979_s7 + $0x168] sm:$0xff] }
  0x22   : > { %190 = vst [vmem:[%s3984_s8 + $0x58] sm:$0xff] %v189_v11  ;;  %v215_v24 = vld [vmem:[%s3979_s7 + $0x180] sm:$0xff]  ;;  %v217_v25 = vld [vmem:[%s3979_s7 + $0x188] sm:$0xff] }
  0x23   : > { %192 = vst [vmem:[%s3984_s8 + $0x60] sm:$0xff] %v191_v12  ;;  %v219_v26 = vld [vmem:[%s3979_s7 + $0x1a0] sm:$0xff]  ;;  %v221_v27 = vld [vmem:[%s3979_s7 + $0x1a8] sm:$0xff] }
  0x24   : > { %194 = vst [vmem:[%s3984_s8 + $0x68] sm:$0xff] %v193_v13  ;;  %v223_v28 = vld [vmem:[%s3979_s7 + $0x1c0] sm:$0xff]  ;;  %v225_v29 = vld [vmem:[%s3979_s7 + $0x1c8] sm:$0xff] }
  0x25   : > { %196 = vst [vmem:[%s3984_s8 + $0x70] sm:$0xff] %v195_v14  ;;  %v227_v30 = vld [vmem:[%s3979_s7 + $0x1e0] sm:$0xff]  ;;  %v229_v31 = vld [vmem:[%s3979_s7 + $0x1e8] sm:$0xff] }
  0x26   : > { %198 = vst [vmem:[%s3984_s8 + $0x78] sm:$0xff] %v197_v15  ;;  %v231_v32 = vld [vmem:[%s3979_s7 + $0x200] sm:$0xff]  ;;  %v233_v33 = vld [vmem:[%s3979_s7 + $0x208] sm:$0xff] }
  0x27   : > { %200 = vst [vmem:[%s3984_s8 + $0x80] sm:$0xff] %v199_v16  ;;  %v235_v34 = vld [vmem:[%s3979_s7 + $0x220] sm:$0xff]  ;;  %v237_v35 = vld [vmem:[%s3979_s7 + $0x228] sm:$0xff] }
  0x28   : > { %202 = vst [vmem:[%s3984_s8 + $0x88] sm:$0xff] %v201_v17  ;;  %v239_v36 = vld [vmem:[%s3979_s7 + $0x240] sm:$0xff]  ;;  %v241_v37 = vld [vmem:[%s3979_s7 + $0x248] sm:$0xff] }
  0x29   : > { %204 = vst [vmem:[%s3984_s8 + $0x90] sm:$0xff] %v203_v18  ;;  %v243_v38 = vld [vmem:[%s3979_s7 + $0x260] sm:$0xff]  ;;  %v245_v39 = vld [vmem:[%s3979_s7 + $0x268] sm:$0xff] }
  0x2a   : > { %206 = vst [vmem:[%s3984_s8 + $0x98] sm:$0xff] %v205_v19  ;;  %v247_v40 = vld [vmem:[%s3979_s7 + $0x280] sm:$0xff]  ;;  %v249_v41 = vld [vmem:[%s3979_s7 + $0x288] sm:$0xff] }
  0x2b   : > { %208 = vst [vmem:[%s3984_s8 + $0xa0] sm:$0xff] %v207_v20  ;;  %v251_v42 = vld [vmem:[%s3979_s7 + $0x2a0] sm:$0xff]  ;;  %v253_v43 = vld [vmem:[%s3979_s7 + $0x2a8] sm:$0xff] }
  0x2c   : > { %210 = vst [vmem:[%s3984_s8 + $0xa8] sm:$0xff] %v209_v21  ;;  %v255_v44 = vld [vmem:[%s3979_s7 + $0x2c0] sm:$0xff]  ;;  %v257_v45 = vld [vmem:[%s3979_s7 + $0x2c8] sm:$0xff] }
  0x2d   : > { %212 = vst [vmem:[%s3984_s8 + $0xb0] sm:$0xff] %v211_v22  ;;  %v259_v46 = vld [vmem:[%s3979_s7 + $0x2e0] sm:$0xff]  ;;  %v261_v47 = vld [vmem:[%s3979_s7 + $0x2e8] sm:$0xff] }
  0x2e   : > { %214 = vst [vmem:[%s3984_s8 + $0xb8] sm:$0xff] %v213_v23  ;;  %v263_v48 = vld [vmem:[%s3979_s7 + $0x300] sm:$0xff]  ;;  %v265_v49 = vld [vmem:[%s3979_s7 + $0x308] sm:$0xff] }
  0x2f   : > { %216 = vst [vmem:[%s3984_s8 + $0xc0] sm:$0xff] %v215_v24  ;;  %v267_v50 = vld [vmem:[%s3979_s7 + $0x320] sm:$0xff]  ;;  %v269_v51 = vld [vmem:[%s3979_s7 + $0x328] sm:$0xff] }
  0x30   : > { %218 = vst [vmem:[%s3984_s8 + $0xc8] sm:$0xff] %v217_v25  ;;  %v271_v52 = vld [vmem:[%s3979_s7 + $0x340] sm:$0xff]  ;;  %v273_v53 = vld [vmem:[%s3979_s7 + $0x348] sm:$0xff] }
  0x31   : > { %220 = vst [vmem:[%s3984_s8 + $0xd0] sm:$0xff] %v219_v26  ;;  %v275_v54 = vld [vmem:[%s3979_s7 + $0x360] sm:$0xff]  ;;  %v277_v55 = vld [vmem:[%s3979_s7 + $0x368] sm:$0xff] }
  0x32   : > { %222 = vst [vmem:[%s3984_s8 + $0xd8] sm:$0xff] %v221_v27  ;;  %v279_v56 = vld [vmem:[%s3979_s7 + $0x380] sm:$0xff]  ;;  %v281_v57 = vld [vmem:[%s3979_s7 + $0x388] sm:$0xff] }
  0x33   : > { %224 = vst [vmem:[%s3984_s8 + $0xe0] sm:$0xff] %v223_v28  ;;  %v283_v58 = vld [vmem:[%s3979_s7 + $0x3a0] sm:$0xff]  ;;  %v285_v59 = vld [vmem:[%s3979_s7 + $0x3a8] sm:$0xff] }
  0x34   : > { %226 = vst [vmem:[%s3984_s8 + $0xe8] sm:$0xff] %v225_v29  ;;  %v287_v60 = vld [vmem:[%s3979_s7 + $0x3c0] sm:$0xff]  ;;  %v289_v61 = vld [vmem:[%s3979_s7 + $0x3c8] sm:$0xff] }
  0x35   : > { %228 = vst [vmem:[%s3984_s8 + $0xf0] sm:$0xff] %v227_v30  ;;  %v291_v62 = vld [vmem:[%s3979_s7 + $0x3e0] sm:$0xff]  ;;  %v293_v63 = vld [vmem:[%s3979_s7 + $0x3e8] sm:$0xff] }
  0x36   : > { %230 = vst [vmem:[%s3984_s8 + $0xf8] sm:$0xff] %v229_v31  ;;  %v295_v0 = vld [vmem:[%s3979_s7 + $0x400] sm:$0xff]  ;;  %v297_v1 = vld [vmem:[%s3979_s7 + $0x408] sm:$0xff] }
  0x37   : > { %232 = vst [vmem:[%s3984_s8 + $0x100] sm:$0xff] %v231_v32  ;;  %v299_v2 = vld [vmem:[%s3979_s7 + $0x420] sm:$0xff]  ;;  %v301_v3 = vld [vmem:[%s3979_s7 + $0x428] sm:$0xff] }
  0x38   : > { %234 = vst [vmem:[%s3984_s8 + $0x108] sm:$0xff] %v233_v33  ;;  %v303_v4 = vld [vmem:[%s3979_s7 + $0x440] sm:$0xff]  ;;  %v305_v5 = vld [vmem:[%s3979_s7 + $0x448] sm:$0xff] }
  0x39   : > { %236 = vst [vmem:[%s3984_s8 + $0x110] sm:$0xff] %v235_v34  ;;  %v307_v6 = vld [vmem:[%s3979_s7 + $0x460] sm:$0xff]  ;;  %v309_v7 = vld [vmem:[%s3979_s7 + $0x468] sm:$0xff] }
  0x3a   : > { %238 = vst [vmem:[%s3984_s8 + $0x118] sm:$0xff] %v237_v35  ;;  %v311_v8 = vld [vmem:[%s3979_s7 + $0x480] sm:$0xff]  ;;  %v313_v9 = vld [vmem:[%s3979_s7 + $0x488] sm:$0xff] }
  0x3b   : > { %240 = vst [vmem:[%s3984_s8 + $0x120] sm:$0xff] %v239_v36  ;;  %v315_v10 = vld [vmem:[%s3979_s7 + $0x4a0] sm:$0xff]  ;;  %v317_v11 = vld [vmem:[%s3979_s7 + $0x4a8] sm:$0xff] }
  0x3c   : > { %242 = vst [vmem:[%s3984_s8 + $0x128] sm:$0xff] %v241_v37  ;;  %v319_v12 = vld [vmem:[%s3979_s7 + $0x4c0] sm:$0xff]  ;;  %v321_v13 = vld [vmem:[%s3979_s7 + $0x4c8] sm:$0xff] }
  0x3d   : > { %244 = vst [vmem:[%s3984_s8 + $0x130] sm:$0xff] %v243_v38  ;;  %v323_v14 = vld [vmem:[%s3979_s7 + $0x4e0] sm:$0xff]  ;;  %v325_v15 = vld [vmem:[%s3979_s7 + $0x4e8] sm:$0xff] }
  0x3e   : > { %246 = vst [vmem:[%s3984_s8 + $0x138] sm:$0xff] %v245_v39  ;;  %v327_v16 = vld [vmem:[%s3979_s7 + $0x500] sm:$0xff]  ;;  %v329_v17 = vld [vmem:[%s3979_s7 + $0x508] sm:$0xff] }
  0x3f   : > { %248 = vst [vmem:[%s3984_s8 + $0x140] sm:$0xff] %v247_v40  ;;  %v331_v18 = vld [vmem:[%s3979_s7 + $0x520] sm:$0xff]  ;;  %v333_v19 = vld [vmem:[%s3979_s7 + $0x528] sm:$0xff] }
  0x40   : > { %250 = vst [vmem:[%s3984_s8 + $0x148] sm:$0xff] %v249_v41  ;;  %v335_v20 = vld [vmem:[%s3979_s7 + $0x540] sm:$0xff]  ;;  %v337_v21 = vld [vmem:[%s3979_s7 + $0x548] sm:$0xff] }
  0x41   : > { %252 = vst [vmem:[%s3984_s8 + $0x150] sm:$0xff] %v251_v42  ;;  %v339_v22 = vld [vmem:[%s3979_s7 + $0x560] sm:$0xff]  ;;  %v341_v23 = vld [vmem:[%s3979_s7 + $0x568] sm:$0xff] }
  0x42   : > { %254 = vst [vmem:[%s3984_s8 + $0x158] sm:$0xff] %v253_v43  ;;  %v343_v24 = vld [vmem:[%s3979_s7 + $0x580] sm:$0xff]  ;;  %v345_v25 = vld [vmem:[%s3979_s7 + $0x588] sm:$0xff] }
  0x43   : > { %256 = vst [vmem:[%s3984_s8 + $0x160] sm:$0xff] %v255_v44  ;;  %v347_v26 = vld [vmem:[%s3979_s7 + $0x5a0] sm:$0xff]  ;;  %v349_v27 = vld [vmem:[%s3979_s7 + $0x5a8] sm:$0xff] }
  0x44   : > { %258 = vst [vmem:[%s3984_s8 + $0x168] sm:$0xff] %v257_v45  ;;  %v351_v28 = vld [vmem:[%s3979_s7 + $0x5c0] sm:$0xff]  ;;  %v353_v29 = vld [vmem:[%s3979_s7 + $0x5c8] sm:$0xff] }
  0x45   : > { %260 = vst [vmem:[%s3984_s8 + $0x170] sm:$0xff] %v259_v46  ;;  %v355_v30 = vld [vmem:[%s3979_s7 + $0x5e0] sm:$0xff]  ;;  %v357_v31 = vld [vmem:[%s3979_s7 + $0x5e8] sm:$0xff] }
  0x46   : > { %262 = vst [vmem:[%s3984_s8 + $0x178] sm:$0xff] %v261_v47  ;;  %v359_v32 = vld [vmem:[%s3979_s7 + $0x600] sm:$0xff]  ;;  %v361_v33 = vld [vmem:[%s3979_s7 + $0x608] sm:$0xff] }
  0x47   : > { %264 = vst [vmem:[%s3984_s8 + $0x180] sm:$0xff] %v263_v48  ;;  %v363_v34 = vld [vmem:[%s3979_s7 + $0x620] sm:$0xff]  ;;  %v365_v35 = vld [vmem:[%s3979_s7 + $0x628] sm:$0xff] }
  0x48   : > { %266 = vst [vmem:[%s3984_s8 + $0x188] sm:$0xff] %v265_v49  ;;  %v367_v36 = vld [vmem:[%s3979_s7 + $0x640] sm:$0xff]  ;;  %v369_v37 = vld [vmem:[%s3979_s7 + $0x648] sm:$0xff] }
  0x49   : > { %268 = vst [vmem:[%s3984_s8 + $0x190] sm:$0xff] %v267_v50  ;;  %v371_v38 = vld [vmem:[%s3979_s7 + $0x660] sm:$0xff]  ;;  %v373_v39 = vld [vmem:[%s3979_s7 + $0x668] sm:$0xff] }
  0x4a   : > { %270 = vst [vmem:[%s3984_s8 + $0x198] sm:$0xff] %v269_v51  ;;  %v375_v40 = vld [vmem:[%s3979_s7 + $0x680] sm:$0xff]  ;;  %v377_v41 = vld [vmem:[%s3979_s7 + $0x688] sm:$0xff] }
  0x4b   : > { %272 = vst [vmem:[%s3984_s8 + $0x1a0] sm:$0xff] %v271_v52  ;;  %v379_v42 = vld [vmem:[%s3979_s7 + $0x6a0] sm:$0xff]  ;;  %v381_v43 = vld [vmem:[%s3979_s7 + $0x6a8] sm:$0xff] }
  0x4c   : > { %274 = vst [vmem:[%s3984_s8 + $0x1a8] sm:$0xff] %v273_v53  ;;  %v383_v44 = vld [vmem:[%s3979_s7 + $0x6c0] sm:$0xff]  ;;  %v385_v45 = vld [vmem:[%s3979_s7 + $0x6c8] sm:$0xff] }
  0x4d   : > { %276 = vst [vmem:[%s3984_s8 + $0x1b0] sm:$0xff] %v275_v54  ;;  %v387_v46 = vld [vmem:[%s3979_s7 + $0x6e0] sm:$0xff]  ;;  %v389_v47 = vld [vmem:[%s3979_s7 + $0x6e8] sm:$0xff] }
  0x4e   : > { %278 = vst [vmem:[%s3984_s8 + $0x1b8] sm:$0xff] %v277_v55  ;;  %v391_v48 = vld [vmem:[%s3979_s7 + $0x700] sm:$0xff]  ;;  %v393_v49 = vld [vmem:[%s3979_s7 + $0x708] sm:$0xff] }
  0x4f   : > { %280 = vst [vmem:[%s3984_s8 + $0x1c0] sm:$0xff] %v279_v56  ;;  %v395_v50 = vld [vmem:[%s3979_s7 + $0x720] sm:$0xff]  ;;  %v397_v51 = vld [vmem:[%s3979_s7 + $0x728] sm:$0xff] }
  0x50   : > { %282 = vst [vmem:[%s3984_s8 + $0x1c8] sm:$0xff] %v281_v57  ;;  %v399_v52 = vld [vmem:[%s3979_s7 + $0x740] sm:$0xff]  ;;  %v401_v53 = vld [vmem:[%s3979_s7 + $0x748] sm:$0xff] }
  0x51   : > { %284 = vst [vmem:[%s3984_s8 + $0x1d0] sm:$0xff] %v283_v58  ;;  %v403_v54 = vld [vmem:[%s3979_s7 + $0x760] sm:$0xff]  ;;  %v405_v55 = vld [vmem:[%s3979_s7 + $0x768] sm:$0xff] }
  0x52   : > { %286 = vst [vmem:[%s3984_s8 + $0x1d8] sm:$0xff] %v285_v59  ;;  %v407_v56 = vld [vmem:[%s3979_s7 + $0x780] sm:$0xff]  ;;  %v409_v57 = vld [vmem:[%s3979_s7 + $0x788] sm:$0xff] }
  0x53   : > { %288 = vst [vmem:[%s3984_s8 + $0x1e0] sm:$0xff] %v287_v60  ;;  %v411_v58 = vld [vmem:[%s3979_s7 + $0x7a0] sm:$0xff]  ;;  %v413_v59 = vld [vmem:[%s3979_s7 + $0x7a8] sm:$0xff] }
  0x54   : > { %290 = vst [vmem:[%s3984_s8 + $0x1e8] sm:$0xff] %v289_v61  ;;  %v415_v60 = vld [vmem:[%s3979_s7 + $0x7c0] sm:$0xff]  ;;  %v417_v61 = vld [vmem:[%s3979_s7 + $0x7c8] sm:$0xff] }
  0x55   : > { %292 = vst [vmem:[%s3984_s8 + $0x1f0] sm:$0xff] %v291_v62  ;;  %v419_v62 = vld [vmem:[%s3979_s7 + $0x7e0] sm:$0xff] }
  0x56   : > { %294 = vst [vmem:[%s3984_s8 + $0x1f8] sm:$0xff] %v293_v63  ;;  %v421_v63 = vld [vmem:[%s3979_s7 + $0x7e8] sm:$0xff] }
  0x57   : > { %296 = vst [vmem:[%s3984_s8 + $0x200] sm:$0xff] %v295_v0 }
  0x58   : > { %298 = vst [vmem:[%s3984_s8 + $0x208] sm:$0xff] %v297_v1 }
  0x59   : > { %300 = vst [vmem:[%s3984_s8 + $0x210] sm:$0xff] %v299_v2 }
  0x5a   : > { %302 = vst [vmem:[%s3984_s8 + $0x218] sm:$0xff] %v301_v3 }
  0x5b   : > { %304 = vst [vmem:[%s3984_s8 + $0x220] sm:$0xff] %v303_v4 }
  0x5c   : > { %306 = vst [vmem:[%s3984_s8 + $0x228] sm:$0xff] %v305_v5 }
  0x5d   : > { %308 = vst [vmem:[%s3984_s8 + $0x230] sm:$0xff] %v307_v6 }
  0x5e   : > { %310 = vst [vmem:[%s3984_s8 + $0x238] sm:$0xff] %v309_v7 }
  0x5f   : > { %312 = vst [vmem:[%s3984_s8 + $0x240] sm:$0xff] %v311_v8 }
  0x60   : > { %314 = vst [vmem:[%s3984_s8 + $0x248] sm:$0xff] %v313_v9 }
  0x61   : > { %316 = vst [vmem:[%s3984_s8 + $0x250] sm:$0xff] %v315_v10 }
  0x62   : > { %318 = vst [vmem:[%s3984_s8 + $0x258] sm:$0xff] %v317_v11 }
  0x63   : > { %320 = vst [vmem:[%s3984_s8 + $0x260] sm:$0xff] %v319_v12 }
  0x64   : > { %322 = vst [vmem:[%s3984_s8 + $0x268] sm:$0xff] %v321_v13 }
  0x65   : > { %324 = vst [vmem:[%s3984_s8 + $0x270] sm:$0xff] %v323_v14 }
  0x66   : > { %326 = vst [vmem:[%s3984_s8 + $0x278] sm:$0xff] %v325_v15 }
  0x67   : > { %328 = vst [vmem:[%s3984_s8 + $0x280] sm:$0xff] %v327_v16 }
  0x68   : > { %330 = vst [vmem:[%s3984_s8 + $0x288] sm:$0xff] %v329_v17 }
  0x69   : > { %332 = vst [vmem:[%s3984_s8 + $0x290] sm:$0xff] %v331_v18 }
  0x6a   : > { %334 = vst [vmem:[%s3984_s8 + $0x298] sm:$0xff] %v333_v19 }
  0x6b   : > { %336 = vst [vmem:[%s3984_s8 + $0x2a0] sm:$0xff] %v335_v20 }
  0x6c   : > { %338 = vst [vmem:[%s3984_s8 + $0x2a8] sm:$0xff] %v337_v21 }
  0x6d   : > { %340 = vst [vmem:[%s3984_s8 + $0x2b0] sm:$0xff] %v339_v22 }
  0x6e   : > { %342 = vst [vmem:[%s3984_s8 + $0x2b8] sm:$0xff] %v341_v23 }
  0x6f   : > { %344 = vst [vmem:[%s3984_s8 + $0x2c0] sm:$0xff] %v343_v24 }
  0x70   : > { %346 = vst [vmem:[%s3984_s8 + $0x2c8] sm:$0xff] %v345_v25 }
  0x71   : > { %348 = vst [vmem:[%s3984_s8 + $0x2d0] sm:$0xff] %v347_v26 }
  0x72   : > { %350 = vst [vmem:[%s3984_s8 + $0x2d8] sm:$0xff] %v349_v27 }
  0x73   : > { %352 = vst [vmem:[%s3984_s8 + $0x2e0] sm:$0xff] %v351_v28 }
  0x74   : > { %354 = vst [vmem:[%s3984_s8 + $0x2e8] sm:$0xff] %v353_v29 }
  0x75   : > { %356 = vst [vmem:[%s3984_s8 + $0x2f0] sm:$0xff] %v355_v30 }
  0x76   : > { %358 = vst [vmem:[%s3984_s8 + $0x2f8] sm:$0xff] %v357_v31 }
  0x77   : > { %360 = vst [vmem:[%s3984_s8 + $0x300] sm:$0xff] %v359_v32 }
  0x78   : > { %362 = vst [vmem:[%s3984_s8 + $0x308] sm:$0xff] %v361_v33 }
  0x79   : > { %364 = vst [vmem:[%s3984_s8 + $0x310] sm:$0xff] %v363_v34 }
  0x7a   : > { %366 = vst [vmem:[%s3984_s8 + $0x318] sm:$0xff] %v365_v35 }
  0x7b   : > { %368 = vst [vmem:[%s3984_s8 + $0x320] sm:$0xff] %v367_v36 }
  0x7c   : > { %370 = vst [vmem:[%s3984_s8 + $0x328] sm:$0xff] %v369_v37 }
  0x7d   : > { %372 = vst [vmem:[%s3984_s8 + $0x330] sm:$0xff] %v371_v38 }
  0x7e   : > { %374 = vst [vmem:[%s3984_s8 + $0x338] sm:$0xff] %v373_v39 }
  0x7f   : > { %376 = vst [vmem:[%s3984_s8 + $0x340] sm:$0xff] %v375_v40 }
  0x80   : > { %378 = vst [vmem:[%s3984_s8 + $0x348] sm:$0xff] %v377_v41 }
  0x81   : > { %380 = vst [vmem:[%s3984_s8 + $0x350] sm:$0xff] %v379_v42 }
  0x82   : > { %382 = vst [vmem:[%s3984_s8 + $0x358] sm:$0xff] %v381_v43 }
  0x83   : > { %384 = vst [vmem:[%s3984_s8 + $0x360] sm:$0xff] %v383_v44 }
  0x84   : > { %386 = vst [vmem:[%s3984_s8 + $0x368] sm:$0xff] %v385_v45 }
  0x85   : > { %388 = vst [vmem:[%s3984_s8 + $0x370] sm:$0xff] %v387_v46 }
  0x86   : > { %390 = vst [vmem:[%s3984_s8 + $0x378] sm:$0xff] %v389_v47 }
  0x87   : > { %392 = vst [vmem:[%s3984_s8 + $0x380] sm:$0xff] %v391_v48 }
  0x88   : > { %394 = vst [vmem:[%s3984_s8 + $0x388] sm:$0xff] %v393_v49 }
  0x89   : > { %396 = vst [vmem:[%s3984_s8 + $0x390] sm:$0xff] %v395_v50 }
  0x8a   : > { %398 = vst [vmem:[%s3984_s8 + $0x398] sm:$0xff] %v397_v51 }
  0x8b   : > { %400 = vst [vmem:[%s3984_s8 + $0x3a0] sm:$0xff] %v399_v52 }
  0x8c   : > { %402 = vst [vmem:[%s3984_s8 + $0x3a8] sm:$0xff] %v401_v53 }
  0x8d   : > { %404 = vst [vmem:[%s3984_s8 + $0x3b0] sm:$0xff] %v403_v54 }
  0x8e   : > { %406 = vst [vmem:[%s3984_s8 + $0x3b8] sm:$0xff] %v405_v55 }
  0x8f   : > { %408 = vst [vmem:[%s3984_s8 + $0x3c0] sm:$0xff] %v407_v56 }
  0x90   : > { %410 = vst [vmem:[%s3984_s8 + $0x3c8] sm:$0xff] %v409_v57 }
  0x91   : > { %412 = vst [vmem:[%s3984_s8 + $0x3d0] sm:$0xff] %v411_v58 }
  0x92   : > { %414 = vst [vmem:[%s3984_s8 + $0x3d8] sm:$0xff] %v413_v59 }
  0x93   : > { %416 = vst [vmem:[%s3984_s8 + $0x3e0] sm:$0xff] %v415_v60 }
  0x94   : > { %418 = vst [vmem:[%s3984_s8 + $0x3e8] sm:$0xff] %v417_v61 }
  0x95   : > { %420 = vst [vmem:[%s3984_s8 + $0x3f0] sm:$0xff] %v419_v62 }
  0x96   : > { %422 = vst [vmem:[%s3984_s8 + $0x3f8] sm:$0xff] %v421_v63 }
  0x97 PF: > { %p2782_p7 = scmp.ge.s32.totalorder %s3896_s18, 1  ;;  %p427_p8 = scmp.lt.s32.totalorder %s3896_s18, 5 }
  0x99   : > { %p428_p9 = pnand %p2782_p7, %p427_p8 }
  0x9a   : > { %s434_s9 = sand.u32 (!%p428_p9), 1, %s3872_s12   ;;  %s2784_s10 = sshll.u32 (!%p428_p9), %s3884_s15, 6 }
  0x9b   : > { %431 = sbr.rel (%p428_p9) target bundleno = 949 (0x3b5), region = 51  ;;  %s2783_s11 = sshll.u32 (!%p428_p9), %s434_s9, 10 }
  0x9c   : > { %p460_p10 = scmp.lt.s32.totalorder (!%p428_p9), %s2784_s10, 127  ;;  %s4248_s26 = scalar_lea.vmem (!%p428_p9), [#allocation3], %s2783_s11 }
  0x9d   : > { %p2786_p11 = scmp.ne.s32.totalorder (!%p428_p9), %s3880_s14, 0 }
  0xa0   : > { %s4749_s10 = smov (!%p460_p10, %s2784_s10), 127  ;;  %468 = sbr.rel (%p2786_p11) target bundleno = 230 (0xe6), region = 59 }
  0xa1   : > { %s2785_s21 = sshll.u32 %s4749_s10, 2 }
  0xa2   : > { %s4246_s24 = scalar_lea.vmem %s4735_s3, %s2785_s21 }
  0xa5   : > { %v3898_v0 = vmov 0.0  }
  0xa6   : > { %469 = vst [vmem:[#allocation2 + $0xb0] sm:$0xff] %v3898_v0 }
  0xa7   : > { %470 = vst [vmem:[#allocation2 + $0x1b0] sm:$0xff] %v3898_v0 }
  0xa8   : > { %471 = vst [vmem:[#allocation2 + $0xd8] sm:$0xff] %v3898_v0 }
  0xa9   : > { %472 = vst [vmem:[#allocation2 + $0x18] sm:$0xff] %v3898_v0 }
  0xaa   : > { %473 = vst [vmem:[#allocation2 + $0x50] sm:$0xff] %v3898_v0 }
  0xab   : > { %474 = vst [vmem:[#allocation2 + $0x168] sm:$0xff] %v3898_v0 }
  0xac   : > { %475 = vst [vmem:[#allocation2 + $0x130] sm:$0xff] %v3898_v0 }
  0xad   : > { %476 = vst [vmem:[#allocation2 + $0x48] sm:$0xff] %v3898_v0 }
  0xae   : > { %477 = vst [vmem:[#allocation2 + $0x180] sm:$0xff] %v3898_v0 }
  0xaf   : > { %478 = vst [vmem:[#allocation2 + $0x110] sm:$0xff] %v3898_v0 }
  0xb0   : > { %479 = vst [vmem:[#allocation2 + $0x118] sm:$0xff] %v3898_v0 }
  0xb1   : > { %480 = vst [vmem:[#allocation2 + $0x98] sm:$0xff] %v3898_v0 }
  0xb2   : > { %481 = vst [vmem:[#allocation2 + $0x120] sm:$0xff] %v3898_v0 }
  0xb3   : > { %482 = vst [vmem:[#allocation2 + $0x150] sm:$0xff] %v3898_v0 }
  0xb4   : > { %483 = vst [vmem:[#allocation2 + $0x108] sm:$0xff] %v3898_v0 }
  0xb5   : > { %484 = vst [vmem:[#allocation2 + $0x60] sm:$0xff] %v3898_v0 }
  0xb6   : > { %485 = vst [vmem:[#allocation2 + $0xe0] sm:$0xff] %v3898_v0 }
  0xb7   : > { %486 = vst [vmem:[#allocation2 + $0x188] sm:$0xff] %v3898_v0 }
  0xb8   : > { %487 = vst [vmem:[#allocation2 + $0x138] sm:$0xff] %v3898_v0 }
  0xb9   : > { %488 = vst [vmem:[#allocation2 + $0x140] sm:$0xff] %v3898_v0 }
  0xba   : > { %489 = vst [vmem:[#allocation2 + $0x80] sm:$0xff] %v3898_v0 }
  0xbb   : > { %490 = vst [vmem:[#allocation2 + $0x1a8] sm:$0xff] %v3898_v0 }
  0xbc   : > { %491 = vst [vmem:[#allocation2 + $0x1b8] sm:$0xff] %v3898_v0 }
  0xbd   : > { %492 = vst [vmem:[#allocation2 + $0x28] sm:$0xff] %v3898_v0 }
  0xbe   : > { %493 = vst [vmem:[#allocation2 + $0x1e8] sm:$0xff] %v3898_v0 }
  0xbf   : > { %494 = vst [vmem:[#allocation2 + $0xf8] sm:$0xff] %v3898_v0 }
  0xc0   : > { %495 = vst [vmem:[#allocation2 + $0x160] sm:$0xff] %v3898_v0 }
  0xc1   : > { %496 = vst [vmem:[#allocation2 + $0x30] sm:$0xff] %v3898_v0 }
  0xc2   : > { %497 = vst [vmem:[#allocation2 + $0x1e0] sm:$0xff] %v3898_v0 }
  0xc3   : > { %498 = vst [vmem:[#allocation2] sm:$0xff] %v3898_v0 }
  0xc4   : > { %499 = vst [vmem:[#allocation2 + $0xf0] sm:$0xff] %v3898_v0 }
  0xc5   : > { %500 = vst [vmem:[#allocation2 + $0x8] sm:$0xff] %v3898_v0 }
  0xc6   : > { %501 = vst [vmem:[#allocation2 + $0x148] sm:$0xff] %v3898_v0 }
  0xc7   : > { %502 = vst [vmem:[#allocation2 + $0x1d0] sm:$0xff] %v3898_v0 }
  0xc8   : > { %503 = vst [vmem:[#allocation2 + $0x100] sm:$0xff] %v3898_v0 }
  0xc9   : > { %504 = vst [vmem:[#allocation2 + $0xc8] sm:$0xff] %v3898_v0 }
  0xca   : > { %505 = vst [vmem:[#allocation2 + $0x40] sm:$0xff] %v3898_v0 }
  0xcb   : > { %506 = vst [vmem:[#allocation2 + $0x1f8] sm:$0xff] %v3898_v0 }
  0xcc   : > { %507 = vst [vmem:[#allocation2 + $0x20] sm:$0xff] %v3898_v0 }
  0xcd   : > { %508 = vst [vmem:[#allocation2 + $0x128] sm:$0xff] %v3898_v0 }
  0xce   : > { %509 = vst [vmem:[#allocation2 + $0x1a0] sm:$0xff] %v3898_v0 }
  0xcf   : > { %510 = vst [vmem:[#allocation2 + $0x1f0] sm:$0xff] %v3898_v0 }
  0xd0   : > { %511 = vst [vmem:[#allocation2 + $0xe8] sm:$0xff] %v3898_v0 }
  0xd1   : > { %512 = vst [vmem:[#allocation2 + $0x78] sm:$0xff] %v3898_v0 }
  0xd2   : > { %513 = vst [vmem:[#allocation2 + $0x70] sm:$0xff] %v3898_v0 }
  0xd3   : > { %514 = vst [vmem:[#allocation2 + $0x90] sm:$0xff] %v3898_v0 }
  0xd4   : > { %515 = vst [vmem:[#allocation2 + $0x1d8] sm:$0xff] %v3898_v0 }
  0xd5   : > { %516 = vst [vmem:[#allocation2 + $0xd0] sm:$0xff] %v3898_v0 }
  0xd6   : > { %517 = vst [vmem:[#allocation2 + $0xb8] sm:$0xff] %v3898_v0 }
  0xd7   : > { %518 = vst [vmem:[#allocation2 + $0x88] sm:$0xff] %v3898_v0 }
  0xd8   : > { %519 = vst [vmem:[#allocation2 + $0xa8] sm:$0xff] %v3898_v0 }
  0xd9   : > { %520 = vst [vmem:[#allocation2 + $0x1c8] sm:$0xff] %v3898_v0 }
  0xda   : > { %521 = vst [vmem:[#allocation2 + $0x170] sm:$0xff] %v3898_v0 }
  0xdb   : > { %522 = vst [vmem:[#allocation2 + $0x178] sm:$0xff] %v3898_v0 }
  0xdc   : > { %523 = vst [vmem:[#allocation2 + $0x68] sm:$0xff] %v3898_v0 }
  0xdd   : > { %524 = vst [vmem:[#allocation2 + $0x190] sm:$0xff] %v3898_v0 }
  0xde   : > { %525 = vst [vmem:[#allocation2 + $0x198] sm:$0xff] %v3898_v0 }
  0xdf   : > { %526 = vst [vmem:[#allocation2 + $0x38] sm:$0xff] %v3898_v0 }
  0xe0   : > { %527 = vst [vmem:[#allocation2 + $0xc0] sm:$0xff] %v3898_v0 }
  0xe1   : > { %528 = vst [vmem:[#allocation2 + $0x1c0] sm:$0xff] %v3898_v0 }
  0xe2   : > { %529 = vst [vmem:[#allocation2 + $0x158] sm:$0xff] %v3898_v0 }
  0xe3   : > { %530 = vst [vmem:[#allocation2 + $0x10] sm:$0xff] %v3898_v0 }
  0xe4   : > { %531 = vst [vmem:[#allocation2 + $0x58] sm:$0xff] %v3898_v0 }
  0xe5   : > { %532 = vst [vmem:[#allocation2 + $0xa0] sm:$0xff] %v3898_v0 }
  0xe6 PF: > { %s2787_s12 = sshll.u32 %s3880_s14, 9  ;;  %v2791_v29 = vld [vmem:[%s4248_s26] sm:$0xf]  ;;  %v3467_v30 = vld [vmem:[%s4248_s26 + $0xc] sm:$0xf0]  ;;  %p3429_p12 = scmp.ne.s32.totalorder %s3880_s14, 1 }
  0xe7   : > { %s534_s15 = sshra.s32 %s2787_s12, 3  ;;  %v3465_v31 = vld [vmem:[%s4248_s26 + $0x4] sm:$0xf]  ;;  %v2793_v36 = vld [vmem:[%s4248_s26 + $0x10] sm:$0xf0]  ;;  %v2792_v41 = vor.u32 %v3467_v30, %v2791_v29 }
  0xe8   : > { %s2788_s27 = sshll.u32 %s534_s15, 2  ;;  %v2799_v37 = vld [vmem:[%s4248_s26 + $0x8] sm:$0xf]  ;;  %v3468_v38 = vld [vmem:[%s4248_s26 + $0x14] sm:$0xf0]  ;;  %v2796_v42 = vor.u32 %v3465_v31, %v2793_v36 }
  0xe9   : > { %s4319_s30 = scalar_lea.vmem %s4733_s1, %s2788_s27  ;;  %v3466_v39 = vld [vmem:[%s4248_s26 + $0xc] sm:$0xf]  ;;  %v2801_v40 = vld [vmem:[%s4248_s26 + $0x18] sm:$0xf0]  ;;  %v2800_v43 = vor.u32 %v3468_v38, %v2799_v37  ;;  %v2807_v45 = vld [vmem:[%s4248_s26 + $0x20] sm:$0xf] }
  0xea   : > { %v3440_v1 = vld [vmem:[%s4319_s30 + $0x38] sm:$0xff]  ;;  %v3439_v5 = vld [vmem:[%s4319_s30 + $0x30] sm:$0xff]  ;;  %v3438_v9 = vld [vmem:[%s4319_s30 + $0x28] sm:$0xff]  ;;  %v2804_v44 = vor.u32 %v3466_v39, %v2801_v40 }
  0xeb   : > { %v3448_v2 = vld [vmem:[%s4319_s30 + $0x78] sm:$0xff]  ;;  %1626 = vmatpush.bf16.msra.mxu0 %v3440_v1  ;;  %v3447_v6 = vld [vmem:[%s4319_s30 + $0x70] sm:$0xff]  ;;  %v3446_v10 = vld [vmem:[%s4319_s30 + $0x68] sm:$0xff] }
  0xec   : > { %v3456_v3 = vld [vmem:[%s4319_s30 + $0xb8] sm:$0xff]  ;;  %1795 = vmatpush.bf16.msra.mxu1 %v3448_v2  ;;  %v3455_v7 = vld [vmem:[%s4319_s30 + $0xb0] sm:$0xff]  ;;  %v3454_v11 = vld [vmem:[%s4319_s30 + $0xa8] sm:$0xff] }
  0xed   : > { %v3464_v4 = vld [vmem:[%s4319_s30 + $0xf8] sm:$0xff]  ;;  %1964 = vmatpush.bf16.msra.mxu2 %v3456_v3  ;;  %v3463_v8 = vld [vmem:[%s4319_s30 + $0xf0] sm:$0xff]  ;;  %v3462_v12 = vld [vmem:[%s4319_s30 + $0xe8] sm:$0xff] }
  0xee   : > { %2133 = vmatpush.bf16.msra.mxu3 %v3464_v4  ;;  %v3437_v13 = vld [vmem:[%s4319_s30 + $0x20] sm:$0xff]  ;;  %v3436_v17 = vld [vmem:[%s4319_s30 + $0x18] sm:$0xff]  ;;  %v3435_v21 = vld [vmem:[%s4319_s30 + $0x10] sm:$0xff] }
  0xef   : > { %1627 = vmatpush.bf16.msra.mxu0 %v3439_v5  ;;  %v3445_v14 = vld [vmem:[%s4319_s30 + $0x60] sm:$0xff]  ;;  %v3444_v18 = vld [vmem:[%s4319_s30 + $0x58] sm:$0xff]  ;;  %v3443_v22 = vld [vmem:[%s4319_s30 + $0x50] sm:$0xff] }
  0xf0   : > { %1796 = vmatpush.bf16.msra.mxu1 %v3447_v6  ;;  %v3453_v15 = vld [vmem:[%s4319_s30 + $0xa0] sm:$0xff]  ;;  %v3452_v19 = vld [vmem:[%s4319_s30 + $0x98] sm:$0xff]  ;;  %v3451_v23 = vld [vmem:[%s4319_s30 + $0x90] sm:$0xff] }
  0xf1   : > { %1965 = vmatpush.bf16.msra.mxu2 %v3455_v7  ;;  %v3461_v16 = vld [vmem:[%s4319_s30 + $0xe0] sm:$0xff]  ;;  %v3460_v20 = vld [vmem:[%s4319_s30 + $0xd8] sm:$0xff]  ;;  %v3459_v24 = vld [vmem:[%s4319_s30 + $0xd0] sm:$0xff] }
  0xf2   : > { %2134 = vmatpush.bf16.msra.mxu3 %v3463_v8  ;;  %v3434_v25 = vld [vmem:[%s4319_s30 + $0x8] sm:$0xff]  ;;  %v3433_v32 = vld [vmem:[%s4319_s30] sm:$0xff]  ;;  %v3471_v46 = vld [vmem:[%s4248_s26 + $0x2c] sm:$0xf0] }
  0xf3   : > { %1628 = vmatpush.bf16.msra.mxu0 %v3438_v9  ;;  %v3442_v26 = vld [vmem:[%s4319_s30 + $0x48] sm:$0xff]  ;;  %v3441_v33 = vld [vmem:[%s4319_s30 + $0x40] sm:$0xff]  ;;  %v2809_v48 = vld [vmem:[%s4248_s26 + $0x30] sm:$0xf0]  ;;  %v2808_v53 = vor.u32 %v3471_v46, %v2807_v45 }
  0xf4   : > { %1797 = vmatpush.bf16.msra.mxu1 %v3446_v10  ;;  %v3450_v27 = vld [vmem:[%s4319_s30 + $0x88] sm:$0xff]  ;;  %v3449_v34 = vld [vmem:[%s4319_s30 + $0x80] sm:$0xff]  ;;  %v3472_v50 = vld [vmem:[%s4248_s26 + $0x34] sm:$0xf0] }
  0xf5   : > { %1966 = vmatpush.bf16.msra.mxu2 %v3454_v11  ;;  %v3458_v28 = vld [vmem:[%s4319_s30 + $0xc8] sm:$0xff]  ;;  %v3457_v35 = vld [vmem:[%s4319_s30 + $0xc0] sm:$0xff]  ;;  %v2817_v52 = vld [vmem:[%s4248_s26 + $0x38] sm:$0xf0] }
  0xf6   : > { %2135 = vmatpush.bf16.msra.mxu3 %v3462_v12  ;;  %v3469_v47 = vld [vmem:[%s4248_s26 + $0x24] sm:$0xf]  ;;  %v2815_v49 = vld [vmem:[%s4248_s26 + $0x28] sm:$0xf]  ;;  %v3470_v51 = vld [vmem:[%s4248_s26 + $0x2c] sm:$0xf] }
  0xf7   : > { %1629 = vmatpush.bf16.msra.mxu0 %v3437_v13  ;;  %v2812_v54 = vor.u32 %v3469_v47, %v2809_v48  ;;  %v2816_v55 = vor.u32 %v3472_v50, %v2815_v49  ;;  %v2820_v56 = vor.u32 %v3470_v51, %v2817_v52  ;;  %v2823_v57 = vld [vmem:[%s4248_s26 + $0x40] sm:$0xf]  ;;  %v3475_v58 = vld [vmem:[%s4248_s26 + $0x4c] sm:$0xf0]  ;;  %v3473_v59 = vld [vmem:[%s4248_s26 + $0x44] sm:$0xf] }
  0xf8   : > { %1798 = vmatpush.bf16.msra.mxu1 %v3445_v14  ;;  %v2825_v60 = vld [vmem:[%s4248_s26 + $0x50] sm:$0xf0]  ;;  %v2831_v61 = vld [vmem:[%s4248_s26 + $0x48] sm:$0xf]  ;;  %v3476_v62 = vld [vmem:[%s4248_s26 + $0x54] sm:$0xf0]  ;;  %v2824_v1 = vor.u32 %v3475_v58, %v2823_v57 }
  0xf9   : > { %1967 = vmatpush.bf16.msra.mxu2 %v3453_v15  ;;  %v3474_v63 = vld [vmem:[%s4248_s26 + $0x4c] sm:$0xf]  ;;  %v2833_v0 = vld [vmem:[%s4248_s26 + $0x58] sm:$0xf0]  ;;  %v2828_v2 = vor.u32 %v3473_v59, %v2825_v60  ;;  %v2832_v3 = vor.u32 %v3476_v62, %v2831_v61  ;;  %v2839_v5 = vld [vmem:[%s4248_s26 + $0x60] sm:$0xf] }
  0xfa   : > { %2136 = vmatpush.bf16.msra.mxu3 %v3461_v16  ;;  %v2836_v4 = vor.u32 %v3474_v63, %v2833_v0  ;;  %v3479_v6 = vld [vmem:[%s4248_s26 + $0x6c] sm:$0xf0]  ;;  %v3477_v7 = vld [vmem:[%s4248_s26 + $0x64] sm:$0xf]  ;;  %v2841_v8 = vld [vmem:[%s4248_s26 + $0x70] sm:$0xf0] }
  0xfb   : > { %1630 = vmatpush.bf16.msra.mxu0 %v3436_v17  ;;  %v2847_v9 = vld [vmem:[%s4248_s26 + $0x68] sm:$0xf]  ;;  %v3480_v10 = vld [vmem:[%s4248_s26 + $0x74] sm:$0xf0]  ;;  %v3478_v11 = vld [vmem:[%s4248_s26 + $0x6c] sm:$0xf]  ;;  %v2840_v13 = vor.u32 %v3479_v6, %v2839_v5  ;;  %v2844_v14 = vor.u32 %v3477_v7, %v2841_v8 }
  0xfc   : > { %1799 = vmatpush.bf16.msra.mxu1 %v3444_v18  ;;  %v2849_v12 = vld [vmem:[%s4248_s26 + $0x78] sm:$0xf0]  ;;  %v2848_v15 = vor.u32 %v3480_v10, %v2847_v9  ;;  %v2855_v17 = vld [vmem:[%s4248_s26 + $0x80] sm:$0xf]  ;;  %v3483_v18 = vld [vmem:[%s4248_s26 + $0x8c] sm:$0xf0] }
  0xfd   : > { %1968 = vmatpush.bf16.msra.mxu2 %v3452_v19  ;;  %v2852_v16 = vor.u32 %v3478_v11, %v2849_v12  ;;  %v3481_v19 = vld [vmem:[%s4248_s26 + $0x84] sm:$0xf]  ;;  %v2871_v29 = vld [vmem:[%s4248_s26 + $0xa0] sm:$0xf]  ;;  %v3487_v30 = vld [vmem:[%s4248_s26 + $0xac] sm:$0xf0] }
  0xfe   : > { %2137 = vmatpush.bf16.msra.mxu3 %v3460_v20  ;;  %v2857_v20 = vld [vmem:[%s4248_s26 + $0x90] sm:$0xf0]  ;;  %v3485_v31 = vld [vmem:[%s4248_s26 + $0xa4] sm:$0xf]  ;;  %v2881_v36 = vld [vmem:[%s4248_s26 + $0xb8] sm:$0xf0]  ;;  %v2872_v37 = vor.u32 %v3487_v30, %v2871_v29 }
  0xff   : > { %1631 = vmatpush.bf16.msra.mxu0 %v3435_v21  ;;  %v2863_v21 = vld [vmem:[%s4248_s26 + $0x88] sm:$0xf]  ;;  %v3492_v46 = vld [vmem:[%s4248_s26 + $0xd4] sm:$0xf0]  ;;  %v3490_v47 = vld [vmem:[%s4248_s26 + $0xcc] sm:$0xf] }
 0x100   : > { %1800 = vmatpush.bf16.msra.mxu1 %v3443_v22  ;;  %v3484_v22 = vld [vmem:[%s4248_s26 + $0x94] sm:$0xf0]  ;;  %v2895_v45 = vld [vmem:[%s4248_s26 + $0xc8] sm:$0xf]  ;;  %v2897_v48 = vld [vmem:[%s4248_s26 + $0xd8] sm:$0xf0] }
 0x101   : > { %1969 = vmatpush.bf16.msra.mxu2 %v3451_v23  ;;  %v3482_v23 = vld [vmem:[%s4248_s26 + $0x8c] sm:$0xf]  ;;  %v2896_v51 = vor.u32 %v3492_v46, %v2895_v45  ;;  %v2900_v52 = vor.u32 %v3490_v47, %v2897_v48  ;;  %v2911_v57 = vld [vmem:[%s4248_s26 + $0xe8] sm:$0xf]  ;;  %v3496_v58 = vld [vmem:[%s4248_s26 + $0xf4] sm:$0xf0] }
 0x102   : > { %2138 = vmatpush.bf16.msra.mxu3 %v3459_v24  ;;  %v2865_v24 = vld [vmem:[%s4248_s26 + $0x98] sm:$0xf0]  ;;  %v3494_v59 = vld [vmem:[%s4248_s26 + $0xec] sm:$0xf]  ;;  %v2912_v63 = vor.u32 %v3496_v58, %v2911_v57  ;;  %v2927_v5 = vld [vmem:[%s4248_s26 + $0x108] sm:$0xf] }
 0x103   : > { %1632 = vmatpush.bf16.msra.mxu0 %v3434_v25  ;;  %v2856_v25 = vor.u32 %v3483_v18, %v2855_v17  ;;  %v2913_v60 = vld [vmem:[%s4248_s26 + $0xf8] sm:$0xf0]  ;;  %v3500_v6 = vld [vmem:[%s4248_s26 + $0x114] sm:$0xf0]  ;;  %v3498_v7 = vld [vmem:[%s4248_s26 + $0x10c] sm:$0xf] }
 0x104   : > { %1801 = vmatpush.bf16.msra.mxu1 %v3442_v26  ;;  %v2860_v26 = vor.u32 %v3481_v19, %v2857_v20  ;;  %v2916_v0 = vor.u32 %v3494_v59, %v2913_v60  ;;  %v2929_v8 = vld [vmem:[%s4248_s26 + $0x118] sm:$0xf0]  ;;  %v3504_v29 = vld [vmem:[%s4248_s26 + $0x134] sm:$0xf0]  ;;  %v3502_v30 = vld [vmem:[%s4248_s26 + $0x12c] sm:$0xf] }
 0x105   : > { %1970 = vmatpush.bf16.msra.mxu2 %v3450_v27  ;;  %v2864_v27 = vor.u32 %v3484_v22, %v2863_v21  ;;  %v602_v21 = vld [vmem:[#allocation2 + $0xb0] sm:$0xff]  ;;  %v2959_v58 = vld [vmem:[%s4248_s26 + $0x148] sm:$0xf]  ;;  %v3508_v59 = vld [vmem:[%s4248_s26 + $0x154] sm:$0xf0] }
 0x106   : > { %2139 = vmatpush.bf16.msra.mxu3 %v3458_v28  ;;  %v2868_v28 = vor.u32 %v3482_v23, %v2865_v24  ;;  %v2935_v23 = vld [vmem:[%s4248_s26 + $0x120] sm:$0xf]  ;;  %v3503_v24 = vld [vmem:[%s4248_s26 + $0x12c] sm:$0xf0]  ;;  %v2953_v57 = vld [vmem:[%s4248_s26 + $0x150] sm:$0xf0] }
 0x107   : > { %1633 = vmatpush.bf16.msra.mxu0 %v3433_v32  ;;  %v2873_v32 = vld [vmem:[%s4248_s26 + $0xb0] sm:$0xf0]  ;;  %v3506_v60 = vld [vmem:[%s4248_s26 + $0x14c] sm:$0xf] }
 0x108   : > { %1802 = vmatpush.bf16.msra.mxu1 %v3441_v33  ;;  %v2879_v33 = vld [vmem:[%s4248_s26 + $0xa8] sm:$0xf]  ;;  %v2876_v38 = vor.u32 %v3485_v31, %v2873_v32  ;;  %v2945_v31 = vld [vmem:[%s4248_s26 + $0x138] sm:$0xf0] }
 0x109   : > { %1971 = vmatpush.bf16.msra.mxu2 %v3449_v34  ;;  %v3488_v34 = vld [vmem:[%s4248_s26 + $0xb4] sm:$0xf0] }
 0x10a   : > { %2140 = vmatpush.bf16.msra.mxu3 %v3457_v35  ;;  %1634 = vmatmul.bf16.vlgmr.msra.gmra.mxu0 %v2792_v41  ;;  %v3486_v35 = vld [vmem:[%s4248_s26 + $0xac] sm:$0xf]  ;;  %v2880_v39 = vor.u32 %v3488_v34, %v2879_v33  ;;  %v2887_v41 = vld [vmem:[%s4248_s26 + $0xc0] sm:$0xf] }
 0x10b   : > { %1803 = vmatmul.bf16.vlgmr.msra.gmra.mxu1 %v2796_v42  ;;  %v2884_v40 = vor.u32 %v3486_v35, %v2881_v36  ;;  %v3491_v42 = vld [vmem:[%s4248_s26 + $0xcc] sm:$0xf0]  ;;  %v2936_v35 = vor.u32 %v3503_v24, %v2935_v23  ;;  %v2969_v23 = vld [vmem:[%s4248_s26 + $0x170] sm:$0xf0]  ;;  %v2975_v24 = vld [vmem:[%s4248_s26 + $0x168] sm:$0xf] }
 0x10c   : > { %1972 = vmatmul.bf16.vlgmr.msra.gmra.mxu2 %v2800_v43  ;;  %v3489_v43 = vld [vmem:[%s4248_s26 + $0xc4] sm:$0xf]  ;;  %v2888_v49 = vor.u32 %v3491_v42, %v2887_v41  ;;  %v2948_v41 = vor.u32 %v3502_v30, %v2945_v31  ;;  %v603_v42 = vld [vmem:[#allocation2 + $0x1b0] sm:$0xff] }
 0x10d   : > { %2141 = vmatmul.bf16.vlgmr.msra.gmra.mxu3 %v2804_v44  ;;  %v2889_v44 = vld [vmem:[%s4248_s26 + $0xd0] sm:$0xf0] }
 0x10e   : > { %v2892_v50 = vor.u32 %v3489_v43, %v2889_v44 }
 0x11a   : > { %1639 = vmatmul.bf16.gmra.mxu0 %v2808_v53  ;;  %v2903_v53 = vld [vmem:[%s4248_s26 + $0xe0] sm:$0xf] }
 0x11b   : > { %1808 = vmatmul.bf16.gmra.mxu1 %v2812_v54  ;;  %v3495_v54 = vld [vmem:[%s4248_s26 + $0xec] sm:$0xf0] }
 0x11c   : > { %1977 = vmatmul.bf16.gmra.mxu2 %v2816_v55  ;;  %v3493_v55 = vld [vmem:[%s4248_s26 + $0xe4] sm:$0xf]  ;;  %v2904_v61 = vor.u32 %v3495_v54, %v2903_v53  ;;  %v2951_v53 = vld [vmem:[%s4248_s26 + $0x140] sm:$0xf]  ;;  %v3507_v54 = vld [vmem:[%s4248_s26 + $0x14c] sm:$0xf0] }
 0x11d   : > { %2146 = vmatmul.bf16.gmra.mxu3 %v2820_v56  ;;  %v2905_v56 = vld [vmem:[%s4248_s26 + $0xf0] sm:$0xf0] }
 0x11e   : > { %v2908_v62 = vor.u32 %v3493_v55, %v2905_v56  ;;  %v3505_v56 = vld [vmem:[%s4248_s26 + $0x144] sm:$0xf] }
 0x12a   : > { %1644 = vmatmul.bf16.gmra.mxu0 %v2824_v1  ;;  %v2919_v1 = vld [vmem:[%s4248_s26 + $0x100] sm:$0xf] }
 0x12b   : > { %1813 = vmatmul.bf16.gmra.mxu1 %v2828_v2  ;;  %v3499_v2 = vld [vmem:[%s4248_s26 + $0x10c] sm:$0xf0] }
 0x12c   : > { %1982 = vmatmul.bf16.gmra.mxu2 %v2832_v3  ;;  %v3497_v3 = vld [vmem:[%s4248_s26 + $0x104] sm:$0xf]  ;;  %v2920_v9 = vor.u32 %v3499_v2, %v2919_v1  ;;  %v2952_v1 = vor.u32 %v3507_v54, %v2951_v53  ;;  %v2956_v2 = vor.u32 %v3505_v56, %v2953_v57  ;;  %v2985_v53 = vld [vmem:[%s4248_s26 + $0x190] sm:$0xf0]  ;;  %v2991_v54 = vld [vmem:[%s4248_s26 + $0x188] sm:$0xf] }
 0x12d   : > { %2151 = vmatmul.bf16.gmra.mxu3 %v2836_v4  ;;  %v2921_v4 = vld [vmem:[%s4248_s26 + $0x110] sm:$0xf0]  ;;  %v3514_v56 = vld [vmem:[%s4248_s26 + $0x18c] sm:$0xf]  ;;  %v2993_v57 = vld [vmem:[%s4248_s26 + $0x198] sm:$0xf0] }
 0x12e   : > { %v2924_v10 = vor.u32 %v3497_v3, %v2921_v4 }
 0x13a   : > { %1649 = vmatmul.bf16.gmra.mxu0 %v2840_v13  ;;  %v2928_v13 = vor.u32 %v3500_v6, %v2927_v5  ;;  %v2960_v6 = vor.u32 %v3508_v59, %v2959_v58 }
 0x13b   : > { %1818 = vmatmul.bf16.gmra.mxu1 %v2844_v14  ;;  %v2932_v14 = vor.u32 %v3498_v7, %v2929_v8  ;;  %v605_v8 = vld [vmem:[#allocation2 + $0x18] sm:$0xff] }
 0x13c   : > { %1987 = vmatmul.bf16.gmra.mxu2 %v2848_v15 }
 0x13d   : > { %2156 = vmatmul.bf16.gmra.mxu3 %v2852_v16 }
 0x14a   : > { %1654 = vmatmul.bf16.gmra.mxu0 %v2856_v25 }
 0x14b   : > { %1823 = vmatmul.bf16.gmra.mxu1 %v2860_v26  ;;  %v3501_v26 = vld [vmem:[%s4248_s26 + $0x124] sm:$0xf] }
 0x14c   : > { %1992 = vmatmul.bf16.gmra.mxu2 %v2864_v27  ;;  %v2937_v27 = vld [vmem:[%s4248_s26 + $0x130] sm:$0xf0] }
 0x14d   : > { %2161 = vmatmul.bf16.gmra.mxu3 %v2868_v28  ;;  %v2943_v28 = vld [vmem:[%s4248_s26 + $0x128] sm:$0xf]  ;;  %v2940_v36 = vor.u32 %v3501_v26, %v2937_v27  ;;  %v3510_v26 = vld [vmem:[%s4248_s26 + $0x16c] sm:$0xf]  ;;  %v2977_v27 = vld [vmem:[%s4248_s26 + $0x178] sm:$0xf0] }
 0x15a   : > { %1659 = vmatmul.bf16.gmra.mxu0 %v2872_v37 }
 0x15b   : > { %1828 = vmatmul.bf16.gmra.mxu1 %v2876_v38 }
 0x15c   : > { %1997 = vmatmul.bf16.gmra.mxu2 %v2880_v39 }
 0x15d   : > { %2166 = vmatmul.bf16.gmra.mxu3 %v2884_v40  ;;  %v2944_v40 = vor.u32 %v3504_v29, %v2943_v28 }
 0x16a   : > { %1664 = vmatmul.bf16.gmra.mxu0 %v2888_v49 }
 0x16b   : > { %1833 = vmatmul.bf16.gmra.mxu1 %v2892_v50 }
 0x16c   : > { %2002 = vmatmul.bf16.gmra.mxu2 %v2896_v51  ;;  %v604_v51 = vld [vmem:[#allocation2 + $0xd8] sm:$0xff] }
 0x16d   : > { %2171 = vmatmul.bf16.gmra.mxu3 %v2900_v52 }
 0x17a   : > { %1669 = vmatmul.bf16.gmra.mxu0 %v2904_v61  ;;  %v2961_v61 = vld [vmem:[%s4248_s26 + $0x158] sm:$0xf0] }
 0x17b   : > { %1838 = vmatmul.bf16.gmra.mxu1 %v2908_v62  ;;  %v2964_v7 = vor.u32 %v3506_v60, %v2961_v61 }
 0x17c   : > { %2007 = vmatmul.bf16.gmra.mxu2 %v2912_v63 }
 0x17d   : > { %2176 = vmatmul.bf16.gmra.mxu3 %v2916_v0 }
 0x187   : > { %v1635_v11 = vpop.f32.mrf.mxu0 }
 0x188   : > { %v1804_v12 = vpop.f32.mrf.mxu1 }
 0x189   : > { %v1805_v15 = vadd.f32 %v1804_v12, %v1635_v11 }
 0x18a   : > { %1674 = vmatmul.bf16.gmra.mxu0 %v2920_v9 }
 0x18b   : > { %1843 = vmatmul.bf16.gmra.mxu1 %v2924_v10 }
 0x18c   : > { %2012 = vmatmul.bf16.gmra.mxu2 %v2928_v13 }
 0x18d   : > { %2181 = vmatmul.bf16.gmra.mxu3 %v2932_v14 }
 0x18f   : > { %v1973_v16 = vpop.f32.mrf.mxu2  ;;  %v1637_v19 = vpop.f32.mrf.mxu0 }
 0x190   : > { %v2142_v17 = vpop.f32.mrf.mxu3  ;;  %v1974_v18 = vadd.f32 %v1973_v16, %v1805_v15  ;;  %v1806_v20 = vpop.f32.mrf.mxu1 }
 0x191   : > { %v1807_v32 = vadd.f32 %v1806_v20, %v1637_v19  ;;  %v2967_v19 = vld [vmem:[%s4248_s26 + $0x160] sm:$0xf]  ;;  %v3511_v20 = vld [vmem:[%s4248_s26 + $0x16c] sm:$0xf0] }
 0x192   : > { %v2143_v22 = vadd.f32 %v2142_v17, %v1974_v18  ;;  %v606_v17 = vld [vmem:[#allocation2 + $0x50] sm:$0xff]  ;;  %v2968_v31 = vor.u32 %v3511_v20, %v2967_v19  ;;  %v3007_v20 = vld [vmem:[%s4248_s26 + $0x1a8] sm:$0xf] }
 0x193   : > { %v3001_v19 = vld [vmem:[%s4248_s26 + $0x1b0] sm:$0xf0] }
 0x194   : > { %v2302_v25 = vadd.f32 %v2143_v22, %v602_v21  ;;  %v3509_v22 = vld [vmem:[%s4248_s26 + $0x164] sm:$0xf] }
 0x196   : > { %2366 = vst [vmem:[#allocation2 + $0xb0] sm:$0xff] %v2302_v25  ;;  %v3512_v25 = vld [vmem:[%s4248_s26 + $0x174] sm:$0xf0] }
 0x197   : > { %v1975_v33 = vpop.f32.mrf.mxu2  ;;  %v1640_v38 = vpop.f32.mrf.mxu0 }
 0x198   : > { %v2144_v34 = vpop.f32.mrf.mxu3  ;;  %v1976_v37 = vadd.f32 %v1975_v33, %v1807_v32  ;;  %v1809_v39 = vpop.f32.mrf.mxu1  ;;  %v2972_v32 = vor.u32 %v3509_v22, %v2969_v23  ;;  %v3518_v22 = vld [vmem:[%s4248_s26 + $0x1ac] sm:$0xf]  ;;  %v3009_v23 = vld [vmem:[%s4248_s26 + $0x1b8] sm:$0xf0] }
 0x199   : > { %v1810_v45 = vadd.f32 %v1809_v39, %v1640_v38  ;;  %v607_v38 = vld [vmem:[#allocation2 + $0x168] sm:$0xff] }
 0x19a   : > { %v2145_v43 = vadd.f32 %v2144_v34, %v1976_v37  ;;  %1679 = vmatmul.bf16.gmra.mxu0 %v2936_v35  ;;  %v2980_v37 = vor.u32 %v3510_v26, %v2977_v27 }
 0x19b   : > { %1848 = vmatmul.bf16.gmra.mxu1 %v2940_v36  ;;  %v2976_v36 = vor.u32 %v3512_v25, %v2975_v24 }
 0x19c   : > { %v2303_v44 = vadd.f32 %v2145_v43, %v603_v42  ;;  %2017 = vmatmul.bf16.gmra.mxu2 %v2944_v40 }
 0x19d   : > { %2186 = vmatmul.bf16.gmra.mxu3 %v2948_v41 }
 0x19e   : > { %2367 = vst [vmem:[#allocation2 + $0x1b0] sm:$0xff] %v2303_v44 }
 0x19f   : > { %v1978_v46 = vpop.f32.mrf.mxu2  ;;  %v1642_v49 = vpop.f32.mrf.mxu0 }
 0x1a0   : > { %v2147_v47 = vpop.f32.mrf.mxu3  ;;  %v1979_v48 = vadd.f32 %v1978_v46, %v1810_v45  ;;  %v1811_v50 = vpop.f32.mrf.mxu1 }
 0x1a1   : > { %v1812_v62 = vadd.f32 %v1811_v50, %v1642_v49  ;;  %v2983_v49 = vld [vmem:[%s4248_s26 + $0x180] sm:$0xf]  ;;  %v3515_v50 = vld [vmem:[%s4248_s26 + $0x18c] sm:$0xf0] }
 0x1a2   : > { %v2148_v52 = vadd.f32 %v2147_v47, %v1979_v48  ;;  %v608_v47 = vld [vmem:[#allocation2 + $0x130] sm:$0xff]  ;;  %v2984_v61 = vor.u32 %v3515_v50, %v2983_v49  ;;  %v3023_v50 = vld [vmem:[%s4248_s26 + $0x1c8] sm:$0xf] }
 0x1a3   : > { %v3017_v49 = vld [vmem:[%s4248_s26 + $0x1d0] sm:$0xf0] }
 0x1a4   : > { %v2304_v55 = vadd.f32 %v2148_v52, %v604_v51  ;;  %v3513_v52 = vld [vmem:[%s4248_s26 + $0x184] sm:$0xf] }
 0x1a6   : > { %2368 = vst [vmem:[#allocation2 + $0xd8] sm:$0xff] %v2304_v55  ;;  %v3516_v55 = vld [vmem:[%s4248_s26 + $0x194] sm:$0xf0] }
 0x1a7   : > { %v1980_v63 = vpop.f32.mrf.mxu2  ;;  %v1645_v4 = vpop.f32.mrf.mxu0 }
 0x1a8   : > { %v2149_v0 = vpop.f32.mrf.mxu3  ;;  %v1981_v3 = vadd.f32 %v1980_v63, %v1812_v62  ;;  %v1814_v5 = vpop.f32.mrf.mxu1  ;;  %v2988_v62 = vor.u32 %v3513_v52, %v2985_v53  ;;  %v3522_v52 = vld [vmem:[%s4248_s26 + $0x1cc] sm:$0xf]  ;;  %v3025_v53 = vld [vmem:[%s4248_s26 + $0x1d8] sm:$0xf0] }
 0x1a9   : > { %v1815_v11 = vadd.f32 %v1814_v5, %v1645_v4  ;;  %v609_v4 = vld [vmem:[#allocation2 + $0x48] sm:$0xff] }
 0x1aa   : > { %v2150_v9 = vadd.f32 %v2149_v0, %v1981_v3  ;;  %1684 = vmatmul.bf16.gmra.mxu0 %v2952_v1  ;;  %v2996_v3 = vor.u32 %v3514_v56, %v2993_v57 }
 0x1ab   : > { %1853 = vmatmul.bf16.gmra.mxu1 %v2956_v2  ;;  %v2992_v2 = vor.u32 %v3516_v55, %v2991_v54 }
 0x1ac   : > { %v2305_v10 = vadd.f32 %v2150_v9, %v605_v8  ;;  %2022 = vmatmul.bf16.gmra.mxu2 %v2960_v6 }
 0x1ad   : > { %2191 = vmatmul.bf16.gmra.mxu3 %v2964_v7 }
 0x1ae   : > { %2369 = vst [vmem:[#allocation2 + $0x18] sm:$0xff] %v2305_v10 }
 0x1af   : > { %v1983_v12 = vpop.f32.mrf.mxu2  ;;  %v1647_v15 = vpop.f32.mrf.mxu0 }
 0x1b0   : > { %v2152_v13 = vpop.f32.mrf.mxu3  ;;  %v1984_v14 = vadd.f32 %v1983_v12, %v1815_v11  ;;  %v1816_v16 = vpop.f32.mrf.mxu1 }
 0x1b1   : > { %v1817_v28 = vadd.f32 %v1816_v16, %v1647_v15  ;;  %v2999_v15 = vld [vmem:[%s4248_s26 + $0x1a0] sm:$0xf]  ;;  %v3519_v16 = vld [vmem:[%s4248_s26 + $0x1ac] sm:$0xf0] }
 0x1b2   : > { %v2153_v18 = vadd.f32 %v2152_v13, %v1984_v14  ;;  %v610_v13 = vld [vmem:[#allocation2 + $0x180] sm:$0xff]  ;;  %v3000_v27 = vor.u32 %v3519_v16, %v2999_v15  ;;  %v3033_v15 = vld [vmem:[%s4248_s26 + $0x1f0] sm:$0xf0]  ;;  %v3039_v16 = vld [vmem:[%s4248_s26 + $0x1e8] sm:$0xf] }
 0x1b4   : > { %v2306_v21 = vadd.f32 %v2153_v18, %v606_v17  ;;  %v3517_v18 = vld [vmem:[%s4248_s26 + $0x1a4] sm:$0xf] }
 0x1b6   : > { %2370 = vst [vmem:[#allocation2 + $0x50] sm:$0xff] %v2306_v21  ;;  %v3520_v21 = vld [vmem:[%s4248_s26 + $0x1b4] sm:$0xf0] }
 0x1b7   : > { %v1985_v29 = vpop.f32.mrf.mxu2  ;;  %v1650_v34 = vpop.f32.mrf.mxu0 }
 0x1b8   : > { %v2154_v30 = vpop.f32.mrf.mxu3  ;;  %v1986_v33 = vadd.f32 %v1985_v29, %v1817_v28  ;;  %v1819_v35 = vpop.f32.mrf.mxu1  ;;  %v3004_v28 = vor.u32 %v3517_v18, %v3001_v19  ;;  %v3526_v18 = vld [vmem:[%s4248_s26 + $0x1ec] sm:$0xf]  ;;  %v3041_v19 = vld [vmem:[%s4248_s26 + $0x1f8] sm:$0xf0] }
 0x1b9   : > { %v1820_v41 = vadd.f32 %v1819_v35, %v1650_v34  ;;  %v611_v34 = vld [vmem:[#allocation2 + $0x110] sm:$0xff] }
 0x1ba   : > { %v2155_v39 = vadd.f32 %v2154_v30, %v1986_v33  ;;  %1689 = vmatmul.bf16.gmra.mxu0 %v2968_v31  ;;  %v3012_v33 = vor.u32 %v3518_v22, %v3009_v23 }
 0x1bb   : > { %1858 = vmatmul.bf16.gmra.mxu1 %v2972_v32  ;;  %v3008_v32 = vor.u32 %v3520_v21, %v3007_v20 }
 0x1bc   : > { %v2307_v40 = vadd.f32 %v2155_v39, %v607_v38  ;;  %2027 = vmatmul.bf16.gmra.mxu2 %v2976_v36 }
 0x1bd   : > { %2196 = vmatmul.bf16.gmra.mxu3 %v2980_v37 }
 0x1be   : > { %2371 = vst [vmem:[#allocation2 + $0x168] sm:$0xff] %v2307_v40 }
 0x1bf   : > { %v1988_v42 = vpop.f32.mrf.mxu2  ;;  %v1652_v45 = vpop.f32.mrf.mxu0 }
 0x1c0   : > { %v2157_v43 = vpop.f32.mrf.mxu3  ;;  %v1989_v44 = vadd.f32 %v1988_v42, %v1820_v41  ;;  %v1821_v46 = vpop.f32.mrf.mxu1 }
 0x1c1   : > { %v1822_v58 = vadd.f32 %v1821_v46, %v1652_v45  ;;  %v3015_v45 = vld [vmem:[%s4248_s26 + $0x1c0] sm:$0xf]  ;;  %v3523_v46 = vld [vmem:[%s4248_s26 + $0x1cc] sm:$0xf0] }
 0x1c2   : > { %v2158_v48 = vadd.f32 %v2157_v43, %v1989_v44  ;;  %v612_v43 = vld [vmem:[#allocation2 + $0x118] sm:$0xff]  ;;  %v3016_v57 = vor.u32 %v3523_v46, %v3015_v45  ;;  %v3049_v45 = vld [vmem:[%s4248_s26 + $0x210] sm:$0xf0]  ;;  %v3055_v46 = vld [vmem:[%s4248_s26 + $0x208] sm:$0xf] }
 0x1c4   : > { %v2308_v51 = vadd.f32 %v2158_v48, %v608_v47  ;;  %v3521_v48 = vld [vmem:[%s4248_s26 + $0x1c4] sm:$0xf] }
 0x1c6   : > { %2372 = vst [vmem:[#allocation2 + $0x130] sm:$0xff] %v2308_v51  ;;  %v3524_v51 = vld [vmem:[%s4248_s26 + $0x1d4] sm:$0xf0] }
 0x1c7   : > { %v1990_v59 = vpop.f32.mrf.mxu2  ;;  %v1655_v0 = vpop.f32.mrf.mxu0 }
 0x1c8   : > { %v2159_v60 = vpop.f32.mrf.mxu3  ;;  %v1991_v63 = vadd.f32 %v1990_v59, %v1822_v58  ;;  %v1824_v1 = vpop.f32.mrf.mxu1  ;;  %v3020_v58 = vor.u32 %v3521_v48, %v3017_v49  ;;  %v3530_v48 = vld [vmem:[%s4248_s26 + $0x20c] sm:$0xf]  ;;  %v3057_v49 = vld [vmem:[%s4248_s26 + $0x218] sm:$0xf0] }
 0x1c9   : > { %v1825_v7 = vadd.f32 %v1824_v1, %v1655_v0  ;;  %v613_v0 = vld [vmem:[#allocation2 + $0x98] sm:$0xff] }
 0x1ca   : > { %v2160_v5 = vadd.f32 %v2159_v60, %v1991_v63  ;;  %1694 = vmatmul.bf16.gmra.mxu0 %v2984_v61  ;;  %v3028_v63 = vor.u32 %v3522_v52, %v3025_v53 }
 0x1cb   : > { %1863 = vmatmul.bf16.gmra.mxu1 %v2988_v62  ;;  %v3024_v62 = vor.u32 %v3524_v51, %v3023_v50 }
 0x1cc   : > { %v2309_v6 = vadd.f32 %v2160_v5, %v609_v4  ;;  %2032 = vmatmul.bf16.gmra.mxu2 %v2992_v2 }
 0x1cd   : > { %2201 = vmatmul.bf16.gmra.mxu3 %v2996_v3 }
 0x1ce   : > { %2373 = vst [vmem:[#allocation2 + $0x48] sm:$0xff] %v2309_v6 }
 0x1cf   : > { %v1993_v8 = vpop.f32.mrf.mxu2  ;;  %v1657_v11 = vpop.f32.mrf.mxu0 }
 0x1d0   : > { %v2162_v9 = vpop.f32.mrf.mxu3  ;;  %v1994_v10 = vadd.f32 %v1993_v8, %v1825_v7  ;;  %v1826_v12 = vpop.f32.mrf.mxu1 }
 0x1d1   : > { %v1827_v24 = vadd.f32 %v1826_v12, %v1657_v11  ;;  %v3031_v11 = vld [vmem:[%s4248_s26 + $0x1e0] sm:$0xf]  ;;  %v3527_v12 = vld [vmem:[%s4248_s26 + $0x1ec] sm:$0xf0] }
 0x1d2   : > { %v2163_v14 = vadd.f32 %v2162_v9, %v1994_v10  ;;  %v614_v9 = vld [vmem:[#allocation2 + $0x120] sm:$0xff]  ;;  %v3032_v23 = vor.u32 %v3527_v12, %v3031_v11  ;;  %v3065_v11 = vld [vmem:[%s4248_s26 + $0x230] sm:$0xf0]  ;;  %v3071_v12 = vld [vmem:[%s4248_s26 + $0x228] sm:$0xf] }
 0x1d4   : > { %v2310_v17 = vadd.f32 %v2163_v14, %v610_v13  ;;  %v3525_v14 = vld [vmem:[%s4248_s26 + $0x1e4] sm:$0xf] }
 0x1d6   : > { %2374 = vst [vmem:[#allocation2 + $0x180] sm:$0xff] %v2310_v17  ;;  %v3528_v17 = vld [vmem:[%s4248_s26 + $0x1f4] sm:$0xf0] }
 0x1d7   : > { %v1995_v25 = vpop.f32.mrf.mxu2  ;;  %v1660_v30 = vpop.f32.mrf.mxu0 }
 0x1d8   : > { %v2164_v26 = vpop.f32.mrf.mxu3  ;;  %v1996_v29 = vadd.f32 %v1995_v25, %v1827_v24  ;;  %v1829_v31 = vpop.f32.mrf.mxu1  ;;  %v3036_v24 = vor.u32 %v3525_v14, %v3033_v15  ;;  %v3534_v14 = vld [vmem:[%s4248_s26 + $0x22c] sm:$0xf]  ;;  %v3073_v15 = vld [vmem:[%s4248_s26 + $0x238] sm:$0xf0] }
 0x1d9   : > { %v1830_v37 = vadd.f32 %v1829_v31, %v1660_v30  ;;  %v615_v30 = vld [vmem:[#allocation2 + $0x150] sm:$0xff] }
 0x1da   : > { %v2165_v35 = vadd.f32 %v2164_v26, %v1996_v29  ;;  %1699 = vmatmul.bf16.gmra.mxu0 %v3000_v27  ;;  %v3044_v29 = vor.u32 %v3526_v18, %v3041_v19 }
 0x1db   : > { %1868 = vmatmul.bf16.gmra.mxu1 %v3004_v28  ;;  %v3040_v28 = vor.u32 %v3528_v17, %v3039_v16 }
 0x1dc   : > { %v2311_v36 = vadd.f32 %v2165_v35, %v611_v34  ;;  %2037 = vmatmul.bf16.gmra.mxu2 %v3008_v32 }
 0x1dd   : > { %2206 = vmatmul.bf16.gmra.mxu3 %v3012_v33 }
 0x1de   : > { %2375 = vst [vmem:[#allocation2 + $0x110] sm:$0xff] %v2311_v36 }
 0x1df   : > { %v1998_v38 = vpop.f32.mrf.mxu2  ;;  %v1662_v41 = vpop.f32.mrf.mxu0 }
 0x1e0   : > { %v2167_v39 = vpop.f32.mrf.mxu3  ;;  %v1999_v40 = vadd.f32 %v1998_v38, %v1830_v37  ;;  %v1831_v42 = vpop.f32.mrf.mxu1 }
 0x1e1   : > { %v1832_v54 = vadd.f32 %v1831_v42, %v1662_v41  ;;  %v3047_v41 = vld [vmem:[%s4248_s26 + $0x200] sm:$0xf]  ;;  %v3531_v42 = vld [vmem:[%s4248_s26 + $0x20c] sm:$0xf0] }
 0x1e2   : > { %v2168_v44 = vadd.f32 %v2167_v39, %v1999_v40  ;;  %v616_v39 = vld [vmem:[#allocation2 + $0x108] sm:$0xff]  ;;  %v3048_v53 = vor.u32 %v3531_v42, %v3047_v41  ;;  %v3081_v41 = vld [vmem:[%s4248_s26 + $0x250] sm:$0xf0] }
 0x1e3   : > { %v3087_v42 = vld [vmem:[%s4248_s26 + $0x248] sm:$0xf] }
 0x1e4   : > { %v2312_v47 = vadd.f32 %v2168_v44, %v612_v43  ;;  %v3529_v44 = vld [vmem:[%s4248_s26 + $0x204] sm:$0xf] }
 0x1e6   : > { %2376 = vst [vmem:[#allocation2 + $0x118] sm:$0xff] %v2312_v47  ;;  %v3532_v47 = vld [vmem:[%s4248_s26 + $0x214] sm:$0xf0] }
 0x1e7   : > { %v2000_v55 = vpop.f32.mrf.mxu2  ;;  %v1665_v60 = vpop.f32.mrf.mxu0 }
 0x1e8   : > { %v2169_v56 = vpop.f32.mrf.mxu3  ;;  %v2001_v59 = vadd.f32 %v2000_v55, %v1832_v54  ;;  %v1834_v61 = vpop.f32.mrf.mxu1  ;;  %v3052_v54 = vor.u32 %v3529_v44, %v3049_v45  ;;  %v3538_v44 = vld [vmem:[%s4248_s26 + $0x24c] sm:$0xf]  ;;  %v3089_v45 = vld [vmem:[%s4248_s26 + $0x258] sm:$0xf0] }
 0x1e9   : > { %v1835_v3 = vadd.f32 %v1834_v61, %v1665_v60  ;;  %v617_v60 = vld [vmem:[#allocation2 + $0x60] sm:$0xff] }
 0x1ea   : > { %v2170_v1 = vadd.f32 %v2169_v56, %v2001_v59  ;;  %1704 = vmatmul.bf16.gmra.mxu0 %v3016_v57  ;;  %v3060_v59 = vor.u32 %v3530_v48, %v3057_v49 }
 0x1eb   : > { %1873 = vmatmul.bf16.gmra.mxu1 %v3020_v58  ;;  %v3056_v58 = vor.u32 %v3532_v47, %v3055_v46 }
 0x1ec   : > { %v2313_v2 = vadd.f32 %v2170_v1, %v613_v0  ;;  %2042 = vmatmul.bf16.gmra.mxu2 %v3024_v62 }
 0x1ed   : > { %2211 = vmatmul.bf16.gmra.mxu3 %v3028_v63 }
 0x1ee   : > { %2377 = vst [vmem:[#allocation2 + $0x98] sm:$0xff] %v2313_v2 }
 0x1ef   : > { %v2003_v4 = vpop.f32.mrf.mxu2  ;;  %v1667_v7 = vpop.f32.mrf.mxu0 }
 0x1f0   : > { %v2172_v5 = vpop.f32.mrf.mxu3  ;;  %v2004_v6 = vadd.f32 %v2003_v4, %v1835_v3  ;;  %v1836_v8 = vpop.f32.mrf.mxu1 }
 0x1f1   : > { %v1837_v20 = vadd.f32 %v1836_v8, %v1667_v7  ;;  %v3063_v7 = vld [vmem:[%s4248_s26 + $0x220] sm:$0xf]  ;;  %v3535_v8 = vld [vmem:[%s4248_s26 + $0x22c] sm:$0xf0] }
 0x1f2   : > { %v2173_v10 = vadd.f32 %v2172_v5, %v2004_v6  ;;  %v618_v5 = vld [vmem:[#allocation2 + $0xe0] sm:$0xff]  ;;  %v3064_v19 = vor.u32 %v3535_v8, %v3063_v7  ;;  %v3097_v7 = vld [vmem:[%s4248_s26 + $0x270] sm:$0xf0]  ;;  %v3103_v8 = vld [vmem:[%s4248_s26 + $0x268] sm:$0xf] }
 0x1f4   : > { %v2314_v13 = vadd.f32 %v2173_v10, %v614_v9  ;;  %v3533_v10 = vld [vmem:[%s4248_s26 + $0x224] sm:$0xf] }
 0x1f6   : > { %2378 = vst [vmem:[#allocation2 + $0x120] sm:$0xff] %v2314_v13  ;;  %v3536_v13 = vld [vmem:[%s4248_s26 + $0x234] sm:$0xf0] }
 0x1f7   : > { %v2005_v21 = vpop.f32.mrf.mxu2  ;;  %v1670_v26 = vpop.f32.mrf.mxu0 }
 0x1f8   : > { %v2174_v22 = vpop.f32.mrf.mxu3  ;;  %v2006_v25 = vadd.f32 %v2005_v21, %v1837_v20  ;;  %v1839_v27 = vpop.f32.mrf.mxu1  ;;  %v3068_v20 = vor.u32 %v3533_v10, %v3065_v11  ;;  %v3542_v10 = vld [vmem:[%s4248_s26 + $0x26c] sm:$0xf]  ;;  %v3105_v11 = vld [vmem:[%s4248_s26 + $0x278] sm:$0xf0] }
 0x1f9   : > { %v1840_v33 = vadd.f32 %v1839_v27, %v1670_v26  ;;  %v619_v26 = vld [vmem:[#allocation2 + $0x188] sm:$0xff] }
 0x1fa   : > { %v2175_v31 = vadd.f32 %v2174_v22, %v2006_v25  ;;  %1709 = vmatmul.bf16.gmra.mxu0 %v3032_v23  ;;  %v3076_v25 = vor.u32 %v3534_v14, %v3073_v15 }
 0x1fb   : > { %1878 = vmatmul.bf16.gmra.mxu1 %v3036_v24  ;;  %v3072_v24 = vor.u32 %v3536_v13, %v3071_v12 }
 0x1fc   : > { %v2315_v32 = vadd.f32 %v2175_v31, %v615_v30  ;;  %2047 = vmatmul.bf16.gmra.mxu2 %v3040_v28 }
 0x1fd   : > { %2216 = vmatmul.bf16.gmra.mxu3 %v3044_v29 }
 0x1fe   : > { %2379 = vst [vmem:[#allocation2 + $0x150] sm:$0xff] %v2315_v32 }
 0x1ff   : > { %v2008_v34 = vpop.f32.mrf.mxu2  ;;  %v1672_v37 = vpop.f32.mrf.mxu0 }
 0x200   : > { %v2177_v35 = vpop.f32.mrf.mxu3  ;;  %v2009_v36 = vadd.f32 %v2008_v34, %v1840_v33  ;;  %v1841_v38 = vpop.f32.mrf.mxu1 }
 0x201   : > { %v1842_v50 = vadd.f32 %v1841_v38, %v1672_v37  ;;  %v3079_v37 = vld [vmem:[%s4248_s26 + $0x240] sm:$0xf]  ;;  %v3539_v38 = vld [vmem:[%s4248_s26 + $0x24c] sm:$0xf0] }
 0x202   : > { %v2178_v40 = vadd.f32 %v2177_v35, %v2009_v36  ;;  %v620_v35 = vld [vmem:[#allocation2 + $0x138] sm:$0xff]  ;;  %v3080_v49 = vor.u32 %v3539_v38, %v3079_v37  ;;  %v3113_v37 = vld [vmem:[%s4248_s26 + $0x290] sm:$0xf0]  ;;  %v3119_v38 = vld [vmem:[%s4248_s26 + $0x288] sm:$0xf] }
 0x204   : > { %v2316_v43 = vadd.f32 %v2178_v40, %v616_v39  ;;  %v3537_v40 = vld [vmem:[%s4248_s26 + $0x244] sm:$0xf] }
 0x206   : > { %2380 = vst [vmem:[#allocation2 + $0x108] sm:$0xff] %v2316_v43  ;;  %v3540_v43 = vld [vmem:[%s4248_s26 + $0x254] sm:$0xf0] }
 0x207   : > { %v2010_v51 = vpop.f32.mrf.mxu2  ;;  %v1675_v56 = vpop.f32.mrf.mxu0 }
 0x208   : > { %v2179_v52 = vpop.f32.mrf.mxu3  ;;  %v2011_v55 = vadd.f32 %v2010_v51, %v1842_v50  ;;  %v1844_v57 = vpop.f32.mrf.mxu1  ;;  %v3084_v50 = vor.u32 %v3537_v40, %v3081_v41  ;;  %v3546_v40 = vld [vmem:[%s4248_s26 + $0x28c] sm:$0xf]  ;;  %v3121_v41 = vld [vmem:[%s4248_s26 + $0x298] sm:$0xf0] }
 0x209   : > { %v1845_v63 = vadd.f32 %v1844_v57, %v1675_v56  ;;  %v621_v56 = vld [vmem:[#allocation2 + $0x140] sm:$0xff] }
 0x20a   : > { %v2180_v61 = vadd.f32 %v2179_v52, %v2011_v55  ;;  %1714 = vmatmul.bf16.gmra.mxu0 %v3048_v53  ;;  %v3092_v55 = vor.u32 %v3538_v44, %v3089_v45 }
 0x20b   : > { %1883 = vmatmul.bf16.gmra.mxu1 %v3052_v54  ;;  %v3088_v54 = vor.u32 %v3540_v43, %v3087_v42 }
 0x20c   : > { %v2317_v62 = vadd.f32 %v2180_v61, %v617_v60  ;;  %2052 = vmatmul.bf16.gmra.mxu2 %v3056_v58 }
 0x20d   : > { %2221 = vmatmul.bf16.gmra.mxu3 %v3060_v59 }
 0x20e   : > { %2381 = vst [vmem:[#allocation2 + $0x60] sm:$0xff] %v2317_v62 }
 0x20f   : > { %v2013_v0 = vpop.f32.mrf.mxu2  ;;  %v1677_v3 = vpop.f32.mrf.mxu0 }
 0x210   : > { %v2182_v1 = vpop.f32.mrf.mxu3  ;;  %v2014_v2 = vadd.f32 %v2013_v0, %v1845_v63  ;;  %v1846_v4 = vpop.f32.mrf.mxu1 }
 0x211   : > { %v1847_v16 = vadd.f32 %v1846_v4, %v1677_v3  ;;  %v3095_v3 = vld [vmem:[%s4248_s26 + $0x260] sm:$0xf]  ;;  %v3543_v4 = vld [vmem:[%s4248_s26 + $0x26c] sm:$0xf0] }
 0x212   : > { %v2183_v6 = vadd.f32 %v2182_v1, %v2014_v2  ;;  %v622_v1 = vld [vmem:[#allocation2 + $0x80] sm:$0xff]  ;;  %v3096_v15 = vor.u32 %v3543_v4, %v3095_v3  ;;  %v3129_v3 = vld [vmem:[%s4248_s26 + $0x2b0] sm:$0xf0]  ;;  %v3135_v4 = vld [vmem:[%s4248_s26 + $0x2a8] sm:$0xf] }
 0x214   : > { %v2318_v9 = vadd.f32 %v2183_v6, %v618_v5  ;;  %v3541_v6 = vld [vmem:[%s4248_s26 + $0x264] sm:$0xf] }
 0x216   : > { %2382 = vst [vmem:[#allocation2 + $0xe0] sm:$0xff] %v2318_v9  ;;  %v3544_v9 = vld [vmem:[%s4248_s26 + $0x274] sm:$0xf0] }
 0x217   : > { %v2015_v17 = vpop.f32.mrf.mxu2  ;;  %v1680_v22 = vpop.f32.mrf.mxu0 }
 0x218   : > { %v2184_v18 = vpop.f32.mrf.mxu3  ;;  %v2016_v21 = vadd.f32 %v2015_v17, %v1847_v16  ;;  %v1849_v23 = vpop.f32.mrf.mxu1  ;;  %v3100_v16 = vor.u32 %v3541_v6, %v3097_v7  ;;  %v3550_v6 = vld [vmem:[%s4248_s26 + $0x2ac] sm:$0xf]  ;;  %v3137_v7 = vld [vmem:[%s4248_s26 + $0x2b8] sm:$0xf0] }
 0x219   : > { %v1850_v29 = vadd.f32 %v1849_v23, %v1680_v22  ;;  %v623_v22 = vld [vmem:[#allocation2 + $0x1a8] sm:$0xff] }
 0x21a   : > { %v2185_v27 = vadd.f32 %v2184_v18, %v2016_v21  ;;  %1719 = vmatmul.bf16.gmra.mxu0 %v3064_v19  ;;  %v3108_v21 = vor.u32 %v3542_v10, %v3105_v11 }
 0x21b   : > { %1888 = vmatmul.bf16.gmra.mxu1 %v3068_v20  ;;  %v3104_v20 = vor.u32 %v3544_v9, %v3103_v8 }
 0x21c   : > { %v2319_v28 = vadd.f32 %v2185_v27, %v619_v26  ;;  %2057 = vmatmul.bf16.gmra.mxu2 %v3072_v24 }
 0x21d   : > { %2226 = vmatmul.bf16.gmra.mxu3 %v3076_v25 }
 0x21e   : > { %2383 = vst [vmem:[#allocation2 + $0x188] sm:$0xff] %v2319_v28 }
 0x21f   : > { %v2018_v30 = vpop.f32.mrf.mxu2  ;;  %v1682_v33 = vpop.f32.mrf.mxu0 }
 0x220   : > { %v2187_v31 = vpop.f32.mrf.mxu3  ;;  %v2019_v32 = vadd.f32 %v2018_v30, %v1850_v29  ;;  %v1851_v34 = vpop.f32.mrf.mxu1 }
 0x221   : > { %v1852_v46 = vadd.f32 %v1851_v34, %v1682_v33  ;;  %v3111_v33 = vld [vmem:[%s4248_s26 + $0x280] sm:$0xf]  ;;  %v3547_v34 = vld [vmem:[%s4248_s26 + $0x28c] sm:$0xf0] }
 0x222   : > { %v2188_v36 = vadd.f32 %v2187_v31, %v2019_v32  ;;  %v624_v31 = vld [vmem:[#allocation2 + $0x1b8] sm:$0xff]  ;;  %v3112_v45 = vor.u32 %v3547_v34, %v3111_v33  ;;  %v3145_v33 = vld [vmem:[%s4248_s26 + $0x2d0] sm:$0xf0]  ;;  %v3151_v34 = vld [vmem:[%s4248_s26 + $0x2c8] sm:$0xf] }
 0x224   : > { %v2320_v39 = vadd.f32 %v2188_v36, %v620_v35  ;;  %v3545_v36 = vld [vmem:[%s4248_s26 + $0x284] sm:$0xf] }
 0x226   : > { %2384 = vst [vmem:[#allocation2 + $0x138] sm:$0xff] %v2320_v39  ;;  %v3548_v39 = vld [vmem:[%s4248_s26 + $0x294] sm:$0xf0] }
 0x227   : > { %v2020_v47 = vpop.f32.mrf.mxu2  ;;  %v1685_v52 = vpop.f32.mrf.mxu0 }
 0x228   : > { %v2189_v48 = vpop.f32.mrf.mxu3  ;;  %v2021_v51 = vadd.f32 %v2020_v47, %v1852_v46  ;;  %v1854_v53 = vpop.f32.mrf.mxu1  ;;  %v3116_v46 = vor.u32 %v3545_v36, %v3113_v37  ;;  %v3554_v36 = vld [vmem:[%s4248_s26 + $0x2cc] sm:$0xf]  ;;  %v3153_v37 = vld [vmem:[%s4248_s26 + $0x2d8] sm:$0xf0] }
 0x229   : > { %v1855_v59 = vadd.f32 %v1854_v53, %v1685_v52  ;;  %v625_v52 = vld [vmem:[#allocation2 + $0x28] sm:$0xff] }
 0x22a   : > { %v2190_v57 = vadd.f32 %v2189_v48, %v2021_v51  ;;  %1724 = vmatmul.bf16.gmra.mxu0 %v3080_v49  ;;  %v3124_v51 = vor.u32 %v3546_v40, %v3121_v41 }
 0x22b   : > { %1893 = vmatmul.bf16.gmra.mxu1 %v3084_v50  ;;  %v3120_v50 = vor.u32 %v3548_v39, %v3119_v38 }
 0x22c   : > { %v2321_v58 = vadd.f32 %v2190_v57, %v621_v56  ;;  %2062 = vmatmul.bf16.gmra.mxu2 %v3088_v54 }
 0x22d   : > { %2231 = vmatmul.bf16.gmra.mxu3 %v3092_v55 }
 0x22e   : > { %2385 = vst [vmem:[#allocation2 + $0x140] sm:$0xff] %v2321_v58 }
 0x22f   : > { %v2023_v60 = vpop.f32.mrf.mxu2  ;;  %v1687_v63 = vpop.f32.mrf.mxu0 }
 0x230   : > { %v2192_v61 = vpop.f32.mrf.mxu3  ;;  %v2024_v62 = vadd.f32 %v2023_v60, %v1855_v59  ;;  %v1856_v0 = vpop.f32.mrf.mxu1 }
 0x231   : > { %v1857_v12 = vadd.f32 %v1856_v0, %v1687_v63  ;;  %v3127_v63 = vld [vmem:[%s4248_s26 + $0x2a0] sm:$0xf]  ;;  %v3551_v0 = vld [vmem:[%s4248_s26 + $0x2ac] sm:$0xf0] }
 0x232   : > { %v2193_v2 = vadd.f32 %v2192_v61, %v2024_v62  ;;  %v626_v61 = vld [vmem:[#allocation2 + $0x1e8] sm:$0xff]  ;;  %v3128_v11 = vor.u32 %v3551_v0, %v3127_v63  ;;  %v3161_v63 = vld [vmem:[%s4248_s26 + $0x2f0] sm:$0xf0] }
 0x233   : > { %v3167_v0 = vld [vmem:[%s4248_s26 + $0x2e8] sm:$0xf] }
 0x234   : > { %v2322_v5 = vadd.f32 %v2193_v2, %v622_v1  ;;  %v3549_v2 = vld [vmem:[%s4248_s26 + $0x2a4] sm:$0xf] }
 0x236   : > { %2386 = vst [vmem:[#allocation2 + $0x80] sm:$0xff] %v2322_v5  ;;  %v3552_v5 = vld [vmem:[%s4248_s26 + $0x2b4] sm:$0xf0] }
 0x237   : > { %v2025_v13 = vpop.f32.mrf.mxu2  ;;  %v1690_v18 = vpop.f32.mrf.mxu0 }
 0x238   : > { %v2194_v14 = vpop.f32.mrf.mxu3  ;;  %v2026_v17 = vadd.f32 %v2025_v13, %v1857_v12  ;;  %v1859_v19 = vpop.f32.mrf.mxu1  ;;  %v3132_v12 = vor.u32 %v3549_v2, %v3129_v3  ;;  %v3558_v2 = vld [vmem:[%s4248_s26 + $0x2ec] sm:$0xf]  ;;  %v3169_v3 = vld [vmem:[%s4248_s26 + $0x2f8] sm:$0xf0] }
 0x239   : > { %v1860_v25 = vadd.f32 %v1859_v19, %v1690_v18  ;;  %v627_v18 = vld [vmem:[#allocation2 + $0xf8] sm:$0xff] }
 0x23a   : > { %v2195_v23 = vadd.f32 %v2194_v14, %v2026_v17  ;;  %1729 = vmatmul.bf16.gmra.mxu0 %v3096_v15  ;;  %v3140_v17 = vor.u32 %v3550_v6, %v3137_v7 }
 0x23b   : > { %1898 = vmatmul.bf16.gmra.mxu1 %v3100_v16  ;;  %v3136_v16 = vor.u32 %v3552_v5, %v3135_v4 }
 0x23c   : > { %v2323_v24 = vadd.f32 %v2195_v23, %v623_v22  ;;  %2067 = vmatmul.bf16.gmra.mxu2 %v3104_v20 }
 0x23d   : > { %2236 = vmatmul.bf16.gmra.mxu3 %v3108_v21 }
 0x23e   : > { %2387 = vst [vmem:[#allocation2 + $0x1a8] sm:$0xff] %v2323_v24 }
 0x23f   : > { %v2028_v26 = vpop.f32.mrf.mxu2  ;;  %v1692_v29 = vpop.f32.mrf.mxu0 }
 0x240   : > { %v2197_v27 = vpop.f32.mrf.mxu3  ;;  %v2029_v28 = vadd.f32 %v2028_v26, %v1860_v25  ;;  %v1861_v30 = vpop.f32.mrf.mxu1 }
 0x241   : > { %v1862_v42 = vadd.f32 %v1861_v30, %v1692_v29  ;;  %v3143_v29 = vld [vmem:[%s4248_s26 + $0x2c0] sm:$0xf]  ;;  %v3555_v30 = vld [vmem:[%s4248_s26 + $0x2cc] sm:$0xf0] }
 0x242   : > { %v2198_v32 = vadd.f32 %v2197_v27, %v2029_v28  ;;  %v628_v27 = vld [vmem:[#allocation2 + $0x160] sm:$0xff]  ;;  %v3144_v41 = vor.u32 %v3555_v30, %v3143_v29  ;;  %v3177_v29 = vld [vmem:[%s4248_s26 + $0x310] sm:$0xf0]  ;;  %v3183_v30 = vld [vmem:[%s4248_s26 + $0x308] sm:$0xf] }
 0x244   : > { %v2324_v35 = vadd.f32 %v2198_v32, %v624_v31  ;;  %v3553_v32 = vld [vmem:[%s4248_s26 + $0x2c4] sm:$0xf] }
 0x246   : > { %2388 = vst [vmem:[#allocation2 + $0x1b8] sm:$0xff] %v2324_v35  ;;  %v3556_v35 = vld [vmem:[%s4248_s26 + $0x2d4] sm:$0xf0] }
 0x247   : > { %v2030_v43 = vpop.f32.mrf.mxu2  ;;  %v1695_v48 = vpop.f32.mrf.mxu0 }
 0x248   : > { %v2199_v44 = vpop.f32.mrf.mxu3  ;;  %v2031_v47 = vadd.f32 %v2030_v43, %v1862_v42  ;;  %v1864_v49 = vpop.f32.mrf.mxu1  ;;  %v3148_v42 = vor.u32 %v3553_v32, %v3145_v33  ;;  %v3562_v32 = vld [vmem:[%s4248_s26 + $0x30c] sm:$0xf]  ;;  %v3185_v33 = vld [vmem:[%s4248_s26 + $0x318] sm:$0xf0] }
 0x249   : > { %v1865_v55 = vadd.f32 %v1864_v49, %v1695_v48  ;;  %v629_v48 = vld [vmem:[#allocation2 + $0x30] sm:$0xff] }
 0x24a   : > { %v2200_v53 = vadd.f32 %v2199_v44, %v2031_v47  ;;  %1734 = vmatmul.bf16.gmra.mxu0 %v3112_v45  ;;  %v3156_v47 = vor.u32 %v3554_v36, %v3153_v37 }
 0x24b   : > { %1903 = vmatmul.bf16.gmra.mxu1 %v3116_v46  ;;  %v3152_v46 = vor.u32 %v3556_v35, %v3151_v34 }
 0x24c   : > { %v2325_v54 = vadd.f32 %v2200_v53, %v625_v52  ;;  %2072 = vmatmul.bf16.gmra.mxu2 %v3120_v50 }
 0x24d   : > { %2241 = vmatmul.bf16.gmra.mxu3 %v3124_v51 }
 0x24e   : > { %2389 = vst [vmem:[#allocation2 + $0x28] sm:$0xff] %v2325_v54 }
 0x24f   : > { %v2033_v56 = vpop.f32.mrf.mxu2  ;;  %v1697_v59 = vpop.f32.mrf.mxu0 }
 0x250   : > { %v2202_v57 = vpop.f32.mrf.mxu3  ;;  %v2034_v58 = vadd.f32 %v2033_v56, %v1865_v55  ;;  %v1866_v60 = vpop.f32.mrf.mxu1 }
 0x251   : > { %v1867_v8 = vadd.f32 %v1866_v60, %v1697_v59  ;;  %v3159_v59 = vld [vmem:[%s4248_s26 + $0x2e0] sm:$0xf]  ;;  %v3559_v60 = vld [vmem:[%s4248_s26 + $0x2ec] sm:$0xf0] }
 0x252   : > { %v2203_v62 = vadd.f32 %v2202_v57, %v2034_v58  ;;  %v630_v57 = vld [vmem:[#allocation2 + $0x1e0] sm:$0xff]  ;;  %v3160_v7 = vor.u32 %v3559_v60, %v3159_v59  ;;  %v3193_v59 = vld [vmem:[%s4248_s26 + $0x330] sm:$0xf0]  ;;  %v3199_v60 = vld [vmem:[%s4248_s26 + $0x328] sm:$0xf] }
 0x254   : > { %v2326_v1 = vadd.f32 %v2203_v62, %v626_v61  ;;  %v3557_v62 = vld [vmem:[%s4248_s26 + $0x2e4] sm:$0xf] }
 0x256   : > { %2390 = vst [vmem:[#allocation2 + $0x1e8] sm:$0xff] %v2326_v1  ;;  %v3560_v1 = vld [vmem:[%s4248_s26 + $0x2f4] sm:$0xf0] }
 0x257   : > { %v2035_v9 = vpop.f32.mrf.mxu2  ;;  %v1700_v14 = vpop.f32.mrf.mxu0 }
 0x258   : > { %v2204_v10 = vpop.f32.mrf.mxu3  ;;  %v2036_v13 = vadd.f32 %v2035_v9, %v1867_v8  ;;  %v1869_v15 = vpop.f32.mrf.mxu1  ;;  %v3164_v8 = vor.u32 %v3557_v62, %v3161_v63  ;;  %v3566_v62 = vld [vmem:[%s4248_s26 + $0x32c] sm:$0xf]  ;;  %v3201_v63 = vld [vmem:[%s4248_s26 + $0x338] sm:$0xf0] }
 0x259   : > { %v1870_v21 = vadd.f32 %v1869_v15, %v1700_v14  ;;  %v631_v14 = vld [vmem:[#allocation2] sm:$0xff] }
 0x25a   : > { %v2205_v19 = vadd.f32 %v2204_v10, %v2036_v13  ;;  %1739 = vmatmul.bf16.gmra.mxu0 %v3128_v11  ;;  %v3172_v13 = vor.u32 %v3558_v2, %v3169_v3 }
 0x25b   : > { %1908 = vmatmul.bf16.gmra.mxu1 %v3132_v12  ;;  %v3168_v12 = vor.u32 %v3560_v1, %v3167_v0 }
 0x25c   : > { %v2327_v20 = vadd.f32 %v2205_v19, %v627_v18  ;;  %2077 = vmatmul.bf16.gmra.mxu2 %v3136_v16 }
 0x25d   : > { %2246 = vmatmul.bf16.gmra.mxu3 %v3140_v17 }
 0x25e   : > { %2391 = vst [vmem:[#allocation2 + $0xf8] sm:$0xff] %v2327_v20 }
 0x25f   : > { %v2038_v22 = vpop.f32.mrf.mxu2  ;;  %v1702_v25 = vpop.f32.mrf.mxu0 }
 0x260   : > { %v2207_v23 = vpop.f32.mrf.mxu3  ;;  %v2039_v24 = vadd.f32 %v2038_v22, %v1870_v21  ;;  %v1871_v26 = vpop.f32.mrf.mxu1 }
 0x261   : > { %v1872_v38 = vadd.f32 %v1871_v26, %v1702_v25  ;;  %v3175_v25 = vld [vmem:[%s4248_s26 + $0x300] sm:$0xf]  ;;  %v3563_v26 = vld [vmem:[%s4248_s26 + $0x30c] sm:$0xf0] }
 0x262   : > { %v2208_v28 = vadd.f32 %v2207_v23, %v2039_v24  ;;  %v632_v23 = vld [vmem:[#allocation2 + $0xf0] sm:$0xff]  ;;  %v3176_v37 = vor.u32 %v3563_v26, %v3175_v25  ;;  %v3215_v26 = vld [vmem:[%s4248_s26 + $0x348] sm:$0xf] }
 0x263   : > { %v3209_v25 = vld [vmem:[%s4248_s26 + $0x350] sm:$0xf0] }
 0x264   : > { %v2328_v31 = vadd.f32 %v2208_v28, %v628_v27  ;;  %v3561_v28 = vld [vmem:[%s4248_s26 + $0x304] sm:$0xf] }
 0x266   : > { %2392 = vst [vmem:[#allocation2 + $0x160] sm:$0xff] %v2328_v31  ;;  %v3564_v31 = vld [vmem:[%s4248_s26 + $0x314] sm:$0xf0] }
 0x267   : > { %v2040_v39 = vpop.f32.mrf.mxu2  ;;  %v1705_v44 = vpop.f32.mrf.mxu0 }
 0x268   : > { %v2209_v40 = vpop.f32.mrf.mxu3  ;;  %v2041_v43 = vadd.f32 %v2040_v39, %v1872_v38  ;;  %v1874_v45 = vpop.f32.mrf.mxu1  ;;  %v3180_v38 = vor.u32 %v3561_v28, %v3177_v29  ;;  %v3570_v28 = vld [vmem:[%s4248_s26 + $0x34c] sm:$0xf]  ;;  %v3217_v29 = vld [vmem:[%s4248_s26 + $0x358] sm:$0xf0] }
 0x269   : > { %v1875_v51 = vadd.f32 %v1874_v45, %v1705_v44  ;;  %v633_v44 = vld [vmem:[#allocation2 + $0x8] sm:$0xff] }
 0x26a   : > { %v2210_v49 = vadd.f32 %v2209_v40, %v2041_v43  ;;  %1744 = vmatmul.bf16.gmra.mxu0 %v3144_v41  ;;  %v3188_v43 = vor.u32 %v3562_v32, %v3185_v33 }
 0x26b   : > { %1913 = vmatmul.bf16.gmra.mxu1 %v3148_v42  ;;  %v3184_v42 = vor.u32 %v3564_v31, %v3183_v30 }
 0x26c   : > { %v2329_v50 = vadd.f32 %v2210_v49, %v629_v48  ;;  %2082 = vmatmul.bf16.gmra.mxu2 %v3152_v46 }
 0x26d   : > { %2251 = vmatmul.bf16.gmra.mxu3 %v3156_v47 }
 0x26e   : > { %2393 = vst [vmem:[#allocation2 + $0x30] sm:$0xff] %v2329_v50 }
 0x26f   : > { %v2043_v52 = vpop.f32.mrf.mxu2  ;;  %v1707_v55 = vpop.f32.mrf.mxu0 }
 0x270   : > { %v2212_v53 = vpop.f32.mrf.mxu3  ;;  %v2044_v54 = vadd.f32 %v2043_v52, %v1875_v51  ;;  %v1876_v56 = vpop.f32.mrf.mxu1 }
 0x271   : > { %v1877_v4 = vadd.f32 %v1876_v56, %v1707_v55  ;;  %v3191_v55 = vld [vmem:[%s4248_s26 + $0x320] sm:$0xf]  ;;  %v3567_v56 = vld [vmem:[%s4248_s26 + $0x32c] sm:$0xf0] }
 0x272   : > { %v2213_v58 = vadd.f32 %v2212_v53, %v2044_v54  ;;  %v634_v53 = vld [vmem:[#allocation2 + $0x148] sm:$0xff]  ;;  %v3192_v3 = vor.u32 %v3567_v56, %v3191_v55  ;;  %v3225_v55 = vld [vmem:[%s4248_s26 + $0x370] sm:$0xf0] }
 0x273   : > { %v3231_v56 = vld [vmem:[%s4248_s26 + $0x368] sm:$0xf] }
 0x274   : > { %v2330_v61 = vadd.f32 %v2213_v58, %v630_v57  ;;  %v3565_v58 = vld [vmem:[%s4248_s26 + $0x324] sm:$0xf] }
 0x276   : > { %2394 = vst [vmem:[#allocation2 + $0x1e0] sm:$0xff] %v2330_v61  ;;  %v3568_v61 = vld [vmem:[%s4248_s26 + $0x334] sm:$0xf0] }
 0x277   : > { %v2045_v5 = vpop.f32.mrf.mxu2  ;;  %v1710_v10 = vpop.f32.mrf.mxu0 }
 0x278   : > { %v2214_v6 = vpop.f32.mrf.mxu3  ;;  %v2046_v9 = vadd.f32 %v2045_v5, %v1877_v4  ;;  %v1879_v11 = vpop.f32.mrf.mxu1  ;;  %v3196_v4 = vor.u32 %v3565_v58, %v3193_v59  ;;  %v3574_v58 = vld [vmem:[%s4248_s26 + $0x36c] sm:$0xf]  ;;  %v3233_v59 = vld [vmem:[%s4248_s26 + $0x378] sm:$0xf0] }
 0x279   : > { %v1880_v17 = vadd.f32 %v1879_v11, %v1710_v10  ;;  %v635_v10 = vld [vmem:[#allocation2 + $0x1d0] sm:$0xff] }
 0x27a   : > { %v2215_v15 = vadd.f32 %v2214_v6, %v2046_v9  ;;  %1749 = vmatmul.bf16.gmra.mxu0 %v3160_v7  ;;  %v3204_v9 = vor.u32 %v3566_v62, %v3201_v63 }
 0x27b   : > { %1918 = vmatmul.bf16.gmra.mxu1 %v3164_v8  ;;  %v3200_v8 = vor.u32 %v3568_v61, %v3199_v60 }
 0x27c   : > { %v2331_v16 = vadd.f32 %v2215_v15, %v631_v14  ;;  %2087 = vmatmul.bf16.gmra.mxu2 %v3168_v12 }
 0x27d   : > { %2256 = vmatmul.bf16.gmra.mxu3 %v3172_v13 }
 0x27e   : > { %2395 = vst [vmem:[#allocation2] sm:$0xff] %v2331_v16 }
 0x27f   : > { %v2048_v18 = vpop.f32.mrf.mxu2  ;;  %v1712_v21 = vpop.f32.mrf.mxu0 }
 0x280   : > { %v2217_v19 = vpop.f32.mrf.mxu3  ;;  %v2049_v20 = vadd.f32 %v2048_v18, %v1880_v17  ;;  %v1881_v22 = vpop.f32.mrf.mxu1 }
 0x281   : > { %v1882_v34 = vadd.f32 %v1881_v22, %v1712_v21  ;;  %v3207_v21 = vld [vmem:[%s4248_s26 + $0x340] sm:$0xf]  ;;  %v3571_v22 = vld [vmem:[%s4248_s26 + $0x34c] sm:$0xf0] }
 0x282   : > { %v2218_v24 = vadd.f32 %v2217_v19, %v2049_v20  ;;  %v636_v19 = vld [vmem:[#allocation2 + $0x100] sm:$0xff]  ;;  %v3208_v33 = vor.u32 %v3571_v22, %v3207_v21  ;;  %v3241_v21 = vld [vmem:[%s4248_s26 + $0x390] sm:$0xf0]  ;;  %v3247_v22 = vld [vmem:[%s4248_s26 + $0x388] sm:$0xf] }
 0x284   : > { %v2332_v27 = vadd.f32 %v2218_v24, %v632_v23  ;;  %v3569_v24 = vld [vmem:[%s4248_s26 + $0x344] sm:$0xf] }
 0x286   : > { %2396 = vst [vmem:[#allocation2 + $0xf0] sm:$0xff] %v2332_v27  ;;  %v3572_v27 = vld [vmem:[%s4248_s26 + $0x354] sm:$0xf0] }
 0x287   : > { %v2050_v35 = vpop.f32.mrf.mxu2  ;;  %v1715_v40 = vpop.f32.mrf.mxu0 }
 0x288   : > { %v2219_v36 = vpop.f32.mrf.mxu3  ;;  %v2051_v39 = vadd.f32 %v2050_v35, %v1882_v34  ;;  %v1884_v41 = vpop.f32.mrf.mxu1  ;;  %v3212_v34 = vor.u32 %v3569_v24, %v3209_v25  ;;  %v3578_v24 = vld [vmem:[%s4248_s26 + $0x38c] sm:$0xf]  ;;  %v3249_v25 = vld [vmem:[%s4248_s26 + $0x398] sm:$0xf0] }
 0x289   : > { %v1885_v47 = vadd.f32 %v1884_v41, %v1715_v40  ;;  %v637_v40 = vld [vmem:[#allocation2 + $0xc8] sm:$0xff] }
 0x28a   : > { %v2220_v45 = vadd.f32 %v2219_v36, %v2051_v39  ;;  %1754 = vmatmul.bf16.gmra.mxu0 %v3176_v37  ;;  %v3220_v39 = vor.u32 %v3570_v28, %v3217_v29 }
 0x28b   : > { %1923 = vmatmul.bf16.gmra.mxu1 %v3180_v38  ;;  %v3216_v38 = vor.u32 %v3572_v27, %v3215_v26 }
 0x28c   : > { %v2333_v46 = vadd.f32 %v2220_v45, %v633_v44  ;;  %2092 = vmatmul.bf16.gmra.mxu2 %v3184_v42 }
 0x28d   : > { %2261 = vmatmul.bf16.gmra.mxu3 %v3188_v43 }
 0x28e   : > { %2397 = vst [vmem:[#allocation2 + $0x8] sm:$0xff] %v2333_v46 }
 0x28f   : > { %v2053_v48 = vpop.f32.mrf.mxu2  ;;  %v1717_v51 = vpop.f32.mrf.mxu0 }
 0x290   : > { %v2222_v49 = vpop.f32.mrf.mxu3  ;;  %v2054_v50 = vadd.f32 %v2053_v48, %v1885_v47  ;;  %v1886_v52 = vpop.f32.mrf.mxu1 }
 0x291   : > { %v1887_v0 = vadd.f32 %v1886_v52, %v1717_v51  ;;  %v3223_v51 = vld [vmem:[%s4248_s26 + $0x360] sm:$0xf]  ;;  %v3575_v52 = vld [vmem:[%s4248_s26 + $0x36c] sm:$0xf0] }
 0x292   : > { %v2223_v54 = vadd.f32 %v2222_v49, %v2054_v50  ;;  %v638_v49 = vld [vmem:[#allocation2 + $0x40] sm:$0xff]  ;;  %v3224_v63 = vor.u32 %v3575_v52, %v3223_v51  ;;  %v3257_v51 = vld [vmem:[%s4248_s26 + $0x3b0] sm:$0xf0]  ;;  %v3263_v52 = vld [vmem:[%s4248_s26 + $0x3a8] sm:$0xf] }
 0x294   : > { %v2334_v57 = vadd.f32 %v2223_v54, %v634_v53  ;;  %v3573_v54 = vld [vmem:[%s4248_s26 + $0x364] sm:$0xf] }
 0x296   : > { %2398 = vst [vmem:[#allocation2 + $0x148] sm:$0xff] %v2334_v57  ;;  %v3576_v57 = vld [vmem:[%s4248_s26 + $0x374] sm:$0xf0] }
 0x297   : > { %v2055_v1 = vpop.f32.mrf.mxu2  ;;  %v1720_v6 = vpop.f32.mrf.mxu0 }
 0x298   : > { %v2224_v2 = vpop.f32.mrf.mxu3  ;;  %v2056_v5 = vadd.f32 %v2055_v1, %v1887_v0  ;;  %v1889_v7 = vpop.f32.mrf.mxu1  ;;  %v3228_v0 = vor.u32 %v3573_v54, %v3225_v55  ;;  %v3582_v54 = vld [vmem:[%s4248_s26 + $0x3ac] sm:$0xf]  ;;  %v3265_v55 = vld [vmem:[%s4248_s26 + $0x3b8] sm:$0xf0] }
 0x299   : > { %v1890_v13 = vadd.f32 %v1889_v7, %v1720_v6  ;;  %v639_v6 = vld [vmem:[#allocation2 + $0x1f8] sm:$0xff] }
 0x29a   : > { %v2225_v11 = vadd.f32 %v2224_v2, %v2056_v5  ;;  %1759 = vmatmul.bf16.gmra.mxu0 %v3192_v3  ;;  %v3236_v5 = vor.u32 %v3574_v58, %v3233_v59 }
 0x29b   : > { %1928 = vmatmul.bf16.gmra.mxu1 %v3196_v4  ;;  %v3232_v4 = vor.u32 %v3576_v57, %v3231_v56 }
 0x29c   : > { %v2335_v12 = vadd.f32 %v2225_v11, %v635_v10  ;;  %2097 = vmatmul.bf16.gmra.mxu2 %v3200_v8 }
 0x29d   : > { %2266 = vmatmul.bf16.gmra.mxu3 %v3204_v9 }
 0x29e   : > { %2399 = vst [vmem:[#allocation2 + $0x1d0] sm:$0xff] %v2335_v12 }
 0x29f   : > { %v2058_v14 = vpop.f32.mrf.mxu2  ;;  %v1722_v17 = vpop.f32.mrf.mxu0 }
 0x2a0   : > { %v2227_v15 = vpop.f32.mrf.mxu3  ;;  %v2059_v16 = vadd.f32 %v2058_v14, %v1890_v13  ;;  %v1891_v18 = vpop.f32.mrf.mxu1 }
 0x2a1   : > { %v1892_v30 = vadd.f32 %v1891_v18, %v1722_v17  ;;  %v3239_v17 = vld [vmem:[%s4248_s26 + $0x380] sm:$0xf]  ;;  %v3579_v18 = vld [vmem:[%s4248_s26 + $0x38c] sm:$0xf0] }
 0x2a2   : > { %v2228_v20 = vadd.f32 %v2227_v15, %v2059_v16  ;;  %v640_v15 = vld [vmem:[#allocation2 + $0x20] sm:$0xff]  ;;  %v3240_v29 = vor.u32 %v3579_v18, %v3239_v17  ;;  %v3273_v17 = vld [vmem:[%s4248_s26 + $0x3d0] sm:$0xf0]  ;;  %v3279_v18 = vld [vmem:[%s4248_s26 + $0x3c8] sm:$0xf] }
 0x2a4   : > { %v2336_v23 = vadd.f32 %v2228_v20, %v636_v19  ;;  %v3577_v20 = vld [vmem:[%s4248_s26 + $0x384] sm:$0xf] }
 0x2a6   : > { %2400 = vst [vmem:[#allocation2 + $0x100] sm:$0xff] %v2336_v23  ;;  %v3580_v23 = vld [vmem:[%s4248_s26 + $0x394] sm:$0xf0] }
 0x2a7   : > { %v2060_v31 = vpop.f32.mrf.mxu2  ;;  %v1725_v36 = vpop.f32.mrf.mxu0 }
 0x2a8   : > { %v2229_v32 = vpop.f32.mrf.mxu3  ;;  %v2061_v35 = vadd.f32 %v2060_v31, %v1892_v30  ;;  %v1894_v37 = vpop.f32.mrf.mxu1  ;;  %v3244_v30 = vor.u32 %v3577_v20, %v3241_v21  ;;  %v3586_v20 = vld [vmem:[%s4248_s26 + $0x3cc] sm:$0xf]  ;;  %v3281_v21 = vld [vmem:[%s4248_s26 + $0x3d8] sm:$0xf0] }
 0x2a9   : > { %v1895_v43 = vadd.f32 %v1894_v37, %v1725_v36  ;;  %v641_v36 = vld [vmem:[#allocation2 + $0x128] sm:$0xff] }
 0x2aa   : > { %v2230_v41 = vadd.f32 %v2229_v32, %v2061_v35  ;;  %1764 = vmatmul.bf16.gmra.mxu0 %v3208_v33  ;;  %v3252_v35 = vor.u32 %v3578_v24, %v3249_v25 }
 0x2ab   : > { %1933 = vmatmul.bf16.gmra.mxu1 %v3212_v34  ;;  %v3248_v34 = vor.u32 %v3580_v23, %v3247_v22 }
 0x2ac   : > { %v2337_v42 = vadd.f32 %v2230_v41, %v637_v40  ;;  %2102 = vmatmul.bf16.gmra.mxu2 %v3216_v38 }
 0x2ad   : > { %2271 = vmatmul.bf16.gmra.mxu3 %v3220_v39 }
 0x2ae   : > { %2401 = vst [vmem:[#allocation2 + $0xc8] sm:$0xff] %v2337_v42 }
 0x2af   : > { %v2063_v44 = vpop.f32.mrf.mxu2  ;;  %v1727_v47 = vpop.f32.mrf.mxu0 }
 0x2b0   : > { %v2232_v45 = vpop.f32.mrf.mxu3  ;;  %v2064_v46 = vadd.f32 %v2063_v44, %v1895_v43  ;;  %v1896_v48 = vpop.f32.mrf.mxu1 }
 0x2b1   : > { %v1897_v60 = vadd.f32 %v1896_v48, %v1727_v47  ;;  %v3255_v47 = vld [vmem:[%s4248_s26 + $0x3a0] sm:$0xf]  ;;  %v3583_v48 = vld [vmem:[%s4248_s26 + $0x3ac] sm:$0xf0] }
 0x2b2   : > { %v2233_v50 = vadd.f32 %v2232_v45, %v2064_v46  ;;  %v642_v45 = vld [vmem:[#allocation2 + $0x1a0] sm:$0xff]  ;;  %v3256_v59 = vor.u32 %v3583_v48, %v3255_v47  ;;  %v3289_v47 = vld [vmem:[%s4248_s26 + $0x3f0] sm:$0xf0]  ;;  %v3295_v48 = vld [vmem:[%s4248_s26 + $0x3e8] sm:$0xf] }
 0x2b4   : > { %v2338_v53 = vadd.f32 %v2233_v50, %v638_v49  ;;  %v3581_v50 = vld [vmem:[%s4248_s26 + $0x3a4] sm:$0xf] }
 0x2b6   : > { %2402 = vst [vmem:[#allocation2 + $0x40] sm:$0xff] %v2338_v53  ;;  %v3584_v53 = vld [vmem:[%s4248_s26 + $0x3b4] sm:$0xf0] }
 0x2b7   : > { %v2065_v61 = vpop.f32.mrf.mxu2  ;;  %v1730_v2 = vpop.f32.mrf.mxu0 }
 0x2b8   : > { %v2234_v62 = vpop.f32.mrf.mxu3  ;;  %v2066_v1 = vadd.f32 %v2065_v61, %v1897_v60  ;;  %v1899_v3 = vpop.f32.mrf.mxu1  ;;  %v3260_v60 = vor.u32 %v3581_v50, %v3257_v51  ;;  %v3590_v50 = vld [vmem:[%s4248_s26 + $0x3ec] sm:$0xf]  ;;  %v3297_v51 = vld [vmem:[%s4248_s26 + $0x3f8] sm:$0xf0] }
 0x2b9   : > { %v1900_v9 = vadd.f32 %v1899_v3, %v1730_v2  ;;  %v643_v2 = vld [vmem:[#allocation2 + $0x1f0] sm:$0xff] }
 0x2ba   : > { %v2235_v7 = vadd.f32 %v2234_v62, %v2066_v1  ;;  %1769 = vmatmul.bf16.gmra.mxu0 %v3224_v63  ;;  %v3268_v1 = vor.u32 %v3582_v54, %v3265_v55 }
 0x2bb   : > { %1938 = vmatmul.bf16.gmra.mxu1 %v3228_v0  ;;  %v3264_v0 = vor.u32 %v3584_v53, %v3263_v52 }
 0x2bc   : > { %v2339_v8 = vadd.f32 %v2235_v7, %v639_v6  ;;  %2107 = vmatmul.bf16.gmra.mxu2 %v3232_v4 }
 0x2bd   : > { %2276 = vmatmul.bf16.gmra.mxu3 %v3236_v5 }
 0x2be   : > { %2403 = vst [vmem:[#allocation2 + $0x1f8] sm:$0xff] %v2339_v8 }
 0x2bf   : > { %v2068_v10 = vpop.f32.mrf.mxu2  ;;  %v1732_v13 = vpop.f32.mrf.mxu0 }
 0x2c0   : > { %v2237_v11 = vpop.f32.mrf.mxu3  ;;  %v2069_v12 = vadd.f32 %v2068_v10, %v1900_v9  ;;  %v1901_v14 = vpop.f32.mrf.mxu1 }
 0x2c1   : > { %v1902_v26 = vadd.f32 %v1901_v14, %v1732_v13  ;;  %v3271_v13 = vld [vmem:[%s4248_s26 + $0x3c0] sm:$0xf]  ;;  %v3587_v14 = vld [vmem:[%s4248_s26 + $0x3cc] sm:$0xf0] }
 0x2c2   : > { %v2238_v16 = vadd.f32 %v2237_v11, %v2069_v12  ;;  %v644_v11 = vld [vmem:[#allocation2 + $0xe8] sm:$0xff]  ;;  %v3272_v25 = vor.u32 %v3587_v14, %v3271_v13 }
 0x2c4   : > { %v2340_v19 = vadd.f32 %v2238_v16, %v640_v15  ;;  %v3585_v16 = vld [vmem:[%s4248_s26 + $0x3c4] sm:$0xf] }
 0x2c6   : > { %2404 = vst [vmem:[#allocation2 + $0x20] sm:$0xff] %v2340_v19  ;;  %v3588_v19 = vld [vmem:[%s4248_s26 + $0x3d4] sm:$0xf0] }
 0x2c7   : > { %v2070_v27 = vpop.f32.mrf.mxu2  ;;  %v1735_v32 = vpop.f32.mrf.mxu0 }
 0x2c8   : > { %v2239_v28 = vpop.f32.mrf.mxu3  ;;  %v2071_v31 = vadd.f32 %v2070_v27, %v1902_v26  ;;  %v1904_v33 = vpop.f32.mrf.mxu1  ;;  %v3276_v26 = vor.u32 %v3585_v16, %v3273_v17  ;;  %v649_v16 = vld [vmem:[#allocation2 + $0xd0] sm:$0xff] }
 0x2c9   : > { %v1905_v39 = vadd.f32 %v1904_v33, %v1735_v32  ;;  %v645_v32 = vld [vmem:[#allocation2 + $0x78] sm:$0xff] }
 0x2ca   : > { %v2240_v37 = vadd.f32 %v2239_v28, %v2071_v31  ;;  %1774 = vmatmul.bf16.gmra.mxu0 %v3240_v29  ;;  %v3284_v31 = vor.u32 %v3586_v20, %v3281_v21 }
 0x2cb   : > { %1943 = vmatmul.bf16.gmra.mxu1 %v3244_v30  ;;  %v3280_v30 = vor.u32 %v3588_v19, %v3279_v18 }
 0x2cc   : > { %v2341_v38 = vadd.f32 %v2240_v37, %v641_v36  ;;  %2112 = vmatmul.bf16.gmra.mxu2 %v3248_v34 }
 0x2cd   : > { %2281 = vmatmul.bf16.gmra.mxu3 %v3252_v35 }
 0x2ce   : > { %2405 = vst [vmem:[#allocation2 + $0x128] sm:$0xff] %v2341_v38 }
 0x2cf   : > { %v2073_v40 = vpop.f32.mrf.mxu2  ;;  %v1737_v43 = vpop.f32.mrf.mxu0 }
 0x2d0   : > { %v2242_v41 = vpop.f32.mrf.mxu3  ;;  %v2074_v42 = vadd.f32 %v2073_v40, %v1905_v39  ;;  %v1906_v44 = vpop.f32.mrf.mxu1 }
 0x2d1   : > { %v1907_v56 = vadd.f32 %v1906_v44, %v1737_v43  ;;  %v3287_v43 = vld [vmem:[%s4248_s26 + $0x3e0] sm:$0xf]  ;;  %v3591_v44 = vld [vmem:[%s4248_s26 + $0x3ec] sm:$0xf0] }
 0x2d2   : > { %v2243_v46 = vadd.f32 %v2242_v41, %v2074_v42  ;;  %v646_v41 = vld [vmem:[#allocation2 + $0x70] sm:$0xff]  ;;  %v3288_v55 = vor.u32 %v3591_v44, %v3287_v43  ;;  %v652_v43 = vld [vmem:[#allocation2 + $0xa8] sm:$0xff] }
 0x2d4   : > { %v2342_v49 = vadd.f32 %v2243_v46, %v642_v45  ;;  %v3589_v46 = vld [vmem:[%s4248_s26 + $0x3e4] sm:$0xf] }
 0x2d6   : > { %2406 = vst [vmem:[#allocation2 + $0x1a0] sm:$0xff] %v2342_v49  ;;  %v3592_v49 = vld [vmem:[%s4248_s26 + $0x3f4] sm:$0xf0] }
 0x2d7   : > { %v2075_v57 = vpop.f32.mrf.mxu2  ;;  %v1740_v62 = vpop.f32.mrf.mxu0 }
 0x2d8   : > { %v2244_v58 = vpop.f32.mrf.mxu3  ;;  %v2076_v61 = vadd.f32 %v2075_v57, %v1907_v56  ;;  %v1909_v63 = vpop.f32.mrf.mxu1  ;;  %v3292_v56 = vor.u32 %v3589_v46, %v3289_v47 }
 0x2d9   : > { %v1910_v5 = vadd.f32 %v1909_v63, %v1740_v62  ;;  %v647_v62 = vld [vmem:[#allocation2 + $0x90] sm:$0xff] }
 0x2da   : > { %v2245_v3 = vadd.f32 %v2244_v58, %v2076_v61  ;;  %1779 = vmatmul.bf16.gmra.mxu0 %v3256_v59  ;;  %v3300_v61 = vor.u32 %v3590_v50, %v3297_v51 }
 0x2db   : > { %1948 = vmatmul.bf16.gmra.mxu1 %v3260_v60  ;;  %v3296_v60 = vor.u32 %v3592_v49, %v3295_v48 }
 0x2dc   : > { %v2343_v4 = vadd.f32 %v2245_v3, %v643_v2  ;;  %2117 = vmatmul.bf16.gmra.mxu2 %v3264_v0 }
 0x2dd   : > { %2286 = vmatmul.bf16.gmra.mxu3 %v3268_v1 }
 0x2de   : > { %2407 = vst [vmem:[#allocation2 + $0x1f0] sm:$0xff] %v2343_v4 }
 0x2df   : > { %v2078_v6 = vpop.f32.mrf.mxu2  ;;  %v1742_v9 = vpop.f32.mrf.mxu0 }
 0x2e0   : > { %v2247_v7 = vpop.f32.mrf.mxu3  ;;  %v2079_v8 = vadd.f32 %v2078_v6, %v1910_v5  ;;  %v1911_v10 = vpop.f32.mrf.mxu1 }
 0x2e1   : > { %v1912_v22 = vadd.f32 %v1911_v10, %v1742_v9 }
 0x2e2   : > { %v2248_v12 = vadd.f32 %v2247_v7, %v2079_v8  ;;  %v648_v7 = vld [vmem:[#allocation2 + $0x1d8] sm:$0xff] }
 0x2e4   : > { %v2344_v15 = vadd.f32 %v2248_v12, %v644_v11 }
 0x2e6   : > { %2408 = vst [vmem:[#allocation2 + $0xe8] sm:$0xff] %v2344_v15 }
 0x2e7   : > { %v2080_v23 = vpop.f32.mrf.mxu2  ;;  %v1745_v28 = vpop.f32.mrf.mxu0 }
 0x2e8   : > { %v2249_v24 = vpop.f32.mrf.mxu3  ;;  %v2081_v27 = vadd.f32 %v2080_v23, %v1912_v22  ;;  %v1914_v29 = vpop.f32.mrf.mxu1 }
 0x2e9   : > { %v1915_v35 = vadd.f32 %v1914_v29, %v1745_v28 }
 0x2ea   : > { %v2250_v33 = vadd.f32 %v2249_v24, %v2081_v27  ;;  %1784 = vmatmul.bf16.gmra.mxu0 %v3272_v25  ;;  %v650_v25 = vld [vmem:[#allocation2 + $0xb8] sm:$0xff] }
 0x2eb   : > { %1953 = vmatmul.bf16.gmra.mxu1 %v3276_v26 }
 0x2ec   : > { %v2345_v34 = vadd.f32 %v2250_v33, %v645_v32  ;;  %2122 = vmatmul.bf16.gmra.mxu2 %v3280_v30 }
 0x2ed   : > { %2291 = vmatmul.bf16.gmra.mxu3 %v3284_v31 }
 0x2ee   : > { %2409 = vst [vmem:[#allocation2 + $0x78] sm:$0xff] %v2345_v34  ;;  %v651_v34 = vld [vmem:[#allocation2 + $0x88] sm:$0xff] }
 0x2ef   : > { %v2083_v36 = vpop.f32.mrf.mxu2  ;;  %v1747_v39 = vpop.f32.mrf.mxu0 }
 0x2f0   : > { %v2252_v37 = vpop.f32.mrf.mxu3  ;;  %v2084_v38 = vadd.f32 %v2083_v36, %v1915_v35  ;;  %v1916_v40 = vpop.f32.mrf.mxu1 }
 0x2f1   : > { %v1917_v52 = vadd.f32 %v1916_v40, %v1747_v39 }
 0x2f2   : > { %v2253_v42 = vadd.f32 %v2252_v37, %v2084_v38 }
 0x2f4   : > { %v2346_v45 = vadd.f32 %v2253_v42, %v646_v41 }
 0x2f6   : > { %2410 = vst [vmem:[#allocation2 + $0x70] sm:$0xff] %v2346_v45 }
 0x2f7   : > { %v2085_v53 = vpop.f32.mrf.mxu2  ;;  %v1750_v58 = vpop.f32.mrf.mxu0 }
 0x2f8   : > { %v2254_v54 = vpop.f32.mrf.mxu3  ;;  %v2086_v57 = vadd.f32 %v2085_v53, %v1917_v52  ;;  %v1919_v59 = vpop.f32.mrf.mxu1  ;;  %v653_v52 = vld [vmem:[#allocation2 + $0x1c8] sm:$0xff] }
 0x2f9   : > { %v1920_v1 = vadd.f32 %v1919_v59, %v1750_v58 }
 0x2fa   : > { %v2255_v63 = vadd.f32 %v2254_v54, %v2086_v57  ;;  %1789 = vmatmul.bf16.gmra.mxu0 %v3288_v55 }
 0x2fb   : > { %1958 = vmatmul.bf16.gmra.mxu1 %v3292_v56 }
 0x2fc   : > { %v2347_v0 = vadd.f32 %v2255_v63, %v647_v62  ;;  %2127 = vmatmul.bf16.gmra.mxu2 %v3296_v60 }
 0x2fd   : > { %2296 = vmatmul.bf16.gmra.mxu3 %v3300_v61  ;;  %v654_v61 = vld [vmem:[#allocation2 + $0x170] sm:$0xff] }
 0x2fe   : > { %2411 = vst [vmem:[#allocation2 + $0x90] sm:$0xff] %v2347_v0 }
 0x2ff   : > { %v2088_v2 = vpop.f32.mrf.mxu2  ;;  %v1752_v5 = vpop.f32.mrf.mxu0 }
 0x300   : > { %v2257_v3 = vpop.f32.mrf.mxu3  ;;  %v2089_v4 = vadd.f32 %v2088_v2, %v1920_v1  ;;  %v1921_v6 = vpop.f32.mrf.mxu1 }
 0x301   : > { %v1922_v10 = vadd.f32 %v1921_v6, %v1752_v5  ;;  %v655_v6 = vld [vmem:[#allocation2 + $0x178] sm:$0xff] }
 0x302   : > { %v2258_v8 = vadd.f32 %v2257_v3, %v2089_v4 }
 0x304   : > { %v2348_v9 = vadd.f32 %v2258_v8, %v648_v7 }
 0x306   : > { %2412 = vst [vmem:[#allocation2 + $0x1d8] sm:$0xff] %v2348_v9 }
 0x307   : > { %v2090_v11 = vpop.f32.mrf.mxu2  ;;  %v1755_v14 = vpop.f32.mrf.mxu0 }
 0x308   : > { %v2259_v12 = vpop.f32.mrf.mxu3  ;;  %v2091_v13 = vadd.f32 %v2090_v11, %v1922_v10  ;;  %v1924_v15 = vpop.f32.mrf.mxu1 }
 0x309   : > { %v1925_v19 = vadd.f32 %v1924_v15, %v1755_v14  ;;  %v656_v15 = vld [vmem:[#allocation2 + $0x68] sm:$0xff] }
 0x30a   : > { %v2260_v17 = vadd.f32 %v2259_v12, %v2091_v13 }
 0x30c   : > { %v2349_v18 = vadd.f32 %v2260_v17, %v649_v16 }
 0x30e   : > { %2413 = vst [vmem:[#allocation2 + $0xd0] sm:$0xff] %v2349_v18 }
 0x30f   : > { %v2093_v20 = vpop.f32.mrf.mxu2  ;;  %v1757_v23 = vpop.f32.mrf.mxu0 }
 0x310   : > { %v2262_v21 = vpop.f32.mrf.mxu3  ;;  %v2094_v22 = vadd.f32 %v2093_v20, %v1925_v19  ;;  %v1926_v24 = vpop.f32.mrf.mxu1 }
 0x311   : > { %v1927_v28 = vadd.f32 %v1926_v24, %v1757_v23  ;;  %v657_v24 = vld [vmem:[#allocation2 + $0x190] sm:$0xff] }
 0x312   : > { %v2263_v26 = vadd.f32 %v2262_v21, %v2094_v22 }
 0x314   : > { %v2350_v27 = vadd.f32 %v2263_v26, %v650_v25 }
 0x316   : > { %2414 = vst [vmem:[#allocation2 + $0xb8] sm:$0xff] %v2350_v27 }
 0x317   : > { %v2095_v29 = vpop.f32.mrf.mxu2  ;;  %v1760_v32 = vpop.f32.mrf.mxu0 }
 0x318   : > { %v2264_v30 = vpop.f32.mrf.mxu3  ;;  %v2096_v31 = vadd.f32 %v2095_v29, %v1927_v28  ;;  %v1929_v33 = vpop.f32.mrf.mxu1 }
 0x319   : > { %v1930_v37 = vadd.f32 %v1929_v33, %v1760_v32  ;;  %v658_v33 = vld [vmem:[#allocation2 + $0x198] sm:$0xff] }
 0x31a   : > { %v2265_v35 = vadd.f32 %v2264_v30, %v2096_v31 }
 0x31c   : > { %v2351_v36 = vadd.f32 %v2265_v35, %v651_v34 }
 0x31e   : > { %2415 = vst [vmem:[#allocation2 + $0x88] sm:$0xff] %v2351_v36 }
 0x31f   : > { %v2098_v38 = vpop.f32.mrf.mxu2  ;;  %v1762_v41 = vpop.f32.mrf.mxu0 }
 0x320   : > { %v2267_v39 = vpop.f32.mrf.mxu3  ;;  %v2099_v40 = vadd.f32 %v2098_v38, %v1930_v37  ;;  %v1931_v42 = vpop.f32.mrf.mxu1 }
 0x321   : > { %v1932_v46 = vadd.f32 %v1931_v42, %v1762_v41  ;;  %v659_v42 = vld [vmem:[#allocation2 + $0x38] sm:$0xff] }
 0x322   : > { %v2268_v44 = vadd.f32 %v2267_v39, %v2099_v40 }
 0x324   : > { %v2352_v45 = vadd.f32 %v2268_v44, %v652_v43 }
 0x326   : > { %2416 = vst [vmem:[#allocation2 + $0xa8] sm:$0xff] %v2352_v45 }
 0x327   : > { %v2100_v47 = vpop.f32.mrf.mxu2  ;;  %v1765_v50 = vpop.f32.mrf.mxu0 }
 0x328   : > { %v2269_v48 = vpop.f32.mrf.mxu3  ;;  %v2101_v49 = vadd.f32 %v2100_v47, %v1932_v46  ;;  %v1934_v51 = vpop.f32.mrf.mxu1 }
 0x329   : > { %v1935_v55 = vadd.f32 %v1934_v51, %v1765_v50  ;;  %v660_v51 = vld [vmem:[#allocation2 + $0xc0] sm:$0xff] }
 0x32a   : > { %v2270_v53 = vadd.f32 %v2269_v48, %v2101_v49 }
 0x32c   : > { %v2353_v54 = vadd.f32 %v2270_v53, %v653_v52 }
 0x32e   : > { %2417 = vst [vmem:[#allocation2 + $0x1c8] sm:$0xff] %v2353_v54 }
 0x32f   : > { %v2103_v56 = vpop.f32.mrf.mxu2  ;;  %v1767_v59 = vpop.f32.mrf.mxu0 }
 0x330   : > { %v2272_v57 = vpop.f32.mrf.mxu3  ;;  %v2104_v58 = vadd.f32 %v2103_v56, %v1935_v55  ;;  %v1936_v60 = vpop.f32.mrf.mxu1 }
 0x331   : > { %v1937_v0 = vadd.f32 %v1936_v60, %v1767_v59  ;;  %v661_v60 = vld [vmem:[#allocation2 + $0x1c0] sm:$0xff] }
 0x332   : > { %v2273_v62 = vadd.f32 %v2272_v57, %v2104_v58 }
 0x334   : > { %v2354_v63 = vadd.f32 %v2273_v62, %v654_v61 }
 0x336   : > { %2418 = vst [vmem:[#allocation2 + $0x170] sm:$0xff] %v2354_v63 }
 0x337   : > { %v2105_v1 = vpop.f32.mrf.mxu2  ;;  %v1770_v4 = vpop.f32.mrf.mxu0 }
 0x338   : > { %v2274_v2 = vpop.f32.mrf.mxu3  ;;  %v2106_v3 = vadd.f32 %v2105_v1, %v1937_v0  ;;  %v1939_v5 = vpop.f32.mrf.mxu1 }
 0x339   : > { %v1940_v9 = vadd.f32 %v1939_v5, %v1770_v4  ;;  %v662_v5 = vld [vmem:[#allocation2 + $0x158] sm:$0xff] }
 0x33a   : > { %v2275_v7 = vadd.f32 %v2274_v2, %v2106_v3 }
 0x33c   : > { %v2355_v8 = vadd.f32 %v2275_v7, %v655_v6 }
 0x33e   : > { %2419 = vst [vmem:[#allocation2 + $0x178] sm:$0xff] %v2355_v8 }
 0x33f   : > { %v2108_v10 = vpop.f32.mrf.mxu2  ;;  %v1772_v13 = vpop.f32.mrf.mxu0 }
 0x340   : > { %v2277_v11 = vpop.f32.mrf.mxu3  ;;  %v2109_v12 = vadd.f32 %v2108_v10, %v1940_v9  ;;  %v1941_v14 = vpop.f32.mrf.mxu1 }
 0x341   : > { %v1942_v18 = vadd.f32 %v1941_v14, %v1772_v13 }
 0x342   : > { %v2278_v16 = vadd.f32 %v2277_v11, %v2109_v12  ;;  %v663_v12 = vld [vmem:[#allocation2 + $0x10] sm:$0xff] }
 0x344   : > { %v2356_v17 = vadd.f32 %v2278_v16, %v656_v15 }
 0x346   : > { %2420 = vst [vmem:[#allocation2 + $0x68] sm:$0xff] %v2356_v17 }
 0x347   : > { %v2110_v19 = vpop.f32.mrf.mxu2  ;;  %v1775_v22 = vpop.f32.mrf.mxu0 }
 0x348   : > { %v2279_v20 = vpop.f32.mrf.mxu3  ;;  %v2111_v21 = vadd.f32 %v2110_v19, %v1942_v18  ;;  %v1944_v23 = vpop.f32.mrf.mxu1 }
 0x349   : > { %v1945_v27 = vadd.f32 %v1944_v23, %v1775_v22 }
 0x34a   : > { %v2280_v25 = vadd.f32 %v2279_v20, %v2111_v21  ;;  %v664_v21 = vld [vmem:[#allocation2 + $0x58] sm:$0xff] }
 0x34c   : > { %v2357_v26 = vadd.f32 %v2280_v25, %v657_v24 }
 0x34e   : > { %2421 = vst [vmem:[#allocation2 + $0x190] sm:$0xff] %v2357_v26 }
 0x34f   : > { %v2113_v28 = vpop.f32.mrf.mxu2  ;;  %v1777_v31 = vpop.f32.mrf.mxu0 }
 0x350   : > { %v2282_v29 = vpop.f32.mrf.mxu3  ;;  %v2114_v30 = vadd.f32 %v2113_v28, %v1945_v27  ;;  %v1946_v32 = vpop.f32.mrf.mxu1 }
 0x351   : > { %v1947_v36 = vadd.f32 %v1946_v32, %v1777_v31 }
 0x352   : > { %v2283_v34 = vadd.f32 %v2282_v29, %v2114_v30  ;;  %v665_v29 = vld [vmem:[#allocation2 + $0xa0] sm:$0xff] }
 0x354   : > { %v2358_v35 = vadd.f32 %v2283_v34, %v658_v33 }
 0x356   : > { %2422 = vst [vmem:[#allocation2 + $0x198] sm:$0xff] %v2358_v35 }
 0x357   : > { %v2115_v37 = vpop.f32.mrf.mxu2  ;;  %v1780_v40 = vpop.f32.mrf.mxu0 }
 0x358   : > { %v2284_v38 = vpop.f32.mrf.mxu3  ;;  %v2116_v39 = vadd.f32 %v2115_v37, %v1947_v36  ;;  %v1949_v41 = vpop.f32.mrf.mxu1 }
 0x359   : > { %v1950_v45 = vadd.f32 %v1949_v41, %v1780_v40 }
 0x35a   : > { %v2285_v43 = vadd.f32 %v2284_v38, %v2116_v39 }
 0x35c   : > { %v2359_v44 = vadd.f32 %v2285_v43, %v659_v42 }
 0x35e   : > { %2423 = vst [vmem:[#allocation2 + $0x38] sm:$0xff] %v2359_v44 }
 0x35f   : > { %v2118_v46 = vpop.f32.mrf.mxu2  ;;  %v1782_v49 = vpop.f32.mrf.mxu0 }
 0x360   : > { %v2287_v47 = vpop.f32.mrf.mxu3  ;;  %v2119_v48 = vadd.f32 %v2118_v46, %v1950_v45  ;;  %v1951_v50 = vpop.f32.mrf.mxu1 }
 0x361   : > { %v1952_v54 = vadd.f32 %v1951_v50, %v1782_v49 }
 0x362   : > { %v2288_v52 = vadd.f32 %v2287_v47, %v2119_v48 }
 0x364   : > { %v2360_v53 = vadd.f32 %v2288_v52, %v660_v51 }
 0x366   : > { %2424 = vst [vmem:[#allocation2 + $0xc0] sm:$0xff] %v2360_v53 }
 0x367   : > { %v2120_v55 = vpop.f32.mrf.mxu2  ;;  %v1785_v58 = vpop.f32.mrf.mxu0 }
 0x368   : > { %v2289_v56 = vpop.f32.mrf.mxu3  ;;  %v2121_v57 = vadd.f32 %v2120_v55, %v1952_v54  ;;  %v1954_v59 = vpop.f32.mrf.mxu1 }
 0x369   : > { %v1955_v63 = vadd.f32 %v1954_v59, %v1785_v58 }
 0x36a   : > { %v2290_v61 = vadd.f32 %v2289_v56, %v2121_v57 }
 0x36c   : > { %v2361_v62 = vadd.f32 %v2290_v61, %v661_v60 }
 0x36e   : > { %2425 = vst [vmem:[#allocation2 + $0x1c0] sm:$0xff] %v2361_v62 }
 0x36f   : > { %v2123_v0 = vpop.f32.mrf.mxu2  ;;  %v1787_v3 = vpop.f32.mrf.mxu0 }
 0x370   : > { %v2292_v1 = vpop.f32.mrf.mxu3  ;;  %v2124_v2 = vadd.f32 %v2123_v0, %v1955_v63  ;;  %v1956_v4 = vpop.f32.mrf.mxu1 }
 0x371   : > { %v1957_v8 = vadd.f32 %v1956_v4, %v1787_v3 }
 0x372   : > { %v2293_v6 = vadd.f32 %v2292_v1, %v2124_v2 }
 0x374   : > { %v2362_v7 = vadd.f32 %v2293_v6, %v662_v5 }
 0x376   : > { %2426 = vst [vmem:[#allocation2 + $0x158] sm:$0xff] %v2362_v7 }
 0x377   : > { %v2125_v9 = vpop.f32.mrf.mxu2  ;;  %v1790_v13 = vpop.f32.mrf.mxu0 }
 0x378   : > { %v2294_v10 = vpop.f32.mrf.mxu3  ;;  %v2126_v11 = vadd.f32 %v2125_v9, %v1957_v8  ;;  %v1959_v14 = vpop.f32.mrf.mxu1 }
 0x379   : > { %v1960_v17 = vadd.f32 %v1959_v14, %v1790_v13 }
 0x37a   : > { %v2295_v15 = vadd.f32 %v2294_v10, %v2126_v11 }
 0x37c   : > { %v2363_v16 = vadd.f32 %v2295_v15, %v663_v12 }
 0x37e   : > { %2427 = vst [vmem:[#allocation2 + $0x10] sm:$0xff] %v2363_v16 }
 0x37f   : > { %v2128_v18 = vpop.f32.mrf.mxu2  ;;  %v1792_v23 = vpop.f32.mrf.mxu0 }
 0x380   : > { %v2297_v19 = vpop.f32.mrf.mxu3  ;;  %v2129_v20 = vadd.f32 %v2128_v18, %v1960_v17  ;;  %v1961_v24 = vpop.f32.mrf.mxu1 }
 0x381   : > { %v1962_v26 = vadd.f32 %v1961_v24, %v1792_v23 }
 0x382   : > { %v2298_v22 = vadd.f32 %v2297_v19, %v2129_v20 }
 0x384   : > { %v2364_v25 = vadd.f32 %v2298_v22, %v664_v21 }
 0x386   : > { %2428 = vst [vmem:[#allocation2 + $0x58] sm:$0xff] %v2364_v25 }
 0x387   : > { %v2130_v27 = vpop.f32.mrf.mxu2 }
 0x388   : > { %v2131_v28 = vadd.f32 %v2130_v27, %v1962_v26  ;;  %v2299_v30 = vpop.f32.mrf.mxu3 }
 0x38a   : > { %v2300_v31 = vadd.f32 %v2299_v30, %v2131_v28  ;;  %2433 = sbr.rel (%p3429_p12) target bundleno = 949 (0x3b5), region = 63 }
 0x38c   : > { %v2365_v32 = vadd.f32 %v2300_v31, %v665_v29 }
 0x38e   : > { %2429 = vst [vmem:[#allocation2 + $0xa0] sm:$0xff] %v2365_v32 }
 0x38f   : > { %v2434_v33 = vld [vmem:[#allocation2 + $0xb0] sm:$0xff]  ;;  %v4613_v35 = vld [vmem:[%s4734_s2] ss:$0 sm:$0xff]  ;;  %v2436_v36 = vld [vmem:[#allocation2 + $0xd8] sm:$0xff] }
 0x390   : > { %v2435_v34 = vld [vmem:[#allocation2 + $0x1b0] sm:$0xff]  ;;  %v2437_v37 = vld [vmem:[#allocation2 + $0x18] sm:$0xff]  ;;  %v2439_v39 = vld [vmem:[#allocation2 + $0x168] sm:$0xff]  ;;  %v2502_v41 = vadd.f32 %v4613_v35, %v2434_v33  ;;  %v2504_v43 = vadd.f32 %v4613_v35, %v2436_v36 }
 0x391   : > { %v2438_v38 = vld [vmem:[#allocation2 + $0x50] sm:$0xff]  ;;  %v2503_v42 = vadd.f32 %v4613_v35, %v2435_v34  ;;  %v2505_v44 = vadd.f32 %v4613_v35, %v2437_v37  ;;  %v2441_v45 = vld [vmem:[#allocation2 + $0x48] sm:$0xff]  ;;  %v2442_v46 = vld [vmem:[#allocation2 + $0x180] sm:$0xff]  ;;  %v2507_v49 = vadd.f32 %v4613_v35, %v2439_v39 }
 0x392   : > { %v2440_v40 = vld [vmem:[#allocation2 + $0x130] sm:$0xff]  ;;  %v2506_v48 = vadd.f32 %v4613_v35, %v2438_v38  ;;  %v2509_v51 = vadd.f32 %v4613_v35, %v2441_v45  ;;  %v2444_v52 = vld [vmem:[#allocation2 + $0x118] sm:$0xff]  ;;  %v2446_v54 = vld [vmem:[#allocation2 + $0x120] sm:$0xff]  ;;  %v2510_v57 = vadd.f32 %v4613_v35, %v2442_v46 }
 0x393   : > { %v2443_v47 = vld [vmem:[#allocation2 + $0x110] sm:$0xff]  ;;  %v2508_v50 = vadd.f32 %v4613_v35, %v2440_v40  ;;  %v2445_v53 = vld [vmem:[#allocation2 + $0x98] sm:$0xff]  ;;  %v3596_v55 = vpack.c.bf16 %v2503_v42, %v2502_v41  ;;  %v3601_v56 = vpack.c.bf16 %v2505_v44, %v2504_v43  ;;  %v2448_v60 = vld [vmem:[#allocation2 + $0x108] sm:$0xff]  ;;  %v2512_v0 = vadd.f32 %v4613_v35, %v2444_v52 }
 0x394   : > { %v2511_v58 = vadd.f32 %v4613_v35, %v2443_v47  ;;  %v2447_v59 = vld [vmem:[#allocation2 + $0x150] sm:$0xff]  ;;  %v2449_v61 = vld [vmem:[#allocation2 + $0x60] sm:$0xff]  ;;  %v3606_v62 = vpack.c.bf16 %v2507_v49, %v2506_v48  ;;  %v2513_v1 = vadd.f32 %v4613_v35, %v2445_v53  ;;  %v2451_v3 = vld [vmem:[#allocation2 + $0x188] sm:$0xff]  ;;  %v2514_v6 = vadd.f32 %v4613_v35, %v2446_v54 }
 0x395   : > { %v3611_v63 = vpack.c.bf16 %v2509_v51, %v2508_v50  ;;  %v2450_v2 = vld [vmem:[#allocation2 + $0xe0] sm:$0xff]  ;;  %v2452_v4 = vld [vmem:[#allocation2 + $0x138] sm:$0xff]  ;;  %3597 = vst [vmem:[%s4246_s24] sm:$0xff] %v3596_v55   ;;  %v2515_v7 = vadd.f32 %v4613_v35, %v2447_v59  ;;  %v2516_v8 = vadd.f32 %v4613_v35, %v2448_v60  ;;  %v2455_v11 = vld [vmem:[#allocation2 + $0x1a8] sm:$0xff]  ;;  %v2517_v13 = vadd.f32 %v4613_v35, %v2449_v61 }
 0x396   : > { %v3616_v5 = vpack.c.bf16 %v2511_v58, %v2510_v57  ;;  %v2453_v9 = vld [vmem:[#allocation2 + $0x140] sm:$0xff]  ;;  %3753 = vst [vmem:[%s4246_s24 + $0x8] sm:$0xff] %v3601_v56   ;;  %v3621_v12 = vpack.c.bf16 %v2513_v1, %v2512_v0  ;;  %v2518_v14 = vadd.f32 %v4613_v35, %v2450_v2  ;;  %v2519_v15 = vadd.f32 %v4613_v35, %v2451_v3  ;;  %v2456_v16 = vld [vmem:[#allocation2 + $0x1b8] sm:$0xff]  ;;  %v2457_v17 = vld [vmem:[#allocation2 + $0x28] sm:$0xff] }
 0x397   : > { %v2454_v10 = vld [vmem:[#allocation2 + $0x80] sm:$0xff]  ;;  %v2458_v18 = vld [vmem:[#allocation2 + $0x1e8] sm:$0xff]  ;;  %3754 = vst [vmem:[%s4246_s24 + $0x10] sm:$0xff] %v3606_v62   ;;  %v3626_v19 = vpack.c.bf16 %v2515_v7, %v2514_v6  ;;  %v2520_v20 = vadd.f32 %v4613_v35, %v2452_v4  ;;  %v2521_v21 = vadd.f32 %v4613_v35, %v2453_v9  ;;  %v2459_v23 = vld [vmem:[#allocation2 + $0xf8] sm:$0xff]  ;;  %v3631_v26 = vpack.c.bf16 %v2517_v13, %v2516_v8 }
 0x398   : > { %v2522_v22 = vadd.f32 %v4613_v35, %v2454_v10  ;;  %v2460_v24 = vld [vmem:[#allocation2 + $0x160] sm:$0xff]  ;;  %v2461_v25 = vld [vmem:[#allocation2 + $0x30] sm:$0xff]  ;;  %3755 = vst [vmem:[%s4246_s24 + $0x18] sm:$0xff] %v3611_v63   ;;  %v2523_v27 = vadd.f32 %v4613_v35, %v2455_v11  ;;  %v2524_v28 = vadd.f32 %v4613_v35, %v2456_v16  ;;  %v3636_v31 = vpack.c.bf16 %v2519_v15, %v2518_v14  ;;  %v2465_v37 = vld [vmem:[#allocation2 + $0x8] sm:$0xff] }
 0x399   : > { %v2462_v29 = vld [vmem:[#allocation2 + $0x1e0] sm:$0xff]  ;;  %3756 = vst [vmem:[%s4246_s24 + $0x20] sm:$0xff] %v3616_v5   ;;  %v2525_v32 = vadd.f32 %v4613_v35, %v2457_v17  ;;  %v2526_v33 = vadd.f32 %v4613_v35, %v2458_v18  ;;  %v2527_v34 = vadd.f32 %v4613_v35, %v2459_v23  ;;  %v2464_v36 = vld [vmem:[#allocation2 + $0xf0] sm:$0xff]  ;;  %v3641_v38 = vpack.c.bf16 %v2521_v21, %v2520_v20  ;;  %v2466_v41 = vld [vmem:[#allocation2 + $0x148] sm:$0xff] }
 0x39a   : > { %v2463_v30 = vld [vmem:[#allocation2] sm:$0xff]  ;;  %3757 = vst [vmem:[%s4246_s24 + $0x28] sm:$0xff] %v3621_v12   ;;  %v2528_v39 = vadd.f32 %v4613_v35, %v2460_v24  ;;  %v2529_v40 = vadd.f32 %v4613_v35, %v2461_v25  ;;  %v2467_v42 = vld [vmem:[#allocation2 + $0x1d0] sm:$0xff]  ;;  %v3646_v43 = vpack.c.bf16 %v2523_v27, %v2522_v22  ;;  %v2530_v44 = vadd.f32 %v4613_v35, %v2462_v29  ;;  %v2469_v47 = vld [vmem:[#allocation2 + $0xc8] sm:$0xff] }
 0x39b   : > { %3758 = vst [vmem:[%s4246_s24 + $0x30] sm:$0xff] %v3626_v19   ;;  %v2531_v45 = vadd.f32 %v4613_v35, %v2463_v30  ;;  %v2468_v46 = vld [vmem:[#allocation2 + $0x100] sm:$0xff]  ;;  %v3651_v48 = vpack.c.bf16 %v2525_v32, %v2524_v28  ;;  %v2532_v49 = vadd.f32 %v4613_v35, %v2464_v36  ;;  %v2533_v50 = vadd.f32 %v4613_v35, %v2465_v37  ;;  %v2471_v52 = vld [vmem:[#allocation2 + $0x1f8] sm:$0xff]  ;;  %v2473_v57 = vld [vmem:[#allocation2 + $0x128] sm:$0xff] }
 0x39c   : > { %3759 = vst [vmem:[%s4246_s24 + $0x38] sm:$0xff] %v3631_v26   ;;  %v2470_v51 = vld [vmem:[#allocation2 + $0x40] sm:$0xff]  ;;  %v3656_v53 = vpack.c.bf16 %v2527_v34, %v2526_v33  ;;  %v2534_v54 = vadd.f32 %v4613_v35, %v2466_v41  ;;  %v2535_v55 = vadd.f32 %v4613_v35, %v2467_v42  ;;  %v3661_v58 = vpack.c.bf16 %v2529_v40, %v2528_v39  ;;  %v2475_v62 = vld [vmem:[#allocation2 + $0x1f0] sm:$0xff]  ;;  %v2476_v2 = vld [vmem:[#allocation2 + $0xe8] sm:$0xff] }
 0x39d   : > { %3760 = vst [vmem:[%s4246_s24 + $0x40] sm:$0xff] %v3636_v31   ;;  %v2472_v56 = vld [vmem:[#allocation2 + $0x20] sm:$0xff]  ;;  %v2536_v59 = vadd.f32 %v4613_v35, %v2468_v46  ;;  %v2537_v60 = vadd.f32 %v4613_v35, %v2469_v47  ;;  %v3666_v63 = vpack.c.bf16 %v2531_v45, %v2530_v44  ;;  %v2538_v0 = vadd.f32 %v4613_v35, %v2470_v51  ;;  %v2477_v3 = vld [vmem:[#allocation2 + $0x78] sm:$0xff]  ;;  %v2478_v7 = vld [vmem:[#allocation2 + $0x70] sm:$0xff] }
 0x39e   : > { %3761 = vst [vmem:[%s4246_s24 + $0x48] sm:$0xff] %v3641_v38   ;;  %v2474_v61 = vld [vmem:[#allocation2 + $0x1a0] sm:$0xff]  ;;  %v2539_v1 = vadd.f32 %v4613_v35, %v2471_v52  ;;  %v3671_v4 = vpack.c.bf16 %v2533_v50, %v2532_v49  ;;  %v2540_v5 = vadd.f32 %v4613_v35, %v2472_v56  ;;  %v2541_v6 = vadd.f32 %v4613_v35, %v2473_v57  ;;  %v2479_v8 = vld [vmem:[#allocation2 + $0x90] sm:$0xff]  ;;  %v2480_v12 = vld [vmem:[#allocation2 + $0x1d8] sm:$0xff] }
 0x39f   : > { %3762 = vst [vmem:[%s4246_s24 + $0x50] sm:$0xff] %v3646_v43   ;;  %v3676_v9 = vpack.c.bf16 %v2535_v55, %v2534_v54  ;;  %v2542_v10 = vadd.f32 %v4613_v35, %v2474_v61  ;;  %v2543_v11 = vadd.f32 %v4613_v35, %v2475_v62  ;;  %v2481_v13 = vld [vmem:[#allocation2 + $0xd0] sm:$0xff]  ;;  %v3681_v14 = vpack.c.bf16 %v2537_v60, %v2536_v59  ;;  %v2482_v17 = vld [vmem:[#allocation2 + $0xb8] sm:$0xff]  ;;  %v2483_v18 = vld [vmem:[#allocation2 + $0x88] sm:$0xff] }
 0x3a0   : > { %3763 = vst [vmem:[%s4246_s24 + $0x58] sm:$0xff] %v3651_v48   ;;  %v2544_v15 = vadd.f32 %v4613_v35, %v2476_v2  ;;  %v2545_v16 = vadd.f32 %v4613_v35, %v2477_v3  ;;  %v3686_v19 = vpack.c.bf16 %v2539_v1, %v2538_v0  ;;  %v2546_v20 = vadd.f32 %v4613_v35, %v2478_v7  ;;  %v2484_v22 = vld [vmem:[#allocation2 + $0xa8] sm:$0xff]  ;;  %v2486_v27 = vld [vmem:[#allocation2 + $0x170] sm:$0xff]  ;;  %v2487_v28 = vld [vmem:[#allocation2 + $0x178] sm:$0xff] }
 0x3a1   : > { %3764 = vst [vmem:[%s4246_s24 + $0x60] sm:$0xff] %v3656_v53   ;;  %v2547_v21 = vadd.f32 %v4613_v35, %v2479_v8  ;;  %v2485_v23 = vld [vmem:[#allocation2 + $0x1c8] sm:$0xff]  ;;  %v3691_v24 = vpack.c.bf16 %v2541_v6, %v2540_v5  ;;  %v2548_v25 = vadd.f32 %v4613_v35, %v2480_v12  ;;  %v2549_v26 = vadd.f32 %v4613_v35, %v2481_v13  ;;  %v2489_v33 = vld [vmem:[#allocation2 + $0x190] sm:$0xff]  ;;  %v2490_v38 = vld [vmem:[#allocation2 + $0x198] sm:$0xff] }
 0x3a2   : > { %3765 = vst [vmem:[%s4246_s24 + $0x68] sm:$0xff] %v3661_v58   ;;  %v3696_v29 = vpack.c.bf16 %v2543_v11, %v2542_v10  ;;  %v2550_v30 = vadd.f32 %v4613_v35, %v2482_v17  ;;  %v2551_v31 = vadd.f32 %v4613_v35, %v2483_v18  ;;  %v2488_v32 = vld [vmem:[#allocation2 + $0x68] sm:$0xff]  ;;  %v3701_v34 = vpack.c.bf16 %v2545_v16, %v2544_v15  ;;  %v2491_v39 = vld [vmem:[#allocation2 + $0x38] sm:$0xff]  ;;  %v2492_v43 = vld [vmem:[#allocation2 + $0xc0] sm:$0xff] }
 0x3a3   : > { %3766 = vst [vmem:[%s4246_s24 + $0x70] sm:$0xff] %v3666_v63   ;;  %v2552_v36 = vadd.f32 %v4613_v35, %v2484_v22  ;;  %v2553_v37 = vadd.f32 %v4613_v35, %v2485_v23  ;;  %v3706_v40 = vpack.c.bf16 %v2547_v21, %v2546_v20  ;;  %v2554_v41 = vadd.f32 %v4613_v35, %v2486_v27  ;;  %v2493_v44 = vld [vmem:[#allocation2 + $0x1c0] sm:$0xff]  ;;  %v2494_v48 = vld [vmem:[#allocation2 + $0x158] sm:$0xff]  ;;  %v2495_v49 = vld [vmem:[#allocation2 + $0x10] sm:$0xff] }
 0x3a4   : > { %3767 = vst [vmem:[%s4246_s24 + $0x78] sm:$0xff] %v3671_v4   ;;  %v2555_v42 = vadd.f32 %v4613_v35, %v2487_v28  ;;  %v3711_v45 = vpack.c.bf16 %v2549_v26, %v2548_v25  ;;  %v2556_v46 = vadd.f32 %v4613_v35, %v2488_v32  ;;  %v2557_v47 = vadd.f32 %v4613_v35, %v2489_v33  ;;  %v2496_v53 = vld [vmem:[#allocation2 + $0x58] sm:$0xff]  ;;  %v2497_v54 = vld [vmem:[#allocation2 + $0xa0] sm:$0xff] }
 0x3a5   : > { %3768 = vst [vmem:[%s4246_s24 + $0x80] sm:$0xff] %v3676_v9   ;;  %v3716_v50 = vpack.c.bf16 %v2551_v31, %v2550_v30  ;;  %v2558_v51 = vadd.f32 %v4613_v35, %v2490_v38  ;;  %v2559_v52 = vadd.f32 %v4613_v35, %v2491_v39  ;;  %v3721_v55 = vpack.c.bf16 %v2553_v37, %v2552_v36 }
 0x3a6   : > { %3769 = vst [vmem:[%s4246_s24 + $0x88] sm:$0xff] %v3681_v14   ;;  %v2560_v56 = vadd.f32 %v4613_v35, %v2492_v43  ;;  %v2561_v57 = vadd.f32 %v4613_v35, %v2493_v44  ;;  %v3726_v58 = vpack.c.bf16 %v2555_v42, %v2554_v41  ;;  %v2562_v59 = vadd.f32 %v4613_v35, %v2494_v48 }
 0x3a7   : > { %3770 = vst [vmem:[%s4246_s24 + $0x90] sm:$0xff] %v3686_v19   ;;  %v2563_v60 = vadd.f32 %v4613_v35, %v2495_v49  ;;  %v3731_v61 = vpack.c.bf16 %v2557_v47, %v2556_v46  ;;  %v2564_v62 = vadd.f32 %v4613_v35, %v2496_v53  ;;  %v2565_v63 = vadd.f32 %v4613_v35, %v2497_v54 }
 0x3a8   : > { %3771 = vst [vmem:[%s4246_s24 + $0x98] sm:$0xff] %v3691_v24   ;;  %v3736_v0 = vpack.c.bf16 %v2559_v52, %v2558_v51  ;;  %v3741_v1 = vpack.c.bf16 %v2561_v57, %v2560_v56 }
 0x3a9   : > { %3772 = vst [vmem:[%s4246_s24 + $0xa0] sm:$0xff] %v3696_v29   ;;  %v3746_v2 = vpack.c.bf16 %v2563_v60, %v2562_v59  ;;  %v3751_v3 = vpack.c.bf16 %v2565_v63, %v2564_v62 }
 0x3aa   : > { %3773 = vst [vmem:[%s4246_s24 + $0xa8] sm:$0xff] %v3701_v34  }
 0x3ab   : > { %3774 = vst [vmem:[%s4246_s24 + $0xb0] sm:$0xff] %v3706_v40  }
 0x3ac   : > { %3775 = vst [vmem:[%s4246_s24 + $0xb8] sm:$0xff] %v3711_v45  }
 0x3ad   : > { %3776 = vst [vmem:[%s4246_s24 + $0xc0] sm:$0xff] %v3716_v50  }
 0x3ae   : > { %3777 = vst [vmem:[%s4246_s24 + $0xc8] sm:$0xff] %v3721_v55  }
 0x3af   : > { %3778 = vst [vmem:[%s4246_s24 + $0xd0] sm:$0xff] %v3726_v58  }
 0x3b0   : > { %3779 = vst [vmem:[%s4246_s24 + $0xd8] sm:$0xff] %v3731_v61  }
 0x3b1   : > { %3780 = vst [vmem:[%s4246_s24 + $0xe0] sm:$0xff] %v3736_v0  }
 0x3b2   : > { %3781 = vst [vmem:[%s4246_s24 + $0xe8] sm:$0xff] %v3741_v1  }
 0x3b3   : > { %3782 = vst [vmem:[%s4246_s24 + $0xf0] sm:$0xff] %v3746_v2  }
 0x3b4   : > { %3783 = vst [vmem:[%s4246_s24 + $0xf8] sm:$0xff] %v3751_v3  }
 0x3b5 PF: > { %s13_s18 = sadd.s32 1, %s3896_s18   ;;  %s4736_s12 = smov %s3876_s13 }
 0x3b6   : > { %p10_p13 = scmp.ge.s32.totalorder %s13_s18, 6   ;;  %s4737_s13 = smov %s3970_s25 }
 0x3b7   : > { %s4738_s14 = smov %s3888_s16  ;;  %s4739_s15 = smov %s3892_s17 }
 0x3b8   : > { %s4740_s16 = smov %s4743_s19  ;;  %s4741_s17 = smov %s4747_s20 }
 0x3b9   :  { %12 = sbr.rel (!%p10_p13) target bundleno = 4 (0x4), region = 99 }

</bundles_post_ra>
